<compile_context>
chip_gen: v7x
topology: tpu7x:2x2x1
jax: 0.10.0
libtpu: 0.0.40
codegen_flags: <defaults>
</compile_context>

<pallas_src>
import functools

import jax
import jax.numpy as jnp
from jax import lax
from jax.experimental import pallas as pl
from jax.experimental.pallas import tpu as pltpu

_BN_EPS = 1e-5
_GUARD = 128   # lane guard band around the flat padded grid in every VMEM buffer


# ---------------------------------------------------------------------------
# In-kernel helpers
# ---------------------------------------------------------------------------
def _conv3x3_acc(src_ref, w_ref, scale_ref, shift_ref, *, Wp, Mc, relu):
    """3x3 'same' conv over the flat padded grid held in `src_ref`.

    src_ref   : (Cin, _GUARD + Mc + _GUARD) bf16 buffer; the zero-padded image grid
                (B, Hp, Wp) lives flattened at lane offset _GUARD.
    w_ref     : (9, Cout, Cin) bf16, tap-major (ky*3 + kx).
    scale/shift: (Cout, 1) f32 folded BN scale / shift (or 1 / conv-bias).
    Returns the f32 (Cout, Mc) result of conv*scale + shift (+ReLU).  Positions outside
    the per-image interiors contain garbage and must be masked by the caller.
    """
    acc = None
    t = 0
    for ky in range(3):
        for kx in range(3):
            off = (ky - 1) * Wp + (kx - 1)
            xt = src_ref[:, pl.ds(_GUARD + off, Mc)]       # (Cin, Mc) bf16, shifted tap
            wt = w_ref[t]                                   # (Cout, Cin) bf16
            d = jnp.dot(wt, xt, preferred_element_type=jnp.float32)
            acc = d if acc is None else acc + d
            t += 1
    y = acc * scale_ref[...] + shift_ref[...]               # f32 epilogue
    if relu:
        y = jnp.maximum(y, 0.0)
    return y


def _up_block_kernel(x_ref, wT_ref, sT_ref, bT_ref,
                     w1_ref, s1_ref, b1_ref,
                     w2_ref, s2_ref, b2_ref,
                     *rest, Wp, Mc, fuse_out):
    """One fused `up` block: tconv(+bias) -> conv+BN+ReLU -> conv+BN+ReLU [-> 1x1]."""
    if fuse_out:
        wo_ref, bo_ref, mask_ref, o_ref, bufA, bufB = rest
    else:
        mask_ref, o_ref, bufA, bufB = rest

    # Deterministic guard bands (tap reads for masked positions may touch them).
    bufA[...] = jnp.zeros(bufA.shape, bufA.dtype)
    bufB[...] = jnp.zeros(bufB.shape, bufB.dtype)
    mask = mask_ref[...] > 0.5                              # (1, Mc) interior mask

    # ConvTranspose2d(k3,s2,p1,op1) == ordinary 3x3 conv over the zero-dilated,
    # asymmetrically padded grid (built by the wrapper) with the flipped/IO-swapped
    # weight.  Output lands on the interior of the same grid = next conv's padded input.
    yT = _conv3x3_acc(x_ref, wT_ref, sT_ref, bT_ref, Wp=Wp, Mc=Mc, relu=False)
    bufA[:, pl.ds(_GUARD, Mc)] = jnp.where(mask, yT, 0.0).astype(bufA.dtype)

    # conv1 3x3 + BN + ReLU (BN folded into per-channel scale/shift).
    y1 = _conv3x3_acc(bufA, w1_ref, s1_ref, b1_ref, Wp=Wp, Mc=Mc, relu=True)
    bufB[:, pl.ds(_GUARD, Mc)] = jnp.where(mask, y1, 0.0).astype(bufB.dtype)

    # conv2 3x3 + BN + ReLU.
    y2 = _conv3x3_acc(bufB, w2_ref, s2_ref, b2_ref, Wp=Wp, Mc=Mc, relu=True)
    if fuse_out:
        # Fused 1x1 outconv (Cout=4, K=8) on the ReLU'd tile; rides in VLIW slack.
        z = jnp.dot(wo_ref[...], y2.astype(jnp.bfloat16),
                    preferred_element_type=jnp.float32) + bo_ref[...]
        o_ref[...] = z.astype(o_ref.dtype)
    else:
        o_ref[...] = y2.astype(o_ref.dtype)


# ---------------------------------------------------------------------------
# pallas_call wrapper (grid=(1,), everything VMEM-resident)
# ---------------------------------------------------------------------------
def _full_spec(shape):
    n = len(shape)
    return pl.BlockSpec(shape, lambda *_: (0,) * n)


def _up_block_call(inputs, *, out_ch, out_dtype, ct, c1, L, Wp, Mc, fuse_out):
    kernel = functools.partial(_up_block_kernel, Wp=Wp, Mc=Mc, fuse_out=fuse_out)
    return pl.pallas_call(
        kernel,
        out_shape=jax.ShapeDtypeStruct((out_ch, Mc), out_dtype),
        grid_spec=pltpu.PrefetchScalarGridSpec(
            num_scalar_prefetch=0,
            grid=(1,),
            in_specs=[_full_spec(a.shape) for a in inputs],
            out_specs=_full_spec((out_ch, Mc)),
            scratch_shapes=[pltpu.VMEM((ct, L), jnp.bfloat16),   # tconv output grid
                            pltpu.VMEM((c1, L), jnp.bfloat16)],  # conv1 output grid
        ),
        compiler_params=pltpu.CompilerParams(
            dimension_semantics=("arbitrary",)),
    )(*inputs)


# ---------------------------------------------------------------------------
# Wrapper-side parameter prep and (tiny) layout glue
# ---------------------------------------------------------------------------
def _prep_conv(w, b, bn=None):
    """(Cout,Cin,3,3) weight -> (9,Cout,Cin) bf16 taps + f32 (Cout,1) scale/shift."""
    # TODO(synk): BatchNorm2d is inference-mode only (running stats folded into a
    # per-channel affine); training-mode batch statistics are not computed in-kernel.
    Cout, Cin = w.shape[0], w.shape[1]
    w9 = w.transpose(2, 3, 0, 1).reshape(9, Cout, Cin).astype(jnp.bfloat16)
    if bn is None:
        scale = jnp.ones((Cout,), jnp.float32)
        shift = b.astype(jnp.float32)
    else:
        gamma, beta, mean, var = bn
        scale = gamma / jnp.sqrt(var + _BN_EPS)
        shift = scale * (b - mean) + beta
    return (w9, scale.reshape(Cout, 1).astype(jnp.float32),
            shift.reshape(Cout, 1).astype(jnp.float32))


def _dilate_to_grid(x_cm, Hp, Wp):
    """(C,B,H,W) -> (C, B*Hp*Wp) zero-dilated (stride-2) + pad(1,2) flat grid."""
    C, B, H, W = x_cm.shape
    g = jnp.zeros((C, B, Hp, Wp), x_cm.dtype)
    g = g.at[:, :, 1:1 + 2 * H:2, 1:1 + 2 * W:2].set(x_cm)
    return g.reshape(C, B * Hp * Wp)


def _add_guards(flat, Mc):
    C, Mp = flat.shape
    return jnp.pad(flat, ((0, 0), (_GUARD, _GUARD + Mc - Mp)))


def _interior_mask(B, Hp, Wp, Mc):
    Mp = B * Hp * Wp
    m = jnp.arange(Mc)
    r = m % (Hp * Wp)
    i = r // Wp
    j = r % Wp
    ok = (m < Mp) & (i >= 1) & (i <= Hp - 2) & (j >= 1) & (j <= Wp - 2)
    return ok.astype(jnp.float32)[None, :]


def _run_up_block(x_cm, blk, outconv=None):
    """One fused `up` block. x_cm: (Cin, B, H, W) channel-major -> (Cout, B, 2H, 2W)."""
    tw, tb, c1w, c1b, bn1, c2w, c2b, bn2 = blk
    Cin, B, H, W = x_cm.shape
    Hp = Wp = 2 * H + 2            # tconv's dilated+padded grid == convs' padded grid
    Mp = B * Hp * Wp
    Mc = ((Mp + 127) // 128) * 128
    L = Mc + 2 * _GUARD

    xg = _add_guards(_dilate_to_grid(x_cm, Hp, Wp), Mc).astype(jnp.bfloat16)
    mask = _interior_mask(B, Hp, Wp, Mc)

    # ConvTranspose2d weight (Cin,Cout,3,3) -> equivalent conv weight (flip + IO swap).
    w_eq = jnp.flip(tw, axis=(2, 3)).transpose(1, 0, 2, 3)
    wT9, sT, bT = _prep_conv(w_eq, tb)
    w19, s1, b1 = _prep_conv(c1w, c1b, bn1)
    w29, s2, b2 = _prep_conv(c2w, c2b, bn2)

    inputs = [xg, wT9, sT, bT, w19, s1, b1, w29, s2, b2]
    if outconv is not None:
        ow, ob = outconv
        wo = ow.reshape(ow.shape[0], ow.shape[1]).astype(jnp.bfloat16)
        bo = ob.reshape(-1, 1).astype(jnp.float32)
        inputs += [wo, bo]
        out_ch, out_dtype = int(ow.shape[0]), jnp.float32
    else:
        out_ch, out_dtype = int(c2w.shape[0]), jnp.bfloat16
    inputs.append(mask)

    flat = _up_block_call(inputs, out_ch=out_ch, out_dtype=out_dtype,
                          ct=int(w_eq.shape[0]), c1=int(c1w.shape[0]),
                          L=L, Wp=Wp, Mc=Mc, fuse_out=outconv is not None)
    grid = flat[:, :Mp].reshape(out_ch, B, Hp, Wp)
    return grid[:, :, 1:Hp - 1, 1:Wp - 1]


def spatial_decoder_pallas(x, params):
    # Channel-major end-to-end; only the final result is transposed back to NCHW.
    x_cm = jnp.transpose(x, (1, 0, 2, 3))
    a = _run_up_block(x_cm, params["up2"])                      # (16, B, 16, 16) bf16
    y = _run_up_block(a, params["up3"], outconv=params["out"])  # (4, B, 32, 32) f32
    return jnp.transpose(y, (1, 0, 2, 3))


# ---------------------------------------------------------------------------
# Plain-JAX reference mirroring the PyTorch forward
# ---------------------------------------------------------------------------
def _ref_conv(x, w, b, pad):
    y = lax.conv_general_dilated(
        x, w, (1, 1), ((pad, pad), (pad, pad)),
        dimension_numbers=("NCHW", "OIHW", "NCHW"),
        precision=lax.Precision.HIGHEST)
    return y + b[None, :, None, None]


def _ref_conv_transpose(x, w_t, b):
    w_eq = jnp.flip(w_t, axis=(2, 3)).transpose(1, 0, 2, 3)
    y = lax.conv_general_dilated(
        x, w_eq, (1, 1), ((1, 2), (1, 2)), lhs_dilation=(2, 2),
        dimension_numbers=("NCHW", "OIHW", "NCHW"),
        precision=lax.Precision.HIGHEST)
    return y + b[None, :, None, None]


def _ref_bn_relu(x, gamma, beta, mean, var):
    s = gamma / jnp.sqrt(var + _BN_EPS)
    y = (x - mean[None, :, None, None]) * s[None, :, None, None] \
        + beta[None, :, None, None]
    return jnp.maximum(y, 0.0)


def _ref_up(x, tw, tb, c1w, c1b, bn1, c2w, c2b, bn2):
    x = _ref_conv_transpose(x, tw, tb)
    x = _ref_bn_relu(_ref_conv(x, c1w, c1b, 1), *bn1)
    x = _ref_bn_relu(_ref_conv(x, c2w, c2b, 1), *bn2)
    return x


def spatial_decoder_ref(x, params):
    x = _ref_up(x, *params["up2"])
    x = _ref_up(x, *params["up3"])
    x = _ref_conv(x, params["out"][0], params["out"][1], 0)
    return x


# ---------------------------------------------------------------------------
if __name__ == "__main__":
    # Spatial_Decoder(nums_hidden=[8, 16, 32], channel_num=4); input is the bottleneck
    # feature map x: (B, nums_hidden[2], H, W) = (2, 32, 8, 8) -> output (2, 4, 32, 32).
    nums_hidden = (8, 16, 32)
    channel_num = 4
    B, H0, W0 = 2, 8, 8

    key = jax.random.PRNGKey(0)
    keys = iter(jax.random.split(key, 32))

    def conv_params(cout, cin, k):
        bound = 1.0 / (cin * k * k) ** 0.5
        w = jax.random.uniform(next(keys), (cout, cin, k, k), jnp.float32,
                               -bound, bound)
        b = jax.random.uniform(next(keys), (cout,), jnp.float32, -bound, bound)
        return w, b

    def tconv_params(cin, cout, k):
        bound = 1.0 / (cout * k * k) ** 0.5
        # PyTorch ConvTranspose2d weight layout: (Cin, Cout, KH, KW)
        w = jax.random.uniform(next(keys), (cin, cout, k, k), jnp.float32,
                               -bound, bound)
        b = jax.random.uniform(next(keys), (cout,), jnp.float32, -bound, bound)
        return w, b

    def bn_params(c):
        gamma = jax.random.uniform(next(keys), (c,), jnp.float32, 0.5, 1.5)
        beta = 0.1 * jax.random.normal(next(keys), (c,), jnp.float32)
        mean = 0.1 * jax.random.normal(next(keys), (c,), jnp.float32)
        var = jax.random.uniform(next(keys), (c,), jnp.float32, 0.5, 1.5)
        return gamma, beta, mean, var

    def up_params(in_ch, out_ch):
        tw, tb = tconv_params(in_ch, in_ch, 3)          # ConvTranspose: in_ch -> in_ch
        c1w, c1b = conv_params(out_ch, in_ch, 3)        # double_conv conv1
        bn1 = bn_params(out_ch)
        c2w, c2b = conv_params(out_ch, out_ch, 3)       # double_conv conv2
        bn2 = bn_params(out_ch)
        return (tw, tb, c1w, c1b, bn1, c2w, c2b, bn2)

    params = {
        "up2": up_params(nums_hidden[2], nums_hidden[1]),
        "up3": up_params(nums_hidden[1], nums_hidden[0]),
        "out": conv_params(channel_num, nums_hidden[0], 1),
    }

    x = jax.random.normal(next(keys), (B, nums_hidden[2], H0, W0), jnp.float32)

    out = jax.jit(spatial_decoder_pallas)(x, params)
    out = jax.block_until_ready(out)

    ref = spatial_decoder_ref(x, params)
    assert out.shape == (B, channel_num, 4 * H0, 4 * W0), out.shape
    # bf16 MXU inputs (f32 accumulation / f32 epilogue) through 7 fused layers give
    # ~0.5-1% relative error vs. the f32 HIGHEST-precision reference.
    assert jnp.allclose(out, ref, atol=2e-2, rtol=2e-2), \
        float(jnp.max(jnp.abs(out - ref)))

    print("KERNEL_OK")
</pallas_src>

<mosaic_0001>
module attributes {stable_mosaic.version = 11 : i64} {
  func.func @_up_block_kernel(%arg0: i32, %arg1: memref<32x1024xbf16, #tpu.memory_space<vmem>>, %arg2: memref<9x32x32xbf16, #tpu.memory_space<vmem>>, %arg3: memref<32x1xf32, #tpu.memory_space<vmem>>, %arg4: memref<32x1xf32, #tpu.memory_space<vmem>>, %arg5: memref<9x16x32xbf16, #tpu.memory_space<vmem>>, %arg6: memref<16x1xf32, #tpu.memory_space<vmem>>, %arg7: memref<16x1xf32, #tpu.memory_space<vmem>>, %arg8: memref<9x16x16xbf16, #tpu.memory_space<vmem>>, %arg9: memref<16x1xf32, #tpu.memory_space<vmem>>, %arg10: memref<16x1xf32, #tpu.memory_space<vmem>>, %arg11: memref<1x768xf32, #tpu.memory_space<vmem>>, %arg12: memref<16x768xbf16, #tpu.memory_space<vmem>>, %arg13: memref<32x1024xbf16, #tpu.memory_space<vmem>>, %arg14: memref<16x1024xbf16, #tpu.memory_space<vmem>>) attributes {dimension_semantics = [#tpu.dimension_semantics<arbitrary>], iteration_bounds = array<i64: 1>, scalar_prefetch = 0 : i64, scratch_operands = 2 : i64, tpu.core_type = #tpu.core_type<tc>, window_params = [{pipeline_mode = #tpu.pipeline_mode<synchronous>, transform_indices = @transform_0, window_bounds = array<i64: 32, 1024>}, {pipeline_mode = #tpu.pipeline_mode<synchronous>, transform_indices = @transform_1, window_bounds = array<i64: 9, 32, 32>}, {pipeline_mode = #tpu.pipeline_mode<synchronous>, transform_indices = @transform_2, window_bounds = array<i64: 32, 1>}, {pipeline_mode = #tpu.pipeline_mode<synchronous>, transform_indices = @transform_3, window_bounds = array<i64: 32, 1>}, {pipeline_mode = #tpu.pipeline_mode<synchronous>, transform_indices = @transform_4, window_bounds = array<i64: 9, 16, 32>}, {pipeline_mode = #tpu.pipeline_mode<synchronous>, transform_indices = @transform_5, window_bounds = array<i64: 16, 1>}, {pipeline_mode = #tpu.pipeline_mode<synchronous>, transform_indices = @transform_6, window_bounds = array<i64: 16, 1>}, {pipeline_mode = #tpu.pipeline_mode<synchronous>, transform_indices = @transform_7, window_bounds = array<i64: 9, 16, 16>}, {pipeline_mode = #tpu.pipeline_mode<synchronous>, transform_indices = @transform_8, window_bounds = array<i64: 16, 1>}, {pipeline_mode = #tpu.pipeline_mode<synchronous>, transform_indices = @transform_9, window_bounds = array<i64: 16, 1>}, {pipeline_mode = #tpu.pipeline_mode<synchronous>, transform_indices = @transform_10, window_bounds = array<i64: 1, 768>}, {pipeline_mode = #tpu.pipeline_mode<synchronous>, transform_indices = @transform_11, window_bounds = array<i64: 16, 768>}]} {
    %cst = arith.constant 0.000000e+00 : bf16
    %0 = vector.broadcast %cst : bf16 to vector<32x1024xbf16>
    %c0 = arith.constant 0 : index
    %c0_0 = arith.constant 0 : index
    %1 = vector.load %arg13[%c0, %c0_0] : memref<32x1024xbf16, #tpu.memory_space<vmem>>, vector<32x1024xbf16>
    tpu.vector_store %arg13[%c0, %c0_0], %0 {strides = array<i32>} : memref<32x1024xbf16, #tpu.memory_space<vmem>>, vector<32x1024xbf16>,
    %cst_1 = arith.constant 0.000000e+00 : bf16
    %2 = vector.broadcast %cst_1 : bf16 to vector<16x1024xbf16>
    %c0_2 = arith.constant 0 : index
    %c0_3 = arith.constant 0 : index
    %3 = vector.load %arg14[%c0_2, %c0_3] : memref<16x1024xbf16, #tpu.memory_space<vmem>>, vector<16x1024xbf16>
    tpu.vector_store %arg14[%c0_2, %c0_3], %2 {strides = array<i32>} : memref<16x1024xbf16, #tpu.memory_space<vmem>>, vector<16x1024xbf16>,
    %c0_4 = arith.constant 0 : index
    %c0_5 = arith.constant 0 : index
    %4 = vector.load %arg11[%c0_4, %c0_5] : memref<1x768xf32, #tpu.memory_space<vmem>>, vector<1x768xf32>
    %cst_6 = arith.constant 5.000000e-01 : f32
    %5 = vector.broadcast %cst_6 : f32 to vector<1x768xf32>
    %6 = arith.cmpf ogt, %4, %5 : vector<1x768xf32>
    %c0_7 = arith.constant 0 : index
    %c109 = arith.constant 109 : index
    %7 = vector.load %arg1[%c0_7, %c109] : memref<32x1024xbf16, #tpu.memory_space<vmem>>, vector<32x768xbf16>
    %c0_8 = arith.constant 0 : index
    %c0_9 = arith.constant 0 : index
    %c0_10 = arith.constant 0 : index
    %8 = vector.load %arg2[%c0_8, %c0_9, %c0_10] : memref<9x32x32xbf16, #tpu.memory_space<vmem>>, vector<1x32x32xbf16>
    %9 = vector.shape_cast %8 : vector<1x32x32xbf16> to vector<32x32xbf16>
    %cst_11 = arith.constant dense<0.000000e+00> : vector<32x768xf32>
    %10 = tpu.matmul %9, %7, %cst_11 {dimension_numbers = #tpu.dot_dimension_numbers<[1], [0], [0], [1], [0, 0, 1, 1], [], []>} : vector<32x32xbf16>, vector<32x768xbf16>, vector<32x768xf32> -> vector<32x768xf32>
    %c0_12 = arith.constant 0 : index
    %c110 = arith.constant 110 : index
    %11 = vector.load %arg1[%c0_12, %c110] : memref<32x1024xbf16, #tpu.memory_space<vmem>>, vector<32x768xbf16>
    %c1 = arith.constant 1 : index
    %c0_13 = arith.constant 0 : index
    %c0_14 = arith.constant 0 : index
    %12 = vector.load %arg2[%c1, %c0_13, %c0_14] : memref<9x32x32xbf16, #tpu.memory_space<vmem>>, vector<1x32x32xbf16>
    %13 = vector.shape_cast %12 : vector<1x32x32xbf16> to vector<32x32xbf16>
    %cst_15 = arith.constant dense<0.000000e+00> : vector<32x768xf32>
    %14 = tpu.matmul %13, %11, %cst_15 {dimension_numbers = #tpu.dot_dimension_numbers<[1], [0], [0], [1], [0, 0, 1, 1], [], []>} : vector<32x32xbf16>, vector<32x768xbf16>, vector<32x768xf32> -> vector<32x768xf32>
    %15 = arith.addf %10, %14 : vector<32x768xf32>
    %c0_16 = arith.constant 0 : index
    %c111 = arith.constant 111 : index
    %16 = vector.load %arg1[%c0_16, %c111] : memref<32x1024xbf16, #tpu.memory_space<vmem>>, vector<32x768xbf16>
    %c2 = arith.constant 2 : index
    %c0_17 = arith.constant 0 : index
    %c0_18 = arith.constant 0 : index
    %17 = vector.load %arg2[%c2, %c0_17, %c0_18] : memref<9x32x32xbf16, #tpu.memory_space<vmem>>, vector<1x32x32xbf16>
    %18 = vector.shape_cast %17 : vector<1x32x32xbf16> to vector<32x32xbf16>
    %cst_19 = arith.constant dense<0.000000e+00> : vector<32x768xf32>
    %19 = tpu.matmul %18, %16, %cst_19 {dimension_numbers = #tpu.dot_dimension_numbers<[1], [0], [0], [1], [0, 0, 1, 1], [], []>} : vector<32x32xbf16>, vector<32x768xbf16>, vector<32x768xf32> -> vector<32x768xf32>
    %20 = arith.addf %15, %19 : vector<32x768xf32>
    %c0_20 = arith.constant 0 : index
    %c127 = arith.constant 127 : index
    %21 = vector.load %arg1[%c0_20, %c127] : memref<32x1024xbf16, #tpu.memory_space<vmem>>, vector<32x768xbf16>
    %c3 = arith.constant 3 : index
    %c0_21 = arith.constant 0 : index
    %c0_22 = arith.constant 0 : index
    %22 = vector.load %arg2[%c3, %c0_21, %c0_22] : memref<9x32x32xbf16, #tpu.memory_space<vmem>>, vector<1x32x32xbf16>
    %23 = vector.shape_cast %22 : vector<1x32x32xbf16> to vector<32x32xbf16>
    %cst_23 = arith.constant dense<0.000000e+00> : vector<32x768xf32>
    %24 = tpu.matmul %23, %21, %cst_23 {dimension_numbers = #tpu.dot_dimension_numbers<[1], [0], [0], [1], [0, 0, 1, 1], [], []>} : vector<32x32xbf16>, vector<32x768xbf16>, vector<32x768xf32> -> vector<32x768xf32>
    %25 = arith.addf %20, %24 : vector<32x768xf32>
    %c0_24 = arith.constant 0 : index
    %c128 = arith.constant 128 : index
    %26 = vector.load %arg1[%c0_24, %c128] : memref<32x1024xbf16, #tpu.memory_space<vmem>>, vector<32x768xbf16>
    %c4 = arith.constant 4 : index
    %c0_25 = arith.constant 0 : index
    %c0_26 = arith.constant 0 : index
    %27 = vector.load %arg2[%c4, %c0_25, %c0_26] : memref<9x32x32xbf16, #tpu.memory_space<vmem>>, vector<1x32x32xbf16>
    %28 = vector.shape_cast %27 : vector<1x32x32xbf16> to vector<32x32xbf16>
    %cst_27 = arith.constant dense<0.000000e+00> : vector<32x768xf32>
    %29 = tpu.matmul %28, %26, %cst_27 {dimension_numbers = #tpu.dot_dimension_numbers<[1], [0], [0], [1], [0, 0, 1, 1], [], []>} : vector<32x32xbf16>, vector<32x768xbf16>, vector<32x768xf32> -> vector<32x768xf32>
    %30 = arith.addf %25, %29 : vector<32x768xf32>
    %c0_28 = arith.constant 0 : index
    %c129 = arith.constant 129 : index
    %31 = vector.load %arg1[%c0_28, %c129] : memref<32x1024xbf16, #tpu.memory_space<vmem>>, vector<32x768xbf16>
    %c5 = arith.constant 5 : index
    %c0_29 = arith.constant 0 : index
    %c0_30 = arith.constant 0 : index
    %32 = vector.load %arg2[%c5, %c0_29, %c0_30] : memref<9x32x32xbf16, #tpu.memory_space<vmem>>, vector<1x32x32xbf16>
    %33 = vector.shape_cast %32 : vector<1x32x32xbf16> to vector<32x32xbf16>
    %cst_31 = arith.constant dense<0.000000e+00> : vector<32x768xf32>
    %34 = tpu.matmul %33, %31, %cst_31 {dimension_numbers = #tpu.dot_dimension_numbers<[1], [0], [0], [1], [0, 0, 1, 1], [], []>} : vector<32x32xbf16>, vector<32x768xbf16>, vector<32x768xf32> -> vector<32x768xf32>
    %35 = arith.addf %30, %34 : vector<32x768xf32>
    %c0_32 = arith.constant 0 : index
    %c145 = arith.constant 145 : index
    %36 = vector.load %arg1[%c0_32, %c145] : memref<32x1024xbf16, #tpu.memory_space<vmem>>, vector<32x768xbf16>
    %c6 = arith.constant 6 : index
    %c0_33 = arith.constant 0 : index
    %c0_34 = arith.constant 0 : index
    %37 = vector.load %arg2[%c6, %c0_33, %c0_34] : memref<9x32x32xbf16, #tpu.memory_space<vmem>>, vector<1x32x32xbf16>
    %38 = vector.shape_cast %37 : vector<1x32x32xbf16> to vector<32x32xbf16>
    %cst_35 = arith.constant dense<0.000000e+00> : vector<32x768xf32>
    %39 = tpu.matmul %38, %36, %cst_35 {dimension_numbers = #tpu.dot_dimension_numbers<[1], [0], [0], [1], [0, 0, 1, 1], [], []>} : vector<32x32xbf16>, vector<32x768xbf16>, vector<32x768xf32> -> vector<32x768xf32>
    %40 = arith.addf %35, %39 : vector<32x768xf32>
    %c0_36 = arith.constant 0 : index
    %c146 = arith.constant 146 : index
    %41 = vector.load %arg1[%c0_36, %c146] : memref<32x1024xbf16, #tpu.memory_space<vmem>>, vector<32x768xbf16>
    %c7 = arith.constant 7 : index
    %c0_37 = arith.constant 0 : index
    %c0_38 = arith.constant 0 : index
    %42 = vector.load %arg2[%c7, %c0_37, %c0_38] : memref<9x32x32xbf16, #tpu.memory_space<vmem>>, vector<1x32x32xbf16>
    %43 = vector.shape_cast %42 : vector<1x32x32xbf16> to vector<32x32xbf16>
    %cst_39 = arith.constant dense<0.000000e+00> : vector<32x768xf32>
    %44 = tpu.matmul %43, %41, %cst_39 {dimension_numbers = #tpu.dot_dimension_numbers<[1], [0], [0], [1], [0, 0, 1, 1], [], []>} : vector<32x32xbf16>, vector<32x768xbf16>, vector<32x768xf32> -> vector<32x768xf32>
    %45 = arith.addf %40, %44 : vector<32x768xf32>
    %c0_40 = arith.constant 0 : index
    %c147 = arith.constant 147 : index
    %46 = vector.load %arg1[%c0_40, %c147] : memref<32x1024xbf16, #tpu.memory_space<vmem>>, vector<32x768xbf16>
    %c8 = arith.constant 8 : index
    %c0_41 = arith.constant 0 : index
    %c0_42 = arith.constant 0 : index
    %47 = vector.load %arg2[%c8, %c0_41, %c0_42] : memref<9x32x32xbf16, #tpu.memory_space<vmem>>, vector<1x32x32xbf16>
    %48 = vector.shape_cast %47 : vector<1x32x32xbf16> to vector<32x32xbf16>
    %cst_43 = arith.constant dense<0.000000e+00> : vector<32x768xf32>
    %49 = tpu.matmul %48, %46, %cst_43 {dimension_numbers = #tpu.dot_dimension_numbers<[1], [0], [0], [1], [0, 0, 1, 1], [], []>} : vector<32x32xbf16>, vector<32x768xbf16>, vector<32x768xf32> -> vector<32x768xf32>
    %50 = arith.addf %45, %49 : vector<32x768xf32>
    %c0_44 = arith.constant 0 : index
    %c0_45 = arith.constant 0 : index
    %51 = vector.load %arg3[%c0_44, %c0_45] : memref<32x1xf32, #tpu.memory_space<vmem>>, vector<32x1xf32>
    %52 = vector.broadcast %51 : vector<32x1xf32> to vector<32x768xf32>
    %53 = arith.mulf %50, %52 : vector<32x768xf32>
    %c0_46 = arith.constant 0 : index
    %c0_47 = arith.constant 0 : index
    %54 = vector.load %arg4[%c0_46, %c0_47] : memref<32x1xf32, #tpu.memory_space<vmem>>, vector<32x1xf32>
    %55 = vector.broadcast %54 : vector<32x1xf32> to vector<32x768xf32>
    %56 = arith.addf %53, %55 : vector<32x768xf32>
    %cst_48 = arith.constant 0.000000e+00 : f32
    %57 = vector.shape_cast %6 : vector<1x768xi1> to vector<1x768xi1>
    %58 = vector.broadcast %57 : vector<1x768xi1> to vector<32x768xi1>
    %59 = vector.broadcast %cst_48 : f32 to vector<32x768xf32>
    %60 = arith.select %58, %56, %59 : vector<32x768xi1>, vector<32x768xf32>
    %61 = arith.truncf %60 : vector<32x768xf32> to vector<32x768xbf16>
    %c0_49 = arith.constant 0 : index
    %c128_50 = arith.constant 128 : index
    %62 = vector.load %arg13[%c0_49, %c128_50] : memref<32x1024xbf16, #tpu.memory_space<vmem>>, vector<32x768xbf16>
    tpu.vector_store %arg13[%c0_49, %c128_50], %61 {strides = array<i32>} : memref<32x1024xbf16, #tpu.memory_space<vmem>>, vector<32x768xbf16>,
    %c0_51 = arith.constant 0 : index
    %c109_52 = arith.constant 109 : index
    %63 = vector.load %arg13[%c0_51, %c109_52] : memref<32x1024xbf16, #tpu.memory_space<vmem>>, vector<32x768xbf16>
    %c0_53 = arith.constant 0 : index
    %c0_54 = arith.constant 0 : index
    %c0_55 = arith.constant 0 : index
    %64 = vector.load %arg5[%c0_53, %c0_54, %c0_55] : memref<9x16x32xbf16, #tpu.memory_space<vmem>>, vector<1x16x32xbf16>
    %65 = vector.shape_cast %64 : vector<1x16x32xbf16> to vector<16x32xbf16>
    %cst_56 = arith.constant dense<0.000000e+00> : vector<16x768xf32>
    %66 = tpu.matmul %65, %63, %cst_56 {dimension_numbers = #tpu.dot_dimension_numbers<[1], [0], [0], [1], [0, 0, 1, 1], [], []>} : vector<16x32xbf16>, vector<32x768xbf16>, vector<16x768xf32> -> vector<16x768xf32>
    %c0_57 = arith.constant 0 : index
    %c110_58 = arith.constant 110 : index
    %67 = vector.load %arg13[%c0_57, %c110_58] : memref<32x1024xbf16, #tpu.memory_space<vmem>>, vector<32x768xbf16>
    %c1_59 = arith.constant 1 : index
    %c0_60 = arith.constant 0 : index
    %c0_61 = arith.constant 0 : index
    %68 = vector.load %arg5[%c1_59, %c0_60, %c0_61] : memref<9x16x32xbf16, #tpu.memory_space<vmem>>, vector<1x16x32xbf16>
    %69 = vector.shape_cast %68 : vector<1x16x32xbf16> to vector<16x32xbf16>
    %cst_62 = arith.constant dense<0.000000e+00> : vector<16x768xf32>
    %70 = tpu.matmul %69, %67, %cst_62 {dimension_numbers = #tpu.dot_dimension_numbers<[1], [0], [0], [1], [0, 0, 1, 1], [], []>} : vector<16x32xbf16>, vector<32x768xbf16>, vector<16x768xf32> -> vector<16x768xf32>
    %71 = arith.addf %66, %70 : vector<16x768xf32>
    %c0_63 = arith.constant 0 : index
    %c111_64 = arith.constant 111 : index
    %72 = vector.load %arg13[%c0_63, %c111_64] : memref<32x1024xbf16, #tpu.memory_space<vmem>>, vector<32x768xbf16>
    %c2_65 = arith.constant 2 : index
    %c0_66 = arith.constant 0 : index
    %c0_67 = arith.constant 0 : index
    %73 = vector.load %arg5[%c2_65, %c0_66, %c0_67] : memref<9x16x32xbf16, #tpu.memory_space<vmem>>, vector<1x16x32xbf16>
    %74 = vector.shape_cast %73 : vector<1x16x32xbf16> to vector<16x32xbf16>
    %cst_68 = arith.constant dense<0.000000e+00> : vector<16x768xf32>
    %75 = tpu.matmul %74, %72, %cst_68 {dimension_numbers = #tpu.dot_dimension_numbers<[1], [0], [0], [1], [0, 0, 1, 1], [], []>} : vector<16x32xbf16>, vector<32x768xbf16>, vector<16x768xf32> -> vector<16x768xf32>
    %76 = arith.addf %71, %75 : vector<16x768xf32>
    %c0_69 = arith.constant 0 : index
    %c127_70 = arith.constant 127 : index
    %77 = vector.load %arg13[%c0_69, %c127_70] : memref<32x1024xbf16, #tpu.memory_space<vmem>>, vector<32x768xbf16>
    %c3_71 = arith.constant 3 : index
    %c0_72 = arith.constant 0 : index
    %c0_73 = arith.constant 0 : index
    %78 = vector.load %arg5[%c3_71, %c0_72, %c0_73] : memref<9x16x32xbf16, #tpu.memory_space<vmem>>, vector<1x16x32xbf16>
    %79 = vector.shape_cast %78 : vector<1x16x32xbf16> to vector<16x32xbf16>
    %cst_74 = arith.constant dense<0.000000e+00> : vector<16x768xf32>
    %80 = tpu.matmul %79, %77, %cst_74 {dimension_numbers = #tpu.dot_dimension_numbers<[1], [0], [0], [1], [0, 0, 1, 1], [], []>} : vector<16x32xbf16>, vector<32x768xbf16>, vector<16x768xf32> -> vector<16x768xf32>
    %81 = arith.addf %76, %80 : vector<16x768xf32>
    %c0_75 = arith.constant 0 : index
    %c128_76 = arith.constant 128 : index
    %82 = vector.load %arg13[%c0_75, %c128_76] : memref<32x1024xbf16, #tpu.memory_space<vmem>>, vector<32x768xbf16>
    %c4_77 = arith.constant 4 : index
    %c0_78 = arith.constant 0 : index
    %c0_79 = arith.constant 0 : index
    %83 = vector.load %arg5[%c4_77, %c0_78, %c0_79] : memref<9x16x32xbf16, #tpu.memory_space<vmem>>, vector<1x16x32xbf16>
    %84 = vector.shape_cast %83 : vector<1x16x32xbf16> to vector<16x32xbf16>
    %cst_80 = arith.constant dense<0.000000e+00> : vector<16x768xf32>
    %85 = tpu.matmul %84, %82, %cst_80 {dimension_numbers = #tpu.dot_dimension_numbers<[1], [0], [0], [1], [0, 0, 1, 1], [], []>} : vector<16x32xbf16>, vector<32x768xbf16>, vector<16x768xf32> -> vector<16x768xf32>
    %86 = arith.addf %81, %85 : vector<16x768xf32>
    %c0_81 = arith.constant 0 : index
    %c129_82 = arith.constant 129 : index
    %87 = vector.load %arg13[%c0_81, %c129_82] : memref<32x1024xbf16, #tpu.memory_space<vmem>>, vector<32x768xbf16>
    %c5_83 = arith.constant 5 : index
    %c0_84 = arith.constant 0 : index
    %c0_85 = arith.constant 0 : index
    %88 = vector.load %arg5[%c5_83, %c0_84, %c0_85] : memref<9x16x32xbf16, #tpu.memory_space<vmem>>, vector<1x16x32xbf16>
    %89 = vector.shape_cast %88 : vector<1x16x32xbf16> to vector<16x32xbf16>
    %cst_86 = arith.constant dense<0.000000e+00> : vector<16x768xf32>
    %90 = tpu.matmul %89, %87, %cst_86 {dimension_numbers = #tpu.dot_dimension_numbers<[1], [0], [0], [1], [0, 0, 1, 1], [], []>} : vector<16x32xbf16>, vector<32x768xbf16>, vector<16x768xf32> -> vector<16x768xf32>
    %91 = arith.addf %86, %90 : vector<16x768xf32>
    %c0_87 = arith.constant 0 : index
    %c145_88 = arith.constant 145 : index
    %92 = vector.load %arg13[%c0_87, %c145_88] : memref<32x1024xbf16, #tpu.memory_space<vmem>>, vector<32x768xbf16>
    %c6_89 = arith.constant 6 : index
    %c0_90 = arith.constant 0 : index
    %c0_91 = arith.constant 0 : index
    %93 = vector.load %arg5[%c6_89, %c0_90, %c0_91] : memref<9x16x32xbf16, #tpu.memory_space<vmem>>, vector<1x16x32xbf16>
    %94 = vector.shape_cast %93 : vector<1x16x32xbf16> to vector<16x32xbf16>
    %cst_92 = arith.constant dense<0.000000e+00> : vector<16x768xf32>
    %95 = tpu.matmul %94, %92, %cst_92 {dimension_numbers = #tpu.dot_dimension_numbers<[1], [0], [0], [1], [0, 0, 1, 1], [], []>} : vector<16x32xbf16>, vector<32x768xbf16>, vector<16x768xf32> -> vector<16x768xf32>
    %96 = arith.addf %91, %95 : vector<16x768xf32>
    %c0_93 = arith.constant 0 : index
    %c146_94 = arith.constant 146 : index
    %97 = vector.load %arg13[%c0_93, %c146_94] : memref<32x1024xbf16, #tpu.memory_space<vmem>>, vector<32x768xbf16>
    %c7_95 = arith.constant 7 : index
    %c0_96 = arith.constant 0 : index
    %c0_97 = arith.constant 0 : index
    %98 = vector.load %arg5[%c7_95, %c0_96, %c0_97] : memref<9x16x32xbf16, #tpu.memory_space<vmem>>, vector<1x16x32xbf16>
    %99 = vector.shape_cast %98 : vector<1x16x32xbf16> to vector<16x32xbf16>
    %cst_98 = arith.constant dense<0.000000e+00> : vector<16x768xf32>
    %100 = tpu.matmul %99, %97, %cst_98 {dimension_numbers = #tpu.dot_dimension_numbers<[1], [0], [0], [1], [0, 0, 1, 1], [], []>} : vector<16x32xbf16>, vector<32x768xbf16>, vector<16x768xf32> -> vector<16x768xf32>
    %101 = arith.addf %96, %100 : vector<16x768xf32>
    %c0_99 = arith.constant 0 : index
    %c147_100 = arith.constant 147 : index
    %102 = vector.load %arg13[%c0_99, %c147_100] : memref<32x1024xbf16, #tpu.memory_space<vmem>>, vector<32x768xbf16>
    %c8_101 = arith.constant 8 : index
    %c0_102 = arith.constant 0 : index
    %c0_103 = arith.constant 0 : index
    %103 = vector.load %arg5[%c8_101, %c0_102, %c0_103] : memref<9x16x32xbf16, #tpu.memory_space<vmem>>, vector<1x16x32xbf16>
    %104 = vector.shape_cast %103 : vector<1x16x32xbf16> to vector<16x32xbf16>
    %cst_104 = arith.constant dense<0.000000e+00> : vector<16x768xf32>
    %105 = tpu.matmul %104, %102, %cst_104 {dimension_numbers = #tpu.dot_dimension_numbers<[1], [0], [0], [1], [0, 0, 1, 1], [], []>} : vector<16x32xbf16>, vector<32x768xbf16>, vector<16x768xf32> -> vector<16x768xf32>
    %106 = arith.addf %101, %105 : vector<16x768xf32>
    %c0_105 = arith.constant 0 : index
    %c0_106 = arith.constant 0 : index
    %107 = vector.load %arg6[%c0_105, %c0_106] : memref<16x1xf32, #tpu.memory_space<vmem>>, vector<16x1xf32>
    %108 = vector.broadcast %107 : vector<16x1xf32> to vector<16x768xf32>
    %109 = arith.mulf %106, %108 : vector<16x768xf32>
    %c0_107 = arith.constant 0 : index
    %c0_108 = arith.constant 0 : index
    %110 = vector.load %arg7[%c0_107, %c0_108] : memref<16x1xf32, #tpu.memory_space<vmem>>, vector<16x1xf32>
    %111 = vector.broadcast %110 : vector<16x1xf32> to vector<16x768xf32>
    %112 = arith.addf %109, %111 : vector<16x768xf32>
    %cst_109 = arith.constant 0.000000e+00 : f32
    %113 = vector.broadcast %cst_109 : f32 to vector<16x768xf32>
    %114 = arith.maximumf %112, %113 : vector<16x768xf32>
    %cst_110 = arith.constant 0.000000e+00 : f32
    %115 = vector.shape_cast %6 : vector<1x768xi1> to vector<1x768xi1>
    %116 = vector.broadcast %115 : vector<1x768xi1> to vector<16x768xi1>
    %117 = vector.broadcast %cst_110 : f32 to vector<16x768xf32>
    %118 = arith.select %116, %114, %117 : vector<16x768xi1>, vector<16x768xf32>
    %119 = arith.truncf %118 : vector<16x768xf32> to vector<16x768xbf16>
    %c0_111 = arith.constant 0 : index
    %c128_112 = arith.constant 128 : index
    %120 = vector.load %arg14[%c0_111, %c128_112] : memref<16x1024xbf16, #tpu.memory_space<vmem>>, vector<16x768xbf16>
    tpu.vector_store %arg14[%c0_111, %c128_112], %119 {strides = array<i32>} : memref<16x1024xbf16, #tpu.memory_space<vmem>>, vector<16x768xbf16>,
    %c0_113 = arith.constant 0 : index
    %c109_114 = arith.constant 109 : index
    %121 = vector.load %arg14[%c0_113, %c109_114] : memref<16x1024xbf16, #tpu.memory_space<vmem>>, vector<16x768xbf16>
    %c0_115 = arith.constant 0 : index
    %c0_116 = arith.constant 0 : index
    %c0_117 = arith.constant 0 : index
    %122 = vector.load %arg8[%c0_115, %c0_116, %c0_117] : memref<9x16x16xbf16, #tpu.memory_space<vmem>>, vector<1x16x16xbf16>
    %123 = vector.shape_cast %122 : vector<1x16x16xbf16> to vector<16x16xbf16>
    %cst_118 = arith.constant dense<0.000000e+00> : vector<16x768xf32>
    %124 = tpu.matmul %123, %121, %cst_118 {dimension_numbers = #tpu.dot_dimension_numbers<[1], [0], [0], [1], [0, 0, 1, 1], [], []>} : vector<16x16xbf16>, vector<16x768xbf16>, vector<16x768xf32> -> vector<16x768xf32>
    %c0_119 = arith.constant 0 : index
    %c110_120 = arith.constant 110 : index
    %125 = vector.load %arg14[%c0_119, %c110_120] : memref<16x1024xbf16, #tpu.memory_space<vmem>>, vector<16x768xbf16>
    %c1_121 = arith.constant 1 : index
    %c0_122 = arith.constant 0 : index
    %c0_123 = arith.constant 0 : index
    %126 = vector.load %arg8[%c1_121, %c0_122, %c0_123] : memref<9x16x16xbf16, #tpu.memory_space<vmem>>, vector<1x16x16xbf16>
    %127 = vector.shape_cast %126 : vector<1x16x16xbf16> to vector<16x16xbf16>
    %cst_124 = arith.constant dense<0.000000e+00> : vector<16x768xf32>
    %128 = tpu.matmul %127, %125, %cst_124 {dimension_numbers = #tpu.dot_dimension_numbers<[1], [0], [0], [1], [0, 0, 1, 1], [], []>} : vector<16x16xbf16>, vector<16x768xbf16>, vector<16x768xf32> -> vector<16x768xf32>
    %129 = arith.addf %124, %128 : vector<16x768xf32>
    %c0_125 = arith.constant 0 : index
    %c111_126 = arith.constant 111 : index
    %130 = vector.load %arg14[%c0_125, %c111_126] : memref<16x1024xbf16, #tpu.memory_space<vmem>>, vector<16x768xbf16>
    %c2_127 = arith.constant 2 : index
    %c0_128 = arith.constant 0 : index
    %c0_129 = arith.constant 0 : index
    %131 = vector.load %arg8[%c2_127, %c0_128, %c0_129] : memref<9x16x16xbf16, #tpu.memory_space<vmem>>, vector<1x16x16xbf16>
    %132 = vector.shape_cast %131 : vector<1x16x16xbf16> to vector<16x16xbf16>
    %cst_130 = arith.constant dense<0.000000e+00> : vector<16x768xf32>
    %133 = tpu.matmul %132, %130, %cst_130 {dimension_numbers = #tpu.dot_dimension_numbers<[1], [0], [0], [1], [0, 0, 1, 1], [], []>} : vector<16x16xbf16>, vector<16x768xbf16>, vector<16x768xf32> -> vector<16x768xf32>
    %134 = arith.addf %129, %133 : vector<16x768xf32>
    %c0_131 = arith.constant 0 : index
    %c127_132 = arith.constant 127 : index
    %135 = vector.load %arg14[%c0_131, %c127_132] : memref<16x1024xbf16, #tpu.memory_space<vmem>>, vector<16x768xbf16>
    %c3_133 = arith.constant 3 : index
    %c0_134 = arith.constant 0 : index
    %c0_135 = arith.constant 0 : index
    %136 = vector.load %arg8[%c3_133, %c0_134, %c0_135] : memref<9x16x16xbf16, #tpu.memory_space<vmem>>, vector<1x16x16xbf16>
    %137 = vector.shape_cast %136 : vector<1x16x16xbf16> to vector<16x16xbf16>
    %cst_136 = arith.constant dense<0.000000e+00> : vector<16x768xf32>
    %138 = tpu.matmul %137, %135, %cst_136 {dimension_numbers = #tpu.dot_dimension_numbers<[1], [0], [0], [1], [0, 0, 1, 1], [], []>} : vector<16x16xbf16>, vector<16x768xbf16>, vector<16x768xf32> -> vector<16x768xf32>
    %139 = arith.addf %134, %138 : vector<16x768xf32>
    %c0_137 = arith.constant 0 : index
    %c128_138 = arith.constant 128 : index
    %140 = vector.load %arg14[%c0_137, %c128_138] : memref<16x1024xbf16, #tpu.memory_space<vmem>>, vector<16x768xbf16>
    %c4_139 = arith.constant 4 : index
    %c0_140 = arith.constant 0 : index
    %c0_141 = arith.constant 0 : index
    %141 = vector.load %arg8[%c4_139, %c0_140, %c0_141] : memref<9x16x16xbf16, #tpu.memory_space<vmem>>, vector<1x16x16xbf16>
    %142 = vector.shape_cast %141 : vector<1x16x16xbf16> to vector<16x16xbf16>
    %cst_142 = arith.constant dense<0.000000e+00> : vector<16x768xf32>
    %143 = tpu.matmul %142, %140, %cst_142 {dimension_numbers = #tpu.dot_dimension_numbers<[1], [0], [0], [1], [0, 0, 1, 1], [], []>} : vector<16x16xbf16>, vector<16x768xbf16>, vector<16x768xf32> -> vector<16x768xf32>
    %144 = arith.addf %139, %143 : vector<16x768xf32>
    %c0_143 = arith.constant 0 : index
    %c129_144 = arith.constant 129 : index
    %145 = vector.load %arg14[%c0_143, %c129_144] : memref<16x1024xbf16, #tpu.memory_space<vmem>>, vector<16x768xbf16>
    %c5_145 = arith.constant 5 : index
    %c0_146 = arith.constant 0 : index
    %c0_147 = arith.constant 0 : index
    %146 = vector.load %arg8[%c5_145, %c0_146, %c0_147] : memref<9x16x16xbf16, #tpu.memory_space<vmem>>, vector<1x16x16xbf16>
    %147 = vector.shape_cast %146 : vector<1x16x16xbf16> to vector<16x16xbf16>
    %cst_148 = arith.constant dense<0.000000e+00> : vector<16x768xf32>
    %148 = tpu.matmul %147, %145, %cst_148 {dimension_numbers = #tpu.dot_dimension_numbers<[1], [0], [0], [1], [0, 0, 1, 1], [], []>} : vector<16x16xbf16>, vector<16x768xbf16>, vector<16x768xf32> -> vector<16x768xf32>
    %149 = arith.addf %144, %148 : vector<16x768xf32>
    %c0_149 = arith.constant 0 : index
    %c145_150 = arith.constant 145 : index
    %150 = vector.load %arg14[%c0_149, %c145_150] : memref<16x1024xbf16, #tpu.memory_space<vmem>>, vector<16x768xbf16>
    %c6_151 = arith.constant 6 : index
    %c0_152 = arith.constant 0 : index
    %c0_153 = arith.constant 0 : index
    %151 = vector.load %arg8[%c6_151, %c0_152, %c0_153] : memref<9x16x16xbf16, #tpu.memory_space<vmem>>, vector<1x16x16xbf16>
    %152 = vector.shape_cast %151 : vector<1x16x16xbf16> to vector<16x16xbf16>
    %cst_154 = arith.constant dense<0.000000e+00> : vector<16x768xf32>
    %153 = tpu.matmul %152, %150, %cst_154 {dimension_numbers = #tpu.dot_dimension_numbers<[1], [0], [0], [1], [0, 0, 1, 1], [], []>} : vector<16x16xbf16>, vector<16x768xbf16>, vector<16x768xf32> -> vector<16x768xf32>
    %154 = arith.addf %149, %153 : vector<16x768xf32>
    %c0_155 = arith.constant 0 : index
    %c146_156 = arith.constant 146 : index
    %155 = vector.load %arg14[%c0_155, %c146_156] : memref<16x1024xbf16, #tpu.memory_space<vmem>>, vector<16x768xbf16>
    %c7_157 = arith.constant 7 : index
    %c0_158 = arith.constant 0 : index
    %c0_159 = arith.constant 0 : index
    %156 = vector.load %arg8[%c7_157, %c0_158, %c0_159] : memref<9x16x16xbf16, #tpu.memory_space<vmem>>, vector<1x16x16xbf16>
    %157 = vector.shape_cast %156 : vector<1x16x16xbf16> to vector<16x16xbf16>
    %cst_160 = arith.constant dense<0.000000e+00> : vector<16x768xf32>
    %158 = tpu.matmul %157, %155, %cst_160 {dimension_numbers = #tpu.dot_dimension_numbers<[1], [0], [0], [1], [0, 0, 1, 1], [], []>} : vector<16x16xbf16>, vector<16x768xbf16>, vector<16x768xf32> -> vector<16x768xf32>
    %159 = arith.addf %154, %158 : vector<16x768xf32>
    %c0_161 = arith.constant 0 : index
    %c147_162 = arith.constant 147 : index
    %160 = vector.load %arg14[%c0_161, %c147_162] : memref<16x1024xbf16, #tpu.memory_space<vmem>>, vector<16x768xbf16>
    %c8_163 = arith.constant 8 : index
    %c0_164 = arith.constant 0 : index
    %c0_165 = arith.constant 0 : index
    %161 = vector.load %arg8[%c8_163, %c0_164, %c0_165] : memref<9x16x16xbf16, #tpu.memory_space<vmem>>, vector<1x16x16xbf16>
    %162 = vector.shape_cast %161 : vector<1x16x16xbf16> to vector<16x16xbf16>
    %cst_166 = arith.constant dense<0.000000e+00> : vector<16x768xf32>
    %163 = tpu.matmul %162, %160, %cst_166 {dimension_numbers = #tpu.dot_dimension_numbers<[1], [0], [0], [1], [0, 0, 1, 1], [], []>} : vector<16x16xbf16>, vector<16x768xbf16>, vector<16x768xf32> -> vector<16x768xf32>
    %164 = arith.addf %159, %163 : vector<16x768xf32>
    %c0_167 = arith.constant 0 : index
    %c0_168 = arith.constant 0 : index
    %165 = vector.load %arg9[%c0_167, %c0_168] : memref<16x1xf32, #tpu.memory_space<vmem>>, vector<16x1xf32>
    %166 = vector.broadcast %165 : vector<16x1xf32> to vector<16x768xf32>
    %167 = arith.mulf %164, %166 : vector<16x768xf32>
    %c0_169 = arith.constant 0 : index
    %c0_170 = arith.constant 0 : index
    %168 = vector.load %arg10[%c0_169, %c0_170] : memref<16x1xf32, #tpu.memory_space<vmem>>, vector<16x1xf32>
    %169 = vector.broadcast %168 : vector<16x1xf32> to vector<16x768xf32>
    %170 = arith.addf %167, %169 : vector<16x768xf32>
    %cst_171 = arith.constant 0.000000e+00 : f32
    %171 = vector.broadcast %cst_171 : f32 to vector<16x768xf32>
    %172 = arith.maximumf %170, %171 : vector<16x768xf32>
    %173 = arith.truncf %172 : vector<16x768xf32> to vector<16x768xbf16>
    %c0_172 = arith.constant 0 : index
    %c0_173 = arith.constant 0 : index
    %174 = vector.load %arg12[%c0_172, %c0_173] : memref<16x768xbf16, #tpu.memory_space<vmem>>, vector<16x768xbf16>
    tpu.vector_store %arg12[%c0_172, %c0_173], %173 {strides = array<i32>} : memref<16x768xbf16, #tpu.memory_space<vmem>>, vector<16x768xbf16>,
    return
  }
  func.func @transform_0(%arg0: i32) -> (i32, i32) {
    %c0_i32 = arith.constant 0 : i32
    %c0_i32_0 = arith.constant 0 : i32
    %c0_i32_1 = arith.constant 0 : i32
    return %c0_i32, %c0_i32_0 : i32, i32
  }
  func.func @transform_1(%arg0: i32) -> (i32, i32, i32) {
    %c0_i32 = arith.constant 0 : i32
    %c0_i32_0 = arith.constant 0 : i32
    %c0_i32_1 = arith.constant 0 : i32
    %c0_i32_2 = arith.constant 0 : i32
    return %c0_i32, %c0_i32_0, %c0_i32_1 : i32, i32, i32
  }
  func.func @transform_2(%arg0: i32) -> (i32, i32) {
    %c0_i32 = arith.constant 0 : i32
    %c0_i32_0 = arith.constant 0 : i32
    %c0_i32_1 = arith.constant 0 : i32
    return %c0_i32, %c0_i32_0 : i32, i32
  }
  func.func @transform_3(%arg0: i32) -> (i32, i32) {
    %c0_i32 = arith.constant 0 : i32
    %c0_i32_0 = arith.constant 0 : i32
    %c0_i32_1 = arith.constant 0 : i32
    return %c0_i32, %c0_i32_0 : i32, i32
  }
  func.func @transform_4(%arg0: i32) -> (i32, i32, i32) {
    %c0_i32 = arith.constant 0 : i32
    %c0_i32_0 = arith.constant 0 : i32
    %c0_i32_1 = arith.constant 0 : i32
    %c0_i32_2 = arith.constant 0 : i32
    return %c0_i32, %c0_i32_0, %c0_i32_1 : i32, i32, i32
  }
  func.func @transform_5(%arg0: i32) -> (i32, i32) {
    %c0_i32 = arith.constant 0 : i32
    %c0_i32_0 = arith.constant 0 : i32
    %c0_i32_1 = arith.constant 0 : i32
    return %c0_i32, %c0_i32_0 : i32, i32
  }
  func.func @transform_6(%arg0: i32) -> (i32, i32) {
    %c0_i32 = arith.constant 0 : i32
    %c0_i32_0 = arith.constant 0 : i32
    %c0_i32_1 = arith.constant 0 : i32
    return %c0_i32, %c0_i32_0 : i32, i32
  }
  func.func @transform_7(%arg0: i32) -> (i32, i32, i32) {
    %c0_i32 = arith.constant 0 : i32
    %c0_i32_0 = arith.constant 0 : i32
    %c0_i32_1 = arith.constant 0 : i32
    %c0_i32_2 = arith.constant 0 : i32
    return %c0_i32, %c0_i32_0, %c0_i32_1 : i32, i32, i32
  }
  func.func @transform_8(%arg0: i32) -> (i32, i32) {
    %c0_i32 = arith.constant 0 : i32
    %c0_i32_0 = arith.constant 0 : i32
    %c0_i32_1 = arith.constant 0 : i32
    return %c0_i32, %c0_i32_0 : i32, i32
  }
  func.func @transform_9(%arg0: i32) -> (i32, i32) {
    %c0_i32 = arith.constant 0 : i32
    %c0_i32_0 = arith.constant 0 : i32
    %c0_i32_1 = arith.constant 0 : i32
    return %c0_i32, %c0_i32_0 : i32, i32
  }
  func.func @transform_10(%arg0: i32) -> (i32, i32) {
    %c0_i32 = arith.constant 0 : i32
    %c0_i32_0 = arith.constant 0 : i32
    %c0_i32_1 = arith.constant 0 : i32
    return %c0_i32, %c0_i32_0 : i32, i32
  }
  func.func @transform_11(%arg0: i32) -> (i32, i32) {
    %c0_i32 = arith.constant 0 : i32
    %c0_i32_0 = arith.constant 0 : i32
    %c0_i32_1 = arith.constant 0 : i32
    return %c0_i32, %c0_i32_0 : i32, i32
  }
}

module attributes {stable_mosaic.version = 11 : i64} {
  func.func @_up_block_kernel(%arg0: i32, %arg1: memref<16x2688xbf16, #tpu.memory_space<vmem>>, %arg2: memref<9x16x16xbf16, #tpu.memory_space<vmem>>, %arg3: memref<16x1xf32, #tpu.memory_space<vmem>>, %arg4: memref<16x1xf32, #tpu.memory_space<vmem>>, %arg5: memref<9x8x16xbf16, #tpu.memory_space<vmem>>, %arg6: memref<8x1xf32, #tpu.memory_space<vmem>>, %arg7: memref<8x1xf32, #tpu.memory_space<vmem>>, %arg8: memref<9x8x8xbf16, #tpu.memory_space<vmem>>, %arg9: memref<8x1xf32, #tpu.memory_space<vmem>>, %arg10: memref<8x1xf32, #tpu.memory_space<vmem>>, %arg11: memref<4x8xbf16, #tpu.memory_space<vmem>>, %arg12: memref<4x1xf32, #tpu.memory_space<vmem>>, %arg13: memref<1x2432xf32, #tpu.memory_space<vmem>>, %arg14: memref<4x2432xf32, #tpu.memory_space<vmem>>, %arg15: memref<16x2688xbf16, #tpu.memory_space<vmem>>, %arg16: memref<8x2688xbf16, #tpu.memory_space<vmem>>) attributes {dimension_semantics = [#tpu.dimension_semantics<arbitrary>], iteration_bounds = array<i64: 1>, scalar_prefetch = 0 : i64, scratch_operands = 2 : i64, tpu.core_type = #tpu.core_type<tc>, window_params = [{pipeline_mode = #tpu.pipeline_mode<synchronous>, transform_indices = @transform_0, window_bounds = array<i64: 16, 2688>}, {pipeline_mode = #tpu.pipeline_mode<synchronous>, transform_indices = @transform_1, window_bounds = array<i64: 9, 16, 16>}, {pipeline_mode = #tpu.pipeline_mode<synchronous>, transform_indices = @transform_2, window_bounds = array<i64: 16, 1>}, {pipeline_mode = #tpu.pipeline_mode<synchronous>, transform_indices = @transform_3, window_bounds = array<i64: 16, 1>}, {pipeline_mode = #tpu.pipeline_mode<synchronous>, transform_indices = @transform_4, window_bounds = array<i64: 9, 8, 16>}, {pipeline_mode = #tpu.pipeline_mode<synchronous>, transform_indices = @transform_5, window_bounds = array<i64: 8, 1>}, {pipeline_mode = #tpu.pipeline_mode<synchronous>, transform_indices = @transform_6, window_bounds = array<i64: 8, 1>}, {pipeline_mode = #tpu.pipeline_mode<synchronous>, transform_indices = @transform_7, window_bounds = array<i64: 9, 8, 8>}, {pipeline_mode = #tpu.pipeline_mode<synchronous>, transform_indices = @transform_8, window_bounds = array<i64: 8, 1>}, {pipeline_mode = #tpu.pipeline_mode<synchronous>, transform_indices = @transform_9, window_bounds = array<i64: 8, 1>}, {pipeline_mode = #tpu.pipeline_mode<synchronous>, transform_indices = @transform_10, window_bounds = array<i64: 4, 8>}, {pipeline_mode = #tpu.pipeline_mode<synchronous>, transform_indices = @transform_11, window_bounds = array<i64: 4, 1>}, {pipeline_mode = #tpu.pipeline_mode<synchronous>, transform_indices = @transform_12, window_bounds = array<i64: 1, 2432>}, {pipeline_mode = #tpu.pipeline_mode<synchronous>, transform_indices = @transform_13, window_bounds = array<i64: 4, 2432>}]} {
    %cst = arith.constant 0.000000e+00 : bf16
    %0 = vector.broadcast %cst : bf16 to vector<16x2688xbf16>
    %c0 = arith.constant 0 : index
    %c0_0 = arith.constant 0 : index
    %1 = vector.load %arg15[%c0, %c0_0] : memref<16x2688xbf16, #tpu.memory_space<vmem>>, vector<16x2688xbf16>
    tpu.vector_store %arg15[%c0, %c0_0], %0 {strides = array<i32>} : memref<16x2688xbf16, #tpu.memory_space<vmem>>, vector<16x2688xbf16>,
    %cst_1 = arith.constant 0.000000e+00 : bf16
    %2 = vector.broadcast %cst_1 : bf16 to vector<8x2688xbf16>
    %c0_2 = arith.constant 0 : index
    %c0_3 = arith.constant 0 : index
    %3 = vector.load %arg16[%c0_2, %c0_3] : memref<8x2688xbf16, #tpu.memory_space<vmem>>, vector<8x2688xbf16>
    tpu.vector_store %arg16[%c0_2, %c0_3], %2 {strides = array<i32>} : memref<8x2688xbf16, #tpu.memory_space<vmem>>, vector<8x2688xbf16>,
    %c0_4 = arith.constant 0 : index
    %c0_5 = arith.constant 0 : index
    %4 = vector.load %arg13[%c0_4, %c0_5] : memref<1x2432xf32, #tpu.memory_space<vmem>>, vector<1x2432xf32>
    %cst_6 = arith.constant 5.000000e-01 : f32
    %5 = vector.broadcast %cst_6 : f32 to vector<1x2432xf32>
    %6 = arith.cmpf ogt, %4, %5 : vector<1x2432xf32>
    %c0_7 = arith.constant 0 : index
    %c93 = arith.constant 93 : index
    %7 = vector.load %arg1[%c0_7, %c93] : memref<16x2688xbf16, #tpu.memory_space<vmem>>, vector<16x2432xbf16>
    %c0_8 = arith.constant 0 : index
    %c0_9 = arith.constant 0 : index
    %c0_10 = arith.constant 0 : index
    %8 = vector.load %arg2[%c0_8, %c0_9, %c0_10] : memref<9x16x16xbf16, #tpu.memory_space<vmem>>, vector<1x16x16xbf16>
    %9 = vector.shape_cast %8 : vector<1x16x16xbf16> to vector<16x16xbf16>
    %cst_11 = arith.constant dense<0.000000e+00> : vector<16x2432xf32>
    %10 = tpu.matmul %9, %7, %cst_11 {dimension_numbers = #tpu.dot_dimension_numbers<[1], [0], [0], [1], [0, 0, 1, 1], [], []>} : vector<16x16xbf16>, vector<16x2432xbf16>, vector<16x2432xf32> -> vector<16x2432xf32>
    %c0_12 = arith.constant 0 : index
    %c94 = arith.constant 94 : index
    %11 = vector.load %arg1[%c0_12, %c94] : memref<16x2688xbf16, #tpu.memory_space<vmem>>, vector<16x2432xbf16>
    %c1 = arith.constant 1 : index
    %c0_13 = arith.constant 0 : index
    %c0_14 = arith.constant 0 : index
    %12 = vector.load %arg2[%c1, %c0_13, %c0_14] : memref<9x16x16xbf16, #tpu.memory_space<vmem>>, vector<1x16x16xbf16>
    %13 = vector.shape_cast %12 : vector<1x16x16xbf16> to vector<16x16xbf16>
    %cst_15 = arith.constant dense<0.000000e+00> : vector<16x2432xf32>
    %14 = tpu.matmul %13, %11, %cst_15 {dimension_numbers = #tpu.dot_dimension_numbers<[1], [0], [0], [1], [0, 0, 1, 1], [], []>} : vector<16x16xbf16>, vector<16x2432xbf16>, vector<16x2432xf32> -> vector<16x2432xf32>
    %15 = arith.addf %10, %14 : vector<16x2432xf32>
    %c0_16 = arith.constant 0 : index
    %c95 = arith.constant 95 : index
    %16 = vector.load %arg1[%c0_16, %c95] : memref<16x2688xbf16, #tpu.memory_space<vmem>>, vector<16x2432xbf16>
    %c2 = arith.constant 2 : index
    %c0_17 = arith.constant 0 : index
    %c0_18 = arith.constant 0 : index
    %17 = vector.load %arg2[%c2, %c0_17, %c0_18] : memref<9x16x16xbf16, #tpu.memory_space<vmem>>, vector<1x16x16xbf16>
    %18 = vector.shape_cast %17 : vector<1x16x16xbf16> to vector<16x16xbf16>
    %cst_19 = arith.constant dense<0.000000e+00> : vector<16x2432xf32>
    %19 = tpu.matmul %18, %16, %cst_19 {dimension_numbers = #tpu.dot_dimension_numbers<[1], [0], [0], [1], [0, 0, 1, 1], [], []>} : vector<16x16xbf16>, vector<16x2432xbf16>, vector<16x2432xf32> -> vector<16x2432xf32>
    %20 = arith.addf %15, %19 : vector<16x2432xf32>
    %c0_20 = arith.constant 0 : index
    %c127 = arith.constant 127 : index
    %21 = vector.load %arg1[%c0_20, %c127] : memref<16x2688xbf16, #tpu.memory_space<vmem>>, vector<16x2432xbf16>
    %c3 = arith.constant 3 : index
    %c0_21 = arith.constant 0 : index
    %c0_22 = arith.constant 0 : index
    %22 = vector.load %arg2[%c3, %c0_21, %c0_22] : memref<9x16x16xbf16, #tpu.memory_space<vmem>>, vector<1x16x16xbf16>
    %23 = vector.shape_cast %22 : vector<1x16x16xbf16> to vector<16x16xbf16>
    %cst_23 = arith.constant dense<0.000000e+00> : vector<16x2432xf32>
    %24 = tpu.matmul %23, %21, %cst_23 {dimension_numbers = #tpu.dot_dimension_numbers<[1], [0], [0], [1], [0, 0, 1, 1], [], []>} : vector<16x16xbf16>, vector<16x2432xbf16>, vector<16x2432xf32> -> vector<16x2432xf32>
    %25 = arith.addf %20, %24 : vector<16x2432xf32>
    %c0_24 = arith.constant 0 : index
    %c128 = arith.constant 128 : index
    %26 = vector.load %arg1[%c0_24, %c128] : memref<16x2688xbf16, #tpu.memory_space<vmem>>, vector<16x2432xbf16>
    %c4 = arith.constant 4 : index
    %c0_25 = arith.constant 0 : index
    %c0_26 = arith.constant 0 : index
    %27 = vector.load %arg2[%c4, %c0_25, %c0_26] : memref<9x16x16xbf16, #tpu.memory_space<vmem>>, vector<1x16x16xbf16>
    %28 = vector.shape_cast %27 : vector<1x16x16xbf16> to vector<16x16xbf16>
    %cst_27 = arith.constant dense<0.000000e+00> : vector<16x2432xf32>
    %29 = tpu.matmul %28, %26, %cst_27 {dimension_numbers = #tpu.dot_dimension_numbers<[1], [0], [0], [1], [0, 0, 1, 1], [], []>} : vector<16x16xbf16>, vector<16x2432xbf16>, vector<16x2432xf32> -> vector<16x2432xf32>
    %30 = arith.addf %25, %29 : vector<16x2432xf32>
    %c0_28 = arith.constant 0 : index
    %c129 = arith.constant 129 : index
    %31 = vector.load %arg1[%c0_28, %c129] : memref<16x2688xbf16, #tpu.memory_space<vmem>>, vector<16x2432xbf16>
    %c5 = arith.constant 5 : index
    %c0_29 = arith.constant 0 : index
    %c0_30 = arith.constant 0 : index
    %32 = vector.load %arg2[%c5, %c0_29, %c0_30] : memref<9x16x16xbf16, #tpu.memory_space<vmem>>, vector<1x16x16xbf16>
    %33 = vector.shape_cast %32 : vector<1x16x16xbf16> to vector<16x16xbf16>
    %cst_31 = arith.constant dense<0.000000e+00> : vector<16x2432xf32>
    %34 = tpu.matmul %33, %31, %cst_31 {dimension_numbers = #tpu.dot_dimension_numbers<[1], [0], [0], [1], [0, 0, 1, 1], [], []>} : vector<16x16xbf16>, vector<16x2432xbf16>, vector<16x2432xf32> -> vector<16x2432xf32>
    %35 = arith.addf %30, %34 : vector<16x2432xf32>
    %c0_32 = arith.constant 0 : index
    %c161 = arith.constant 161 : index
    %36 = vector.load %arg1[%c0_32, %c161] : memref<16x2688xbf16, #tpu.memory_space<vmem>>, vector<16x2432xbf16>
    %c6 = arith.constant 6 : index
    %c0_33 = arith.constant 0 : index
    %c0_34 = arith.constant 0 : index
    %37 = vector.load %arg2[%c6, %c0_33, %c0_34] : memref<9x16x16xbf16, #tpu.memory_space<vmem>>, vector<1x16x16xbf16>
    %38 = vector.shape_cast %37 : vector<1x16x16xbf16> to vector<16x16xbf16>
    %cst_35 = arith.constant dense<0.000000e+00> : vector<16x2432xf32>
    %39 = tpu.matmul %38, %36, %cst_35 {dimension_numbers = #tpu.dot_dimension_numbers<[1], [0], [0], [1], [0, 0, 1, 1], [], []>} : vector<16x16xbf16>, vector<16x2432xbf16>, vector<16x2432xf32> -> vector<16x2432xf32>
    %40 = arith.addf %35, %39 : vector<16x2432xf32>
    %c0_36 = arith.constant 0 : index
    %c162 = arith.constant 162 : index
    %41 = vector.load %arg1[%c0_36, %c162] : memref<16x2688xbf16, #tpu.memory_space<vmem>>, vector<16x2432xbf16>
    %c7 = arith.constant 7 : index
    %c0_37 = arith.constant 0 : index
    %c0_38 = arith.constant 0 : index
    %42 = vector.load %arg2[%c7, %c0_37, %c0_38] : memref<9x16x16xbf16, #tpu.memory_space<vmem>>, vector<1x16x16xbf16>
    %43 = vector.shape_cast %42 : vector<1x16x16xbf16> to vector<16x16xbf16>
    %cst_39 = arith.constant dense<0.000000e+00> : vector<16x2432xf32>
    %44 = tpu.matmul %43, %41, %cst_39 {dimension_numbers = #tpu.dot_dimension_numbers<[1], [0], [0], [1], [0, 0, 1, 1], [], []>} : vector<16x16xbf16>, vector<16x2432xbf16>, vector<16x2432xf32> -> vector<16x2432xf32>
    %45 = arith.addf %40, %44 : vector<16x2432xf32>
    %c0_40 = arith.constant 0 : index
    %c163 = arith.constant 163 : index
    %46 = vector.load %arg1[%c0_40, %c163] : memref<16x2688xbf16, #tpu.memory_space<vmem>>, vector<16x2432xbf16>
    %c8 = arith.constant 8 : index
    %c0_41 = arith.constant 0 : index
    %c0_42 = arith.constant 0 : index
    %47 = vector.load %arg2[%c8, %c0_41, %c0_42] : memref<9x16x16xbf16, #tpu.memory_space<vmem>>, vector<1x16x16xbf16>
    %48 = vector.shape_cast %47 : vector<1x16x16xbf16> to vector<16x16xbf16>
    %cst_43 = arith.constant dense<0.000000e+00> : vector<16x2432xf32>
    %49 = tpu.matmul %48, %46, %cst_43 {dimension_numbers = #tpu.dot_dimension_numbers<[1], [0], [0], [1], [0, 0, 1, 1], [], []>} : vector<16x16xbf16>, vector<16x2432xbf16>, vector<16x2432xf32> -> vector<16x2432xf32>
    %50 = arith.addf %45, %49 : vector<16x2432xf32>
    %c0_44 = arith.constant 0 : index
    %c0_45 = arith.constant 0 : index
    %51 = vector.load %arg3[%c0_44, %c0_45] : memref<16x1xf32, #tpu.memory_space<vmem>>, vector<16x1xf32>
    %52 = vector.broadcast %51 : vector<16x1xf32> to vector<16x2432xf32>
    %53 = arith.mulf %50, %52 : vector<16x2432xf32>
    %c0_46 = arith.constant 0 : index
    %c0_47 = arith.constant 0 : index
    %54 = vector.load %arg4[%c0_46, %c0_47] : memref<16x1xf32, #tpu.memory_space<vmem>>, vector<16x1xf32>
    %55 = vector.broadcast %54 : vector<16x1xf32> to vector<16x2432xf32>
    %56 = arith.addf %53, %55 : vector<16x2432xf32>
    %cst_48 = arith.constant 0.000000e+00 : f32
    %57 = vector.shape_cast %6 : vector<1x2432xi1> to vector<1x2432xi1>
    %58 = vector.broadcast %57 : vector<1x2432xi1> to vector<16x2432xi1>
    %59 = vector.broadcast %cst_48 : f32 to vector<16x2432xf32>
    %60 = arith.select %58, %56, %59 : vector<16x2432xi1>, vector<16x2432xf32>
    %61 = arith.truncf %60 : vector<16x2432xf32> to vector<16x2432xbf16>
    %c0_49 = arith.constant 0 : index
    %c128_50 = arith.constant 128 : index
    %62 = vector.load %arg15[%c0_49, %c128_50] : memref<16x2688xbf16, #tpu.memory_space<vmem>>, vector<16x2432xbf16>
    tpu.vector_store %arg15[%c0_49, %c128_50], %61 {strides = array<i32>} : memref<16x2688xbf16, #tpu.memory_space<vmem>>, vector<16x2432xbf16>,
    %c0_51 = arith.constant 0 : index
    %c93_52 = arith.constant 93 : index
    %63 = vector.load %arg15[%c0_51, %c93_52] : memref<16x2688xbf16, #tpu.memory_space<vmem>>, vector<16x2432xbf16>
    %c0_53 = arith.constant 0 : index
    %c0_54 = arith.constant 0 : index
    %c0_55 = arith.constant 0 : index
    %64 = vector.load %arg5[%c0_53, %c0_54, %c0_55] : memref<9x8x16xbf16, #tpu.memory_space<vmem>>, vector<1x8x16xbf16>
    %65 = vector.shape_cast %64 : vector<1x8x16xbf16> to vector<8x16xbf16>
    %cst_56 = arith.constant dense<0.000000e+00> : vector<8x2432xf32>
    %66 = tpu.matmul %65, %63, %cst_56 {dimension_numbers = #tpu.dot_dimension_numbers<[1], [0], [0], [1], [0, 0, 1, 1], [], []>} : vector<8x16xbf16>, vector<16x2432xbf16>, vector<8x2432xf32> -> vector<8x2432xf32>
    %c0_57 = arith.constant 0 : index
    %c94_58 = arith.constant 94 : index
    %67 = vector.load %arg15[%c0_57, %c94_58] : memref<16x2688xbf16, #tpu.memory_space<vmem>>, vector<16x2432xbf16>
    %c1_59 = arith.constant 1 : index
    %c0_60 = arith.constant 0 : index
    %c0_61 = arith.constant 0 : index
    %68 = vector.load %arg5[%c1_59, %c0_60, %c0_61] : memref<9x8x16xbf16, #tpu.memory_space<vmem>>, vector<1x8x16xbf16>
    %69 = vector.shape_cast %68 : vector<1x8x16xbf16> to vector<8x16xbf16>
    %cst_62 = arith.constant dense<0.000000e+00> : vector<8x2432xf32>
    %70 = tpu.matmul %69, %67, %cst_62 {dimension_numbers = #tpu.dot_dimension_numbers<[1], [0], [0], [1], [0, 0, 1, 1], [], []>} : vector<8x16xbf16>, vector<16x2432xbf16>, vector<8x2432xf32> -> vector<8x2432xf32>
    %71 = arith.addf %66, %70 : vector<8x2432xf32>
    %c0_63 = arith.constant 0 : index
    %c95_64 = arith.constant 95 : index
    %72 = vector.load %arg15[%c0_63, %c95_64] : memref<16x2688xbf16, #tpu.memory_space<vmem>>, vector<16x2432xbf16>
    %c2_65 = arith.constant 2 : index
    %c0_66 = arith.constant 0 : index
    %c0_67 = arith.constant 0 : index
    %73 = vector.load %arg5[%c2_65, %c0_66, %c0_67] : memref<9x8x16xbf16, #tpu.memory_space<vmem>>, vector<1x8x16xbf16>
    %74 = vector.shape_cast %73 : vector<1x8x16xbf16> to vector<8x16xbf16>
    %cst_68 = arith.constant dense<0.000000e+00> : vector<8x2432xf32>
    %75 = tpu.matmul %74, %72, %cst_68 {dimension_numbers = #tpu.dot_dimension_numbers<[1], [0], [0], [1], [0, 0, 1, 1], [], []>} : vector<8x16xbf16>, vector<16x2432xbf16>, vector<8x2432xf32> -> vector<8x2432xf32>
    %76 = arith.addf %71, %75 : vector<8x2432xf32>
    %c0_69 = arith.constant 0 : index
    %c127_70 = arith.constant 127 : index
    %77 = vector.load %arg15[%c0_69, %c127_70] : memref<16x2688xbf16, #tpu.memory_space<vmem>>, vector<16x2432xbf16>
    %c3_71 = arith.constant 3 : index
    %c0_72 = arith.constant 0 : index
    %c0_73 = arith.constant 0 : index
    %78 = vector.load %arg5[%c3_71, %c0_72, %c0_73] : memref<9x8x16xbf16, #tpu.memory_space<vmem>>, vector<1x8x16xbf16>
    %79 = vector.shape_cast %78 : vector<1x8x16xbf16> to vector<8x16xbf16>
    %cst_74 = arith.constant dense<0.000000e+00> : vector<8x2432xf32>
    %80 = tpu.matmul %79, %77, %cst_74 {dimension_numbers = #tpu.dot_dimension_numbers<[1], [0], [0], [1], [0, 0, 1, 1], [], []>} : vector<8x16xbf16>, vector<16x2432xbf16>, vector<8x2432xf32> -> vector<8x2432xf32>
    %81 = arith.addf %76, %80 : vector<8x2432xf32>
    %c0_75 = arith.constant 0 : index
    %c128_76 = arith.constant 128 : index
    %82 = vector.load %arg15[%c0_75, %c128_76] : memref<16x2688xbf16, #tpu.memory_space<vmem>>, vector<16x2432xbf16>
    %c4_77 = arith.constant 4 : index
    %c0_78 = arith.constant 0 : index
    %c0_79 = arith.constant 0 : index
    %83 = vector.load %arg5[%c4_77, %c0_78, %c0_79] : memref<9x8x16xbf16, #tpu.memory_space<vmem>>, vector<1x8x16xbf16>
    %84 = vector.shape_cast %83 : vector<1x8x16xbf16> to vector<8x16xbf16>
    %cst_80 = arith.constant dense<0.000000e+00> : vector<8x2432xf32>
    %85 = tpu.matmul %84, %82, %cst_80 {dimension_numbers = #tpu.dot_dimension_numbers<[1], [0], [0], [1], [0, 0, 1, 1], [], []>} : vector<8x16xbf16>, vector<16x2432xbf16>, vector<8x2432xf32> -> vector<8x2432xf32>
    %86 = arith.addf %81, %85 : vector<8x2432xf32>
    %c0_81 = arith.constant 0 : index
    %c129_82 = arith.constant 129 : index
    %87 = vector.load %arg15[%c0_81, %c129_82] : memref<16x2688xbf16, #tpu.memory_space<vmem>>, vector<16x2432xbf16>
    %c5_83 = arith.constant 5 : index
    %c0_84 = arith.constant 0 : index
    %c0_85 = arith.constant 0 : index
    %88 = vector.load %arg5[%c5_83, %c0_84, %c0_85] : memref<9x8x16xbf16, #tpu.memory_space<vmem>>, vector<1x8x16xbf16>
    %89 = vector.shape_cast %88 : vector<1x8x16xbf16> to vector<8x16xbf16>
    %cst_86 = arith.constant dense<0.000000e+00> : vector<8x2432xf32>
    %90 = tpu.matmul %89, %87, %cst_86 {dimension_numbers = #tpu.dot_dimension_numbers<[1], [0], [0], [1], [0, 0, 1, 1], [], []>} : vector<8x16xbf16>, vector<16x2432xbf16>, vector<8x2432xf32> -> vector<8x2432xf32>
    %91 = arith.addf %86, %90 : vector<8x2432xf32>
    %c0_87 = arith.constant 0 : index
    %c161_88 = arith.constant 161 : index
    %92 = vector.load %arg15[%c0_87, %c161_88] : memref<16x2688xbf16, #tpu.memory_space<vmem>>, vector<16x2432xbf16>
    %c6_89 = arith.constant 6 : index
    %c0_90 = arith.constant 0 : index
    %c0_91 = arith.constant 0 : index
    %93 = vector.load %arg5[%c6_89, %c0_90, %c0_91] : memref<9x8x16xbf16, #tpu.memory_space<vmem>>, vector<1x8x16xbf16>
    %94 = vector.shape_cast %93 : vector<1x8x16xbf16> to vector<8x16xbf16>
    %cst_92 = arith.constant dense<0.000000e+00> : vector<8x2432xf32>
    %95 = tpu.matmul %94, %92, %cst_92 {dimension_numbers = #tpu.dot_dimension_numbers<[1], [0], [0], [1], [0, 0, 1, 1], [], []>} : vector<8x16xbf16>, vector<16x2432xbf16>, vector<8x2432xf32> -> vector<8x2432xf32>
    %96 = arith.addf %91, %95 : vector<8x2432xf32>
    %c0_93 = arith.constant 0 : index
    %c162_94 = arith.constant 162 : index
    %97 = vector.load %arg15[%c0_93, %c162_94] : memref<16x2688xbf16, #tpu.memory_space<vmem>>, vector<16x2432xbf16>
    %c7_95 = arith.constant 7 : index
    %c0_96 = arith.constant 0 : index
    %c0_97 = arith.constant 0 : index
    %98 = vector.load %arg5[%c7_95, %c0_96, %c0_97] : memref<9x8x16xbf16, #tpu.memory_space<vmem>>, vector<1x8x16xbf16>
    %99 = vector.shape_cast %98 : vector<1x8x16xbf16> to vector<8x16xbf16>
    %cst_98 = arith.constant dense<0.000000e+00> : vector<8x2432xf32>
    %100 = tpu.matmul %99, %97, %cst_98 {dimension_numbers = #tpu.dot_dimension_numbers<[1], [0], [0], [1], [0, 0, 1, 1], [], []>} : vector<8x16xbf16>, vector<16x2432xbf16>, vector<8x2432xf32> -> vector<8x2432xf32>
    %101 = arith.addf %96, %100 : vector<8x2432xf32>
    %c0_99 = arith.constant 0 : index
    %c163_100 = arith.constant 163 : index
    %102 = vector.load %arg15[%c0_99, %c163_100] : memref<16x2688xbf16, #tpu.memory_space<vmem>>, vector<16x2432xbf16>
    %c8_101 = arith.constant 8 : index
    %c0_102 = arith.constant 0 : index
    %c0_103 = arith.constant 0 : index
    %103 = vector.load %arg5[%c8_101, %c0_102, %c0_103] : memref<9x8x16xbf16, #tpu.memory_space<vmem>>, vector<1x8x16xbf16>
    %104 = vector.shape_cast %103 : vector<1x8x16xbf16> to vector<8x16xbf16>
    %cst_104 = arith.constant dense<0.000000e+00> : vector<8x2432xf32>
    %105 = tpu.matmul %104, %102, %cst_104 {dimension_numbers = #tpu.dot_dimension_numbers<[1], [0], [0], [1], [0, 0, 1, 1], [], []>} : vector<8x16xbf16>, vector<16x2432xbf16>, vector<8x2432xf32> -> vector<8x2432xf32>
    %106 = arith.addf %101, %105 : vector<8x2432xf32>
    %c0_105 = arith.constant 0 : index
    %c0_106 = arith.constant 0 : index
    %107 = vector.load %arg6[%c0_105, %c0_106] : memref<8x1xf32, #tpu.memory_space<vmem>>, vector<8x1xf32>
    %108 = vector.broadcast %107 : vector<8x1xf32> to vector<8x2432xf32>
    %109 = arith.mulf %106, %108 : vector<8x2432xf32>
    %c0_107 = arith.constant 0 : index
    %c0_108 = arith.constant 0 : index
    %110 = vector.load %arg7[%c0_107, %c0_108] : memref<8x1xf32, #tpu.memory_space<vmem>>, vector<8x1xf32>
    %111 = vector.broadcast %110 : vector<8x1xf32> to vector<8x2432xf32>
    %112 = arith.addf %109, %111 : vector<8x2432xf32>
    %cst_109 = arith.constant 0.000000e+00 : f32
    %113 = vector.broadcast %cst_109 : f32 to vector<8x2432xf32>
    %114 = arith.maximumf %112, %113 : vector<8x2432xf32>
    %cst_110 = arith.constant 0.000000e+00 : f32
    %115 = vector.shape_cast %6 : vector<1x2432xi1> to vector<1x2432xi1>
    %116 = vector.broadcast %115 : vector<1x2432xi1> to vector<8x2432xi1>
    %117 = vector.broadcast %cst_110 : f32 to vector<8x2432xf32>
    %118 = arith.select %116, %114, %117 : vector<8x2432xi1>, vector<8x2432xf32>
    %119 = arith.truncf %118 : vector<8x2432xf32> to vector<8x2432xbf16>
    %c0_111 = arith.constant 0 : index
    %c128_112 = arith.constant 128 : index
    %120 = vector.load %arg16[%c0_111, %c128_112] : memref<8x2688xbf16, #tpu.memory_space<vmem>>, vector<8x2432xbf16>
    tpu.vector_store %arg16[%c0_111, %c128_112], %119 {strides = array<i32>} : memref<8x2688xbf16, #tpu.memory_space<vmem>>, vector<8x2432xbf16>,
    %c0_113 = arith.constant 0 : index
    %c93_114 = arith.constant 93 : index
    %121 = vector.load %arg16[%c0_113, %c93_114] : memref<8x2688xbf16, #tpu.memory_space<vmem>>, vector<8x2432xbf16>
    %c0_115 = arith.constant 0 : index
    %c0_116 = arith.constant 0 : index
    %c0_117 = arith.constant 0 : index
    %122 = vector.load %arg8[%c0_115, %c0_116, %c0_117] : memref<9x8x8xbf16, #tpu.memory_space<vmem>>, vector<1x8x8xbf16>
    %123 = vector.shape_cast %122 : vector<1x8x8xbf16> to vector<8x8xbf16>
    %cst_118 = arith.constant dense<0.000000e+00> : vector<8x2432xf32>
    %124 = tpu.matmul %123, %121, %cst_118 {dimension_numbers = #tpu.dot_dimension_numbers<[1], [0], [0], [1], [0, 0, 1, 1], [], []>} : vector<8x8xbf16>, vector<8x2432xbf16>, vector<8x2432xf32> -> vector<8x2432xf32>
    %c0_119 = arith.constant 0 : index
    %c94_120 = arith.constant 94 : index
    %125 = vector.load %arg16[%c0_119, %c94_120] : memref<8x2688xbf16, #tpu.memory_space<vmem>>, vector<8x2432xbf16>
    %c1_121 = arith.constant 1 : index
    %c0_122 = arith.constant 0 : index
    %c0_123 = arith.constant 0 : index
    %126 = vector.load %arg8[%c1_121, %c0_122, %c0_123] : memref<9x8x8xbf16, #tpu.memory_space<vmem>>, vector<1x8x8xbf16>
    %127 = vector.shape_cast %126 : vector<1x8x8xbf16> to vector<8x8xbf16>
    %cst_124 = arith.constant dense<0.000000e+00> : vector<8x2432xf32>
    %128 = tpu.matmul %127, %125, %cst_124 {dimension_numbers = #tpu.dot_dimension_numbers<[1], [0], [0], [1], [0, 0, 1, 1], [], []>} : vector<8x8xbf16>, vector<8x2432xbf16>, vector<8x2432xf32> -> vector<8x2432xf32>
    %129 = arith.addf %124, %128 : vector<8x2432xf32>
    %c0_125 = arith.constant 0 : index
    %c95_126 = arith.constant 95 : index
    %130 = vector.load %arg16[%c0_125, %c95_126] : memref<8x2688xbf16, #tpu.memory_space<vmem>>, vector<8x2432xbf16>
    %c2_127 = arith.constant 2 : index
    %c0_128 = arith.constant 0 : index
    %c0_129 = arith.constant 0 : index
    %131 = vector.load %arg8[%c2_127, %c0_128, %c0_129] : memref<9x8x8xbf16, #tpu.memory_space<vmem>>, vector<1x8x8xbf16>
    %132 = vector.shape_cast %131 : vector<1x8x8xbf16> to vector<8x8xbf16>
    %cst_130 = arith.constant dense<0.000000e+00> : vector<8x2432xf32>
    %133 = tpu.matmul %132, %130, %cst_130 {dimension_numbers = #tpu.dot_dimension_numbers<[1], [0], [0], [1], [0, 0, 1, 1], [], []>} : vector<8x8xbf16>, vector<8x2432xbf16>, vector<8x2432xf32> -> vector<8x2432xf32>
    %134 = arith.addf %129, %133 : vector<8x2432xf32>
    %c0_131 = arith.constant 0 : index
    %c127_132 = arith.constant 127 : index
    %135 = vector.load %arg16[%c0_131, %c127_132] : memref<8x2688xbf16, #tpu.memory_space<vmem>>, vector<8x2432xbf16>
    %c3_133 = arith.constant 3 : index
    %c0_134 = arith.constant 0 : index
    %c0_135 = arith.constant 0 : index
    %136 = vector.load %arg8[%c3_133, %c0_134, %c0_135] : memref<9x8x8xbf16, #tpu.memory_space<vmem>>, vector<1x8x8xbf16>
    %137 = vector.shape_cast %136 : vector<1x8x8xbf16> to vector<8x8xbf16>
    %cst_136 = arith.constant dense<0.000000e+00> : vector<8x2432xf32>
    %138 = tpu.matmul %137, %135, %cst_136 {dimension_numbers = #tpu.dot_dimension_numbers<[1], [0], [0], [1], [0, 0, 1, 1], [], []>} : vector<8x8xbf16>, vector<8x2432xbf16>, vector<8x2432xf32> -> vector<8x2432xf32>
    %139 = arith.addf %134, %138 : vector<8x2432xf32>
    %c0_137 = arith.constant 0 : index
    %c128_138 = arith.constant 128 : index
    %140 = vector.load %arg16[%c0_137, %c128_138] : memref<8x2688xbf16, #tpu.memory_space<vmem>>, vector<8x2432xbf16>
    %c4_139 = arith.constant 4 : index
    %c0_140 = arith.constant 0 : index
    %c0_141 = arith.constant 0 : index
    %141 = vector.load %arg8[%c4_139, %c0_140, %c0_141] : memref<9x8x8xbf16, #tpu.memory_space<vmem>>, vector<1x8x8xbf16>
    %142 = vector.shape_cast %141 : vector<1x8x8xbf16> to vector<8x8xbf16>
    %cst_142 = arith.constant dense<0.000000e+00> : vector<8x2432xf32>
    %143 = tpu.matmul %142, %140, %cst_142 {dimension_numbers = #tpu.dot_dimension_numbers<[1], [0], [0], [1], [0, 0, 1, 1], [], []>} : vector<8x8xbf16>, vector<8x2432xbf16>, vector<8x2432xf32> -> vector<8x2432xf32>
    %144 = arith.addf %139, %143 : vector<8x2432xf32>
    %c0_143 = arith.constant 0 : index
    %c129_144 = arith.constant 129 : index
    %145 = vector.load %arg16[%c0_143, %c129_144] : memref<8x2688xbf16, #tpu.memory_space<vmem>>, vector<8x2432xbf16>
    %c5_145 = arith.constant 5 : index
    %c0_146 = arith.constant 0 : index
    %c0_147 = arith.constant 0 : index
    %146 = vector.load %arg8[%c5_145, %c0_146, %c0_147] : memref<9x8x8xbf16, #tpu.memory_space<vmem>>, vector<1x8x8xbf16>
    %147 = vector.shape_cast %146 : vector<1x8x8xbf16> to vector<8x8xbf16>
    %cst_148 = arith.constant dense<0.000000e+00> : vector<8x2432xf32>
    %148 = tpu.matmul %147, %145, %cst_148 {dimension_numbers = #tpu.dot_dimension_numbers<[1], [0], [0], [1], [0, 0, 1, 1], [], []>} : vector<8x8xbf16>, vector<8x2432xbf16>, vector<8x2432xf32> -> vector<8x2432xf32>
    %149 = arith.addf %144, %148 : vector<8x2432xf32>
    %c0_149 = arith.constant 0 : index
    %c161_150 = arith.constant 161 : index
    %150 = vector.load %arg16[%c0_149, %c161_150] : memref<8x2688xbf16, #tpu.memory_space<vmem>>, vector<8x2432xbf16>
    %c6_151 = arith.constant 6 : index
    %c0_152 = arith.constant 0 : index
    %c0_153 = arith.constant 0 : index
    %151 = vector.load %arg8[%c6_151, %c0_152, %c0_153] : memref<9x8x8xbf16, #tpu.memory_space<vmem>>, vector<1x8x8xbf16>
    %152 = vector.shape_cast %151 : vector<1x8x8xbf16> to vector<8x8xbf16>
    %cst_154 = arith.constant dense<0.000000e+00> : vector<8x2432xf32>
    %153 = tpu.matmul %152, %150, %cst_154 {dimension_numbers = #tpu.dot_dimension_numbers<[1], [0], [0], [1], [0, 0, 1, 1], [], []>} : vector<8x8xbf16>, vector<8x2432xbf16>, vector<8x2432xf32> -> vector<8x2432xf32>
    %154 = arith.addf %149, %153 : vector<8x2432xf32>
    %c0_155 = arith.constant 0 : index
    %c162_156 = arith.constant 162 : index
    %155 = vector.load %arg16[%c0_155, %c162_156] : memref<8x2688xbf16, #tpu.memory_space<vmem>>, vector<8x2432xbf16>
    %c7_157 = arith.constant 7 : index
    %c0_158 = arith.constant 0 : index
    %c0_159 = arith.constant 0 : index
    %156 = vector.load %arg8[%c7_157, %c0_158, %c0_159] : memref<9x8x8xbf16, #tpu.memory_space<vmem>>, vector<1x8x8xbf16>
    %157 = vector.shape_cast %156 : vector<1x8x8xbf16> to vector<8x8xbf16>
    %cst_160 = arith.constant dense<0.000000e+00> : vector<8x2432xf32>
    %158 = tpu.matmul %157, %155, %cst_160 {dimension_numbers = #tpu.dot_dimension_numbers<[1], [0], [0], [1], [0, 0, 1, 1], [], []>} : vector<8x8xbf16>, vector<8x2432xbf16>, vector<8x2432xf32> -> vector<8x2432xf32>
    %159 = arith.addf %154, %158 : vector<8x2432xf32>
    %c0_161 = arith.constant 0 : index
    %c163_162 = arith.constant 163 : index
    %160 = vector.load %arg16[%c0_161, %c163_162] : memref<8x2688xbf16, #tpu.memory_space<vmem>>, vector<8x2432xbf16>
    %c8_163 = arith.constant 8 : index
    %c0_164 = arith.constant 0 : index
    %c0_165 = arith.constant 0 : index
    %161 = vector.load %arg8[%c8_163, %c0_164, %c0_165] : memref<9x8x8xbf16, #tpu.memory_space<vmem>>, vector<1x8x8xbf16>
    %162 = vector.shape_cast %161 : vector<1x8x8xbf16> to vector<8x8xbf16>
    %cst_166 = arith.constant dense<0.000000e+00> : vector<8x2432xf32>
    %163 = tpu.matmul %162, %160, %cst_166 {dimension_numbers = #tpu.dot_dimension_numbers<[1], [0], [0], [1], [0, 0, 1, 1], [], []>} : vector<8x8xbf16>, vector<8x2432xbf16>, vector<8x2432xf32> -> vector<8x2432xf32>
    %164 = arith.addf %159, %163 : vector<8x2432xf32>
    %c0_167 = arith.constant 0 : index
    %c0_168 = arith.constant 0 : index
    %165 = vector.load %arg9[%c0_167, %c0_168] : memref<8x1xf32, #tpu.memory_space<vmem>>, vector<8x1xf32>
    %166 = vector.broadcast %165 : vector<8x1xf32> to vector<8x2432xf32>
    %167 = arith.mulf %164, %166 : vector<8x2432xf32>
    %c0_169 = arith.constant 0 : index
    %c0_170 = arith.constant 0 : index
    %168 = vector.load %arg10[%c0_169, %c0_170] : memref<8x1xf32, #tpu.memory_space<vmem>>, vector<8x1xf32>
    %169 = vector.broadcast %168 : vector<8x1xf32> to vector<8x2432xf32>
    %170 = arith.addf %167, %169 : vector<8x2432xf32>
    %cst_171 = arith.constant 0.000000e+00 : f32
    %171 = vector.broadcast %cst_171 : f32 to vector<8x2432xf32>
    %172 = arith.maximumf %170, %171 : vector<8x2432xf32>
    %c0_172 = arith.constant 0 : index
    %c0_173 = arith.constant 0 : index
    %173 = vector.load %arg11[%c0_172, %c0_173] : memref<4x8xbf16, #tpu.memory_space<vmem>>, vector<4x8xbf16>
    %174 = arith.truncf %172 : vector<8x2432xf32> to vector<8x2432xbf16>
    %cst_174 = arith.constant dense<0.000000e+00> : vector<4x2432xf32>
    %175 = tpu.matmul %173, %174, %cst_174 {dimension_numbers = #tpu.dot_dimension_numbers<[1], [0], [0], [1], [0, 0, 1, 1], [], []>} : vector<4x8xbf16>, vector<8x2432xbf16>, vector<4x2432xf32> -> vector<4x2432xf32>
    %c0_175 = arith.constant 0 : index
    %c0_176 = arith.constant 0 : index
    %176 = vector.load %arg12[%c0_175, %c0_176] : memref<4x1xf32, #tpu.memory_space<vmem>>, vector<4x1xf32>
    %177 = vector.broadcast %176 : vector<4x1xf32> to vector<4x2432xf32>
    %178 = arith.addf %175, %177 : vector<4x2432xf32>
    %c0_177 = arith.constant 0 : index
    %c0_178 = arith.constant 0 : index
    %179 = vector.load %arg14[%c0_177, %c0_178] : memref<4x2432xf32, #tpu.memory_space<vmem>>, vector<4x2432xf32>
    tpu.vector_store %arg14[%c0_177, %c0_178], %178 {strides = array<i32>} : memref<4x2432xf32, #tpu.memory_space<vmem>>, vector<4x2432xf32>,
    return
  }
  func.func @transform_0(%arg0: i32) -> (i32, i32) {
    %c0_i32 = arith.constant 0 : i32
    %c0_i32_0 = arith.constant 0 : i32
    %c0_i32_1 = arith.constant 0 : i32
    return %c0_i32, %c0_i32_0 : i32, i32
  }
  func.func @transform_1(%arg0: i32) -> (i32, i32, i32) {
    %c0_i32 = arith.constant 0 : i32
    %c0_i32_0 = arith.constant 0 : i32
    %c0_i32_1 = arith.constant 0 : i32
    %c0_i32_2 = arith.constant 0 : i32
    return %c0_i32, %c0_i32_0, %c0_i32_1 : i32, i32, i32
  }
  func.func @transform_2(%arg0: i32) -> (i32, i32) {
    %c0_i32 = arith.constant 0 : i32
    %c0_i32_0 = arith.constant 0 : i32
    %c0_i32_1 = arith.constant 0 : i32
    return %c0_i32, %c0_i32_0 : i32, i32
  }
  func.func @transform_3(%arg0: i32) -> (i32, i32) {
    %c0_i32 = arith.constant 0 : i32
    %c0_i32_0 = arith.constant 0 : i32
    %c0_i32_1 = arith.constant 0 : i32
    return %c0_i32, %c0_i32_0 : i32, i32
  }
  func.func @transform_4(%arg0: i32) -> (i32, i32, i32) {
    %c0_i32 = arith.constant 0 : i32
    %c0_i32_0 = arith.constant 0 : i32
    %c0_i32_1 = arith.constant 0 : i32
    %c0_i32_2 = arith.constant 0 : i32
    return %c0_i32, %c0_i32_0, %c0_i32_1 : i32, i32, i32
  }
  func.func @transform_5(%arg0: i32) -> (i32, i32) {
    %c0_i32 = arith.constant 0 : i32
    %c0_i32_0 = arith.constant 0 : i32
    %c0_i32_1 = arith.constant 0 : i32
    return %c0_i32, %c0_i32_0 : i32, i32
  }
  func.func @transform_6(%arg0: i32) -> (i32, i32) {
    %c0_i32 = arith.constant 0 : i32
    %c0_i32_0 = arith.constant 0 : i32
    %c0_i32_1 = arith.constant 0 : i32
    return %c0_i32, %c0_i32_0 : i32, i32
  }
  func.func @transform_7(%arg0: i32) -> (i32, i32, i32) {
    %c0_i32 = arith.constant 0 : i32
    %c0_i32_0 = arith.constant 0 : i32
    %c0_i32_1 = arith.constant 0 : i32
    %c0_i32_2 = arith.constant 0 : i32
    return %c0_i32, %c0_i32_0, %c0_i32_1 : i32, i32, i32
  }
  func.func @transform_8(%arg0: i32) -> (i32, i32) {
    %c0_i32 = arith.constant 0 : i32
    %c0_i32_0 = arith.constant 0 : i32
    %c0_i32_1 = arith.constant 0 : i32
    return %c0_i32, %c0_i32_0 : i32, i32
  }
  func.func @transform_9(%arg0: i32) -> (i32, i32) {
    %c0_i32 = arith.constant 0 : i32
    %c0_i32_0 = arith.constant 0 : i32
    %c0_i32_1 = arith.constant 0 : i32
    return %c0_i32, %c0_i32_0 : i32, i32
  }
  func.func @transform_10(%arg0: i32) -> (i32, i32) {
    %c0_i32 = arith.constant 0 : i32
    %c0_i32_0 = arith.constant 0 : i32
    %c0_i32_1 = arith.constant 0 : i32
    return %c0_i32, %c0_i32_0 : i32, i32
  }
  func.func @transform_11(%arg0: i32) -> (i32, i32) {
    %c0_i32 = arith.constant 0 : i32
    %c0_i32_0 = arith.constant 0 : i32
    %c0_i32_1 = arith.constant 0 : i32
    return %c0_i32, %c0_i32_0 : i32, i32
  }
  func.func @transform_12(%arg0: i32) -> (i32, i32) {
    %c0_i32 = arith.constant 0 : i32
    %c0_i32_0 = arith.constant 0 : i32
    %c0_i32_1 = arith.constant 0 : i32
    return %c0_i32, %c0_i32_0 : i32, i32
  }
  func.func @transform_13(%arg0: i32) -> (i32, i32) {
    %c0_i32 = arith.constant 0 : i32
    %c0_i32_0 = arith.constant 0 : i32
    %c0_i32_1 = arith.constant 0 : i32
    return %c0_i32, %c0_i32_0 : i32, i32
  }
}

</mosaic_0001>

<bundles_post_ra>
// kernel: spatial_decoder_pallas.2
= control target key start
LH: loop header
LB: loop body
LE: loop exit
PB: predicated region body
PF: predicated region fallthrough
CT: control target
= control target key end

     0   :  { %s7036_s29 = smov 18   ;;  %s7037_s15 = smov 17   ;;  %v7038_v18 = vmov 0   ;;  %vm9065_vm0 = vcmask 146432   ;;  %vm9062_vm1 = vcmask 138240   ;;  %vm211_vm2 = vcmask 261120   ;;  %s9050_s0 = inlined_call_operand.vmem [shape: bf16[32,1024], index: 0, kind: input, shape index: {}]   ;;  %s9051_s1 = inlined_call_operand.vmem [shape: bf16[9,32,32], index: 1, kind: input, shape index: {}]   ;;  %s9052_s2 = inlined_call_operand.vmem [shape: f32[32,1], index: 2, kind: input, shape index: {}]   ;;  %s9053_s3 = inlined_call_operand.vmem [shape: f32[32,1], index: 3, kind: input, shape index: {}]   ;;  %s9054_s10 = inlined_call_operand.vmem [shape: f32[1,768], index: 10, kind: input, shape index: {}]   ;;  %s9055_s4 = inlined_call_operand.vmem [shape: bf16[9,16,32], index: 4, kind: input, shape index: {}]   ;;  %s9056_s5 = inlined_call_operand.vmem [shape: f32[16,1], index: 5, kind: input, shape index: {}]   ;;  %s9057_s6 = inlined_call_operand.vmem [shape: f32[16,1], index: 6, kind: input, shape index: {}]   ;;  %s9058_s7 = inlined_call_operand.vmem [shape: bf16[9,16,16], index: 7, kind: input, shape index: {}]   ;;  %s9059_s8 = inlined_call_operand.vmem [shape: f32[16,1], index: 8, kind: input, shape index: {}]   ;;  %s9060_s9 = inlined_call_operand.vmem [shape: f32[16,1], index: 9, kind: input, shape index: {}]   ;;  %s9061_s11 = inlined_call_operand.vmem [shape: bf16[16,768], index: 11, kind: output, shape index: {}]  }
   0x1   :  { %v65_v0 = vld [vmem:[%s9050_s0] sm:$0xff]  ;;  %v66_v2 = vld [vmem:[%s9050_s0 + $0x8] sm:$0xff]  ;;  %v67_v14 = vld [vmem:[%s9050_s0 + $0x10] sm:$0xff]  ;;  %711 = vmatprep.mubr.bf16.mxu0 %v7038_v18  ;;  %250 = vmatprep.mubr.bf16.mxu1 %v7038_v18  ;;  %s7039_s14 = smov 1   ;;  %s7040_s16 = smov 19   ;;  %vm9063_vm3 = vcmask 7168  }
   0x2   :  { %v69_v1 = vld [vmem:[%s9050_s0 + $0x20] sm:$0xff]  ;;  %v70_v5 = vld [vmem:[%s9050_s0 + $0x28] sm:$0xff]  ;;  %v71_v15 = vld [vmem:[%s9050_s0 + $0x30] sm:$0xff]  ;;  %6969 = vset.pattern.permute.xlu1 %v7038_v18  ;;  %6968 = vset.pattern.permute.xlu0 %v7038_v18  ;;  %s7041_s30 = smov 127   ;;  %s7042_s24 = smov 111   ;;  %vm9064_vm4 = vcmask 154624  }
   0x3   :  { %v7114_v3 = vcombine.high %v65_v0, %v69_v1  ;;  %v7116_v4 = vcombine.low %v65_v0, %v69_v1  ;;  %v73_v6 = vld [vmem:[%s9050_s0 + $0x40] sm:$0xff]  ;;  %v7131_v8 = vcombine.low %v66_v2, %v70_v5  ;;  %v74_v10 = vld [vmem:[%s9050_s0 + $0x48] sm:$0xff]  ;;  %v68_v16 = vld [vmem:[%s9050_s0 + $0x18] sm:$0xf]  ;;  %v6268_v19 = vcombine.high %v67_v14, %v71_v15  ;;  %s7043_s12 = smov 110   ;;  %s7044_s20 = smov 109  }
   0x4   :  { %v77_v7 = vld [vmem:[%s9050_s0 + $0x60] sm:$0xff]  ;;  %v78_v11 = vld [vmem:[%s9050_s0 + $0x68] sm:$0xff]  ;;  %v72_v17 = vld [vmem:[%s9050_s0 + $0x38] sm:$0xf]  ;;  %v6267_v23 = vcombine.low %v67_v14, %v71_v15  ;;  %v7189_v24 = vcombine.high %v66_v2, %v70_v5  ;;  %vm1512_vm5 = vcmask 1039360   ;;  %vm1769_vm6 = vcmask 908288  }
   0x5   :  { %160 = vrot.lane.b32.xlu0 %v7114_v3, %s7036_s29  ;;  %158 = vrot.lane.b32.xlu1 %v7116_v4, %s7036_s29  ;;  %v7133_v9 = vcombine.high %v73_v6, %v77_v7  ;;  %v7145_v12 = vcombine.low %v74_v10, %v78_v11  ;;  %v7147_v13 = vcombine.low %v73_v6, %v77_v7  ;;  %v75_v21 = vld [vmem:[%s9050_s0 + $0x50] sm:$0xff]  ;;  %v76_v26 = vld [vmem:[%s9050_s0 + $0x58] sm:$0xf]  ;;  %vm2026_vm7 = vcmask 900096  }
   0x6   :  { %v6269_v20 = vcombine.low %v68_v16, %v72_v17  ;;  %v79_v22 = vld [vmem:[%s9050_s0 + $0x70] sm:$0xff]  ;;  %v80_v27 = vld [vmem:[%s9050_s0 + $0x78] sm:$0xf]  ;;  %v7204_v30 = vcombine.high %v74_v10, %v78_v11  ;;  %v1395_v31 = vld [vmem:[%s9050_s0 + $0x4] sm:$0xff]  ;;  %vm2283_vm8 = vcmask 891904  }
   0x7   :  { %v6275_v25 = vcombine.high %v75_v21, %v79_v22  ;;  %v6276_v28 = vcombine.low %v76_v26, %v80_v27  ;;  %v6274_v29 = vcombine.low %v75_v21, %v79_v22  ;;  %v1399_v32 = vld [vmem:[%s9050_s0 + $0x24] sm:$0xff]  ;;  %v7260_v33 = vld [vmem:[%s9050_s0 + $0xc] sm:$0xff]  ;;  %v1397_v45 = vld [vmem:[%s9050_s0 + $0x14] sm:$0xff] }
   0x8   :  { %v7265_v34 = vld [vmem:[%s9050_s0 + $0x2c] sm:$0xff]  ;;  %v7269_v35 = vcombine.high %v1395_v31, %v1399_v32  ;;  %v1403_v37 = vld [vmem:[%s9050_s0 + $0x44] sm:$0xff]  ;;  %v7285_v39 = vcombine.low %v1395_v31, %v1399_v32  ;;  %v1401_v46 = vld [vmem:[%s9050_s0 + $0x34] sm:$0xff] }
   0x9   :  { %162 = vrot.lane.b32.xlu0 %v7131_v8, %s7036_s29  ;;  %174 = vrot.lane.b32.xlu1 %v7133_v9, %s7036_s29  ;;  %v7273_v36 = vcombine.low %v7260_v33, %v7265_v34  ;;  %v1407_v38 = vld [vmem:[%s9050_s0 + $0x64] sm:$0xff]  ;;  %v7292_v41 = vld [vmem:[%s9050_s0 + $0x4c] sm:$0xff]  ;;  %v7329_v51 = vcombine.high %v1397_v45, %v1401_v46  ;;  %v7346_v59 = vcombine.low %v1397_v45, %v1401_v46 }
   0xa   :  { %v7287_v40 = vcombine.high %v1403_v37, %v1407_v38  ;;  %v7297_v42 = vld [vmem:[%s9050_s0 + $0x6c] sm:$0xff]  ;;  %v7307_v44 = vcombine.low %v1403_v37, %v1407_v38  ;;  %v1398_v49 = vld [vmem:[%s9050_s0 + $0x1c] sm:$0xf]  ;;  %v1405_v55 = vld [vmem:[%s9050_s0 + $0x54] sm:$0xff] }
   0xb   :  { %v7305_v43 = vcombine.low %v7292_v41, %v7297_v42  ;;  %v1402_v50 = vld [vmem:[%s9050_s0 + $0x3c] sm:$0xf]  ;;  %v1409_v56 = vld [vmem:[%s9050_s0 + $0x74] sm:$0xff]  ;;  %v7421_v17 = vld [vmem:[%s9051_s1 + $0x20] sm:$0xff]  }
   0xc   :  { %v7331_v52 = vcombine.low %v1398_v49, %v1402_v50  ;;  %v7350_v60 = vcombine.high %v1405_v55, %v1409_v56  ;;  %v1406_v61 = vld [vmem:[%s9050_s0 + $0x5c] sm:$0xf]  ;;  %v7374_v5 = vld [vmem:[%s9051_s1 + $0x10] sm:$0xff]  }
   0xd   :  { %176 = vrot.lane.b32.xlu0 %v7145_v12, %s7036_s29  ;;  %172 = vrot.lane.b32.xlu1 %v7147_v13, %s7036_s29  ;;  %v1410_v62 = vld [vmem:[%s9050_s0 + $0x7c] sm:$0xf] }
   0xe   :  { %v7403_v14 = vld [vmem:[%s9051_s1 + $0x18] sm:$0xff]  }
  0x11   :  { %622 = vrot.lane.b32.xlu0 %v7114_v3, %s7037_s15  ;;  %624 = vrot.lane.b32.xlu1 %v7131_v8, %s7037_s15 }
  0x15   :  { %620 = vrot.lane.b32.xlu0 %v7116_v4, %s7037_s15  ;;  %636 = vrot.lane.b32.xlu1 %v7133_v9, %s7037_s15 }
  0x19   :  { %638 = vrot.lane.b32.xlu0 %v7145_v12, %s7037_s15  ;;  %634 = vrot.lane.b32.xlu1 %v7147_v13, %s7037_s15 }
  0x1d   :  { %630 = vrot.lane.b32.xlu0 %v6268_v19, %s7037_s15  ;;  %632 = vrot.lane.b32.xlu1 %v6269_v20, %s7037_s15 }
  0x21   :  { %628 = vrot.lane.b32.xlu0 %v6267_v23, %s7037_s15  ;;  %164 = vrot.lane.b32.xlu1 %v7189_v24, %s7036_s29 }
  0x25   :  { %166 = vrot.lane.b32.xlu0 %v6267_v23, %s7036_s29  ;;  %644 = vrot.lane.b32.xlu1 %v6275_v25, %s7037_s15 }
  0x29   :  { %646 = vrot.lane.b32.xlu0 %v6276_v28, %s7037_s15  ;;  %642 = vrot.lane.b32.xlu1 %v6274_v29, %s7037_s15 }
  0x2d   :  { %178 = vrot.lane.b32.xlu0 %v7204_v30, %s7036_s29  ;;  %180 = vrot.lane.b32.xlu1 %v6274_v29, %s7036_s29 }
  0x31   :  { %879 = vrot.lane.b32.xlu0 %v7114_v3, %s7039_s14  ;;  %881 = vrot.lane.b32.xlu1 %v7131_v8, %s7039_s14 }
  0x35   :  { %877 = vrot.lane.b32.xlu0 %v7116_v4, %s7039_s14  ;;  %168 = vrot.lane.b32.xlu1 %v6268_v19, %s7036_s29 }
  0x39   :  { %170 = vrot.lane.b32.xlu0 %v6269_v20, %s7036_s29  ;;  %893 = vrot.lane.b32.xlu1 %v7133_v9, %s7039_s14 }
  0x3d   :  { %895 = vrot.lane.b32.xlu0 %v7145_v12, %s7039_s14  ;;  %891 = vrot.lane.b32.xlu1 %v7147_v13, %s7039_s14 }
  0x41   :  { %182 = vrot.lane.b32.xlu0 %v6275_v25, %s7036_s29  ;;  %184 = vrot.lane.b32.xlu1 %v6276_v28, %s7036_s29 }
  0x45   :  { %887 = vrot.lane.b32.xlu0 %v6268_v19, %s7039_s14  ;;  %889 = vrot.lane.b32.xlu1 %v6269_v20, %s7039_s14 }
  0x49   :  { %885 = vrot.lane.b32.xlu0 %v6267_v23, %s7039_s14  ;;  %389 = vrot.lane.b32.xlu1 %v7114_v3, %s7040_s16  ;;  %v7365_v3 = vcombine.low %v1406_v61, %v1410_v62 }
  0x4d   :  { %391 = vrot.lane.b32.xlu0 %v7131_v8, %s7040_s16  ;;  %387 = vrot.lane.b32.xlu1 %v7116_v4, %s7040_s16  ;;  %v7369_v4 = vcombine.low %v1405_v55, %v1409_v56 }
  0x51   :  { %901 = vrot.lane.b32.xlu0 %v6275_v25, %s7039_s14  ;;  %903 = vrot.lane.b32.xlu1 %v6276_v28, %s7039_s14 }
  0x55   :  { %899 = vrot.lane.b32.xlu0 %v6274_v29, %s7039_s14  ;;  %403 = vrot.lane.b32.xlu1 %v7133_v9, %s7040_s16 }
  0x59   :  { %405 = vrot.lane.b32.xlu0 %v7145_v12, %s7040_s16  ;;  %401 = vrot.lane.b32.xlu1 %v7147_v13, %s7040_s16 }
  0x5d   :  { %393 = vrot.lane.b32.xlu0 %v7189_v24, %s7040_s16  ;;  %395 = vrot.lane.b32.xlu1 %v6267_v23, %s7040_s16 }
  0x61   :  { %407 = vrot.lane.b32.xlu0 %v7204_v30, %s7040_s16  ;;  %409 = vrot.lane.b32.xlu1 %v6274_v29, %s7040_s16 }
  0x65   :  { %397 = vrot.lane.b32.xlu0 %v6268_v19, %s7040_s16  ;;  %399 = vrot.lane.b32.xlu1 %v6269_v20, %s7040_s16 }
  0x69   :  { %411 = vrot.lane.b32.xlu0 %v6275_v25, %s7040_s16  ;;  %413 = vrot.lane.b32.xlu1 %v6276_v28, %s7040_s16 }
  0x6d   :  { %1486 = vrot.lane.b32.xlu0 %v7269_v35, %s7041_s30  ;;  %1488 = vrot.lane.b32.xlu1 %v7273_v36, %s7041_s30 }
  0x71   :  { %1484 = vrot.lane.b32.xlu0 %v7285_v39, %s7041_s30  ;;  %1500 = vrot.lane.b32.xlu1 %v7287_v40, %s7041_s30 }
  0x75   :  { %1502 = vrot.lane.b32.xlu0 %v7305_v43, %s7041_s30  ;;  %1498 = vrot.lane.b32.xlu1 %v7307_v44, %s7041_s30 }
  0x77   :  { %v161_v47 = vpop.permute.xlu0 %160  ;;  %v159_v48 = vpop.permute.xlu1 %158 }
  0x78   :  { %v187_v58 = vsel %vm9065_vm0, %v159_v48, %v161_v47  ;;  %v7471_v48 = vcombine.high %v7292_v41, %v7297_v42  ;;  %v7489_v41 = vld [vmem:[%s9051_s1 + $0x28] sm:$0xff]  }
  0x79   :  { %626 = vrot.lane.b32.xlu0 %v7189_v24, %s7037_s15  ;;  %640 = vrot.lane.b32.xlu1 %v7204_v30, %s7037_s15 }
  0x7b   :  { %v7333_v53 = vpop.permute.xlu0 %162  ;;  %v175_v54 = vpop.permute.xlu1 %174 }
  0x7c   :  { %v188_v57 = vsel %vm9065_vm0, %v161_v47, %v7333_v53  ;;  %v7465_v47 = vcombine.high %v7260_v33, %v7265_v34 }
  0x7d   :  { %218 = vmatprep.subr.bf16.mxu1 %v188_v57  ;;  %1494 = vrot.lane.b32.xlu0 %v7329_v51, %s7041_s30 }
  0x7e   :  { %1496 = vrot.lane.b32.xlu1 %v7331_v52, %s7041_s30  ;;  %219 = vmatpush1.bf16.msra.mxu1 %v187_v58 }
  0x7f   :  { %v7358_v63 = vpop.permute.xlu0 %176  ;;  %v173_v0 = vpop.permute.xlu1 %172 }
  0x80   :  { %v194_v1 = vsel %vm9065_vm0, %v175_v54, %v7358_v63  ;;  %v193_v2 = vsel %vm9065_vm0, %v173_v0, %v175_v54 }
  0x81   :  { %1492 = vrot.lane.b32.xlu0 %v7346_v59, %s7041_s30  ;;  %220 = vmatprep.subr.bf16.mxu1 %v194_v1 }
  0x82   :  { %1508 = vrot.lane.b32.xlu1 %v7350_v60, %s7041_s30  ;;  %221 = vmatpush1.bf16.msra.mxu1 %v193_v2  ;;  %v7521_v2 = vld [vmem:[%s9051_s1 + $0x30] sm:$0xff]  }
  0x83   :  { %v623_v6 = vpop.permute.xlu0 %622  ;;  %v7376_v7 = vpop.permute.xlu1 %624 }
  0x84   :  { %v7380_v8 = vsel %vm9062_vm1, %v623_v6, %v7376_v7 }
  0x85   :  { %1510 = vrot.lane.b32.xlu0 %v7365_v3, %s7041_s30  ;;  %679 = vmatprep.subr.bf16.mxu0 %v7380_v8 }
  0x86   :  { %1506 = vrot.lane.b32.xlu1 %v7369_v4, %s7041_s30  ;;  %6277 = vmatmul.mubr.msk.bf16.vlgmr.msra.gmra.mrb[0].mxu1 %vm211_vm2, %v7374_v5 }
  0x87   :  { %v621_v9 = vpop.permute.xlu0 %620  ;;  %v637_v10 = vpop.permute.xlu1 %636  ;;  %260 = vmatprep.mubr.bf16.mxu1 %v7038_v18 }
  0x88   :  { %v7391_v11 = vsel %vm9062_vm1, %v621_v9, %v623_v6 }
  0x89   :  { %883 = vrot.lane.b32.xlu0 %v7189_v24, %s7039_s14  ;;  %680 = vmatpush1.bf16.msra.mxu0 %v7391_v11 }
  0x8a   :  { %897 = vrot.lane.b32.xlu1 %v7204_v30, %s7039_s14 }
  0x8b   :  { %v7398_v12 = vpop.permute.xlu0 %638  ;;  %v635_v13 = vpop.permute.xlu1 %634 }
  0x8c   :  { %v7407_v15 = vsel %vm9062_vm1, %v637_v10, %v7398_v12  ;;  %v7410_v16 = vsel %vm9062_vm1, %v635_v13, %v637_v10 }
  0x8d   :  { %1743 = vrot.lane.b32.xlu0 %v7269_v35, %s7042_s24  ;;  %681 = vmatprep.subr.bf16.mxu0 %v7407_v15 }
  0x8e   :  { %1745 = vrot.lane.b32.xlu1 %v7273_v36, %s7042_s24  ;;  %682 = vmatpush1.bf16.msra.mxu0 %v7410_v16 }
  0x8f   :  { %v631_v19 = vpop.permute.xlu0 %630  ;;  %v633_v20 = vpop.permute.xlu1 %632  ;;  %6278 = vmatmul.mubr.msk.bf16.gmra.mrb[4].mxu1 %vm211_vm2, %v7403_v14 }
  0x90   :  { %v654_v21 = vsel %vm9062_vm1, %v631_v19, %v633_v20  ;;  %303 = vmatprep.mubr.bf16.mxu1 %v7038_v18 }
  0x91   :  { %1741 = vrot.lane.b32.xlu0 %v7285_v39, %s7042_s24  ;;  %785 = vmatprep.subr.bf16.mxu0 %v654_v21 }
  0x92   :  { %1757 = vrot.lane.b32.xlu1 %v7287_v40, %s7042_s24  ;;  %6297 = vmatmul.mubr.msk.bf16.vlgmr.msra.gmra.mrb[0].mxu0 %vm211_vm2, %v7421_v17 }
  0x93   :  { %v7433_v22 = vpop.permute.xlu0 %628  ;;  %v165_v23 = vpop.permute.xlu1 %164  ;;  %817 = vmatprep.mubr.bf16.mxu0 %v7038_v18 }
  0x94   :  { %v653_v24 = vsel %vm9062_vm1, %v7433_v22, %v631_v19  ;;  %v189_v28 = vsel %vm9065_vm0, %v7333_v53, %v165_v23 }
  0x95   :  { %1759 = vrot.lane.b32.xlu0 %v7305_v43, %s7042_s24  ;;  %786 = vmatpush1.bf16.msra.mxu0 %v653_v24 }
  0x96   :  { %1755 = vrot.lane.b32.xlu1 %v7307_v44, %s7042_s24 }
  0x97   :  { %v167_v25 = vpop.permute.xlu0 %166  ;;  %v645_v26 = vpop.permute.xlu1 %644 }
  0x98   :  { %v190_v27 = vsel %vm9065_vm0, %v165_v23, %v167_v25  ;;  %v7544_v23 = vld [vmem:[%s9051_s1 + $0x38] sm:$0xff]  }
  0x99   :  { %1751 = vrot.lane.b32.xlu0 %v7329_v51, %s7042_s24  ;;  %271 = vmatprep.subr.bf16.mxu1 %v190_v27 }
  0x9a   :  { %1753 = vrot.lane.b32.xlu1 %v7331_v52, %s7042_s24  ;;  %272 = vmatpush1.bf16.msra.mxu1 %v189_v28 }
  0x9b   :  { %v647_v29 = vpop.permute.xlu0 %646  ;;  %v7449_v30 = vpop.permute.xlu1 %642 }
  0x9c   :  { %v660_v31 = vsel %vm9062_vm1, %v645_v26, %v647_v29  ;;  %v659_v32 = vsel %vm9062_vm1, %v7449_v30, %v645_v26 }
  0x9d   :  { %1749 = vrot.lane.b32.xlu0 %v7346_v59, %s7042_s24  ;;  %787 = vmatprep.subr.bf16.mxu0 %v660_v31 }
  0x9e   :  { %1765 = vrot.lane.b32.xlu1 %v7350_v60, %s7042_s24  ;;  %788 = vmatpush1.bf16.msra.mxu0 %v659_v32 }
  0x9f   :  { %v179_v37 = vpop.permute.xlu0 %178  ;;  %v181_v38 = vpop.permute.xlu1 %180 }
  0xa0   :  { %v196_v45 = vsel %vm9065_vm0, %v179_v37, %v181_v38  ;;  %v195_v46 = vsel %vm9065_vm0, %v7358_v63, %v179_v37 }
  0xa1   :  { %1767 = vrot.lane.b32.xlu0 %v7365_v3, %s7042_s24  ;;  %273 = vmatprep.subr.bf16.mxu1 %v196_v45 }
  0xa2   :  { %1763 = vrot.lane.b32.xlu1 %v7369_v4, %s7042_s24  ;;  %274 = vmatpush1.bf16.msra.mxu1 %v195_v46 }
  0xa3   :  { %v880_v49 = vpop.permute.xlu0 %879  ;;  %v7473_v50 = vpop.permute.xlu1 %881  ;;  %6301 = vmatmul.mubr.msk.bf16.vlgmr.msra.gmra.mrb[4].mxu0 %vm211_vm2, %v7421_v17 }
  0xa4   :  { %v907_v53 = vsel %vm9063_vm3, %v880_v49, %v7473_v50  ;;  %827 = vmatprep.mubr.bf16.mxu0 %v7038_v18 }
  0xa5   :  { %1490 = vrot.lane.b32.xlu0 %v7465_v47, %s7041_s30  ;;  %936 = vmatprep.subr.bf16.mxu0 %v907_v53  ;;  %v7586_v53 = vld [vmem:[%s9051_s1] sm:$0xff]  }
  0xa6   :  { %1504 = vrot.lane.b32.xlu1 %v7471_v48, %s7041_s30  ;;  %6279 = vmatmul.mubr.msk.bf16.vlgmr.msra.gmra.mrb[8].mxu1 %vm211_vm2, %v7374_v5 }
  0xa7   :  { %v878_v33 = vpop.permute.xlu0 %877  ;;  %v169_v34 = vpop.permute.xlu1 %168  ;;  %313 = vmatprep.mubr.bf16.mxu1 %v7038_v18 }
  0xa8   :  { %v906_v42 = vsel %vm9063_vm3, %v878_v33, %v880_v49  ;;  %v191_v57 = vsel %vm9065_vm0, %v167_v25, %v169_v34 }
  0xa9   :  { %2000 = vrot.lane.b32.xlu0 %v7269_v35, %s7043_s12  ;;  %937 = vmatpush1.bf16.msra.mxu0 %v906_v42 }
  0xaa   :  { %2002 = vrot.lane.b32.xlu1 %v7273_v36, %s7043_s12 }
  0xab   :  { %v171_v54 = vpop.permute.xlu0 %170  ;;  %v894_v55 = vpop.permute.xlu1 %893  ;;  %6302 = vmatmul.mubr.msk.bf16.gmra.mrb[8].mxu0 %vm211_vm2, %v7489_v41 }
  0xac   :  { %v192_v56 = vsel %vm9065_vm0, %v169_v34, %v171_v54  ;;  %968 = vmatprep.mubr.bf16.mxu0 %v7038_v18 }
  0xad   :  { %1998 = vrot.lane.b32.xlu0 %v7285_v39, %s7043_s12  ;;  %324 = vmatprep.subr.bf16.mxu1 %v192_v56  ;;  %v7612_v56 = vld [vmem:[%s9051_s1 + $0x8] sm:$0xff]  }
  0xae   :  { %2014 = vrot.lane.b32.xlu1 %v7287_v40, %s7043_s12  ;;  %325 = vmatpush1.bf16.msra.mxu1 %v191_v57 }
  0xaf   :  { %v7506_v58 = vpop.permute.xlu0 %895  ;;  %v892_v61 = vpop.permute.xlu1 %891  ;;  %6280 = vmatmul.mubr.msk.bf16.gmra.mrb[12].mxu1 %vm211_vm2, %v7403_v14 }
  0xb0   :  { %v912_v62 = vsel %vm9063_vm3, %v892_v61, %v894_v55  ;;  %v913_v63 = vsel %vm9063_vm3, %v894_v55, %v7506_v58  ;;  %356 = vmatprep.mubr.bf16.mxu1 %v7038_v18 }
  0xb1   :  { %2016 = vrot.lane.b32.xlu0 %v7305_v43, %s7043_s12  ;;  %938 = vmatprep.subr.bf16.mxu0 %v913_v63 }
  0xb2   :  { %2012 = vrot.lane.b32.xlu1 %v7307_v44, %s7043_s12  ;;  %939 = vmatpush1.bf16.msra.mxu0 %v912_v62 }
  0xb3   :  { %v183_v0 = vpop.permute.xlu0 %182  ;;  %v185_v1 = vpop.permute.xlu1 %184 }
  0xb4   :  { %v198_v6 = vsel %vm9065_vm0, %v183_v0, %v185_v1  ;;  %v197_v9 = vsel %vm9065_vm0, %v181_v38, %v183_v0 }
  0xb5   :  { %1747 = vrot.lane.b32.xlu0 %v7465_v47, %s7042_s24  ;;  %326 = vmatprep.subr.bf16.mxu1 %v198_v6 }
  0xb6   :  { %1761 = vrot.lane.b32.xlu1 %v7471_v48, %s7042_s24  ;;  %327 = vmatpush1.bf16.msra.mxu1 %v197_v9 }
  0xb7   :  { %v888_v10 = vpop.permute.xlu0 %887  ;;  %v890_v13 = vpop.permute.xlu1 %889  ;;  %6309 = vmatmul.mubr.msk.bf16.vlgmr.msra.gmra.mrb[0].mxu0 %vm211_vm2, %v7521_v2 }
  0xb8   :  { %v911_v19 = vsel %vm9063_vm3, %v888_v10, %v890_v13  ;;  %978 = vmatprep.mubr.bf16.mxu0 %v7038_v18 }
  0xb9   :  { %2008 = vrot.lane.b32.xlu0 %v7329_v51, %s7043_s12  ;;  %1042 = vmatprep.subr.bf16.mxu0 %v911_v19 }
  0xba   :  { %2010 = vrot.lane.b32.xlu1 %v7331_v52, %s7043_s12  ;;  %6281 = vmatmul.mubr.msk.bf16.vlgmr.msra.gmra.mrb[16].mxu1 %vm211_vm2, %v7374_v5 }
  0xbb   :  { %v7539_v20 = vpop.permute.xlu0 %885  ;;  %v390_v21 = vpop.permute.xlu1 %389  ;;  %366 = vmatprep.mubr.bf16.mxu1 %v7038_v18 }
  0xbc   :  { %v910_v24 = vsel %vm9063_vm3, %v7539_v20, %v888_v10  ;;  %v7646_v10 = vld [vmem:[%s9051_s1 + $0x48] sm:$0xff]  }
  0xbd   :  { %2006 = vrot.lane.b32.xlu0 %v7346_v59, %s7043_s12  ;;  %1043 = vmatpush1.bf16.msra.mxu0 %v910_v24 }
  0xbe   :  { %2022 = vrot.lane.b32.xlu1 %v7350_v60, %s7043_s12 }
  0xbf   :  { %v392_v5 = vpop.permute.xlu0 %391  ;;  %v388_v25 = vpop.permute.xlu1 %387  ;;  %6310 = vmatmul.mubr.msk.bf16.gmra.mrb[12].mxu0 %vm211_vm2, %v7544_v23 }
  0xc0   :  { %v416_v26 = vsel %vm9064_vm4, %v388_v25, %v390_v21  ;;  %v417_v27 = vsel %vm9064_vm4, %v390_v21, %v392_v5  ;;  %1074 = vmatprep.mubr.bf16.mxu0 %v7038_v18 }
  0xc1   :  { %2024 = vrot.lane.b32.xlu0 %v7365_v3, %s7043_s12  ;;  %446 = vmatprep.subr.bf16.mxu1 %v417_v27 }
  0xc2   :  { %2020 = vrot.lane.b32.xlu1 %v7369_v4, %s7043_s12  ;;  %447 = vmatpush1.bf16.msra.mxu1 %v416_v26 }
  0xc3   :  { %v902_v28 = vpop.permute.xlu0 %901  ;;  %v904_v29 = vpop.permute.xlu1 %903  ;;  %6282 = vmatmul.mubr.msk.bf16.gmra.mrb[20].mxu1 %vm211_vm2, %v7403_v14 }
  0xc4   :  { %v917_v31 = vsel %vm9063_vm3, %v902_v28, %v904_v29  ;;  %478 = vmatprep.mubr.bf16.mxu1 %v7038_v18 }
  0xc5   :  { %2004 = vrot.lane.b32.xlu0 %v7465_v47, %s7043_s12  ;;  %1044 = vmatprep.subr.bf16.mxu0 %v917_v31 }
  0xc6   :  { %2018 = vrot.lane.b32.xlu1 %v7471_v48, %s7043_s12 }
  0xc7   :  { %v7570_v32 = vpop.permute.xlu0 %899  ;;  %v404_v37 = vpop.permute.xlu1 %403 }
  0xc8   :  { %v916_v38 = vsel %vm9063_vm3, %v7570_v32, %v902_v28 }
  0xc9   :  { %1045 = vmatpush1.bf16.msra.mxu0 %v916_v38  ;;  %2257 = vrot.lane.b32.xlu0 %v7269_v35, %s7044_s20 }
  0xca   :  { %2259 = vrot.lane.b32.xlu1 %v7273_v36, %s7044_s20  ;;  %1212 = vmatprep.subr.bf16.mxu0 %v7269_v35 }
  0xcb   :  { %v406_v14 = vpop.permute.xlu0 %405  ;;  %v402_v45 = vpop.permute.xlu1 %401 }
  0xcc   :  { %v422_v46 = vsel %vm9064_vm4, %v402_v45, %v404_v37  ;;  %6313 = vmatmul.mubr.msk.bf16.vlgmr.msra.gmra.mrb[4].mxu0 %vm211_vm2, %v7521_v2  ;;  %v423_v49 = vsel %vm9064_vm4, %v404_v37, %v406_v14 }
  0xcd   :  { %448 = vmatprep.subr.bf16.mxu1 %v423_v49  ;;  %1084 = vmatprep.mubr.bf16.mxu0 %v7038_v18 }
  0xce   :  { %449 = vmatpush1.bf16.msra.mxu1 %v422_v46  ;;  %2255 = vrot.lane.b32.xlu0 %v7285_v39, %s7044_s20 }
  0xcf   :  { %v394_v35 = vpop.permute.xlu0 %393  ;;  %v396_v33 = vpop.permute.xlu1 %395  ;;  %1213 = vmatpush1.bf16.msra.mxu0 %v7285_v39  ;;  %2271 = vrot.lane.b32.xlu1 %v7287_v40, %s7044_s20 }
  0xd0   :  { %v419_v34 = vsel %vm9064_vm4, %v394_v35, %v396_v33  ;;  %v418_v42 = vsel %vm9064_vm4, %v392_v5, %v394_v35  ;;  %1214 = vmatprep.subr.bf16.mxu0 %v7287_v40 }
  0xd1   :  { %6285 = vmatmul.mubr.msk.bf16.vlgmr.msra.gmra.mrb[0].mxu1 %vm211_vm2, %v7586_v53  ;;  %499 = vmatprep.subr.bf16.mxu1 %v419_v34 }
  0xd2   :  { %500 = vmatpush1.bf16.msra.mxu1 %v418_v42  ;;  %2273 = vrot.lane.b32.xlu0 %v7305_v43, %s7044_s20 }
  0xd3   :  { %v408_v54 = vpop.permute.xlu0 %407  ;;  %v410_v55 = vpop.permute.xlu1 %409  ;;  %488 = vmatprep.mubr.bf16.mxu1 %v7038_v18  ;;  %1215 = vmatpush1.bf16.msra.mxu0 %v7307_v44 }
  0xd4   :  { %6314 = vmatmul.mubr.msk.bf16.gmra.mrb[8].mxu0 %vm211_vm2, %v7544_v23  ;;  %v425_v39 = vsel %vm9064_vm4, %v408_v54, %v410_v55  ;;  %v424_v40 = vsel %vm9064_vm4, %v406_v14, %v408_v54  ;;  %2269 = vrot.lane.b32.xlu1 %v7307_v44, %s7044_s20  ;;  %v7621_v44 = vld [vmem:[%s9051_s1 + $0x40] sm:$0xff]  }
  0xd5   :  { %501 = vmatprep.subr.bf16.mxu1 %v425_v39  ;;  %1244 = vmatprep.mubr.bf16.mxu0 %v7038_v18 }
  0xd6   :  { %502 = vmatpush1.bf16.msra.mxu1 %v424_v40  ;;  %2261 = vrot.lane.b32.xlu0 %v7465_v47, %s7044_s20 }
  0xd7   :  { %v398_v57 = vpop.permute.xlu0 %397  ;;  %v400_v61 = vpop.permute.xlu1 %399  ;;  %1318 = vmatprep.subr.bf16.mxu0 %v7329_v51 }
  0xd8   :  { %2263 = vrot.lane.b32.xlu1 %v7346_v59, %s7044_s20  ;;  %v421_v62 = vsel %vm9064_vm4, %v398_v57, %v400_v61 }
  0xd9   :  { %6286 = vmatmul.mubr.msk.bf16.gmra.mrb[4].mxu1 %vm211_vm2, %v7612_v56  ;;  %552 = vmatprep.subr.bf16.mxu1 %v421_v62 }
  0xda   :  { %531 = vmatprep.mubr.bf16.mxu1 %v7038_v18  ;;  %2275 = vrot.lane.b32.xlu0 %v7471_v48, %s7044_s20 }
  0xdb   :  { %v412_v63 = vpop.permute.xlu0 %411  ;;  %v414_v0 = vpop.permute.xlu1 %413 }
  0xdc   :  { %6333 = vmatmul.mubr.msk.bf16.vlgmr.msra.gmra.mrb[0].mxu0 %vm211_vm2, %v7621_v44  ;;  %2277 = vrot.lane.b32.xlu1 %v7369_v4, %s7044_s20  ;;  %v427_v9 = vsel %vm9064_vm4, %v412_v63, %v414_v0 }
  0xdd   :  { %1254 = vmatprep.mubr.bf16.mxu0 %v7038_v18  ;;  %1319 = vmatpush1.bf16.msra.mxu0 %v7346_v59 }
  0xde   :  { %2265 = vrot.lane.b32.xlu0 %v7329_v51, %s7044_s20  ;;  %1320 = vmatprep.subr.bf16.mxu0 %v7350_v60  ;;  %v420_v51 = vsel %vm9064_vm4, %v396_v33, %v398_v57 }
  0xdf   :  { %v1487_v1 = vpop.permute.xlu0 %1486  ;;  %v7640_v6 = vpop.permute.xlu1 %1488 }
  0xe0   :  { %2267 = vrot.lane.b32.xlu1 %v7331_v52, %s7044_s20  ;;  %v1514_v59 = vsel %vm1512_vm5, %v1487_v1, %v7640_v6  ;;  %v426_v52 = vsel %vm9064_vm4, %v410_v55, %v412_v63 }
  0xe1   :  { %6287 = vmatmul.mubr.msk.bf16.vlgmr.msra.gmra.mrb[8].mxu1 %vm211_vm2, %v7586_v53  ;;  %1321 = vmatpush1.bf16.msra.mxu0 %v7369_v4 }
  0xe2   :  { %553 = vmatpush1.bf16.msra.mxu1 %v420_v51  ;;  %541 = vmatprep.mubr.bf16.mxu1 %v7038_v18 }
  0xe3   :  { %v1485_v13 = vpop.permute.xlu0 %1484  ;;  %v1501_v19 = vpop.permute.xlu1 %1500  ;;  %554 = vmatprep.subr.bf16.mxu1 %v427_v9  ;;  %2279 = vrot.lane.b32.xlu0 %v7350_v60, %s7044_s20  ;;  %v7766_v9 = vld [vmem:[%s9051_s1 + $0x60] sm:$0xff]  }
  0xe4   :  { %6334 = vmatmul.mubr.msk.bf16.gmra.mrb[12].mxu0 %vm211_vm2, %v7646_v10  ;;  %2281 = vrot.lane.b32.xlu1 %v7365_v3, %s7044_s20  ;;  %v1513_v60 = vsel %vm1512_vm5, %v1485_v13, %v1487_v1 }
  0xe5   :  { %1350 = vmatprep.mubr.bf16.mxu0 %v7038_v18  ;;  %1543 = vmatprep.subr.bf16.mxu0 %v1514_v59 }
  0xe6   :  { %555 = vmatpush1.bf16.msra.mxu1 %v426_v52 }
  0xe7   :  { %6571 = vmatprep.subr.bf16.mxu1 %v7380_v8  ;;  %v7666_v4 = vpop.permute.xlu0 %1502  ;;  %v1499_v21 = vpop.permute.xlu1 %1498 }
  0xe8   :  { %v1520_v5 = vsel %vm1512_vm5, %v1501_v19, %v7666_v4  ;;  %v1519_v8 = vsel %vm1512_vm5, %v1499_v21, %v1501_v19  ;;  %v7791_v21 = vld [vmem:[%s9051_s1 + $0x68] sm:$0xff]  }
  0xe9   :  { %6288 = vmatmul.mubr.msk.bf16.gmra.mrb[12].mxu1 %vm211_vm2, %v7612_v56 }
  0xea   :  { %584 = vmatprep.mubr.bf16.mxu1 %v7038_v18 }
  0xeb   :  { %v627_v24 = vpop.permute.xlu0 %626  ;;  %v641_v3 = vpop.permute.xlu1 %640 }
  0xec   :  { %6337 = vmatmul.mubr.msk.bf16.vlgmr.msra.gmra.mrb[4].mxu0 %vm211_vm2, %v7621_v44  ;;  %v652_v31 = vsel %vm9062_vm1, %v627_v24, %v7433_v22  ;;  %v651_v35 = vsel %vm9062_vm1, %v7376_v7, %v627_v24  ;;  %v658_v34 = vsel %vm9062_vm1, %v641_v3, %v7449_v30  ;;  %v657_v7 = vsel %vm9062_vm1, %v7398_v12, %v641_v3  ;;  %v2497_v3 = vld [vmem:[%s9052_s2] sm:$0xff] }
  0xed   :  { %1544 = vmatpush1.bf16.msra.mxu0 %v1513_v60  ;;  %1360 = vmatprep.mubr.bf16.mxu0 %v7038_v18 }
  0xee   :  { %1545 = vmatprep.subr.bf16.mxu0 %v1520_v5  ;;  %2503 = vperm.xlu0 %6968, %v2497_v3  }
  0xef   :  { %v1495_v25 = vpop.permute.xlu0 %1494 }
  0xf0   :  { %v1497_v26 = vpop.permute.xlu1 %1496 }
  0xf1   :  { %6289 = vmatmul.mubr.msk.bf16.vlgmr.msra.gmra.mrb[16].mxu1 %vm211_vm2, %v7586_v53  ;;  %1546 = vmatpush1.bf16.msra.mxu0 %v1519_v8  ;;  %v1518_v27 = vsel %vm1512_vm5, %v1495_v25, %v1497_v26  ;;  %v7715_v53 = vld [vmem:[%s9051_s1 + $0x58] sm:$0xff]  }
  0xf2   :  { %6573 = vmatpush1.bf16.msra.mxu1 %v7391_v11  ;;  %594 = vmatprep.mubr.bf16.mxu1 %v7038_v18 }
  0xf3   :  { %6572 = vmatprep.subr.bf16.mxu1 %v7407_v15  ;;  %v7684_v28 = vpop.permute.xlu0 %1492  ;;  %1649 = vmatprep.subr.bf16.mxu0 %v1518_v27  ;;  %v7697_v15 = vld [vmem:[%s9051_s1 + $0x50] sm:$0xff]  }
  0xf4   :  { %v1509_v29 = vpop.permute.xlu1 %1508  ;;  %6338 = vmatmul.mubr.msk.bf16.gmra.mrb[8].mxu0 %vm211_vm2, %v7646_v10 }
  0xf5   :  { %1575 = vmatprep.mubr.bf16.mxu0 %v7038_v18 }
  0xf6   :  { %6574 = vmatpush1.bf16.msra.mxu1 %v7410_v16  ;;  %v1517_v16 = vsel %vm1512_vm5, %v7684_v28, %v1495_v25  ;;  %v2546_v25 = vld [vmem:[%s9053_s3 + $0x8] sm:$0xff] }
  0xf7   :  { %732 = vmatprep.subr.bf16.mxu1 %v652_v31  ;;  %v1511_v11 = vpop.permute.xlu0 %1510  ;;  %2556 = vperm.xlu0 %6968, %v2546_v25  }
  0xf8   :  { %v7692_v37 = vpop.permute.xlu1 %1506  ;;  %v1524_v22 = vsel %vm1512_vm5, %v1509_v29, %v1511_v11  ;;  %v2500_v11 = vld [vmem:[%s9052_s2 + $0x18] sm:$0xff] }
  0xf9   :  { %6290 = vmatmul.mubr.msk.bf16.gmra.mrb[20].mxu1 %vm211_vm2, %v7612_v56  ;;  %v1523_v45 = vsel %vm1512_vm5, %v7692_v37, %v1509_v29 }
  0xfa   :  { %721 = vmatprep.mubr.bf16.mxu1 %v7038_v18 }
  0xfb   :  { %v884_v38 = vpop.permute.xlu0 %883  ;;  %2518 = vperm.xlu0 %6968, %v2500_v11  }
  0xfc   :  { %v898_v14 = vpop.permute.xlu1 %897  ;;  %6359 = vmatmul.mubr.msk.bf16.vlgmr.msra.gmra.mrb[0].mxu0 %vm211_vm2, %v7697_v15  ;;  %v909_v55 = vsel %vm9063_vm3, %v884_v38, %v7539_v20  ;;  %v908_v40 = vsel %vm9063_vm3, %v7473_v50, %v884_v38 }
  0xfd   :  { %1650 = vmatpush1.bf16.msra.mxu0 %v1517_v16  ;;  %1585 = vmatprep.mubr.bf16.mxu0 %v7038_v18  ;;  %v915_v12 = vsel %vm9063_vm3, %v898_v14, %v7570_v32 }
  0xfe   :  { %1651 = vmatprep.subr.bf16.mxu0 %v1524_v22 }
  0xff   :  { %v1744_v46 = vpop.permute.xlu0 %1743 }
 0x100   :  { %v7710_v49 = vpop.permute.xlu1 %1745 }
 0x101   :  { %6298 = vmatmul.mubr.msk.bf16.vlgmr.msra.gmra.mrb[4].mxu1 %vm211_vm2, %v7489_v41  ;;  %1652 = vmatpush1.bf16.msra.mxu0 %v1523_v45  ;;  %v1771_v33 = vsel %vm1769_vm6, %v1744_v46, %v7710_v49  ;;  %v2548_v45 = vld [vmem:[%s9053_s3 + $0x18] sm:$0xff] }
 0x102   :  { %733 = vmatpush1.bf16.msra.mxu1 %v651_v35  ;;  %764 = vmatprep.mubr.bf16.mxu1 %v7038_v18 }
 0x103   :  { %734 = vmatprep.subr.bf16.mxu1 %v658_v34  ;;  %v1742_v42 = vpop.permute.xlu0 %1741  ;;  %1800 = vmatprep.subr.bf16.mxu0 %v1771_v33  ;;  %v2547_v33 = vld [vmem:[%s9053_s3 + $0x10] sm:$0xff] }
 0x104   :  { %v1758_v54 = vpop.permute.xlu1 %1757  ;;  %6360 = vmatmul.mubr.msk.bf16.gmra.mrb[12].mxu0 %vm211_vm2, %v7715_v53  ;;  %v1770_v56 = vsel %vm1769_vm6, %v1742_v42, %v1744_v46  ;;  %2566 = vperm.xlu0 %6968, %v2548_v45   ;;  %v7853_v42 = vld [vmem:[%s9051_s1 + $0x70] sm:$0xff]   ;;  %v63_v45 = vld [vmem:[%s9054_s10] sm:$0x3f] }
 0x105   :  { %1681 = vmatprep.mubr.bf16.mxu0 %v7038_v18  ;;  %vm64_vm9 = vcmp.gt.f32.partialorder %v63_v45, 0.5 }
 0x106   :  { %735 = vmatpush1.bf16.msra.mxu1 %v657_v7 }
 0x107   :  { %989 = vmatprep.subr.bf16.mxu1 %v909_v55  ;;  %v7733_v30 = vpop.permute.xlu0 %1759 }
 0x108   :  { %v1756_v39 = vpop.permute.xlu1 %1755  ;;  %v1777_v57 = vsel %vm1769_vm6, %v1758_v54, %v7733_v30 }
 0x109   :  { %6299 = vmatmul.mubr.msk.bf16.vlgmr.msra.gmra.mrb[8].mxu1 %vm211_vm2, %v7421_v17  ;;  %v914_v17 = vsel %vm9063_vm3, %v7506_v58, %v898_v14  ;;  %v1776_v50 = vsel %vm1769_vm6, %v1756_v39, %v1758_v54  ;;  %v2499_v14 = vld [vmem:[%s9052_s2 + $0x10] sm:$0xff] }
 0x10a   :  { %990 = vmatpush1.bf16.msra.mxu1 %v908_v40  ;;  %774 = vmatprep.mubr.bf16.mxu1 %v7038_v18 }
 0x10b   :  { %991 = vmatprep.subr.bf16.mxu1 %v915_v12  ;;  %v1752_v20 = vpop.permute.xlu0 %1751 }
 0x10c   :  { %v1754_v61 = vpop.permute.xlu1 %1753  ;;  %6363 = vmatmul.mubr.msk.bf16.vlgmr.msra.gmra.mrb[4].mxu0 %vm211_vm2, %v7697_v15 }
 0x10d   :  { %1801 = vmatpush1.bf16.msra.mxu0 %v1770_v56  ;;  %1691 = vmatprep.mubr.bf16.mxu0 %v7038_v18  ;;  %v1775_v62 = vsel %vm1769_vm6, %v1752_v20, %v1754_v61 }
 0x10e   :  { %992 = vmatpush1.bf16.msra.mxu1 %v914_v17  ;;  %1802 = vmatprep.subr.bf16.mxu0 %v1777_v57  ;;  %v7015_v57 = vld [vmem:[%s9051_s1 + $0x78] sm:$0xff]  }
 0x10f   :  { %v7751_v32 = vpop.permute.xlu0 %1749  ;;  %1265 = vmatprep.subr.bf16.mxu1 %v7465_v47 }
 0x110   :  { %v1766_v63 = vpop.permute.xlu1 %1765 }
 0x111   :  { %6300 = vmatmul.mubr.msk.bf16.gmra.mrb[12].mxu1 %vm211_vm2, %v7489_v41  ;;  %1803 = vmatpush1.bf16.msra.mxu0 %v1776_v50  ;;  %v1774_v41 = vsel %vm1769_vm6, %v7751_v32, %v1752_v20 }
 0x112   :  { %1021 = vmatprep.mubr.bf16.mxu1 %v7038_v18  ;;  %1906 = vmatprep.subr.bf16.mxu0 %v1775_v62 }
 0x113   :  { %v1768_v58 = vpop.permute.xlu0 %1767 }
 0x114   :  { %v7758_v0 = vpop.permute.xlu1 %1763  ;;  %6364 = vmatmul.mubr.msk.bf16.gmra.mrb[8].mxu0 %vm211_vm2, %v7715_v53  ;;  %v1781_v59 = vsel %vm1769_vm6, %v1766_v63, %v1768_v58 }
 0x115   :  { %1832 = vmatprep.mubr.bf16.mxu0 %v7038_v18 }
 0x117   :  { %v1491_v1 = vpop.permute.xlu0 %1490 }
 0x118   :  { %v1505_v47 = vpop.permute.xlu1 %1504  ;;  %v1515_v8 = vsel %vm1512_vm5, %v7640_v6, %v1491_v1  ;;  %v2545_v6 = vld [vmem:[%s9053_s3] sm:$0xff] }
 0x119   :  { %6311 = vmatmul.mubr.msk.bf16.vlgmr.msra.gmra.mrb[8].mxu1 %vm211_vm2, %v7521_v2  ;;  %v1522_v27 = vsel %vm1512_vm5, %v1505_v47, %v7692_v37  ;;  %v1521_v31 = vsel %vm1512_vm5, %v7666_v4, %v1505_v47 }
 0x11a   :  { %1266 = vmatpush1.bf16.msra.mxu1 %v7273_v36  ;;  %1031 = vmatprep.mubr.bf16.mxu1 %v7038_v18  ;;  %v1516_v36 = vsel %vm1512_vm5, %v1491_v1, %v7684_v28 }
 0x11b   :  { %v2001_v51 = vpop.permute.xlu0 %2000  ;;  %1267 = vmatprep.subr.bf16.mxu1 %v7471_v48  ;;  %v1780_v48 = vsel %vm1769_vm6, %v7758_v0, %v1766_v63 }
 0x11c   :  { %v7776_v13 = vpop.permute.xlu1 %2002  ;;  %6371 = vmatmul.mubr.msk.bf16.vlgmr.msra.gmra.mrb[0].mxu0 %vm211_vm2, %v7766_v9 }
 0x11d   :  { %1907 = vmatpush1.bf16.msra.mxu0 %v1774_v41  ;;  %1842 = vmatprep.mubr.bf16.mxu0 %v7038_v18  ;;  %v2028_v19 = vsel %vm2026_vm7, %v2001_v51, %v7776_v13 }
 0x11e   :  { %1268 = vmatpush1.bf16.msra.mxu1 %v7305_v43  ;;  %1908 = vmatprep.subr.bf16.mxu0 %v1781_v59 }
 0x11f   :  { %1596 = vmatprep.subr.bf16.mxu1 %v1516_v36  ;;  %v1999_v2 = vpop.permute.xlu0 %1998 }
 0x120   :  { %v2015_v52 = vpop.permute.xlu1 %2014  ;;  %v2027_v26 = vsel %vm2026_vm7, %v1999_v2, %v2001_v51 }
 0x121   :  { %6312 = vmatmul.mubr.msk.bf16.gmra.mrb[12].mxu1 %vm211_vm2, %v7544_v23  ;;  %1909 = vmatpush1.bf16.msra.mxu0 %v1780_v48  ;;  %v2498_v23 = vld [vmem:[%s9052_s2 + $0x8] sm:$0xff]  ;;  %v7016_v48 = vld [vmem:[%s9051_s1 + $0x80] sm:$0xff]  }
 0x122   :  { %1297 = vmatprep.mubr.bf16.mxu1 %v7038_v18  ;;  %2057 = vmatprep.subr.bf16.mxu0 %v2028_v19 }
 0x123   :  { %v7796_v43 = vpop.permute.xlu0 %2016  ;;  %2508 = vperm.xlu1 %6969, %v2498_v23   ;;  %v7017_v23 = vld [vmem:[%s9051_s1 + $0x88] sm:$0xff]  }
 0x124   :  { %v2013_v60 = vpop.permute.xlu1 %2012  ;;  %6372 = vmatmul.mubr.msk.bf16.gmra.mrb[12].mxu0 %vm211_vm2, %v7791_v21 }
 0x125   :  { %1938 = vmatprep.mubr.bf16.mxu0 %v7038_v18  ;;  %v2033_v37 = vsel %vm2026_vm7, %v2013_v60, %v2015_v52 }
 0x127   :  { %v1748_v24 = vpop.permute.xlu0 %1747  ;;  %2551 = vperm.xlu1 %6969, %v2545_v6  }
 0x128   :  { %v1762_v5 = vpop.permute.xlu1 %1761  ;;  %v1773_v16 = vsel %vm1769_vm6, %v1748_v24, %v7751_v32  ;;  %v1772_v54 = vsel %vm1769_vm6, %v7710_v49, %v1748_v24 }
 0x129   :  { %6335 = vmatmul.mubr.msk.bf16.vlgmr.msra.gmra.mrb[8].mxu1 %vm211_vm2, %v7621_v44  ;;  %v2034_v44 = vsel %vm2026_vm7, %v2015_v52, %v7796_v43  ;;  %v1779_v7 = vsel %vm1769_vm6, %v1762_v5, %v7758_v0  ;;  %v1778_v49 = vsel %vm1769_vm6, %v7733_v30, %v1762_v5 }
 0x12a   :  { %1597 = vmatpush1.bf16.msra.mxu1 %v1515_v8  ;;  %1307 = vmatprep.mubr.bf16.mxu1 %v7038_v18 }
 0x12b   :  { %1598 = vmatprep.subr.bf16.mxu1 %v1522_v27  ;;  %v2009_v28 = vpop.permute.xlu0 %2008  ;;  %2513 = vperm.xlu1 %6969, %v2499_v14   ;;  %v2594_v14 = vlaneseq }
 0x12c   :  { %v2011_v29 = vpop.permute.xlu1 %2010  ;;  %6375 = vmatmul.mubr.msk.bf16.vlgmr.msra.gmra.mrb[4].mxu0 %vm211_vm2, %v7766_v9 }
 0x12d   :  { %2058 = vmatpush1.bf16.msra.mxu0 %v2027_v26  ;;  %1948 = vmatprep.mubr.bf16.mxu0 %v7038_v18  ;;  %v2032_v22 = vsel %vm2026_vm7, %v2009_v28, %v2011_v29 }
 0x12e   :  { %1599 = vmatpush1.bf16.msra.mxu1 %v1521_v31  ;;  %2059 = vmatprep.subr.bf16.mxu0 %v2034_v44 }
 0x12f   :  { %1853 = vmatprep.subr.bf16.mxu1 %v1773_v16  ;;  %v2007_v38 = vpop.permute.xlu0 %2006  ;;  %2561 = vperm.xlu1 %6969, %v2547_v33  }
 0x130   :  { %v2023_v4 = vpop.permute.xlu1 %2022  ;;  %v2031_v55 = vsel %vm2026_vm7, %v2007_v38, %v2009_v28 }
 0x131   :  { %6336 = vmatmul.mubr.msk.bf16.gmra.mrb[12].mxu1 %vm211_vm2, %v7646_v10  ;;  %2060 = vmatpush1.bf16.msra.mxu0 %v2033_v37 }
 0x132   :  { %1628 = vmatprep.mubr.bf16.mxu1 %v7038_v18  ;;  %2163 = vmatprep.subr.bf16.mxu0 %v2032_v22 }
 0x133   :  { %v2025_v46 = vpop.permute.xlu0 %2024  ;;  %6971 = vrot.lane.b32.xlu1 %v7038_v18, %s7036_s29 }
 0x134   :  { %v2021_v35 = vpop.permute.xlu1 %2020  ;;  %6376 = vmatmul.mubr.msk.bf16.gmra.mrb[8].mxu0 %vm211_vm2, %v7791_v21  ;;  %v2038_v40 = vsel %vm2026_vm7, %v2023_v4, %v2025_v46  ;;  %v2595_v46 = vshrl.u32 %v2594_v14, 7 }
 0x135   :  { %2089 = vmatprep.mubr.bf16.mxu0 %v7038_v18  ;;  %v2037_v12 = vsel %vm2026_vm7, %v2021_v35, %v2023_v4 }
 0x137   :  { %v2005_v10 = vpop.permute.xlu0 %2004 }
 0x138   :  { %v2019_v34 = vpop.permute.xlu1 %2018  ;;  %v2029_v62 = vsel %vm2026_vm7, %v7776_v13, %v2005_v10 }
 0x139   :  { %6361 = vmatmul.mubr.msk.bf16.vlgmr.msra.gmra.mrb[8].mxu1 %vm211_vm2, %v7697_v15  ;;  %v2030_v15 = vsel %vm2026_vm7, %v2005_v10, %v2007_v38  ;;  %v2036_v63 = vsel %vm2026_vm7, %v2019_v34, %v2021_v35  ;;  %v2596_v10 = vsub.s32 0, %v2595_v46 }
 0x13a   :  { %1854 = vmatpush1.bf16.msra.mxu1 %v1772_v54  ;;  %1638 = vmatprep.mubr.bf16.mxu1 %v7038_v18 }
 0x13b   :  { %1855 = vmatprep.subr.bf16.mxu1 %v1779_v7  ;;  %v2258_v39 = vpop.permute.xlu0 %2257 }
 0x13c   :  { %6383 = vmatmul.mubr.msk.bf16.vlgmr.msra.gmra.mrb[0].mxu0 %vm211_vm2, %v7853_v42  ;;  %v2260_v56 = vpop.permute.xlu1 %2259 }
 0x13d   :  { %2164 = vmatpush1.bf16.msra.mxu0 %v2031_v55  ;;  %2099 = vmatprep.mubr.bf16.mxu0 %v7038_v18  ;;  %v2285_v20 = vsel %vm2283_vm8, %v2258_v39, %v2260_v56 }
 0x13e   :  { %1856 = vmatpush1.bf16.msra.mxu1 %v1778_v49  ;;  %2165 = vmatprep.subr.bf16.mxu0 %v2038_v40 }
 0x13f   :  { %2110 = vmatprep.subr.bf16.mxu1 %v2030_v15 }
 0x140   :  { %v2256_v61 = vpop.permute.xlu0 %2255 }
 0x141   :  { %6362 = vmatmul.mubr.msk.bf16.gmra.mrb[12].mxu1 %vm211_vm2, %v7715_v53  ;;  %2166 = vmatpush1.bf16.msra.mxu0 %v2037_v12  ;;  %v2272_v30 = vpop.permute.xlu1 %2271  ;;  %v2284_v53 = vsel %vm2283_vm8, %v2256_v61, %v2258_v39 }
 0x142   :  { %1885 = vmatprep.mubr.bf16.mxu1 %v7038_v18  ;;  %2314 = vmatprep.subr.bf16.mxu0 %v2285_v20 }
 0x144   :  { %6384 = vmatmul.mubr.msk.bf16.gmra.mrb[12].mxu0 %vm211_vm2, %v7015_v57  ;;  %v2274_v17 = vpop.permute.xlu0 %2273 }
 0x145   :  { %2195 = vmatprep.mubr.bf16.mxu0 %v7038_v18  ;;  %v2291_v0 = vsel %vm2283_vm8, %v2272_v30, %v2274_v17 }
 0x146   :  { %v2270_v50 = vpop.permute.xlu1 %2269 }
 0x147   :  { %v2290_v41 = vsel %vm2283_vm8, %v2270_v50, %v2272_v30  ;;  %v2604_v30 = vsub.s32 2, %v2595_v46 }
 0x148   :  { %v2262_v32 = vpop.permute.xlu0 %2261 }
 0x149   :  { %6373 = vmatmul.mubr.msk.bf16.vlgmr.msra.gmra.mrb[8].mxu1 %vm211_vm2, %v7766_v9  ;;  %v2035_v9 = vsel %vm2026_vm7, %v7796_v43, %v2019_v34  ;;  %v2593_v34 = vsel %vm64_vm9, 1, %v7038_v18 }
 0x14a   :  { %2111 = vmatpush1.bf16.msra.mxu1 %v2029_v62  ;;  %1895 = vmatprep.mubr.bf16.mxu1 %v7038_v18  ;;  %v2264_v58 = vpop.permute.xlu1 %2263  ;;  %v7958_v39 = vrot.slane %v2593_v34, %v2596_v10  ;;  %v2612_v62 = vsub.s32 4, %v2595_v46 }
 0x14b   :  { %2112 = vmatprep.subr.bf16.mxu1 %v2036_v63  ;;  %v2287_v47 = vsel %vm2283_vm8, %v2262_v32, %v2264_v58 }
 0x14c   :  { %6387 = vmatmul.mubr.msk.bf16.vlgmr.msra.gmra.mrb[4].mxu0 %vm211_vm2, %v7853_v42  ;;  %v2276_v1 = vpop.permute.xlu0 %2275  ;;  %vm2618_vm10 = vcmp.eq.s32.totalorder %v7958_v39, 1 }
 0x14d   :  { %2315 = vmatpush1.bf16.msra.mxu0 %v2284_v53  ;;  %2205 = vmatprep.mubr.bf16.mxu0 %v7038_v18  ;;  %v2292_v24 = vsel %vm2283_vm8, %v2274_v17, %v2276_v1 }
 0x14e   :  { %2113 = vmatpush1.bf16.msra.mxu1 %v2035_v9  ;;  %2316 = vmatprep.subr.bf16.mxu0 %v2291_v0  ;;  %v2278_v51 = vpop.permute.xlu1 %2277  ;;  %v7981_v9 = vrot.slane %v2593_v34, %v2604_v30 }
 0x14f   :  { %2367 = vmatprep.subr.bf16.mxu1 %v2287_v47  ;;  %v2293_v2 = vsel %vm2283_vm8, %v2276_v1, %v2278_v51 }
 0x150   :  { %v2266_v59 = vpop.permute.xlu0 %2265  ;;  %vm2620_vm12 = vcmp.eq.s32.totalorder %v7981_v9, 1 }
 0x151   :  { %6374 = vmatmul.mubr.msk.bf16.gmra.mrb[12].mxu1 %vm211_vm2, %v7791_v21  ;;  %2317 = vmatpush1.bf16.msra.mxu0 %v2290_v41  ;;  %v2286_v21 = vsel %vm2283_vm8, %v2260_v56, %v2262_v32  ;;  %v2288_v43 = vsel %vm2283_vm8, %v2264_v58, %v2266_v59  ;;  %v2608_v32 = vsub.s32 3, %v2595_v46  ;;  %v2616_v41 = vsub.s32 5, %v2595_v46 }
 0x152   :  { %2142 = vmatprep.mubr.bf16.mxu1 %v7038_v18  ;;  %v2268_v13 = vpop.permute.xlu1 %2267 }
 0x153   :  { %v2289_v36 = vsel %vm2283_vm8, %v2266_v59, %v2268_v13 }
 0x154   :  { %6388 = vmatmul.mubr.msk.bf16.gmra.mrb[8].mxu0 %vm211_vm2, %v7015_v57  ;;  %2420 = vmatprep.subr.bf16.mxu0 %v2289_v36 }
 0x155   :  { %2346 = vmatprep.mubr.bf16.mxu0 %v7038_v18  ;;  %v2280_v19 = vpop.permute.xlu0 %2279 }
 0x156   :  { %v2282_v52 = vpop.permute.xlu1 %2281  ;;  %v2294_v3 = vsel %vm2283_vm8, %v2278_v51, %v2280_v19 }
 0x157   :  { %v2295_v60 = vsel %vm2283_vm8, %v2280_v19, %v2282_v52 }
 0x159   :  { %6385 = vmatmul.mubr.msk.bf16.vlgmr.msra.gmra.mrb[8].mxu1 %vm211_vm2, %v7853_v42  ;;  %v2600_v42 = vsub.s32 1, %v2595_v46  ;;  %v8013_v46 = vrot.slane %v2593_v34, %v2616_v41 }
 0x15a   :  { %2368 = vmatpush1.bf16.msra.mxu1 %v2286_v21  ;;  %2152 = vmatprep.mubr.bf16.mxu1 %v7038_v18 }
 0x15b   :  { %2369 = vmatprep.subr.bf16.mxu1 %v2293_v2  ;;  %v7962_v49 = vrot.slane %v2593_v34, %v2600_v42  ;;  %v7993_v2 = vrot.slane %v2593_v34, %v2612_v62  ;;  %vm9066_vm15 = vcmp.eq.s32.totalorder %v8013_v46, 1 }
 0x15c   :  { %6395 = vmatmul.mubr.msk.bf16.vlgmr.msra.gmra.mrb[0].mxu0 %vm211_vm2, %v7016_v48 }
 0x15d   :  { %2421 = vmatpush1.bf16.msra.mxu0 %v2288_v43  ;;  %2356 = vmatprep.mubr.bf16.mxu0 %v7038_v18  ;;  %vm2619_vm11 = vcmp.eq.s32.totalorder %v7962_v49, 1  ;;  %vm2622_vm14 = vcmp.eq.s32.totalorder %v7993_v2, 1 }
 0x15e   :  { %2370 = vmatpush1.bf16.msra.mxu1 %v2292_v24  ;;  %2422 = vmatprep.subr.bf16.mxu0 %v2295_v60  ;;  %vm8524_vm9 = vmpackc.low %vm2619_vm11, %vm2619_vm11 }
 0x161   :  { %2423 = vmatpush1.bf16.msra.mxu0 %v2294_v3  ;;  %6386 = vmatmul.mubr.msk.bf16.gmra.mrb[12].mxu1 %vm211_vm2, %v7015_v57 }
 0x162   :  { %2399 = vmatprep.mubr.bf16.mxu1 %v7038_v18 }
 0x164   :  { %6396 = vmatmul.mubr.msk.bf16.gmra.mrb[12].mxu0 %vm211_vm2, %v7017_v23 }
 0x165   :  { %2452 = vmatprep.mubr.bf16.mxu0 %v7038_v18 }
 0x169   :  { %6397 = vmatmul.mubr.msk.bf16.vlgmr.msra.gmra.mrb[8].mxu1 %vm211_vm2, %v7016_v48 }
 0x16a   :  { %2409 = vmatprep.mubr.bf16.mxu1 %v7038_v18 }
 0x16c   :  { %6399 = vmatmul.mubr.msk.bf16.vlgmr.msra.gmra.mrb[4].mxu0 %vm211_vm2, %v7016_v48  ;;  %v7991_v48 = vrot.slane %v2593_v34, %v2608_v32 }
 0x16d   :  { %2462 = vmatprep.mubr.bf16.mxu0 %v7038_v18  ;;  %v7953_v33 = vpop.permute.xlu0 %2503 }
 0x16e   :  { %vm2621_vm13 = vcmp.eq.s32.totalorder %v7991_v48, 1 }
 0x171   :  { %6398 = vmatmul.mubr.msk.bf16.gmra.mrb[12].mxu1 %vm211_vm2, %v7017_v23 }
 0x172   :  { %2797 = vmatprep.mubr.bf16.mxu1 %v7038_v18 }
 0x174   :  { %6400 = vmatmul.mubr.msk.bf16.gmra.mrb[8].mxu0 %vm211_vm2, %v7017_v23 }
 0x175   :  { %4657 = vmatprep.mubr.bf16.mxu0 %v7038_v18 }
 0x176   :  { %v7960_v15 = vpop.permute.xlu0 %2556 }
 0x17a   :  { %v7983_v51 = vpop.permute.xlu0 %2518 }
 0x183   :  { %v8027_v34 = vpop.permute.xlu0 %2566 }
 0x1a2   :  { %v7951_v35 = vpop.permute.xlu1 %2508 }
 0x1a4   :  { %v480_v5 = vpop.f32.mrb[0].mxu1 }
 0x1a5   :  { %v482_v8 = vpop.f32.mrb[1].mxu1 }
 0x1a6   :  { %v484_v25 = vpop.f32.mrb[2].mxu1  ;;  %v7956_v54 = vpop.permute.xlu1 %2551 }
 0x1a7   :  { %v486_v26 = vpop.f32.mrb[3].mxu1 }
 0x1aa   :  { %v7971_v58 = vpop.permute.xlu1 %2513 }
 0x1c4   :  { %v7932_v27 = vpop.f32.mrb[16].mxu1 }
 0x1c5   :  { %v7934_v28 = vpop.f32.mrb[17].mxu1 }
 0x1c6   :  { %v7936_v44 = vpop.f32.mrb[18].mxu1 }
 0x1c7   :  { %v7938_v29 = vpop.f32.mrb[19].mxu1 }
 0x1cc   :  { %v7940_v6 = vpop.f32.mrb[20].mxu1 }
 0x1cd   :  { %v7942_v31 = vpop.f32.mrb[21].mxu1 }
 0x1ce   :  { %v7944_v11 = vpop.f32.mrb[22].mxu1 }
 0x1cf   :  { %v7946_v37 = vpop.f32.mrb[23].mxu1 }
 0x1d4   :  { %v723_v16 = vpop.f32.mrb[4].mxu1 }
 0x1d5   :  { %v725_v38 = vpop.f32.mrb[5].mxu1 }
 0x1d6   :  { %v727_v22 = vpop.f32.mrb[6].mxu1 }
 0x1d7   :  { %v729_v4 = vpop.f32.mrb[7].mxu1 }
 0x22f   :  { %v2348_v7 = vpop.f32.mrb[0].mxu0 }
 0x230   :  { %v6575_v55 = vadd.f32 %v2348_v7, %v480_v5  ;;  %v2350_v40 = vpop.f32.mrb[1].mxu0 }
 0x231   :  { %v6576_v56 = vadd.f32 %v2350_v40, %v482_v8  ;;  %v2352_v12 = vpop.f32.mrb[2].mxu0 }
 0x232   :  { %v2521_v20 = vmul.f32 %v6575_v55, %v7953_v33  ;;  %v6577_v57 = vadd.f32 %v2352_v12, %v484_v25  ;;  %v2354_v61 = vpop.f32.mrb[3].mxu0 }
 0x233   :  { %v2522_v17 = vmul.f32 %v6576_v56, %v7953_v33  ;;  %v6578_v50 = vadd.f32 %v2354_v61, %v486_v26 }
 0x234   :  { %v7967_v53 = vadd.f32 %v7956_v54, %v2521_v20  ;;  %v2527_v63 = vmul.f32 %v6577_v57, %v7951_v35 }
 0x235   :  { %v7974_v0 = vadd.f32 %v7956_v54, %v2522_v17  ;;  %v2528_v1 = vmul.f32 %v6578_v50, %v7951_v35 }
 0x236   :  { %v7979_v47 = vadd.f32 %v7960_v15, %v2527_v63  ;;  %v2624_v59 = vsel %vm2618_vm10, %v7967_v53, 0.0 }
 0x237   :  { %v7989_v13 = vadd.f32 %v7960_v15, %v2528_v1  ;;  %v2358_v36 = vpop.f32.mrb[12].mxu0  ;;  %v2625_v19 = vsel %vm2619_vm11, %v7974_v0, 0.0 }
 0x238   :  { %v2630_v52 = vsel %vm2618_vm10, %v7979_v47, 0.0  ;;  %v6521_v21 = vpack.c.bf16 %v7979_v47, %v7967_v53  ;;  %v6579_v43 = vadd.f32 %v2358_v36, %v723_v16  ;;  %v2360_v60 = vpop.f32.mrb[13].mxu0  ;;  %v8015_v16 = vpop.permute.xlu1 %2561  ;;  %v7022_v47 = vld [vmem:[%s9055_s4 + $0x20] sm:$0xff]  }
 0x239   :  { %v8003_v24 = vpack.c.bf16 %v2630_v52, %v2624_v59  ;;  %v2631_v3 = vsel %vm2619_vm11, %v7989_v13, 0.0  ;;  %v6518_v23 = vpack.c.bf16 %v7989_v13, %v7974_v0  ;;  %v6580_v5 = vadd.f32 %v2360_v60, %v725_v38  ;;  %v2362_v8 = vpop.f32.mrb[14].mxu0 }
 0x23a   :  { %v8010_v25 = vpack.c.bf16 %v2631_v3, %v2625_v19  ;;  %v2533_v26 = vmul.f32 %v6579_v43, %v7971_v58  ;;  %v6581_v14 = vadd.f32 %v2362_v8, %v727_v22  ;;  %v2364_v45 = vpop.f32.mrb[15].mxu0 }
 0x23b   :  { %v2534_v10 = vmul.f32 %v6580_v5, %v7971_v58  ;;  %v6582_v42 = vadd.f32 %v2364_v45, %v729_v4  ;;  %2901 = vrot.lane.b32.xlu0 %v8003_v24, %s7040_s16  ;;  %2712 = vrot.lane.b32.xlu1 %v8003_v24, %s7036_s29 }
 0x23c   :  { %v8023_v38 = vadd.f32 %v8015_v16, %v2533_v26  ;;  %v2539_v7 = vmul.f32 %v6581_v14, %v7983_v51  ;;  %v2401_v22 = vpop.f32.mrb[8].mxu1 }
 0x23d   :  { %v8030_v55 = vadd.f32 %v8015_v16, %v2534_v10  ;;  %v2540_v4 = vmul.f32 %v6582_v42, %v7983_v51  ;;  %v2523_v40 = vmul.f32 %v7953_v33, %v2401_v22  ;;  %v2403_v56 = vpop.f32.mrb[9].mxu1 }
 0x23e   :  { %v2636_v12 = vsel %vm2618_vm10, %v8023_v38, 0.0  ;;  %v8039_v20 = vadd.f32 %v8027_v34, %v2539_v7  ;;  %v2524_v57 = vmul.f32 %v7953_v33, %v2403_v56  ;;  %v2405_v61 = vpop.f32.mrb[10].mxu1 }
 0x23f   :  { %v2637_v30 = vsel %vm2619_vm11, %v8030_v55, 0.0  ;;  %v8048_v17 = vadd.f32 %v8027_v34, %v2540_v4  ;;  %v8051_v50 = vadd.f32 %v7956_v54, %v2523_v40  ;;  %v2529_v32 = vmul.f32 %v7951_v35, %v2405_v61  ;;  %v2407_v62 = vpop.f32.mrb[11].mxu1  ;;  %v2454_v63 = vpop.f32.mrb[4].mxu0  ;;  %2714 = vrot.lane.b32.xlu0 %v8010_v25, %s7036_s29  ;;  %2903 = vrot.lane.b32.xlu1 %v8010_v25, %s7040_s16 }
 0x240   :  { %v2642_v1 = vsel %vm2618_vm10, %v8039_v20, 0.0  ;;  %v6527_v41 = vpack.c.bf16 %v8039_v20, %v8023_v38  ;;  %v8064_v59 = vadd.f32 %v7956_v54, %v2524_v57  ;;  %v2530_v36 = vmul.f32 %v7951_v35, %v2407_v62  ;;  %v2456_v19 = vpop.f32.mrb[5].mxu0 }
 0x241   :  { %v8067_v52 = vpack.c.bf16 %v2642_v1, %v2636_v12  ;;  %v2643_v43 = vsel %vm2619_vm11, %v8048_v17, 0.0  ;;  %v6524_v60 = vpack.c.bf16 %v8048_v17, %v8030_v55  ;;  %v2626_v3 = vsel %vm2620_vm12, %v8051_v50, 0.0  ;;  %v2458_v5 = vpop.f32.mrb[6].mxu0 }
 0x242   :  { %v8077_v8 = vpack.c.bf16 %v2643_v43, %v2637_v30  ;;  %v2627_v26 = vsel %vm2621_vm13, %v8064_v59, 0.0  ;;  %v8083_v14 = vadd.f32 %v7960_v15, %v2529_v32  ;;  %v8086_v45 = vadd.f32 %v7960_v15, %v2530_v36  ;;  %v2460_v10 = vpop.f32.mrb[7].mxu0 }
 0x243   :  { %v6583_v42 = vadd.f32 %v2454_v63, %v7932_v27  ;;  %v6584_v7 = vadd.f32 %v2456_v19, %v7934_v28  ;;  %v6585_v22 = vadd.f32 %v2458_v5, %v7936_v44  ;;  %v6586_v4 = vadd.f32 %v2460_v10, %v7938_v29  ;;  %2726 = vrot.lane.b32.xlu0 %v8067_v52, %s7036_s29 }
 0x244   :  { %v2632_v40 = vsel %vm2620_vm12, %v8083_v14, 0.0  ;;  %v2633_v27 = vsel %vm2621_vm13, %v8086_v45, 0.0  ;;  %v6530_v28 = vpack.c.bf16 %v8086_v45, %v8064_v59  ;;  %v2411_v44 = vpop.f32.mrb[12].mxu1  ;;  %2728 = vrot.lane.b32.xlu1 %v8077_v8, %s7036_s29  ;;  %v9075_v55 = vpack.c.bf16 %v8083_v14, %v8051_v50  ;;  %v7032_v45 = vld [vmem:[%s9058_s7 + $0x28] sm:$0xff]  }
 0x245   :  { %v8106_v29 = vpack.c.bf16 %v2632_v40, %v2626_v3  ;;  %v8108_v12 = vpack.c.bf16 %v2633_v27, %v2627_v26  ;;  %v2525_v57 = vmul.f32 %v6583_v42, %v7953_v33  ;;  %v2526_v61 = vmul.f32 %v6584_v7, %v7953_v33  ;;  %v2413_v30 = vpop.f32.mrb[13].mxu1 }
 0x246   :  { %v2531_v32 = vmul.f32 %v6585_v22, %v7951_v35  ;;  %v2532_v62 = vmul.f32 %v6586_v4, %v7951_v35  ;;  %v2535_v63 = vmul.f32 %v7971_v58, %v2411_v44  ;;  %v2536_v1 = vmul.f32 %v7971_v58, %v2413_v30  ;;  %v2415_v36 = vpop.f32.mrb[14].mxu1 }
 0x247   :  { %v8117_v19 = vadd.f32 %v7956_v54, %v2525_v57  ;;  %v8120_v43 = vadd.f32 %v7956_v54, %v2526_v61  ;;  %v2541_v3 = vmul.f32 %v7983_v51, %v2415_v36  ;;  %v2417_v5 = vpop.f32.mrb[15].mxu1  ;;  %v2464_v33 = vpop.f32.mrb[8].mxu0  ;;  %2716 = vrot.lane.b32.xlu0 %v8106_v29, %s7036_s29 }
 0x248   :  { %v8126_v35 = vadd.f32 %v7960_v15, %v2531_v32  ;;  %v8129_v26 = vadd.f32 %v7960_v15, %v2532_v62  ;;  %v8132_v10 = vadd.f32 %v8015_v16, %v2535_v63  ;;  %v8135_v42 = vadd.f32 %v8015_v16, %v2536_v1  ;;  %v2466_v54 = vpop.f32.mrb[9].mxu0  ;;  %2718 = vrot.lane.b32.xlu1 %v8108_v12, %s7036_s29 }
 0x249   :  { %v2628_v7 = vsel %vm2622_vm14, %v8117_v19, 0.0  ;;  %v2629_v22 = vsel %vm9066_vm15, %v8120_v43, 0.0  ;;  %v8146_v15 = vadd.f32 %v8027_v34, %v2541_v3  ;;  %v2542_v4 = vmul.f32 %v7983_v51, %v2417_v5  ;;  %v2468_v40 = vpop.f32.mrb[10].mxu0 }
 0x24a   :  { %v2634_v27 = vsel %vm2622_vm14, %v8126_v35, 0.0  ;;  %v2635_v57 = vsel %vm9066_vm15, %v8129_v26, 0.0  ;;  %v2470_v30 = vpop.f32.mrb[11].mxu0  ;;  %v2638_v63 = vsel %vm2620_vm12, %v8132_v10, 0.0  ;;  %v6587_v5 = vadd.f32 %v2464_v33, %v7940_v6 }
 0x24b   :  { %v8159_v32 = vpack.c.bf16 %v2634_v27, %v2628_v7  ;;  %v8161_v62 = vpack.c.bf16 %v2635_v57, %v2629_v22  ;;  %v2644_v1 = vsel %vm2620_vm12, %v8146_v15, 0.0  ;;  %v8172_v3 = vadd.f32 %v8027_v34, %v2542_v4 }
 0x24c   :  { %v8175_v7 = vpack.c.bf16 %v2644_v1, %v2638_v63  ;;  %v6588_v22 = vadd.f32 %v2466_v54, %v7942_v31  ;;  %v6589_v27 = vadd.f32 %v2468_v40, %v7944_v11  ;;  %v6590_v57 = vadd.f32 %v2470_v30, %v7946_v37 }
 0x24d   :  { %2720 = vrot.lane.b32.xlu0 %v8159_v32, %s7036_s29  ;;  %v2639_v44 = vsel %vm2621_vm13, %v8135_v42, 0.0  ;;  %v2645_v4 = vsel %vm2621_vm13, %v8172_v3, 0.0  ;;  %v2537_v31 = vmul.f32 %v6587_v5, %v7971_v58  ;;  %2722 = vrot.lane.b32.xlu1 %v8161_v62, %s7036_s29  ;;  %v9076_v17 = vpack.c.bf16 %v8172_v3, %v8135_v42 }
 0x24e   :  { %v8193_v11 = vpack.c.bf16 %v2645_v4, %v2639_v44  ;;  %v2538_v37 = vmul.f32 %v6588_v22, %v7971_v58  ;;  %v2543_v33 = vmul.f32 %v6589_v27, %v7983_v51  ;;  %v2544_v54 = vmul.f32 %v6590_v57, %v7983_v51  ;;  %v6972_v57 = vpop.permute.xlu1 %6971 }
 0x24f   :  { %v8199_v40 = vadd.f32 %v8015_v16, %v2537_v31  ;;  %v9079_v59 = vpack.c.bf16 %v8146_v15, %v8132_v10  ;;  %v9080_v14 = vpack.c.bf16 %v8129_v26, %v8120_v43  ;;  %v9083_v10 = vpack.c.bf16 %v8126_v35, %v8117_v19 }
 0x250   :  { %v8202_v30 = vadd.f32 %v8015_v16, %v2538_v37  ;;  %v8205_v63 = vadd.f32 %v8027_v34, %v2543_v33  ;;  %v8208_v1 = vadd.f32 %v8027_v34, %v2544_v54  ;;  %v6973_v37 = vunpack.i.l.bf16 %v6972_v57 }
 0x251   :  { %2730 = vrot.lane.b32.xlu0 %v8175_v7, %s7036_s29  ;;  %v2640_v58 = vsel %vm2622_vm14, %v8199_v40, 0.0  ;;  %2732 = vrot.lane.b32.xlu1 %v8193_v11, %s7036_s29 }
 0x252   :  { %v2641_v51 = vsel %vm9066_vm15, %v8202_v30, 0.0  ;;  %v2646_v16 = vsel %vm2622_vm14, %v8205_v63, 0.0  ;;  %v2647_v44 = vsel %vm9066_vm15, %v8208_v1, 0.0  ;;  %v9084_v26 = vpack.c.bf16 %v8208_v1, %v8202_v30 }
 0x253   :  { %v8228_v5 = vpack.c.bf16 %v2646_v16, %v2640_v58  ;;  %v8230_v22 = vpack.c.bf16 %v2647_v44, %v2641_v51  ;;  %v6974_v44 = vunpack.i.h.bf16 %v6972_v57  ;;  %v9085_v15 = vpack.c.bf16 %v8205_v63, %v8199_v40 }
 0x255   :  { %6976 = vrot.lane.b32.xlu0 %v7038_v18, %s7040_s16  ;;  %2915 = vrot.lane.b32.xlu1 %v8067_v52, %s7040_s16 }
 0x259   :  { %2734 = vrot.lane.b32.xlu0 %v8228_v5, %s7036_s29  ;;  %2736 = vrot.lane.b32.xlu1 %v8230_v22, %s7036_s29 }
 0x25d   :  { %2917 = vrot.lane.b32.xlu0 %v8077_v8, %s7040_s16  ;;  %2905 = vrot.lane.b32.xlu1 %v8106_v29, %s7040_s16 }
 0x261   :  { %2907 = vrot.lane.b32.xlu0 %v8108_v12, %s7040_s16  ;;  %2919 = vrot.lane.b32.xlu1 %v8175_v7, %s7040_s16 }
 0x265   :  { %2921 = vrot.lane.b32.xlu0 %v8193_v11, %s7040_s16  ;;  %2909 = vrot.lane.b32.xlu1 %v8159_v32, %s7040_s16 }
 0x269   :  { %2911 = vrot.lane.b32.xlu0 %v8161_v62, %s7040_s16  ;;  %2923 = vrot.lane.b32.xlu1 %v8228_v5, %s7040_s16 }
 0x26d   :  { %3095 = vrot.lane.b32.xlu0 %v8010_v25, %s7037_s15  ;;  %3093 = vrot.lane.b32.xlu1 %v8003_v24, %s7037_s15 }
 0x271   :  { %2925 = vrot.lane.b32.xlu0 %v8230_v22, %s7040_s16  ;;  %6981 = vrot.lane.b32.xlu1 %v7038_v18, %s7037_s15 }
 0x275   :  { %3107 = vrot.lane.b32.xlu0 %v8067_v52, %s7037_s15  ;;  %3109 = vrot.lane.b32.xlu1 %v8077_v8, %s7037_s15 }
 0x279   :  { %3097 = vrot.lane.b32.xlu0 %v8106_v29, %s7037_s15  ;;  %3099 = vrot.lane.b32.xlu1 %v8108_v12, %s7037_s15 }
 0x27d   :  { %3111 = vrot.lane.b32.xlu0 %v8175_v7, %s7037_s15  ;;  %3113 = vrot.lane.b32.xlu1 %v8193_v11, %s7037_s15 }
 0x281   :  { %3101 = vrot.lane.b32.xlu0 %v8159_v32, %s7037_s15  ;;  %3103 = vrot.lane.b32.xlu1 %v8161_v62, %s7037_s15 }
 0x285   :  { %3115 = vrot.lane.b32.xlu0 %v8228_v5, %s7037_s15  ;;  %3299 = vrot.lane.b32.xlu1 %v8010_v25, %s7039_s14 }
 0x289   :  { %3297 = vrot.lane.b32.xlu0 %v8003_v24, %s7039_s14  ;;  %3117 = vrot.lane.b32.xlu1 %v8230_v22, %s7037_s15 }
 0x28d   :  { %3295 = vrot.lane.b32.xlu0 %v7038_v18, %s7039_s14  ;;  %3311 = vrot.lane.b32.xlu1 %v8067_v52, %s7039_s14 }
 0x291   :  { %3313 = vrot.lane.b32.xlu0 %v8077_v8, %s7039_s14  ;;  %3309 = vrot.lane.b32.xlu1 %v7038_v18, %s7039_s14 }
 0x295   :  { %3301 = vrot.lane.b32.xlu0 %v8106_v29, %s7039_s14  ;;  %3303 = vrot.lane.b32.xlu1 %v8108_v12, %s7039_s14 }
 0x299   :  { %3315 = vrot.lane.b32.xlu0 %v8175_v7, %s7039_s14  ;;  %3317 = vrot.lane.b32.xlu1 %v8193_v11, %s7039_s14 }
 0x29d   :  { %3305 = vrot.lane.b32.xlu0 %v8159_v32, %s7039_s14  ;;  %3307 = vrot.lane.b32.xlu1 %v8161_v62, %s7039_s14 }
 0x2a1   :  { %3319 = vrot.lane.b32.xlu0 %v8228_v5, %s7039_s14  ;;  %3321 = vrot.lane.b32.xlu1 %v8230_v22, %s7039_s14 }
 0x2a5   :  { %3681 = vrot.lane.b32.xlu0 %v8010_v25, %s7041_s30  ;;  %3683 = vrot.lane.b32.xlu1 %v8106_v29, %s7041_s30 }
 0x2a9   :  { %3679 = vrot.lane.b32.xlu0 %v8003_v24, %s7041_s30  ;;  %3695 = vrot.lane.b32.xlu1 %v8077_v8, %s7041_s30 }
 0x2ad   :  { %3697 = vrot.lane.b32.xlu0 %v8175_v7, %s7041_s30  ;;  %v8324_v4 = vpop.permute.xlu0 %2901  ;;  %v2713_v31 = vpop.permute.xlu1 %2712  ;;  %3693 = vrot.lane.b32.xlu1 %v8067_v52, %s7041_s30 }
 0x2ae   :  { %v2738_v51 = vsel %vm9065_vm0, %v6973_v37, %v2713_v31 }
 0x2b1   :  { %3685 = vrot.lane.b32.xlu0 %v8108_v12, %s7041_s30  ;;  %v2715_v33 = vpop.permute.xlu0 %2714  ;;  %v8330_v54 = vpop.permute.xlu1 %2903  ;;  %3687 = vrot.lane.b32.xlu1 %v8159_v32, %s7041_s30 }
 0x2b2   :  { %v2739_v58 = vsel %vm9065_vm0, %v2713_v31, %v2715_v33 }
 0x2b3   :  { %2765 = vmatprep.subr.bf16.mxu1 %v2739_v58  ;;  %v7018_v58 = vld [vmem:[%s9055_s4 + $0x8] sm:$0xff]  }
 0x2b4   :  { %2766 = vmatpush1.bf16.msra.mxu1 %v2738_v51 }
 0x2b5   :  { %3699 = vrot.lane.b32.xlu0 %v8193_v11, %s7041_s30  ;;  %v2727_v16 = vpop.permute.xlu0 %2726  ;;  %3701 = vrot.lane.b32.xlu1 %v8228_v5, %s7041_s30 }
 0x2b6   :  { %v2729_v34 = vpop.permute.xlu1 %2728  ;;  %v2744_v61 = vsel %vm9065_vm0, %v6974_v44, %v2727_v16 }
 0x2b7   :  { %v2745_v27 = vsel %vm9065_vm0, %v2727_v16, %v2729_v34 }
 0x2b8   :  { %2767 = vmatprep.subr.bf16.mxu1 %v2745_v27 }
 0x2b9   :  { %3689 = vrot.lane.b32.xlu0 %v8161_v62, %s7041_s30  ;;  %v2717_v31 = vpop.permute.xlu0 %2716  ;;  %2768 = vmatpush1.bf16.msra.mxu1 %v2744_v61 }
 0x2ba   :  { %6986 = vrot.lane.b32.xlu1 %v7038_v18, %s7041_s30  ;;  %v2719_v57 = vpop.permute.xlu1 %2718  ;;  %v2740_v27 = vsel %vm9065_vm0, %v2715_v33, %v2717_v31 }
 0x2bb   :  { %v2741_v37 = vsel %vm9065_vm0, %v2717_v31, %v2719_v57 }
 0x2bc   :  { %2808 = vmatprep.subr.bf16.mxu1 %v2741_v37  ;;  %6404 = vmatmul.mubr.msk.bf16.vlgmr.msra.gmra.mrb[24].mxu1 %vm211_vm2, %v7018_v58 }
 0x2bd   :  { %3887 = vrot.lane.b32.xlu0 %v8106_v29, %s7042_s24  ;;  %2809 = vmatpush1.bf16.msra.mxu1 %v2740_v27 }
 0x2be   :  { %3885 = vrot.lane.b32.xlu1 %v8010_v25, %s7042_s24  ;;  %2840 = vmatprep.mubr.bf16.mxu1 %v7038_v18 }
 0x2bf   :  { %v2721_v61 = vpop.permute.xlu0 %2720  ;;  %v2723_v51 = vpop.permute.xlu1 %2722 }
 0x2c0   :  { %v2743_v27 = vsel %vm9065_vm0, %v2721_v61, %v2723_v51  ;;  %v2742_v6 = vsel %vm9065_vm0, %v2719_v57, %v2721_v61 }
 0x2c1   :  { %3899 = vrot.lane.b32.xlu0 %v8077_v8, %s7042_s24 }
 0x2c2   :  { %3883 = vrot.lane.b32.xlu1 %v8003_v24, %s7042_s24 }
 0x2c3   :  { %v2731_v16 = vpop.permute.xlu0 %2730  ;;  %v2733_v44 = vpop.permute.xlu1 %2732 }
 0x2c4   :  { %v2747_v33 = vsel %vm9065_vm0, %v2731_v16, %v2733_v44  ;;  %v2746_v31 = vsel %vm9065_vm0, %v2729_v34, %v2731_v16 }
 0x2c5   :  { %3703 = vrot.lane.b32.xlu0 %v8230_v22, %s7041_s30  ;;  %2810 = vmatprep.subr.bf16.mxu1 %v2747_v33 }
 0x2c6   :  { %3901 = vrot.lane.b32.xlu1 %v8175_v7, %s7042_s24  ;;  %2811 = vmatpush1.bf16.msra.mxu1 %v2746_v31 }
 0x2c7   :  { %v6977_v37 = vpop.permute.xlu0 %6976  ;;  %v2916_v36 = vpop.permute.xlu1 %2915  ;;  %2851 = vmatprep.subr.bf16.mxu1 %v2743_v27 }
 0x2c8   :  { %v6978_v16 = vunpack.i.l.bf16 %v6977_v37  ;;  %v6979_v61 = vunpack.i.h.bf16 %v6977_v37 }
 0x2c9   :  { %3897 = vrot.lane.b32.xlu0 %v8067_v52, %s7042_s24  ;;  %6405 = vmatmul.mubr.msk.bf16.vlgmr.msra.gmra.mrb[28].mxu1 %vm211_vm2, %v7018_v58 }
 0x2ca   :  { %3889 = vrot.lane.b32.xlu1 %v8108_v12, %s7042_s24  ;;  %2852 = vmatpush1.bf16.msra.mxu1 %v2742_v6  ;;  %v2928_v6 = vsel %vm9064_vm4, %v8324_v4, %v8330_v54  ;;  %v2933_v37 = vsel %vm9064_vm4, %v6979_v61, %v2916_v36 }
 0x2cb   :  { %v2735_v56 = vpop.permute.xlu0 %2734  ;;  %2883 = vmatprep.mubr.bf16.mxu1 %v7038_v18  ;;  %v2737_v34 = vpop.permute.xlu1 %2736 }
 0x2cc   :  { %v2749_v51 = vsel %vm9065_vm0, %v2735_v56, %v2737_v34  ;;  %v2748_v33 = vsel %vm9065_vm0, %v2733_v44, %v2735_v56  ;;  %v2927_v56 = vsel %vm9064_vm4, %v6978_v16, %v8324_v4  ;;  %v7019_v4 = vld [vmem:[%s9055_s4] sm:$0xff]   ;;  %vm8595_vm0 = vmpackc.low %vm9066_vm15, %vm9066_vm15 }
 0x2cd   :  { %3891 = vrot.lane.b32.xlu0 %v8159_v32, %s7042_s24  ;;  %2853 = vmatprep.subr.bf16.mxu1 %v2749_v51  ;;  %vm8612_vm15 = vmpackc.low %vm2622_vm14, %vm2622_vm14 }
 0x2ce   :  { %3903 = vrot.lane.b32.xlu1 %v8193_v11, %s7042_s24  ;;  %2854 = vmatpush1.bf16.msra.mxu1 %v2748_v33 }
 0x2cf   :  { %v2918_v31 = vpop.permute.xlu0 %2917  ;;  %v2906_v57 = vpop.permute.xlu1 %2905  ;;  %2954 = vmatprep.subr.bf16.mxu1 %v2928_v6 }
 0x2d0   :  { %v2934_v27 = vsel %vm9064_vm4, %v2916_v36, %v2918_v31  ;;  %v2929_v36 = vsel %vm9064_vm4, %v8330_v54, %v2906_v57 }
 0x2d1   :  { %3905 = vrot.lane.b32.xlu0 %v8228_v5, %s7042_s24  ;;  %6406 = vmatmul.mubr.msk.bf16.vlgmr.msra.gmra.mrb[32].mxu1 %vm211_vm2, %v7018_v58 }
 0x2d2   :  { %3893 = vrot.lane.b32.xlu1 %v8161_v62, %s7042_s24  ;;  %2955 = vmatpush1.bf16.msra.mxu1 %v2927_v56 }
 0x2d3   :  { %v2908_v44 = vpop.permute.xlu0 %2907  ;;  %2986 = vmatprep.mubr.bf16.mxu1 %v7038_v18  ;;  %v2920_v34 = vpop.permute.xlu1 %2919  ;;  %2956 = vmatprep.subr.bf16.mxu1 %v2934_v27 }
 0x2d4   :  { %v2930_v51 = vsel %vm9064_vm4, %v2906_v57, %v2908_v44  ;;  %v2935_v56 = vsel %vm9064_vm4, %v2918_v31, %v2920_v34 }
 0x2d5   :  { %6991 = vrot.lane.b32.xlu0 %v7038_v18, %s7042_s24 }
 0x2d6   :  { %4091 = vrot.lane.b32.xlu1 %v8106_v29, %s7043_s12  ;;  %2957 = vmatpush1.bf16.msra.mxu1 %v2933_v37 }
 0x2d7   :  { %v2922_v58 = vpop.permute.xlu0 %2921  ;;  %v2910_v16 = vpop.permute.xlu1 %2909  ;;  %2997 = vmatprep.subr.bf16.mxu1 %v2930_v51 }
 0x2d8   :  { %v2936_v6 = vsel %vm9064_vm4, %v2920_v34, %v2922_v58  ;;  %v2931_v37 = vsel %vm9064_vm4, %v2908_v44, %v2910_v16 }
 0x2d9   :  { %4089 = vrot.lane.b32.xlu0 %v8010_v25, %s7043_s12  ;;  %6408 = vmatmul.mubr.msk.bf16.vlgmr.msra.gmra.mrb[24].mxu1 %vm211_vm2, %v7019_v4 }
 0x2da   :  { %3907 = vrot.lane.b32.xlu1 %v8230_v22, %s7042_s24  ;;  %2998 = vmatpush1.bf16.msra.mxu1 %v2929_v36 }
 0x2db   :  { %v2912_v33 = vpop.permute.xlu0 %2911  ;;  %3029 = vmatprep.mubr.bf16.mxu1 %v7038_v18  ;;  %v2924_v61 = vpop.permute.xlu1 %2923  ;;  %2999 = vmatprep.subr.bf16.mxu1 %v2936_v6 }
 0x2dc   :  { %v2932_v54 = vsel %vm9064_vm4, %v2910_v16, %v2912_v33  ;;  %v2937_v33 = vsel %vm9064_vm4, %v2922_v58, %v2924_v61 }
 0x2dd   :  { %4087 = vrot.lane.b32.xlu0 %v8003_v24, %s7043_s12 }
 0x2de   :  { %4103 = vrot.lane.b32.xlu1 %v8077_v8, %s7043_s12  ;;  %3000 = vmatpush1.bf16.msra.mxu1 %v2935_v56 }
 0x2df   :  { %v3096_v27 = vpop.permute.xlu0 %3095  ;;  %v3094_v57 = vpop.permute.xlu1 %3093  ;;  %3040 = vmatprep.subr.bf16.mxu1 %v2932_v54 }
 0x2e0   :  { %v3120_v44 = vsel %vm9062_vm1, %v3094_v57, %v3096_v27 }
 0x2e1   :  { %4105 = vrot.lane.b32.xlu0 %v8175_v7, %s7043_s12  ;;  %6409 = vmatmul.mubr.msk.bf16.vlgmr.msra.gmra.mrb[28].mxu1 %vm211_vm2, %v7019_v4 }
 0x2e2   :  { %4101 = vrot.lane.b32.xlu1 %v8067_v52, %s7043_s12  ;;  %3041 = vmatpush1.bf16.msra.mxu1 %v2931_v37 }
 0x2e3   :  { %v2926_v51 = vpop.permute.xlu0 %2925  ;;  %3072 = vmatprep.mubr.bf16.mxu1 %v7038_v18  ;;  %v6982_v31 = vpop.permute.xlu1 %6981 }
 0x2e4   :  { %v2938_v34 = vsel %vm9064_vm4, %v2924_v61, %v2926_v51  ;;  %v6983_v36 = vunpack.i.l.bf16 %v6982_v31  ;;  %v6984_v56 = vunpack.i.h.bf16 %v6982_v31  ;;  %vm8576_vm4 = vmpackc.low %vm2620_vm12, %vm2620_vm12 }
 0x2e5   :  { %4093 = vrot.lane.b32.xlu0 %v8108_v12, %s7043_s12  ;;  %3042 = vmatprep.subr.bf16.mxu1 %v2938_v34 }
 0x2e6   :  { %4095 = vrot.lane.b32.xlu1 %v8159_v32, %s7043_s12  ;;  %3043 = vmatpush1.bf16.msra.mxu1 %v2937_v33  ;;  %v3119_v54 = vsel %vm9062_vm1, %v6983_v36, %v3094_v57 }
 0x2e7   :  { %v3108_v6 = vpop.permute.xlu0 %3107  ;;  %v3110_v16 = vpop.permute.xlu1 %3109  ;;  %3146 = vmatprep.subr.bf16.mxu1 %v3120_v44 }
 0x2e8   :  { %v3126_v58 = vsel %vm9062_vm1, %v3108_v6, %v3110_v16  ;;  %v3125_v51 = vsel %vm9062_vm1, %v6984_v56, %v3108_v6 }
 0x2e9   :  { %4107 = vrot.lane.b32.xlu0 %v8193_v11, %s7043_s12  ;;  %6410 = vmatmul.mubr.msk.bf16.vlgmr.msra.gmra.mrb[32].mxu1 %vm211_vm2, %v7019_v4  ;;  %v7020_v4 = vld [vmem:[%s9055_s4 + $0x10] sm:$0xff]  }
 0x2ea   :  { %4109 = vrot.lane.b32.xlu1 %v8228_v5, %s7043_s12  ;;  %3147 = vmatpush1.bf16.msra.mxu1 %v3119_v54 }
 0x2eb   :  { %v3098_v37 = vpop.permute.xlu0 %3097  ;;  %3178 = vmatprep.mubr.bf16.mxu1 %v7038_v18  ;;  %v3100_v61 = vpop.permute.xlu1 %3099  ;;  %3148 = vmatprep.subr.bf16.mxu1 %v3126_v58 }
 0x2ec   :  { %v3122_v31 = vsel %vm9062_vm1, %v3098_v37, %v3100_v61  ;;  %v3121_v36 = vsel %vm9062_vm1, %v3096_v27, %v3098_v37 }
 0x2ed   :  { %4097 = vrot.lane.b32.xlu0 %v8161_v62, %s7043_s12 }
 0x2ee   :  { %6996 = vrot.lane.b32.xlu1 %v7038_v18, %s7043_s12  ;;  %3149 = vmatpush1.bf16.msra.mxu1 %v3125_v51 }
 0x2ef   :  { %v3112_v57 = vpop.permute.xlu0 %3111  ;;  %v3114_v34 = vpop.permute.xlu1 %3113  ;;  %3189 = vmatprep.subr.bf16.mxu1 %v3122_v31 }
 0x2f0   :  { %v3128_v6 = vsel %vm9062_vm1, %v3112_v57, %v3114_v34 }
 0x2f1   :  { %4295 = vrot.lane.b32.xlu0 %v8106_v29, %s7044_s20  ;;  %6414 = vmatmul.mubr.msk.bf16.vlgmr.msra.gmra.mrb[24].mxu1 %vm211_vm2, %v7020_v4 }
 0x2f2   :  { %4293 = vrot.lane.b32.xlu1 %v8010_v25, %s7044_s20  ;;  %3190 = vmatpush1.bf16.msra.mxu1 %v3121_v36  ;;  %v3127_v25 = vsel %vm9062_vm1, %v3110_v16, %v3112_v57  ;;  %v4487_v36 = vld [vmem:[%s9056_s5] sm:$0xff] }
 0x2f3   :  { %v3102_v33 = vpop.permute.xlu0 %3101  ;;  %3221 = vmatprep.mubr.bf16.mxu1 %v7038_v18  ;;  %v3104_v44 = vpop.permute.xlu1 %3103  ;;  %3191 = vmatprep.subr.bf16.mxu1 %v3128_v6 }
 0x2f4   :  { %v3124_v27 = vsel %vm9062_vm1, %v3102_v33, %v3104_v44  ;;  %v3123_v54 = vsel %vm9062_vm1, %v3100_v61, %v3102_v33 }
 0x2f5   :  { %4111 = vrot.lane.b32.xlu0 %v8230_v22, %s7043_s12 }
 0x2f6   :  { %4291 = vrot.lane.b32.xlu1 %v8003_v24, %s7044_s20  ;;  %3192 = vmatpush1.bf16.msra.mxu1 %v3127_v25 }
 0x2f7   :  { %v3116_v29 = vpop.permute.xlu0 %3115  ;;  %v3300_v56 = vpop.permute.xlu1 %3299  ;;  %3232 = vmatprep.subr.bf16.mxu1 %v3124_v27 }
 0x2f9   :  { %4307 = vrot.lane.b32.xlu0 %v8077_v8, %s7044_s20  ;;  %6415 = vmatmul.mubr.msk.bf16.vlgmr.msra.gmra.mrb[28].mxu1 %vm211_vm2, %v7020_v4  ;;  %v3129_v8 = vsel %vm9062_vm1, %v3114_v34, %v3116_v29 }
 0x2fa   :  { %4309 = vrot.lane.b32.xlu1 %v8175_v7, %s7044_s20  ;;  %3233 = vmatpush1.bf16.msra.mxu1 %v3123_v54  ;;  %v4512_v54 = vld [vmem:[%s9057_s6 + $0x8] sm:$0xff] }
 0x2fb   :  { %v3298_v37 = vpop.permute.xlu0 %3297  ;;  %3264 = vmatprep.mubr.bf16.mxu1 %v7038_v18  ;;  %v3118_v24 = vpop.permute.xlu1 %3117 }
 0x2fc   :  { %v3130_v16 = vsel %vm9062_vm1, %v3116_v29, %v3118_v24  ;;  %v3324_v58 = vsel %vm9063_vm3, %v3298_v37, %v3300_v56  ;;  %v4511_v29 = vld [vmem:[%s9057_s6] sm:$0xff]  ;;  %vm8537_vm1 = vmpackc.low %vm2618_vm10, %vm2618_vm10 }
 0x2fd   :  { %4305 = vrot.lane.b32.xlu0 %v8067_v52, %s7044_s20  ;;  %3234 = vmatprep.subr.bf16.mxu1 %v3130_v16 }
 0x2fe   :  { %4297 = vrot.lane.b32.xlu1 %v8108_v12, %s7044_s20  ;;  %3235 = vmatpush1.bf16.msra.mxu1 %v3129_v8 }
 0x2ff   :  { %v3296_v7 = vpop.permute.xlu0 %3295  ;;  %v3312_v61 = vpop.permute.xlu1 %3311  ;;  %3350 = vmatprep.subr.bf16.mxu1 %v3324_v58 }
 0x300   :  { %v3323_v51 = vsel %vm9063_vm3, %v3296_v7, %v3298_v37 }
 0x301   :  { %4299 = vrot.lane.b32.xlu0 %v8159_v32, %s7044_s20  ;;  %6416 = vmatmul.mubr.msk.bf16.vlgmr.msra.gmra.mrb[32].mxu1 %vm211_vm2, %v7020_v4  ;;  %v7021_v32 = vld [vmem:[%s9055_s4 + $0x18] sm:$0xff]  }
 0x302   :  { %4311 = vrot.lane.b32.xlu1 %v8193_v11, %s7044_s20  ;;  %3351 = vmatpush1.bf16.msra.mxu1 %v3323_v51 }
 0x303   :  { %v3314_v52 = vpop.permute.xlu0 %3313  ;;  %3382 = vmatprep.mubr.bf16.mxu1 %v7038_v18  ;;  %v3310_v12 = vpop.permute.xlu1 %3309 }
 0x304   :  { %v3330_v57 = vsel %vm9063_vm3, %v3312_v61, %v3314_v52  ;;  %v3329_v31 = vsel %vm9063_vm3, %v3310_v12, %v3312_v61 }
 0x305   :  { %4313 = vrot.lane.b32.xlu0 %v8228_v5, %s7044_s20  ;;  %3352 = vmatprep.subr.bf16.mxu1 %v3330_v57 }
 0x306   :  { %4301 = vrot.lane.b32.xlu1 %v8161_v62, %s7044_s20  ;;  %3353 = vmatpush1.bf16.msra.mxu1 %v3329_v31  ;;  %v7023_v31 = vld [vmem:[%s9055_s4 + $0x28] sm:$0xff]  }
 0x307   :  { %v3302_v11 = vpop.permute.xlu0 %3301  ;;  %v3304_v4 = vpop.permute.xlu1 %3303 }
 0x308   :  { %v3326_v34 = vsel %vm9063_vm3, %v3302_v11, %v3304_v4  ;;  %v3325_v62 = vsel %vm9063_vm3, %v3300_v56, %v3302_v11 }
 0x309   :  { %4303 = vrot.lane.b32.xlu0 %v7038_v18, %s7044_s20  ;;  %6420 = vmatmul.mubr.msk.bf16.vlgmr.msra.gmra.mrb[24].mxu1 %vm211_vm2, %v7021_v32 }
 0x30a   :  { %4315 = vrot.lane.b32.xlu1 %v8230_v22, %s7044_s20  ;;  %3393 = vmatprep.subr.bf16.mxu1 %v3326_v34  ;;  %v4488_v22 = vld [vmem:[%s9056_s5 + $0x8] sm:$0xff] }
 0x30b   :  { %v3316_v5 = vpop.permute.xlu0 %3315  ;;  %3425 = vmatprep.mubr.bf16.mxu1 %v7038_v18  ;;  %3394 = vmatpush1.bf16.msra.mxu1 %v3325_v62  ;;  %v3318_v33 = vpop.permute.xlu1 %3317 }
 0x30c   :  { %v3332_v6 = vsel %vm9063_vm3, %v3316_v5, %v3318_v33  ;;  %v3331_v25 = vsel %vm9063_vm3, %v3314_v52, %v3316_v5 }
 0x30d   :  { %4317 = vrot.lane.b32.xlu0 %v7038_v18, %s7044_s20  ;;  %3395 = vmatprep.subr.bf16.mxu1 %v3332_v6 }
 0x30e   :  { %4491 = vperm.xlu1 %6969, %v4487_v36  }
 0x30f   :  { %v3306_v44 = vpop.permute.xlu0 %3305  ;;  %3396 = vmatpush1.bf16.msra.mxu1 %v3331_v25  ;;  %v3308_v27 = vpop.permute.xlu1 %3307 }
 0x310   :  { %v3328_v56 = vsel %vm9063_vm3, %v3306_v44, %v3308_v27  ;;  %v3327_v24 = vsel %vm9063_vm3, %v3304_v4, %v3306_v44 }
 0x311   :  { %4496 = vperm.xlu0 %6968, %v4488_v22   ;;  %3436 = vmatprep.subr.bf16.mxu1 %v3328_v56 }
 0x312   :  { %4515 = vperm.xlu1 %6969, %v4511_v29   ;;  %6421 = vmatmul.mubr.msk.bf16.vlgmr.msra.gmra.mrb[28].mxu1 %vm211_vm2, %v7021_v32 }
 0x313   :  { %v3320_v37 = vpop.permute.xlu0 %3319  ;;  %3437 = vmatpush1.bf16.msra.mxu1 %v3327_v24  ;;  %v3322_v16 = vpop.permute.xlu1 %3321  ;;  %3468 = vmatprep.mubr.bf16.mxu1 %v7038_v18 }
 0x314   :  { %v3334_v8 = vsel %vm9063_vm3, %v3320_v37, %v3322_v16  ;;  %v3333_v61 = vsel %vm9063_vm3, %v3318_v33, %v3320_v37  ;;  %vm8556_vm3 = vmpackc.low %vm2621_vm13, %vm2621_vm13 }
 0x315   :  { %4520 = vperm.xlu0 %6968, %v4512_v54   ;;  %3438 = vmatprep.subr.bf16.mxu1 %v3334_v8 }
 0x317   :  { %v3682_v58 = vpop.permute.xlu0 %3681  ;;  %3439 = vmatpush1.bf16.msra.mxu1 %v3333_v61  ;;  %v3684_v51 = vpop.permute.xlu1 %3683 }
 0x318   :  { %6519 = vmatprep.subr.msk.bf16.mxu1 %vm8524_vm9, %v6518_v23  ;;  %v3708_v35 = vsel %vm1512_vm5, %v3682_v58, %v3684_v51 }
 0x31a   :  { %6422 = vmatmul.mubr.msk.bf16.vlgmr.msra.gmra.mrb[32].mxu1 %vm211_vm2, %v7021_v32 }
 0x31b   :  { %v3680_v12 = vpop.permute.xlu0 %3679  ;;  %6522 = vmatpush1.bf16.msk.msra.mxu1 %vm8537_vm1, %v6521_v21  ;;  %v3696_v0 = vpop.permute.xlu1 %3695  ;;  %3534 = vmatprep.mubr.bf16.mxu1 %v7038_v18 }
 0x31c   :  { %6525 = vmatprep.subr.msk.bf16.mxu1 %vm8524_vm9, %v6524_v60  ;;  %v3707_v3 = vsel %vm1512_vm5, %v3680_v12, %v3682_v58 }
 0x31f   :  { %v3698_v53 = vpop.permute.xlu0 %3697  ;;  %6528 = vmatpush1.bf16.msk.msra.mxu1 %vm8537_vm1, %v6527_v41  ;;  %v3694_v21 = vpop.permute.xlu1 %3693 }
 0x320   :  { %6531 = vmatprep.subr.msk.bf16.mxu1 %vm8556_vm3, %v6530_v28  ;;  %v3714_v57 = vsel %vm1512_vm5, %v3696_v0, %v3698_v53  ;;  %v3713_v40 = vsel %vm1512_vm5, %v3694_v21, %v3696_v0 }
 0x322   :  { %6426 = vmatmul.mubr.msk.bf16.vlgmr.msra.gmra.mrb[24].mxu1 %vm211_vm2, %v7022_v47 }
 0x323   :  { %v3686_v38 = vpop.permute.xlu0 %3685  ;;  %6534 = vmatpush1.bf16.msk.msra.mxu1 %vm8576_vm4, %v9075_v55  ;;  %v3688_v20 = vpop.permute.xlu1 %3687  ;;  %3577 = vmatprep.mubr.bf16.mxu1 %v7038_v18 }
 0x324   :  { %6537 = vmatprep.subr.msk.bf16.mxu1 %vm8556_vm3, %v9076_v17  ;;  %v3710_v11 = vsel %vm1512_vm5, %v3686_v38, %v3688_v20  ;;  %v3709_v34 = vsel %vm1512_vm5, %v3684_v51, %v3686_v38 }
 0x327   :  { %v3700_v50 = vpop.permute.xlu0 %3699  ;;  %6540 = vmatpush1.bf16.msk.msra.mxu1 %vm8576_vm4, %v9079_v59  ;;  %v3702_v60 = vpop.permute.xlu1 %3701 }
 0x328   :  { %6543 = vmatprep.subr.msk.bf16.mxu1 %vm8595_vm0, %v9080_v14  ;;  %v3716_v36 = vsel %vm1512_vm5, %v3700_v50, %v3702_v60  ;;  %v3715_v6 = vsel %vm1512_vm5, %v3698_v53, %v3700_v50 }
 0x32a   :  { %6427 = vmatmul.mubr.msk.bf16.vlgmr.msra.gmra.mrb[28].mxu1 %vm211_vm2, %v7022_v47 }
 0x32b   :  { %v3690_v28 = vpop.permute.xlu0 %3689  ;;  %6546 = vmatpush1.bf16.msk.msra.mxu1 %vm8612_vm15, %v9083_v10  ;;  %3620 = vmatprep.mubr.bf16.mxu1 %v7038_v18 }
 0x32c   :  { %v6987_v43 = vpop.permute.xlu1 %6986  ;;  %6549 = vmatprep.subr.msk.bf16.mxu1 %vm8595_vm0, %v9084_v26  ;;  %v3711_v27 = vsel %vm1512_vm5, %v3688_v20, %v3690_v28 }
 0x32d   :  { %v6988_v5 = vunpack.i.l.bf16 %v6987_v43  ;;  %v6989_v22 = vunpack.i.h.bf16 %v6987_v43 }
 0x32f   :  { %v8628_v42 = vpop.permute.xlu0 %3887  ;;  %6552 = vmatpush1.bf16.msk.msra.mxu1 %vm8612_vm15, %v9085_v15  ;;  %v3712_v25 = vsel %vm1512_vm5, %v3690_v28, %v6988_v5 }
 0x330   :  { %v3886_v19 = vpop.permute.xlu1 %3885  ;;  %3734 = vmatprep.subr.bf16.mxu1 %v3708_v35 }
 0x331   :  { %v3912_v8 = vsel %vm1769_vm6, %v3886_v19, %v8628_v42 }
 0x332   :  { %6428 = vmatmul.mubr.msk.bf16.vlgmr.msra.gmra.mrb[32].mxu1 %vm211_vm2, %v7022_v47  ;;  %v7024_v47 = vld [vmem:[%s9055_s4 + $0x30] sm:$0xff]  }
 0x333   :  { %v3900_v30 = vpop.permute.xlu0 %3899  ;;  %3735 = vmatpush1.bf16.msra.mxu1 %v3707_v3  ;;  %3766 = vmatprep.mubr.bf16.mxu1 %v7038_v18 }
 0x334   :  { %v3884_v1 = vpop.permute.xlu1 %3883  ;;  %3736 = vmatprep.subr.bf16.mxu1 %v3714_v57 }
 0x335   :  { %v3911_v58 = vsel %vm1769_vm6, %v3884_v1, %v3886_v19 }
 0x337   :  { %v3704_v63 = vpop.permute.xlu0 %3703  ;;  %3737 = vmatpush1.bf16.msra.mxu1 %v3713_v40 }
 0x338   :  { %v3902_v32 = vpop.permute.xlu1 %3901  ;;  %3777 = vmatprep.subr.bf16.mxu1 %v3710_v11  ;;  %v3718_v54 = vsel %vm1512_vm5, %v3704_v63, %v6989_v22  ;;  %v3717_v24 = vsel %vm1512_vm5, %v3702_v60, %v3704_v63 }
 0x339   :  { %v3918_v12 = vsel %vm1769_vm6, %v3900_v30, %v3902_v32 }
 0x33a   :  { %6432 = vmatmul.mubr.msk.bf16.vlgmr.msra.gmra.mrb[24].mxu1 %vm211_vm2, %v7023_v31 }
 0x33b   :  { %v3898_v4 = vpop.permute.xlu0 %3897  ;;  %3778 = vmatpush1.bf16.msra.mxu1 %v3709_v34  ;;  %3809 = vmatprep.mubr.bf16.mxu1 %v7038_v18 }
 0x33c   :  { %v3890_v62 = vpop.permute.xlu1 %3889  ;;  %3779 = vmatprep.subr.bf16.mxu1 %v3716_v36  ;;  %v3917_v0 = vsel %vm1769_vm6, %v3898_v4, %v3900_v30  ;;  %v7025_v4 = vld [vmem:[%s9055_s4 + $0x38] sm:$0xff]  }
 0x33d   :  { %v3913_v55 = vsel %vm1769_vm6, %v8628_v42, %v3890_v62 }
 0x33f   :  { %v3892_v33 = vpop.permute.xlu0 %3891  ;;  %3780 = vmatpush1.bf16.msra.mxu1 %v3715_v6 }
 0x340   :  { %v3904_v44 = vpop.permute.xlu1 %3903  ;;  %3820 = vmatprep.subr.bf16.mxu1 %v3712_v25  ;;  %v3914_v38 = vsel %vm1769_vm6, %v3890_v62, %v3892_v33 }
 0x341   :  { %v3919_v60 = vsel %vm1769_vm6, %v3902_v32, %v3904_v44 }
 0x342   :  { %6433 = vmatmul.mubr.msk.bf16.vlgmr.msra.gmra.mrb[28].mxu1 %vm211_vm2, %v7023_v31 }
 0x343   :  { %v3906_v29 = vpop.permute.xlu0 %3905  ;;  %3821 = vmatpush1.bf16.msra.mxu1 %v3711_v27  ;;  %3852 = vmatprep.mubr.bf16.mxu1 %v7038_v18 }
 0x344   :  { %v3894_v56 = vpop.permute.xlu1 %3893  ;;  %3822 = vmatprep.subr.bf16.mxu1 %v3718_v54  ;;  %v3920_v59 = vsel %vm1769_vm6, %v3904_v44, %v3906_v29 }
 0x345   :  { %v3915_v26 = vsel %vm1769_vm6, %v3892_v33, %v3894_v56 }
 0x347   :  { %v6992_v37 = vpop.permute.xlu0 %6991  ;;  %3823 = vmatpush1.bf16.msra.mxu1 %v3717_v24 }
 0x348   :  { %v8656_v16 = vpop.permute.xlu1 %4091  ;;  %3938 = vmatprep.subr.bf16.mxu1 %v3912_v8  ;;  %v6993_v17 = vunpack.i.l.bf16 %v6992_v37  ;;  %v6994_v28 = vunpack.i.h.bf16 %v6992_v37 }
 0x34a   :  { %6434 = vmatmul.mubr.msk.bf16.vlgmr.msra.gmra.mrb[32].mxu1 %vm211_vm2, %v7023_v31  ;;  %v3916_v43 = vsel %vm1769_vm6, %v3894_v56, %v6993_v17 }
 0x34b   :  { %v4090_v61 = vpop.permute.xlu0 %4089  ;;  %3939 = vmatpush1.bf16.msra.mxu1 %v3911_v58  ;;  %3970 = vmatprep.mubr.bf16.mxu1 %v7038_v18 }
 0x34c   :  { %v3908_v51 = vpop.permute.xlu1 %3907  ;;  %3940 = vmatprep.subr.bf16.mxu1 %v3918_v12  ;;  %v4116_v30 = vsel %vm2026_vm7, %v4090_v61, %v8656_v16 }
 0x34d   :  { %v3922_v19 = vsel %vm1769_vm6, %v3908_v51, %v6994_v28  ;;  %v3921_v35 = vsel %vm1769_vm6, %v3906_v29, %v3908_v51 }
 0x34f   :  { %v4088_v53 = vpop.permute.xlu0 %4087  ;;  %3941 = vmatpush1.bf16.msra.mxu1 %v3917_v0 }
 0x350   :  { %v4104_v21 = vpop.permute.xlu1 %4103  ;;  %3981 = vmatprep.subr.bf16.mxu1 %v3914_v38  ;;  %v4115_v57 = vsel %vm2026_vm7, %v4088_v53, %v4090_v61  ;;  %v7026_v53 = vld [vmem:[%s9055_s4 + $0x40] sm:$0xff]  }
 0x352   :  { %6438 = vmatmul.mubr.msk.bf16.vlgmr.msra.gmra.mrb[24].mxu1 %vm211_vm2, %v7024_v47 }
 0x353   :  { %v4106_v20 = vpop.permute.xlu0 %4105  ;;  %3982 = vmatpush1.bf16.msra.mxu1 %v3913_v55  ;;  %4013 = vmatprep.mubr.bf16.mxu1 %v7038_v18 }
 0x354   :  { %v4102_v50 = vpop.permute.xlu1 %4101  ;;  %3983 = vmatprep.subr.bf16.mxu1 %v3920_v59  ;;  %v4122_v63 = vsel %vm2026_vm7, %v4104_v21, %v4106_v20 }
 0x355   :  { %v4121_v31 = vsel %vm2026_vm7, %v4102_v50, %v4104_v21 }
 0x357   :  { %v4094_v14 = vpop.permute.xlu0 %4093  ;;  %3984 = vmatpush1.bf16.msra.mxu1 %v3919_v60 }
 0x358   :  { %v4096_v10 = vpop.permute.xlu1 %4095  ;;  %4024 = vmatprep.subr.bf16.mxu1 %v3916_v43  ;;  %v4117_v5 = vsel %vm2026_vm7, %v8656_v16, %v4094_v14 }
 0x359   :  { %v4118_v34 = vsel %vm2026_vm7, %v4094_v14, %v4096_v10 }
 0x35a   :  { %6439 = vmatmul.mubr.msk.bf16.vlgmr.msra.gmra.mrb[28].mxu1 %vm211_vm2, %v7024_v47 }
 0x35b   :  { %v4108_v42 = vpop.permute.xlu0 %4107  ;;  %4025 = vmatpush1.bf16.msra.mxu1 %v3915_v26  ;;  %4056 = vmatprep.mubr.bf16.mxu1 %v7038_v18 }
 0x35c   :  { %v4110_v15 = vpop.permute.xlu1 %4109  ;;  %4026 = vmatprep.subr.bf16.mxu1 %v3922_v19  ;;  %v4123_v22 = vsel %vm2026_vm7, %v4106_v20, %v4108_v42 }
 0x35d   :  { %v4124_v33 = vsel %vm2026_vm7, %v4108_v42, %v4110_v15 }
 0x35f   :  { %v4098_v3 = vpop.permute.xlu0 %4097  ;;  %4027 = vmatpush1.bf16.msra.mxu1 %v3921_v35 }
 0x360   :  { %v6997_v1 = vpop.permute.xlu1 %6996  ;;  %4142 = vmatprep.subr.bf16.mxu1 %v4116_v30  ;;  %v4119_v27 = vsel %vm2026_vm7, %v4096_v10, %v4098_v3 }
 0x361   :  { %v6998_v36 = vunpack.i.l.bf16 %v6997_v1  ;;  %v6999_v44 = vunpack.i.h.bf16 %v6997_v1 }
 0x362   :  { %6440 = vmatmul.mubr.msk.bf16.vlgmr.msra.gmra.mrb[32].mxu1 %vm211_vm2, %v7024_v47 }
 0x363   :  { %v4296_v40 = vpop.permute.xlu0 %4295  ;;  %4143 = vmatpush1.bf16.msra.mxu1 %v4115_v57  ;;  %4174 = vmatprep.mubr.bf16.mxu1 %v7038_v18  ;;  %v4120_v25 = vsel %vm2026_vm7, %v4098_v3, %v6998_v36 }
 0x364   :  { %4144 = vmatprep.subr.bf16.mxu1 %v4122_v63  ;;  %v4294_v32 = vpop.permute.xlu1 %4293 }
 0x365   :  { %v4320_v16 = vsel %vm2283_vm8, %v4294_v32, %v4296_v40 }
 0x367   :  { %v4112_v11 = vpop.permute.xlu0 %4111  ;;  %4145 = vmatpush1.bf16.msra.mxu1 %v4121_v31 }
 0x368   :  { %4185 = vmatprep.subr.bf16.mxu1 %v4118_v34  ;;  %v4292_v6 = vpop.permute.xlu1 %4291  ;;  %v4126_v54 = vsel %vm2026_vm7, %v4112_v11, %v6999_v44  ;;  %v4125_v37 = vsel %vm2026_vm7, %v4110_v15, %v4112_v11 }
 0x369   :  { %v4319_v58 = vsel %vm2283_vm8, %v4292_v6, %v4294_v32 }
 0x36a   :  { %6444 = vmatmul.mubr.msk.bf16.vlgmr.msra.gmra.mrb[24].mxu1 %vm211_vm2, %v7025_v4 }
 0x36b   :  { %v4308_v62 = vpop.permute.xlu0 %4307  ;;  %4186 = vmatpush1.bf16.msra.mxu1 %v4117_v5  ;;  %4217 = vmatprep.mubr.bf16.mxu1 %v7038_v18 }
 0x36c   :  { %4187 = vmatprep.subr.bf16.mxu1 %v4124_v33  ;;  %v4310_v56 = vpop.permute.xlu1 %4309 }
 0x36d   :  { %v4326_v61 = vsel %vm2283_vm8, %v4308_v62, %v4310_v56 }
 0x36f   :  { %4188 = vmatpush1.bf16.msra.mxu1 %v4123_v22  ;;  %v4306_v29 = vpop.permute.xlu0 %4305 }
 0x370   :  { %4228 = vmatprep.subr.bf16.mxu1 %v4120_v25  ;;  %v4298_v8 = vpop.permute.xlu1 %4297  ;;  %v4325_v12 = vsel %vm2283_vm8, %v4306_v29, %v4308_v62 }
 0x371   :  { %v4321_v21 = vsel %vm2283_vm8, %v4296_v40, %v4298_v8 }
 0x372   :  { %6445 = vmatmul.mubr.msk.bf16.vlgmr.msra.gmra.mrb[28].mxu1 %vm211_vm2, %v7025_v4 }
 0x373   :  { %4229 = vmatpush1.bf16.msra.mxu1 %v4119_v27  ;;  %4260 = vmatprep.mubr.bf16.mxu1 %v7038_v18  ;;  %v4300_v24 = vpop.permute.xlu0 %4299 }
 0x374   :  { %4230 = vmatprep.subr.bf16.mxu1 %v4126_v54  ;;  %v4312_v0 = vpop.permute.xlu1 %4311  ;;  %v4322_v47 = vsel %vm2283_vm8, %v4298_v8, %v4300_v24 }
 0x375   :  { %v4327_v17 = vsel %vm2283_vm8, %v4310_v56, %v4312_v0 }
 0x377   :  { %4231 = vmatpush1.bf16.msra.mxu1 %v4125_v37  ;;  %v4314_v51 = vpop.permute.xlu0 %4313 }
 0x378   :  { %4346 = vmatprep.subr.bf16.mxu1 %v4320_v16  ;;  %v4328_v55 = vsel %vm2283_vm8, %v4312_v0, %v4314_v51  ;;  %v4302_v20 = vpop.permute.xlu1 %4301 }
 0x379   :  { %v4323_v60 = vsel %vm2283_vm8, %v4300_v24, %v4302_v20 }
 0x37a   :  { %6446 = vmatmul.mubr.msk.bf16.vlgmr.msra.gmra.mrb[32].mxu1 %vm211_vm2, %v7025_v4 }
 0x37b   :  { %4347 = vmatpush1.bf16.msra.mxu1 %v4319_v58  ;;  %4378 = vmatprep.mubr.bf16.mxu1 %v7038_v18  ;;  %v4304_v38 = vpop.permute.xlu0 %4303 }
 0x37c   :  { %4348 = vmatprep.subr.bf16.mxu1 %v4326_v61  ;;  %v4324_v50 = vsel %vm2283_vm8, %v4302_v20, %v4304_v38  ;;  %v4316_v14 = vpop.permute.xlu1 %4315 }
 0x37d   :  { %v4329_v10 = vsel %vm2283_vm8, %v4314_v51, %v4316_v14 }
 0x37f   :  { %4349 = vmatpush1.bf16.msra.mxu1 %v4325_v12  ;;  %v4318_v59 = vpop.permute.xlu0 %4317 }
 0x380   :  { %4389 = vmatprep.subr.bf16.mxu1 %v4322_v47  ;;  %v4330_v28 = vsel %vm2283_vm8, %v4316_v14, %v4318_v59 }
 0x382   :  { %6450 = vmatmul.mubr.msk.bf16.vlgmr.msra.gmra.mrb[24].mxu1 %vm211_vm2, %v7026_v53 }
 0x383   :  { %4390 = vmatpush1.bf16.msra.mxu1 %v4321_v21  ;;  %4421 = vmatprep.mubr.bf16.mxu1 %v7038_v18 }
 0x384   :  { %4391 = vmatprep.subr.bf16.mxu1 %v4328_v55 }
 0x387   :  { %4392 = vmatpush1.bf16.msra.mxu1 %v4327_v17 }
 0x388   :  { %4432 = vmatprep.subr.bf16.mxu1 %v4324_v50 }
 0x38a   :  { %6451 = vmatmul.mubr.msk.bf16.vlgmr.msra.gmra.mrb[28].mxu1 %vm211_vm2, %v7026_v53 }
 0x38b   :  { %4433 = vmatpush1.bf16.msra.mxu1 %v4323_v60  ;;  %4464 = vmatprep.mubr.bf16.mxu1 %v7038_v18 }
 0x38c   :  { %4434 = vmatprep.subr.bf16.mxu1 %v4330_v28 }
 0x38d   :  { %v4492_v43 = vpop.permute.xlu1 %4491 }
 0x38f   :  { %4435 = vmatpush1.bf16.msra.mxu1 %v4329_v10 }
 0x390   :  { %v8726_v26 = vpop.permute.xlu0 %4496 }
 0x391   :  { %v4516_v35 = vpop.permute.xlu1 %4515 }
 0x392   :  { %6452 = vmatmul.mubr.msk.bf16.vlgmr.msra.gmra.mrb[32].mxu1 %vm211_vm2, %v7026_v53  ;;  %vm9086_vm2 = vcmp.eq.s32.totalorder %v8013_v46, 1  ;;  %v6151_v46 = vld [vmem:[%s9059_s8] sm:$0xff] }
 0x394   :  { %v4521_v63 = vpop.permute.xlu0 %4520 }
 0x455   :  { %v4380_v42 = vpop.f32.mrb[24].mxu1 }
 0x456   :  { %v4499_v15 = vmul.f32 %v4492_v43, %v4380_v42  ;;  %v4382_v19 = vpop.f32.mrb[25].mxu1 }
 0x457   :  { %v4500_v3 = vmul.f32 %v4492_v43, %v4382_v19  ;;  %v4384_v30 = vpop.f32.mrb[26].mxu1 }
 0x458   :  { %v4523_v1 = vadd.f32 %v4516_v35, %v4499_v15  ;;  %v4505_v57 = vmul.f32 %v8726_v26, %v4384_v30  ;;  %v4386_v40 = vpop.f32.mrb[27].mxu1 }
 0x459   :  { %v4524_v31 = vadd.f32 %v4516_v35, %v4500_v3  ;;  %v4506_v32 = vmul.f32 %v8726_v26, %v4386_v40 }
 0x45a   :  { %v4535_v11 = vmax.f32 %v4523_v1, 0.0  ;;  %v4529_v4 = vadd.f32 %v4521_v63, %v4505_v57 }
 0x45b   :  { %v4536_v34 = vmax.f32 %v4524_v31, 0.0  ;;  %v4530_v5 = vadd.f32 %v4521_v63, %v4506_v32 }
 0x45c   :  { %v4541_v62 = vmax.f32 %v4529_v4, 0.0  ;;  %v4547_v36 = vsel %vm2618_vm10, %v4535_v11, 0.0 }
 0x45d   :  { %v4548_v33 = vsel %vm2619_vm11, %v4536_v34, 0.0  ;;  %v4542_v6 = vmax.f32 %v4530_v5, 0.0  ;;  %v4423_v22 = vpop.f32.mrb[28].mxu1 }
 0x45e   :  { %v4553_v44 = vsel %vm2618_vm10, %v4541_v62, 0.0  ;;  %v8736_v25 = vpack.c.bf16 %v4541_v62, %v4535_v11  ;;  %v4501_v29 = vmul.f32 %v4492_v43, %v4423_v22  ;;  %v4425_v27 = vpop.f32.mrb[29].mxu1  ;;  %vm9087_vm10 = vmmov %vm9086_vm2 }
 0x45f   :  { %v8738_v56 = vpack.c.bf16 %v4553_v44, %v4547_v36  ;;  %v4554_v54 = vsel %vm2619_vm11, %v4542_v6, 0.0  ;;  %v8742_v37 = vpack.c.bf16 %v4542_v6, %v4536_v34  ;;  %v4502_v24 = vmul.f32 %v4492_v43, %v4425_v27  ;;  %v4427_v16 = vpop.f32.mrb[30].mxu1  ;;  %v6152_v44 = vld [vmem:[%s9059_s8 + $0x8] sm:$0xff]  ;;  %v6175_v27 = vld [vmem:[%s9060_s9] sm:$0xff] }
 0x460   :  { %v8744_v8 = vpack.c.bf16 %v4554_v54, %v4548_v33  ;;  %v4525_v58 = vadd.f32 %v4516_v35, %v4501_v29  ;;  %v4507_v61 = vmul.f32 %v8726_v26, %v4427_v16  ;;  %v4429_v39 = vpop.f32.mrb[31].mxu1  ;;  %vm9088_vm11 = vcmask 146432   ;;  %v7027_v54 = vld [vmem:[%s9058_s7 + $0x8] sm:$0xff]  }
 0x461   :  { %v4526_v51 = vadd.f32 %v4516_v35, %v4502_v24  ;;  %v4508_v12 = vmul.f32 %v8726_v26, %v4429_v39  ;;  %4597 = vrot.lane.b32.xlu1 %v8738_v56, %s7036_s29  ;;  %v6176_v24 = vld [vmem:[%s9060_s9 + $0x8] sm:$0xff] }
 0x462   :  { %v4537_v0 = vmax.f32 %v4525_v58, 0.0  ;;  %v4531_v53 = vadd.f32 %v4521_v63, %v4507_v61  ;;  %4599 = vrot.lane.b32.xlu0 %v8744_v8, %s7036_s29 }
 0x463   :  { %v4538_v49 = vmax.f32 %v4526_v51, 0.0  ;;  %v4532_v47 = vadd.f32 %v4521_v63, %v4508_v12 }
 0x464   :  { %v4543_v21 = vmax.f32 %v4531_v53, 0.0  ;;  %v4549_v38 = vsel %vm2620_vm12, %v4537_v0, 0.0 }
 0x465   :  { %v4544_v55 = vmax.f32 %v4532_v47, 0.0  ;;  %4595 = vrot.lane.b32.xlu1 %v7038_v18, %s7036_s29  ;;  %v4466_v20 = vpop.f32.mrb[32].mxu1  ;;  %v4550_v17 = vsel %vm2621_vm13, %v4538_v49, 0.0 }
 0x466   :  { %v4555_v50 = vsel %vm2620_vm12, %v4543_v21, 0.0  ;;  %v8760_v59 = vpack.c.bf16 %v4543_v21, %v4537_v0  ;;  %v4503_v60 = vmul.f32 %v4492_v43, %v4466_v20  ;;  %v4468_v14 = vpop.f32.mrb[33].mxu1  ;;  %vm9089_vm12 = vmmov %vm9088_vm11 }
 0x467   :  { %v8762_v28 = vpack.c.bf16 %v4555_v50, %v4549_v38  ;;  %v4556_v10 = vsel %vm2621_vm13, %v4544_v55, 0.0  ;;  %v8766_v42 = vpack.c.bf16 %v4544_v55, %v4538_v49  ;;  %v4504_v15 = vmul.f32 %v4492_v43, %v4468_v14  ;;  %v4470_v19 = vpop.f32.mrb[34].mxu1 }
 0x468   :  { %v8768_v3 = vpack.c.bf16 %v4556_v10, %v4550_v17  ;;  %v4527_v30 = vadd.f32 %v4516_v35, %v4503_v60  ;;  %v4509_v1 = vmul.f32 %v8726_v26, %v4470_v19  ;;  %v4472_v9 = vpop.f32.mrb[35].mxu1  ;;  %vm4621_vm13 = vcmask 130048   ;;  %v7028_v60 = vld [vmem:[%s9058_s7] sm:$0xff]  }
 0x469   :  { %v4528_v57 = vadd.f32 %v4516_v35, %v4504_v15  ;;  %v4510_v40 = vmul.f32 %v8726_v26, %v4472_v9  ;;  %4601 = vrot.lane.b32.xlu0 %v8762_v28, %s7036_s29 }
 0x46a   :  { %v4539_v31 = vmax.f32 %v4527_v30, 0.0  ;;  %v4533_v32 = vadd.f32 %v4521_v63, %v4509_v1  ;;  %4603 = vrot.lane.b32.xlu1 %v8768_v3, %s7036_s29 }
 0x46b   :  { %v4540_v48 = vmax.f32 %v4528_v57, 0.0  ;;  %v4534_v43 = vadd.f32 %v4521_v63, %v4510_v40 }
 0x46c   :  { %v4545_v11 = vmax.f32 %v4533_v32, 0.0  ;;  %v4551_v34 = vsel %vm2622_vm14, %v4539_v31, 0.0 }
 0x46d   :  { %v4546_v4 = vmax.f32 %v4534_v43, 0.0  ;;  %v4552_v26 = vsel %vm9086_vm2, %v4540_v48, 0.0  ;;  %vm9091_vm2 = vmmov %vm9088_vm11 }
 0x46e   :  { %v4557_v35 = vsel %vm2622_vm14, %v4545_v11, 0.0  ;;  %v8780_v5 = vpack.c.bf16 %v4545_v11, %v4539_v31  ;;  %vm9090_vm14 = vmmov %vm9088_vm11 }
 0x46f   :  { %v4563_v62 = vpack.c.bf16 %v4557_v35, %v4551_v34  ;;  %v4558_v36 = vsel %vm9087_vm10, %v4546_v4, 0.0  ;;  %v8786_v33 = vpack.c.bf16 %v4546_v4, %v4540_v48  ;;  %vm9092_vm10 = vmmov %vm9091_vm2  ;;  %v7029_v48 = vld [vmem:[%s9058_s7 + $0x10] sm:$0xff]  }
 0x470   :  { %v4564_v63 = vpack.c.bf16 %v4558_v36, %v4552_v26 }
 0x471   :  { %4605 = vrot.lane.b32.xlu0 %v4563_v62, %s7036_s29 }
 0x472   :  { %4607 = vrot.lane.b32.xlu1 %v4564_v63, %s7036_s29 }
 0x475   :  { %4761 = vrot.lane.b32.xlu0 %v8738_v56, %s7040_s16 }
 0x476   :  { %4763 = vrot.lane.b32.xlu1 %v8744_v8, %s7040_s16 }
 0x479   :  { %4759 = vrot.lane.b32.xlu0 %v7038_v18, %s7040_s16 }
 0x47a   :  { %4765 = vrot.lane.b32.xlu1 %v8762_v28, %s7040_s16 }
 0x47d   :  { %4767 = vrot.lane.b32.xlu0 %v8768_v3, %s7040_s16 }
 0x47e   :  { %4769 = vrot.lane.b32.xlu1 %v4563_v62, %s7040_s16 }
 0x481   :  { %4771 = vrot.lane.b32.xlu0 %v4564_v63, %s7040_s16 }
 0x482   :  { %4927 = vrot.lane.b32.xlu1 %v8738_v56, %s7037_s15 }
 0x485   :  { %4929 = vrot.lane.b32.xlu0 %v8744_v8, %s7037_s15 }
 0x486   :  { %4925 = vrot.lane.b32.xlu1 %v7038_v18, %s7037_s15 }
 0x489   :  { %4931 = vrot.lane.b32.xlu0 %v8762_v28, %s7037_s15 }
 0x48a   :  { %4933 = vrot.lane.b32.xlu1 %v8768_v3, %s7037_s15 }
 0x48d   :  { %4935 = vrot.lane.b32.xlu0 %v4563_v62, %s7037_s15 }
 0x48e   :  { %4937 = vrot.lane.b32.xlu1 %v4564_v63, %s7037_s15 }
 0x491   :  { %5105 = vrot.lane.b32.xlu0 %v8738_v56, %s7039_s14 }
 0x492   :  { %5107 = vrot.lane.b32.xlu1 %v8744_v8, %s7039_s14 }
 0x495   :  { %5103 = vrot.lane.b32.xlu0 %v7038_v18, %s7039_s14 }
 0x496   :  { %5109 = vrot.lane.b32.xlu1 %v8762_v28, %s7039_s14 }
 0x499   :  { %5111 = vrot.lane.b32.xlu0 %v8768_v3, %s7039_s14 }
 0x49a   :  { %5113 = vrot.lane.b32.xlu1 %v4563_v62, %s7039_s14 }
 0x49d   :  { %5115 = vrot.lane.b32.xlu0 %v4564_v63, %s7039_s14 }
 0x49e   :  { %5449 = vrot.lane.b32.xlu1 %v8744_v8, %s7041_s30 }
 0x4a1   :  { %5451 = vrot.lane.b32.xlu0 %v8762_v28, %s7041_s30 }
 0x4a2   :  { %5447 = vrot.lane.b32.xlu1 %v8738_v56, %s7041_s30 }
 0x4a5   :  { %5453 = vrot.lane.b32.xlu0 %v8768_v3, %s7041_s30 }
 0x4a6   :  { %5455 = vrot.lane.b32.xlu1 %v4563_v62, %s7041_s30 }
 0x4a9   :  { %5457 = vrot.lane.b32.xlu0 %v4564_v63, %s7041_s30 }
 0x4aa   :  { %5459 = vrot.lane.b32.xlu1 %v7038_v18, %s7041_s30 }
 0x4ad   :  { %5627 = vrot.lane.b32.xlu0 %v8744_v8, %s7042_s24 }
 0x4ae   :  { %5629 = vrot.lane.b32.xlu1 %v8762_v28, %s7042_s24 }
 0x4b1   :  { %5625 = vrot.lane.b32.xlu0 %v8738_v56, %s7042_s24 }
 0x4b2   :  { %5631 = vrot.lane.b32.xlu1 %v8768_v3, %s7042_s24 }
 0x4b5   :  { %5633 = vrot.lane.b32.xlu0 %v4563_v62, %s7042_s24 }
 0x4b6   :  { %5635 = vrot.lane.b32.xlu1 %v4564_v63, %s7042_s24 }
 0x4b9   :  { %5637 = vrot.lane.b32.xlu0 %v7038_v18, %s7042_s24 }
 0x4ba   :  { %5805 = vrot.lane.b32.xlu1 %v8744_v8, %s7043_s12 }
 0x4bd   :  { %5807 = vrot.lane.b32.xlu0 %v8762_v28, %s7043_s12 }
 0x4be   :  { %5803 = vrot.lane.b32.xlu1 %v8738_v56, %s7043_s12 }
 0x4c1   :  { %5809 = vrot.lane.b32.xlu0 %v8768_v3, %s7043_s12 }
 0x4c2   :  { %5811 = vrot.lane.b32.xlu1 %v4563_v62, %s7043_s12 }
 0x4c5   :  { %5813 = vrot.lane.b32.xlu0 %v4564_v63, %s7043_s12 }
 0x4c6   :  { %5815 = vrot.lane.b32.xlu1 %v7038_v18, %s7043_s12 }
 0x4c9   :  { %5983 = vrot.lane.b32.xlu0 %v8744_v8, %s7044_s20 }
 0x4ca   :  { %5985 = vrot.lane.b32.xlu1 %v8762_v28, %s7044_s20 }
 0x4cd   :  { %5981 = vrot.lane.b32.xlu0 %v8738_v56, %s7044_s20 }
 0x4ce   :  { %5987 = vrot.lane.b32.xlu1 %v8768_v3, %s7044_s20 }
 0x4d1   :  { %5989 = vrot.lane.b32.xlu0 %v4563_v62, %s7044_s20 }
 0x4d2   :  { %5991 = vrot.lane.b32.xlu1 %v4564_v63, %s7044_s20 }
 0x4d3   :  { %v4598_v2 = vpop.permute.xlu1 %4597 }
 0x4d4   :  { %v4600_v6 = vpop.permute.xlu0 %4599 }
 0x4d5   :  { %5993 = vrot.lane.b32.xlu0 %v7038_v18, %s7044_s20  ;;  %v4610_v22 = vsel %vm9088_vm11, %v4598_v2, %v4600_v6  ;;  %vm9093_vm11 = vmmov %vm9091_vm2 }
 0x4d6   :  { %4625 = vmatprep.subr.bf16.mxu0 %v4610_v22  ;;  %6155 = vperm.xlu1 %6969, %v6151_v46   ;;  %v7030_v22 = vld [vmem:[%s9058_s7 + $0x18] sm:$0xff]  }
 0x4d7   :  { %v4596_v29 = vpop.permute.xlu1 %4595 }
 0x4d8   :  { %v4609_v56 = vsel %vm9089_vm12, %v4596_v29, %v4598_v2  ;;  %vm9094_vm12 = vcmask 154624  }
 0x4d9   :  { %4626 = vmatpush1.bf16.msra.mxu0 %v4609_v56  ;;  %6160 = vperm.xlu0 %6968, %v6152_v44  }
 0x4da   :  { %6179 = vperm.xlu1 %6969, %v6175_v27  }
 0x4db   :  { %v4602_v16 = vpop.permute.xlu0 %4601 }
 0x4dc   :  { %6456 = vmatmul.mubr.msk.bf16.vlgmr.msra.gmra.mrb[16].mxu0 %vm4621_vm13, %v7027_v54  ;;  %v4604_v8 = vpop.permute.xlu1 %4603  ;;  %v4611_v61 = vsel %vm9091_vm2, %v4600_v6, %v4602_v16  ;;  %vm9096_vm2 = vmmov %vm9094_vm12 }
 0x4dd   :  { %6184 = vperm.xlu0 %6968, %v6176_v24   ;;  %v4612_v58 = vsel %vm9090_vm14, %v4602_v16, %v4604_v8  ;;  %4700 = vmatprep.mubr.bf16.mxu0 %v7038_v18  ;;  %vm9095_vm14 = vmmov %vm9094_vm12  ;;  %v7031_v24 = vld [vmem:[%s9058_s7 + $0x20] sm:$0xff]  }
 0x4de   :  { %4668 = vmatprep.subr.bf16.mxu0 %v4612_v58 }
 0x4df   :  { %4669 = vmatpush1.bf16.msra.mxu0 %v4611_v61 }
 0x4e3   :  { %v4606_v39 = vpop.permute.xlu0 %4605 }
 0x4e4   :  { %6457 = vmatmul.mubr.msk.bf16.vlgmr.msra.gmra.mrb[20].mxu0 %vm4621_vm13, %v7027_v54  ;;  %v4608_v51 = vpop.permute.xlu1 %4607  ;;  %v4613_v0 = vsel %vm9093_vm11, %v4604_v8, %v4606_v39  ;;  %vm9098_vm11 = vmmov %vm9096_vm2 }
 0x4e5   :  { %v4614_v12 = vsel %vm9092_vm10, %v4606_v39, %v4608_v51  ;;  %4743 = vmatprep.mubr.bf16.mxu0 %v7038_v18  ;;  %vm9097_vm10 = vmmov %vm9096_vm2 }
 0x4e6   :  { %4711 = vmatprep.subr.bf16.mxu0 %v4614_v12 }
 0x4e7   :  { %v4762_v53 = vpop.permute.xlu0 %4761  ;;  %4712 = vmatpush1.bf16.msra.mxu0 %v4613_v0 }
 0x4e8   :  { %v4764_v49 = vpop.permute.xlu1 %4763 }
 0x4e9   :  { %v4774_v47 = vsel %vm9094_vm12, %v4762_v53, %v4764_v49  ;;  %vm9099_vm12 = vmmov %vm9096_vm2 }
 0x4ea   :  { %4788 = vmatprep.subr.bf16.mxu0 %v4774_v47 }
 0x4eb   :  { %v4760_v21 = vpop.permute.xlu0 %4759 }
 0x4ec   :  { %v4773_v38 = vsel %vm9095_vm14, %v4760_v21, %v4762_v53  ;;  %6458 = vmatmul.mubr.msk.bf16.vlgmr.msra.gmra.mrb[24].mxu0 %vm4621_vm13, %v7027_v54  ;;  %v4766_v55 = vpop.permute.xlu1 %4765  ;;  %vm9100_vm14 = vcmask 138240   ;;  %v7033_v21 = vld [vmem:[%s9058_s7 + $0x30] sm:$0xff]  }
 0x4ed   :  { %4789 = vmatpush1.bf16.msra.mxu0 %v4773_v38  ;;  %4820 = vmatprep.mubr.bf16.mxu0 %v7038_v18  ;;  %v4775_v28 = vsel %vm9097_vm10, %v4764_v49, %v4766_v55 }
 0x4ef   :  { %v4768_v20 = vpop.permute.xlu0 %4767 }
 0x4f0   :  { %v4770_v17 = vpop.permute.xlu1 %4769  ;;  %v4776_v50 = vsel %vm9096_vm2, %v4766_v55, %v4768_v20  ;;  %vm9101_vm2 = vmmov %vm9100_vm14 }
 0x4f1   :  { %4831 = vmatprep.subr.bf16.mxu0 %v4776_v50  ;;  %v4777_v3 = vsel %vm9099_vm12, %v4768_v20, %v4770_v17  ;;  %vm9102_vm10 = vmmov %vm9101_vm2 }
 0x4f2   :  { %vm9104_vm12 = vmmov %vm9101_vm2 }
 0x4f3   :  { %v4772_v14 = vpop.permute.xlu0 %4771 }
 0x4f4   :  { %6460 = vmatmul.mubr.msk.bf16.vlgmr.msra.gmra.mrb[16].mxu0 %vm4621_vm13, %v7028_v60  ;;  %v4778_v10 = vsel %vm9098_vm11, %v4770_v17, %v4772_v14  ;;  %v4928_v15 = vpop.permute.xlu1 %4927  ;;  %vm9103_vm11 = vmmov %vm9101_vm2 }
 0x4f5   :  { %4832 = vmatpush1.bf16.msra.mxu0 %v4775_v28  ;;  %4863 = vmatprep.mubr.bf16.mxu0 %v7038_v18 }
 0x4f6   :  { %4874 = vmatprep.subr.bf16.mxu0 %v4778_v10 }
 0x4f7   :  { %v4930_v19 = vpop.permute.xlu0 %4929 }
 0x4f8   :  { %v4926_v30 = vpop.permute.xlu1 %4925  ;;  %v4940_v1 = vsel %vm9100_vm14, %v4928_v15, %v4930_v19  ;;  %vm9105_vm14 = vmmov %vm9101_vm2 }
 0x4f9   :  { %v4939_v40 = vsel %vm9101_vm2, %v4926_v30, %v4928_v15  ;;  %vm9106_vm2 = vcmask 7168  }
 0x4fb   :  { %v4932_v9 = vpop.permute.xlu0 %4931 }
 0x4fc   :  { %6461 = vmatmul.mubr.msk.bf16.vlgmr.msra.gmra.mrb[20].mxu0 %vm4621_vm13, %v7028_v60  ;;  %v4934_v57 = vpop.permute.xlu1 %4933  ;;  %v4941_v11 = vsel %vm9103_vm11, %v4930_v19, %v4932_v9  ;;  %vm9108_vm11 = vmmov %vm9106_vm2 }
 0x4fd   :  { %4875 = vmatpush1.bf16.msra.mxu0 %v4777_v3  ;;  %4906 = vmatprep.mubr.bf16.mxu0 %v7038_v18  ;;  %v4942_v31 = vsel %vm9102_vm10, %v4932_v9, %v4934_v57  ;;  %vm9107_vm10 = vmmov %vm9106_vm2 }
 0x4fe   :  { %4954 = vmatprep.subr.bf16.mxu0 %v4940_v1  ;;  %v7034_v1 = vld [vmem:[%s9058_s7 + $0x38] sm:$0xff]  }
 0x4ff   :  { %v4936_v32 = vpop.permute.xlu0 %4935 }
 0x500   :  { %v4938_v43 = vpop.permute.xlu1 %4937  ;;  %v4943_v26 = vsel %vm9105_vm14, %v4934_v57, %v4936_v32  ;;  %vm9110_vm14 = vmmov %vm9106_vm2 }
 0x501   :  { %v4944_v4 = vsel %vm9104_vm12, %v4936_v32, %v4938_v43  ;;  %vm9109_vm12 = vmmov %vm9106_vm2 }
 0x503   :  { %v5106_v34 = vpop.permute.xlu0 %5105 }
 0x504   :  { %6462 = vmatmul.mubr.msk.bf16.vlgmr.msra.gmra.mrb[24].mxu0 %vm4621_vm13, %v7028_v60  ;;  %v5108_v35 = vpop.permute.xlu1 %5107 }
 0x505   :  { %4955 = vmatpush1.bf16.msra.mxu0 %v4939_v40  ;;  %4986 = vmatprep.mubr.bf16.mxu0 %v7038_v18  ;;  %v5118_v36 = vsel %vm9106_vm2, %v5106_v34, %v5108_v35 }
 0x506   :  { %4997 = vmatprep.subr.bf16.mxu0 %v4942_v31 }
 0x507   :  { %v5104_v62 = vpop.permute.xlu0 %5103 }
 0x508   :  { %v5117_v2 = vsel %vm9107_vm10, %v5104_v62, %v5106_v34  ;;  %v5110_v46 = vpop.permute.xlu1 %5109  ;;  %v7035_v62 = vld [vmem:[%s9058_s7 + $0x40] sm:$0xff]  }
 0x509   :  { %v5119_v29 = vsel %vm9109_vm12, %v5108_v35, %v5110_v46 }
 0x50b   :  { %v5112_v63 = vpop.permute.xlu0 %5111 }
 0x50c   :  { %6466 = vmatmul.mubr.msk.bf16.vlgmr.msra.gmra.mrb[16].mxu0 %vm4621_vm13, %v7029_v48  ;;  %v5120_v6 = vsel %vm9108_vm11, %v5110_v46, %v5112_v63  ;;  %v5114_v27 = vpop.permute.xlu1 %5113 }
 0x50d   :  { %4998 = vmatpush1.bf16.msra.mxu0 %v4941_v11  ;;  %5029 = vmatprep.mubr.bf16.mxu0 %v7038_v18  ;;  %v5121_v54 = vsel %vm9106_vm2, %v5112_v63, %v5114_v27 }
 0x50e   :  { %5040 = vmatprep.subr.bf16.mxu0 %v4944_v4 }
 0x50f   :  { %v5116_v44 = vpop.permute.xlu0 %5115 }
 0x510   :  { %v5122_v56 = vsel %vm9110_vm14, %v5114_v27, %v5116_v44  ;;  %v5450_v7 = vpop.permute.xlu1 %5449 }
 0x513   :  { %v5452_v52 = vpop.permute.xlu0 %5451 }
 0x514   :  { %6467 = vmatmul.mubr.msk.bf16.vlgmr.msra.gmra.mrb[20].mxu0 %vm4621_vm13, %v7029_v48  ;;  %v5448_v13 = vpop.permute.xlu1 %5447 }
 0x515   :  { %5041 = vmatpush1.bf16.msra.mxu0 %v4943_v26  ;;  %5072 = vmatprep.mubr.bf16.mxu0 %v7038_v18 }
 0x516   :  { %5132 = vmatprep.subr.bf16.mxu0 %v5118_v36 }
 0x517   :  { %v5454_v23 = vpop.permute.xlu0 %5453 }
 0x51c   :  { %6468 = vmatmul.mubr.msk.bf16.vlgmr.msra.gmra.mrb[24].mxu0 %vm4621_vm13, %v7029_v48 }
 0x51d   :  { %5133 = vmatpush1.bf16.msra.mxu0 %v5117_v2  ;;  %5164 = vmatprep.mubr.bf16.mxu0 %v7038_v18 }
 0x51e   :  { %5175 = vmatprep.subr.bf16.mxu0 %v5120_v6 }
 0x524   :  { %6472 = vmatmul.mubr.msk.bf16.vlgmr.msra.gmra.mrb[16].mxu0 %vm4621_vm13, %v7030_v22 }
 0x525   :  { %5176 = vmatpush1.bf16.msra.mxu0 %v5119_v29  ;;  %5207 = vmatprep.mubr.bf16.mxu0 %v7038_v18 }
 0x526   :  { %5218 = vmatprep.subr.bf16.mxu0 %v5122_v56 }
 0x52c   :  { %6473 = vmatmul.mubr.msk.bf16.vlgmr.msra.gmra.mrb[20].mxu0 %vm4621_vm13, %v7030_v22 }
 0x52d   :  { %5219 = vmatpush1.bf16.msra.mxu0 %v5121_v54  ;;  %5250 = vmatprep.mubr.bf16.mxu0 %v7038_v18 }
 0x52e   :  { %6555 = vmatprep.subr.msk.bf16.mxu0 %vm8524_vm9, %v8742_v37  ;;  %v5456_v37 = vpop.permute.xlu1 %5455 }
 0x52f   :  { %v5464_v41 = vsel %vm1512_vm5, %v5454_v23, %v5456_v37 }
 0x534   :  { %6474 = vmatmul.mubr.msk.bf16.vlgmr.msra.gmra.mrb[24].mxu0 %vm4621_vm13, %v7030_v22 }
 0x535   :  { %6558 = vmatpush1.bf16.msk.msra.mxu0 %vm8537_vm1, %v8736_v25  ;;  %5316 = vmatprep.mubr.bf16.mxu0 %v7038_v18  ;;  %v5462_v25 = vsel %vm1512_vm5, %v5450_v7, %v5452_v52 }
 0x536   :  { %6561 = vmatprep.subr.msk.bf16.mxu0 %vm8556_vm3, %v8766_v42  ;;  %v5458_v42 = vpop.permute.xlu0 %5457 }
 0x537   :  { %v5465_v61 = vsel %vm1512_vm5, %v5456_v37, %v5458_v42 }
 0x53a   :  { %v5628_v8 = vpop.permute.xlu0 %5627 }
 0x53c   :  { %6478 = vmatmul.mubr.msk.bf16.vlgmr.msra.gmra.mrb[16].mxu0 %vm4621_vm13, %v7031_v24 }
 0x53d   :  { %6564 = vmatpush1.bf16.msk.msra.mxu0 %vm8576_vm4, %v8760_v59  ;;  %5359 = vmatprep.mubr.bf16.mxu0 %v7038_v18  ;;  %v5461_v59 = vsel %vm1512_vm5, %v5448_v13, %v5450_v7 }
 0x53e   :  { %6567 = vmatprep.subr.msk.bf16.mxu0 %vm8595_vm0, %v8786_v33  ;;  %v5463_v33 = vsel %vm1512_vm5, %v5452_v52, %v5454_v23  ;;  %v5626_v39 = vpop.permute.xlu0 %5625 }
 0x53f   :  { %v5639_v53 = vsel %vm1769_vm6, %v5626_v39, %v5628_v8 }
 0x542   :  { %v5634_v0 = vpop.permute.xlu0 %5633 }
 0x544   :  { %6479 = vmatmul.mubr.msk.bf16.vlgmr.msra.gmra.mrb[20].mxu0 %vm4621_vm13, %v7031_v24 }
 0x545   :  { %6570 = vmatpush1.bf16.msk.msra.mxu0 %vm8612_vm15, %v8780_v5  ;;  %5402 = vmatprep.mubr.bf16.mxu0 %v7038_v18  ;;  %v5460_v5 = vpop.permute.xlu1 %5459 }
 0x546   :  { %5476 = vmatprep.subr.bf16.mxu0 %v5462_v25  ;;  %v5466_v16 = vsel %vm1512_vm5, %v5458_v42, %v5460_v5  ;;  %v5638_v38 = vpop.permute.xlu0 %5637 }
 0x549   :  { %v5630_v58 = vpop.permute.xlu1 %5629 }
 0x54a   :  { %v5640_v51 = vsel %vm1769_vm6, %v5628_v8, %v5630_v58  ;;  %v5808_v50 = vpop.permute.xlu0 %5807 }
 0x54c   :  { %6480 = vmatmul.mubr.msk.bf16.vlgmr.msra.gmra.mrb[24].mxu0 %vm4621_vm13, %v7031_v24 }
 0x54d   :  { %5477 = vmatpush1.bf16.msra.mxu0 %v5461_v59  ;;  %5508 = vmatprep.mubr.bf16.mxu0 %v7038_v18  ;;  %v5632_v12 = vpop.permute.xlu1 %5631 }
 0x54e   :  { %5519 = vmatprep.subr.bf16.mxu0 %v5464_v41  ;;  %v5642_v49 = vsel %vm1769_vm6, %v5632_v12, %v5634_v0  ;;  %v5641_v55 = vsel %vm1769_vm6, %v5630_v58, %v5632_v12  ;;  %v5810_v10 = vpop.permute.xlu0 %5809 }
 0x54f   :  { %v5819_v57 = vsel %vm2026_vm7, %v5808_v50, %v5810_v10 }
 0x551   :  { %v5636_v47 = vpop.permute.xlu1 %5635 }
 0x552   :  { %v5644_v20 = vsel %vm1769_vm6, %v5636_v47, %v5638_v38  ;;  %v5643_v60 = vsel %vm1769_vm6, %v5634_v0, %v5636_v47  ;;  %v5814_v30 = vpop.permute.xlu0 %5813 }
 0x554   :  { %6484 = vmatmul.mubr.msk.bf16.vlgmr.msra.gmra.mrb[16].mxu0 %vm4621_vm13, %v7032_v45 }
 0x555   :  { %5520 = vmatpush1.bf16.msra.mxu0 %v5463_v33  ;;  %5551 = vmatprep.mubr.bf16.mxu0 %v7038_v18  ;;  %v5806_v17 = vpop.permute.xlu1 %5805 }
 0x556   :  { %5562 = vmatprep.subr.bf16.mxu0 %v5466_v16  ;;  %v5818_v28 = vsel %vm2026_vm7, %v5806_v17, %v5808_v50  ;;  %v5984_v31 = vpop.permute.xlu0 %5983 }
 0x559   :  { %v5804_v14 = vpop.permute.xlu1 %5803 }
 0x55a   :  { %v5817_v19 = vsel %vm2026_vm7, %v5804_v14, %v5806_v17  ;;  %v5982_v43 = vpop.permute.xlu0 %5981 }
 0x55b   :  { %v5995_v34 = vsel %vm2283_vm8, %v5982_v43, %v5984_v31 }
 0x55c   :  { %6485 = vmatmul.mubr.msk.bf16.vlgmr.msra.gmra.mrb[20].mxu0 %vm4621_vm13, %v7032_v45 }
 0x55d   :  { %5563 = vmatpush1.bf16.msra.mxu0 %v5465_v61  ;;  %5594 = vmatprep.mubr.bf16.mxu0 %v7038_v18  ;;  %v5812_v15 = vpop.permute.xlu1 %5811 }
 0x55e   :  { %5654 = vmatprep.subr.bf16.mxu0 %v5640_v51  ;;  %v5820_v3 = vsel %vm2026_vm7, %v5810_v10, %v5812_v15  ;;  %v5821_v48 = vsel %vm2026_vm7, %v5812_v15, %v5814_v30  ;;  %v5990_v4 = vpop.permute.xlu0 %5989 }
 0x561   :  { %v5816_v9 = vpop.permute.xlu1 %5815 }
 0x562   :  { %v5822_v40 = vsel %vm2026_vm7, %v5814_v30, %v5816_v9  ;;  %v5994_v36 = vpop.permute.xlu0 %5993 }
 0x564   :  { %6486 = vmatmul.mubr.msk.bf16.vlgmr.msra.gmra.mrb[24].mxu0 %vm4621_vm13, %v7032_v45 }
 0x565   :  { %5655 = vmatpush1.bf16.msra.mxu0 %v5639_v53  ;;  %5686 = vmatprep.mubr.bf16.mxu0 %v7038_v18  ;;  %v5986_v32 = vpop.permute.xlu1 %5985 }
 0x566   :  { %5697 = vmatprep.subr.bf16.mxu0 %v5642_v49  ;;  %v5996_v11 = vsel %vm2283_vm8, %v5984_v31, %v5986_v32  ;;  %v6161_v44 = vpop.permute.xlu0 %6160 }
 0x569   :  { %v5988_v35 = vpop.permute.xlu1 %5987 }
 0x56a   :  { %v5998_v26 = vsel %vm2283_vm8, %v5988_v35, %v5990_v4  ;;  %v5997_v63 = vsel %vm2283_vm8, %v5986_v32, %v5988_v35  ;;  %v6185_v23 = vpop.permute.xlu0 %6184 }
 0x56c   :  { %6490 = vmatmul.mubr.msk.bf16.vlgmr.msra.gmra.mrb[16].mxu0 %vm4621_vm13, %v7033_v21 }
 0x56d   :  { %5698 = vmatpush1.bf16.msra.mxu0 %v5641_v55  ;;  %5729 = vmatprep.mubr.bf16.mxu0 %v7038_v18  ;;  %v5992_v2 = vpop.permute.xlu1 %5991 }
 0x56e   :  { %5740 = vmatprep.subr.bf16.mxu0 %v5644_v20  ;;  %v6000_v46 = vsel %vm2283_vm8, %v5992_v2, %v5994_v36  ;;  %v5999_v6 = vsel %vm2283_vm8, %v5990_v4, %v5992_v2 }
 0x571   :  { %v6156_v22 = vpop.permute.xlu1 %6155 }
 0x574   :  { %6491 = vmatmul.mubr.msk.bf16.vlgmr.msra.gmra.mrb[20].mxu0 %vm4621_vm13, %v7033_v21 }
 0x575   :  { %5741 = vmatpush1.bf16.msra.mxu0 %v5643_v60  ;;  %5772 = vmatprep.mubr.bf16.mxu0 %v7038_v18  ;;  %v6180_v54 = vpop.permute.xlu1 %6179 }
 0x576   :  { %5832 = vmatprep.subr.bf16.mxu0 %v5818_v28 }
 0x57c   :  { %6492 = vmatmul.mubr.msk.bf16.vlgmr.msra.gmra.mrb[24].mxu0 %vm4621_vm13, %v7033_v21 }
 0x57d   :  { %5833 = vmatpush1.bf16.msra.mxu0 %v5817_v19  ;;  %5864 = vmatprep.mubr.bf16.mxu0 %v7038_v18 }
 0x57e   :  { %5875 = vmatprep.subr.bf16.mxu0 %v5820_v3 }
 0x584   :  { %6496 = vmatmul.mubr.msk.bf16.vlgmr.msra.gmra.mrb[16].mxu0 %vm4621_vm13, %v7034_v1 }
 0x585   :  { %5876 = vmatpush1.bf16.msra.mxu0 %v5819_v57  ;;  %5907 = vmatprep.mubr.bf16.mxu0 %v7038_v18 }
 0x586   :  { %5918 = vmatprep.subr.bf16.mxu0 %v5822_v40 }
 0x58c   :  { %6497 = vmatmul.mubr.msk.bf16.vlgmr.msra.gmra.mrb[20].mxu0 %vm4621_vm13, %v7034_v1 }
 0x58d   :  { %5919 = vmatpush1.bf16.msra.mxu0 %v5821_v48  ;;  %5950 = vmatprep.mubr.bf16.mxu0 %v7038_v18 }
 0x58e   :  { %6010 = vmatprep.subr.bf16.mxu0 %v5996_v11 }
 0x594   :  { %6498 = vmatmul.mubr.msk.bf16.vlgmr.msra.gmra.mrb[24].mxu0 %vm4621_vm13, %v7034_v1 }
 0x595   :  { %6011 = vmatpush1.bf16.msra.mxu0 %v5995_v34  ;;  %6042 = vmatprep.mubr.bf16.mxu0 %v7038_v18 }
 0x596   :  { %6053 = vmatprep.subr.bf16.mxu0 %v5998_v26 }
 0x59c   :  { %6502 = vmatmul.mubr.msk.bf16.vlgmr.msra.gmra.mrb[16].mxu0 %vm4621_vm13, %v7035_v62 }
 0x59d   :  { %6054 = vmatpush1.bf16.msra.mxu0 %v5997_v63  ;;  %6085 = vmatprep.mubr.bf16.mxu0 %v7038_v18 }
 0x59e   :  { %6096 = vmatprep.subr.bf16.mxu0 %v6000_v46 }
 0x5a4   :  { %6503 = vmatmul.mubr.msk.bf16.vlgmr.msra.gmra.mrb[20].mxu0 %vm4621_vm13, %v7035_v62 }
 0x5a5   :  { %6097 = vmatpush1.bf16.msra.mxu0 %v5999_v6  ;;  %6128 = vmatprep.mubr.bf16.mxu0 %v7038_v18 }
 0x5ac   :  { %6504 = vmatmul.mubr.msk.bf16.vlgmr.msra.gmra.mrb[24].mxu0 %vm4621_vm13, %v7035_v62 }
 0x66f   :  { %v6044_v29 = vpop.f32.mrb[16].mxu0 }
 0x670   :  { %v6163_v27 = vmul.f32 %v6156_v22, %v6044_v29  ;;  %v6046_v56 = vpop.f32.mrb[17].mxu0 }
 0x671   :  { %v6164_v24 = vmul.f32 %v6156_v22, %v6046_v56  ;;  %v6048_v7 = vpop.f32.mrb[18].mxu0 }
 0x672   :  { %v6187_v52 = vadd.f32 %v6180_v54, %v6163_v27  ;;  %v6169_v13 = vmul.f32 %v6161_v44, %v6048_v7  ;;  %v6050_v25 = vpop.f32.mrb[19].mxu0 }
 0x673   :  { %v6188_v37 = vadd.f32 %v6180_v54, %v6164_v24  ;;  %v6170_v59 = vmul.f32 %v6161_v44, %v6050_v25 }
 0x674   :  { %v6199_v41 = vmax.f32 %v6187_v52, 0.0  ;;  %v6193_v42 = vadd.f32 %v6185_v23, %v6169_v13 }
 0x675   :  { %v6200_v45 = vmax.f32 %v6188_v37, 0.0  ;;  %v6194_v18 = vadd.f32 %v6185_v23, %v6170_v59 }
 0x676   :  { %v6205_v5 = vmax.f32 %v6193_v42, 0.0 }
 0x677   :  { %v6511_v33 = vpack.c.bf16 %v6200_v45, %v6199_v41  ;;  %v6206_v16 = vmax.f32 %v6194_v18, 0.0  ;;  %v6087_v8 = vpop.f32.mrb[20].mxu0 }
 0x678   :  { %v6165_v58 = vmul.f32 %v6156_v22, %v6087_v8  ;;  %v6089_v61 = vpop.f32.mrb[21].mxu0 }
 0x679   :  { %6247 = vst [vmem:[%s9061_s11] sm:$0xff] %v6511_v33  ;;  %v6514_v39 = vpack.c.bf16 %v6206_v16, %v6205_v5  ;;  %v6166_v51 = vmul.f32 %v6156_v22, %v6089_v61  ;;  %v6091_v12 = vpop.f32.mrb[22].mxu0 }
 0x67a   :  { %v6189_v0 = vadd.f32 %v6180_v54, %v6165_v58  ;;  %v6171_v53 = vmul.f32 %v6161_v44, %v6091_v12  ;;  %v6093_v49 = vpop.f32.mrb[23].mxu0 }
 0x67b   :  { %6250 = vst [vmem:[%s9061_s11 + $0x18] sm:$0xff] %v6514_v39  ;;  %v6190_v47 = vadd.f32 %v6180_v54, %v6166_v51  ;;  %v6172_v21 = vmul.f32 %v6161_v44, %v6093_v49 }
 0x67c   :  { %v6201_v38 = vmax.f32 %v6189_v0, 0.0  ;;  %v6195_v55 = vadd.f32 %v6185_v23, %v6171_v53 }
 0x67d   :  { %v6202_v20 = vmax.f32 %v6190_v47, 0.0  ;;  %v6196_v17 = vadd.f32 %v6185_v23, %v6172_v21 }
 0x67e   :  { %v6207_v50 = vmax.f32 %v6195_v55, 0.0 }
 0x67f   :  { %v6512_v60 = vpack.c.bf16 %v6202_v20, %v6201_v38  ;;  %v6208_v14 = vmax.f32 %v6196_v17, 0.0  ;;  %v6130_v28 = vpop.f32.mrb[24].mxu0 }
 0x680   :  { %v6167_v10 = vmul.f32 %v6156_v22, %v6130_v28  ;;  %v6132_v15 = vpop.f32.mrb[25].mxu0 }
 0x681   :  { %6248 = vst [vmem:[%s9061_s11 + $0x8] sm:$0xff] %v6512_v60  ;;  %v6515_v19 = vpack.c.bf16 %v6208_v14, %v6207_v50  ;;  %v6168_v3 = vmul.f32 %v6156_v22, %v6132_v15  ;;  %v6134_v30 = vpop.f32.mrb[26].mxu0 }
 0x682   :  { %v6191_v1 = vadd.f32 %v6180_v54, %v6167_v10  ;;  %v6173_v9 = vmul.f32 %v6161_v44, %v6134_v30  ;;  %v6136_v57 = vpop.f32.mrb[27].mxu0 }
 0x683   :  { %6251 = vst [vmem:[%s9061_s11 + $0x20] sm:$0xff] %v6515_v19  ;;  %v6192_v40 = vadd.f32 %v6180_v54, %v6168_v3  ;;  %v6174_v31 = vmul.f32 %v6161_v44, %v6136_v57 }
 0x684   :  { %v6203_v32 = vmax.f32 %v6191_v1, 0.0  ;;  %v6197_v48 = vadd.f32 %v6185_v23, %v6173_v9 }
 0x685   :  { %v6204_v43 = vmax.f32 %v6192_v40, 0.0  ;;  %v6198_v11 = vadd.f32 %v6185_v23, %v6174_v31 }
 0x686   :  { %v6209_v4 = vmax.f32 %v6197_v48, 0.0 }
 0x687   :  { %v6513_v34 = vpack.c.bf16 %v6204_v43, %v6203_v32  ;;  %v6210_v35 = vmax.f32 %v6198_v11, 0.0 }
 0x689   :  { %6249 = vst [vmem:[%s9061_s11 + $0x10] sm:$0xff] %v6513_v34  ;;  %v6516_v26 = vpack.c.bf16 %v6210_v35, %v6209_v4 }
 0x68b   :  { %6252 = vst [vmem:[%s9061_s11 + $0x28] sm:$0xff] %v6516_v26 }

// kernel: spatial_decoder_pallas.3
= control target key start
LH: loop header
LB: loop body
LE: loop exit
PB: predicated region body
PF: predicated region fallthrough
CT: control target
= control target key end

     0   :  { %v17832_v1 = vmov 0   ;;  %s17833_s29 = smov 34   ;;  %s17834_s17 = smov 35   ;;  %vm22460_vm0 = vcmask 277504   ;;  %vm272_vm1 = vcmask 130048   ;;  %v22422_v59 = vmov 0.0   ;;  %s22400_s0 = inlined_call_operand.vmem [shape: bf16[16,2688], index: 0, kind: input, shape index: {}]   ;;  %s22401_s1 = inlined_call_operand.vmem [shape: bf16[9,16,16], index: 1, kind: input, shape index: {}]   ;;  %s22402_s2 = inlined_call_operand.vmem [shape: f32[16,1], index: 2, kind: input, shape index: {}]   ;;  %s22403_s3 = inlined_call_operand.vmem [shape: f32[16,1], index: 3, kind: input, shape index: {}]   ;;  %s22404_s12 = inlined_call_operand.vmem [shape: f32[1,2432], index: 12, kind: input, shape index: {}]   ;;  %s22405_s4 = inlined_call_operand.vmem [shape: bf16[9,8,16], index: 4, kind: input, shape index: {}]   ;;  %s22406_s5 = inlined_call_operand.vmem [shape: f32[8,1], index: 5, kind: input, shape index: {}]   ;;  %s22407_s6 = inlined_call_operand.vmem [shape: f32[8,1], index: 6, kind: input, shape index: {}]   ;;  %s22408_s7 = inlined_call_operand.vmem [shape: bf16[9,8,8], index: 7, kind: input, shape index: {}]   ;;  %s22409_s9 = inlined_call_operand.vmem [shape: f32[8,1], index: 9, kind: input, shape index: {}]   ;;  %s22410_s8 = inlined_call_operand.vmem [shape: f32[8,1], index: 8, kind: input, shape index: {}]   ;;  %s22411_s11 = inlined_call_operand.vmem [shape: f32[4,1], index: 11, kind: input, shape index: {}]   ;;  %s22412_s10 = inlined_call_operand.vmem [shape: bf16[4,8], index: 10, kind: input, shape index: {}]   ;;  %s22413_s13 = inlined_call_operand.vmem [shape: f32[4,2432], index: 13, kind: output, shape index: {}]  }
   0x1   :  { %v17916_v0 = vld [vmem:[%s22400_s0 + $0x4] ss:$84 sps:$4 sm:$0xff]   ;;  %308 = vmatprep.mubr.bf16.mxu0 %v17832_v1  ;;  %66 = vst [vmem:[#allocation3] sm:$0xff] %v17832_v1  ;;  %67 = vst [vmem:[#allocation3 + $0x8] sm:$0xff] %v17832_v1  ;;  %351 = vmatprep.mubr.bf16.mxu1 %v17832_v1  ;;  %v17934_v2 = vld [vmem:[%s22400_s0] ss:$84 sps:$4 sm:$0xff]  }
   0x2   :  { %68 = vst [vmem:[#allocation3 + $0x10] sm:$0xff] %v17832_v1  ;;  %69 = vst [vmem:[#allocation3 + $0x18] sm:$0xff] %v17832_v1  ;;  %17698 = vset.pattern.permute.xlu1 %v17832_v1  ;;  %17697 = vset.pattern.permute.xlu0 %v17832_v1  ;;  %v17943_v3 = vld [vmem:[%s22400_s0 + $0x8] ss:$84 sps:$4 sm:$0xff]   ;;  %v17950_v4 = vld [vmem:[%s22400_s0 + $0xc] ss:$84 sps:$4 sm:$0xff]  }
   0x3   :  { %70 = vst [vmem:[#allocation3 + $0x20] sm:$0xff] %v17832_v1  ;;  %71 = vst [vmem:[#allocation3 + $0x28] sm:$0xff] %v17832_v1  ;;  %195 = vrot.lane.b32.xlu0 %v17916_v0, %s17833_s29  ;;  %193 = vrot.lane.b32.xlu1 %v17934_v2, %s17833_s29  ;;  %v17957_v5 = vld [vmem:[%s22400_s0 + $0x10] ss:$84 sps:$4 sm:$0xff]   ;;  %v17964_v6 = vld [vmem:[%s22400_s0 + $0x14] ss:$84 sps:$4 sm:$0xff]  }
   0x4   :  { %72 = vst [vmem:[#allocation3 + $0x30] sm:$0xff] %v17832_v1  ;;  %73 = vst [vmem:[#allocation3 + $0x38] sm:$0xff] %v17832_v1  ;;  %v17971_v7 = vld [vmem:[%s22400_s0 + $0x18] ss:$84 sps:$4 sm:$0xff]   ;;  %v17978_v8 = vld [vmem:[%s22400_s0 + $0x1c] ss:$84 sps:$4 sm:$0xff]  }
   0x5   :  { %74 = vst [vmem:[#allocation3 + $0x40] sm:$0xff] %v17832_v1  ;;  %75 = vst [vmem:[#allocation3 + $0x48] sm:$0xff] %v17832_v1  ;;  %v17983_v9 = vld [vmem:[%s22400_s0 + $0x20] ss:$84 sps:$4 sm:$0xff]   ;;  %v17990_v10 = vld [vmem:[%s22400_s0 + $0x24] ss:$84 sps:$4 sm:$0xff]  }
   0x6   :  { %76 = vst [vmem:[#allocation3 + $0x50] sm:$0xf] %v17832_v1  ;;  %v17997_v11 = vld [vmem:[%s22400_s0 + $0x28] ss:$84 sps:$4 sm:$0xff]   ;;  %v18002_v12 = vld [vmem:[%s22400_s0 + $0x2c] ss:$84 sps:$4 sm:$0xff]  }
   0x7   :  { %197 = vrot.lane.b32.xlu0 %v17943_v3, %s17833_s29  ;;  %199 = vrot.lane.b32.xlu1 %v17950_v4, %s17833_s29  ;;  %v18011_v13 = vld [vmem:[%s22400_s0 + $0x30] ss:$84 sps:$4 sm:$0xff]   ;;  %v18016_v14 = vld [vmem:[%s22400_s0 + $0x34] ss:$84 sps:$4 sm:$0xff]   ;;  %s17835_s18 = smov 33   ;;  %s17836_s19 = smov 1  }
   0x8   :  { %v18027_v15 = vld [vmem:[%s22400_s0 + $0x38] ss:$84 sps:$4 sm:$0xff]   ;;  %v18034_v16 = vld [vmem:[%s22400_s0 + $0x3c] ss:$84 sps:$4 sm:$0xff]   ;;  %v18041_v17 = vld [vmem:[%s22400_s0 + $0x40] ss:$84 sps:$4 sm:$0xff]  }
   0x9   :  { %v18048_v18 = vld [vmem:[%s22400_s0 + $0x44] ss:$84 sps:$4 sm:$0xff]   ;;  %v18055_v19 = vld [vmem:[%s22400_s0 + $0x48] ss:$84 sps:$4 sm:$0xff]   ;;  %v18062_v20 = vld [vmem:[%s22400_s0 + $0x4c] ss:$84 sps:$4 sm:$0xff]  }
   0xa   :  { %v18155_v27 = vld [vmem:[%s22401_s1 + $0x8] sm:$0xff]   ;;  %vm22462_vm2 = vcmask 285696   ;;  %vm22464_vm3 = vmmov 0   ;;  %s17839_s26 = smov 127   ;;  %vm22439_vm4 = vcmask 269312   ;;  %s17840_s30 = smov 95  }
   0xb   :  { %201 = vrot.lane.b32.xlu0 %v17957_v5, %s17833_s29  ;;  %203 = vrot.lane.b32.xlu1 %v17964_v6, %s17833_s29  ;;  %vm22433_vm5 = vcmask 7168   ;;  %s17841_s16 = smov 94   ;;  %s17842_s22 = smov 93   ;;  %vm22417_vm6 = vcmask 1039360   ;;  %vm22416_vm7 = vcmask 777216   ;;  %vm22415_vm8 = vcmask 769024  }
   0xc   :  { %vm22414_vm9 = vcmask 760832  }
   0xf   :  { %205 = vrot.lane.b32.xlu0 %v17971_v7, %s17833_s29  ;;  %207 = vrot.lane.b32.xlu1 %v17978_v8, %s17833_s29 }
  0x13   :  { %209 = vrot.lane.b32.xlu0 %v17983_v9, %s17833_s29  ;;  %211 = vrot.lane.b32.xlu1 %v17990_v10, %s17833_s29 }
  0x17   :  { %213 = vrot.lane.b32.xlu0 %v17997_v11, %s17833_s29  ;;  %215 = vrot.lane.b32.xlu1 %v18002_v12, %s17833_s29 }
  0x1b   :  { %217 = vrot.lane.b32.xlu0 %v18011_v13, %s17833_s29  ;;  %219 = vrot.lane.b32.xlu1 %v18016_v14, %s17833_s29 }
  0x1f   :  { %221 = vrot.lane.b32.xlu0 %v18027_v15, %s17833_s29  ;;  %223 = vrot.lane.b32.xlu1 %v18034_v16, %s17833_s29 }
  0x23   :  { %225 = vrot.lane.b32.xlu0 %v18041_v17, %s17833_s29  ;;  %227 = vrot.lane.b32.xlu1 %v18048_v18, %s17833_s29 }
  0x27   :  { %229 = vrot.lane.b32.xlu0 %v18055_v19, %s17833_s29  ;;  %231 = vrot.lane.b32.xlu1 %v18062_v20, %s17833_s29 }
  0x2b   :  { %711 = vrot.lane.b32.xlu0 %v17916_v0, %s17834_s17  ;;  %713 = vrot.lane.b32.xlu1 %v17943_v3, %s17834_s17 }
  0x2f   :  { %709 = vrot.lane.b32.xlu0 %v17934_v2, %s17834_s17  ;;  %715 = vrot.lane.b32.xlu1 %v17950_v4, %s17834_s17 }
  0x33   :  { %717 = vrot.lane.b32.xlu0 %v17957_v5, %s17834_s17  ;;  %719 = vrot.lane.b32.xlu1 %v17964_v6, %s17834_s17 }
  0x37   :  { %721 = vrot.lane.b32.xlu0 %v17971_v7, %s17834_s17  ;;  %723 = vrot.lane.b32.xlu1 %v17978_v8, %s17834_s17 }
  0x3b   :  { %725 = vrot.lane.b32.xlu0 %v17983_v9, %s17834_s17  ;;  %727 = vrot.lane.b32.xlu1 %v17990_v10, %s17834_s17 }
  0x3f   :  { %729 = vrot.lane.b32.xlu0 %v17997_v11, %s17834_s17  ;;  %731 = vrot.lane.b32.xlu1 %v18002_v12, %s17834_s17 }
  0x43   :  { %733 = vrot.lane.b32.xlu0 %v18011_v13, %s17834_s17  ;;  %735 = vrot.lane.b32.xlu1 %v18016_v14, %s17834_s17 }
  0x47   :  { %737 = vrot.lane.b32.xlu0 %v18027_v15, %s17834_s17  ;;  %739 = vrot.lane.b32.xlu1 %v18034_v16, %s17834_s17 }
  0x4b   :  { %741 = vrot.lane.b32.xlu0 %v18041_v17, %s17834_s17  ;;  %743 = vrot.lane.b32.xlu1 %v18048_v18, %s17834_s17 }
  0x4f   :  { %745 = vrot.lane.b32.xlu0 %v18055_v19, %s17834_s17  ;;  %747 = vrot.lane.b32.xlu1 %v18062_v20, %s17834_s17 }
  0x53   :  { %1229 = vrot.lane.b32.xlu0 %v17916_v0, %s17835_s18  ;;  %1231 = vrot.lane.b32.xlu1 %v17943_v3, %s17835_s18 }
  0x57   :  { %1227 = vrot.lane.b32.xlu0 %v17934_v2, %s17835_s18  ;;  %1233 = vrot.lane.b32.xlu1 %v17950_v4, %s17835_s18 }
  0x5b   :  { %1235 = vrot.lane.b32.xlu0 %v17957_v5, %s17835_s18  ;;  %1237 = vrot.lane.b32.xlu1 %v17964_v6, %s17835_s18 }
  0x5f   :  { %1239 = vrot.lane.b32.xlu0 %v17971_v7, %s17835_s18  ;;  %1241 = vrot.lane.b32.xlu1 %v17978_v8, %s17835_s18 }
  0x63   :  { %1243 = vrot.lane.b32.xlu0 %v17983_v9, %s17835_s18  ;;  %1245 = vrot.lane.b32.xlu1 %v17990_v10, %s17835_s18 }
  0x67   :  { %1247 = vrot.lane.b32.xlu0 %v17997_v11, %s17835_s18  ;;  %1249 = vrot.lane.b32.xlu1 %v18002_v12, %s17835_s18 }
  0x6b   :  { %1251 = vrot.lane.b32.xlu0 %v18011_v13, %s17835_s18  ;;  %1253 = vrot.lane.b32.xlu1 %v18016_v14, %s17835_s18 }
  0x6f   :  { %1255 = vrot.lane.b32.xlu0 %v18027_v15, %s17835_s18  ;;  %1257 = vrot.lane.b32.xlu1 %v18034_v16, %s17835_s18 }
  0x73   :  { %1259 = vrot.lane.b32.xlu0 %v18041_v17, %s17835_s18  ;;  %1261 = vrot.lane.b32.xlu1 %v18048_v18, %s17835_s18 }
  0x75   :  { %v196_v21 = vpop.permute.xlu0 %195  ;;  %v194_v22 = vpop.permute.xlu1 %193 }
  0x76   :  { %v234_v26 = vsel %vm22460_vm0, %v194_v22, %v196_v21  ;;  %v18311_v22 = vld [vmem:[%s22400_s0 + $0x20] ss:$84 sps:$4 sm:$0xff]  }
  0x77   :  { %1263 = vrot.lane.b32.xlu0 %v18055_v19, %s17835_s18  ;;  %1265 = vrot.lane.b32.xlu1 %v18062_v20, %s17835_s18 }
  0x79   :  { %v198_v23 = vpop.permute.xlu0 %197  ;;  %v200_v24 = vpop.permute.xlu1 %199 }
  0x7a   :  { %v235_v25 = vsel %vm22460_vm0, %v196_v21, %v198_v23  ;;  %v236_v31 = vsel %vm22460_vm0, %v198_v23, %v200_v24 }
  0x7b   :  { %276 = vmatprep.subr.bf16.mxu0 %v235_v25  ;;  %1785 = vrot.lane.b32.xlu0 %v17916_v0, %s17836_s19 }
  0x7c   :  { %1787 = vrot.lane.b32.xlu1 %v17943_v3, %s17836_s19  ;;  %277 = vmatpush1.bf16.msra.mxu0 %v234_v26  ;;  %v18249_v3 = vld [vmem:[%s22400_s0 + $0xc] ss:$84 sps:$4 sm:$0xff]   ;;  %v18320_v26 = vld [vmem:[%s22400_s0 + $0x24] ss:$84 sps:$4 sm:$0xff]  }
  0x7d   :  { %v202_v28 = vpop.permute.xlu0 %201  ;;  %v204_v29 = vpop.permute.xlu1 %203 }
  0x7e   :  { %v237_v30 = vsel %vm22460_vm0, %v200_v24, %v202_v28  ;;  %v238_v35 = vsel %vm22460_vm0, %v202_v28, %v204_v29  ;;  %v18330_v28 = vld [vmem:[%s22400_s0 + $0x28] ss:$84 sps:$4 sm:$0xff]  }
  0x7f   :  { %1783 = vrot.lane.b32.xlu0 %v17934_v2, %s17836_s19  ;;  %15919 = vmatmul.mubr.msk.bf16.vlgmr.msra.gmra.mrb[0].mxu0 %vm272_vm1, %v18155_v27  ;;  %v18240_v2 = vld [vmem:[%s22400_s0 + $0x8] ss:$84 sps:$4 sm:$0xff]  }
  0x80   :  { %1789 = vrot.lane.b32.xlu1 %v17950_v4, %s17836_s19  ;;  %319 = vmatprep.subr.bf16.mxu1 %v237_v30 }
  0x81   :  { %320 = vmatpush1.bf16.msra.mxu1 %v236_v31  ;;  %v206_v32 = vpop.permute.xlu0 %205  ;;  %394 = vmatprep.mubr.bf16.mxu0 %v17832_v1  ;;  %v208_v33 = vpop.permute.xlu1 %207 }
  0x82   :  { %v239_v34 = vsel %vm22460_vm0, %v204_v29, %v206_v32  ;;  %v240_v39 = vsel %vm22460_vm0, %v206_v32, %v208_v33  ;;  %v18339_v32 = vld [vmem:[%s22400_s0 + $0x2c] ss:$84 sps:$4 sm:$0xff]  }
  0x83   :  { %1791 = vrot.lane.b32.xlu0 %v17957_v5, %s17836_s19  ;;  %362 = vmatprep.subr.bf16.mxu0 %v239_v34  ;;  %v18349_v34 = vld [vmem:[%s22400_s0 + $0x30] ss:$84 sps:$4 sm:$0xff]  }
  0x84   :  { %1793 = vrot.lane.b32.xlu1 %v17964_v6, %s17836_s19  ;;  %15920 = vmatmul.mubr.msk.bf16.vlgmr.msra.gmra.mrb[0].mxu1 %vm272_vm1, %v18155_v27 }
  0x85   :  { %363 = vmatpush1.bf16.msra.mxu0 %v238_v35  ;;  %v210_v36 = vpop.permute.xlu0 %209  ;;  %437 = vmatprep.mubr.bf16.mxu1 %v17832_v1  ;;  %v212_v37 = vpop.permute.xlu1 %211 }
  0x86   :  { %v241_v38 = vsel %vm22460_vm0, %v208_v33, %v210_v36  ;;  %v242_v43 = vsel %vm22460_vm0, %v210_v36, %v212_v37 }
  0x87   :  { %1795 = vrot.lane.b32.xlu0 %v17971_v7, %s17836_s19  ;;  %405 = vmatprep.subr.bf16.mxu1 %v241_v38  ;;  %v18258_v7 = vld [vmem:[%s22400_s0 + $0x4] ss:$84 sps:$4 sm:$0xff]   ;;  %v18358_v38 = vld [vmem:[%s22400_s0 + $0x34] ss:$84 sps:$4 sm:$0xff]  }
  0x88   :  { %1797 = vrot.lane.b32.xlu1 %v17978_v8, %s17836_s19  ;;  %15921 = vmatmul.mubr.msk.bf16.vlgmr.msra.gmra.mrb[4].mxu0 %vm272_vm1, %v18155_v27  ;;  %v18265_v8 = vld [vmem:[%s22401_s1] sm:$0xff]  }
  0x89   :  { %406 = vmatpush1.bf16.msra.mxu1 %v240_v39  ;;  %v214_v40 = vpop.permute.xlu0 %213  ;;  %480 = vmatprep.mubr.bf16.mxu0 %v17832_v1  ;;  %v216_v41 = vpop.permute.xlu1 %215 }
  0x8a   :  { %v243_v42 = vsel %vm22460_vm0, %v212_v37, %v214_v40  ;;  %v244_v47 = vsel %vm22460_vm0, %v214_v40, %v216_v41  ;;  %v18368_v40 = vld [vmem:[%s22400_s0 + $0x38] ss:$84 sps:$4 sm:$0xff]  }
  0x8b   :  { %1799 = vrot.lane.b32.xlu0 %v17983_v9, %s17836_s19  ;;  %448 = vmatprep.subr.bf16.mxu0 %v243_v42 }
  0x8c   :  { %1801 = vrot.lane.b32.xlu1 %v17990_v10, %s17836_s19  ;;  %15922 = vmatmul.mubr.msk.bf16.vlgmr.msra.gmra.mrb[4].mxu1 %vm272_vm1, %v18155_v27  ;;  %v18273_v10 = vld [vmem:[%s22400_s0 + $0x10] ss:$84 sps:$4 sm:$0xff]  }
  0x8d   :  { %449 = vmatpush1.bf16.msra.mxu0 %v242_v43  ;;  %v218_v44 = vpop.permute.xlu0 %217  ;;  %523 = vmatprep.mubr.bf16.mxu1 %v17832_v1  ;;  %v220_v45 = vpop.permute.xlu1 %219 }
  0x8e   :  { %v245_v46 = vsel %vm22460_vm0, %v216_v41, %v218_v44  ;;  %v246_v51 = vsel %vm22460_vm0, %v218_v44, %v220_v45  ;;  %v18377_v44 = vld [vmem:[%s22400_s0 + $0x3c] ss:$84 sps:$4 sm:$0xff]  }
  0x8f   :  { %1803 = vrot.lane.b32.xlu0 %v17997_v11, %s17836_s19  ;;  %491 = vmatprep.subr.bf16.mxu1 %v245_v46 }
  0x90   :  { %1805 = vrot.lane.b32.xlu1 %v18002_v12, %s17836_s19  ;;  %15923 = vmatmul.mubr.msk.bf16.vlgmr.msra.gmra.mrb[8].mxu0 %vm272_vm1, %v18155_v27 }
  0x91   :  { %492 = vmatpush1.bf16.msra.mxu1 %v244_v47  ;;  %v222_v48 = vpop.permute.xlu0 %221  ;;  %566 = vmatprep.mubr.bf16.mxu0 %v17832_v1  ;;  %v224_v49 = vpop.permute.xlu1 %223 }
  0x92   :  { %v247_v50 = vsel %vm22460_vm0, %v220_v45, %v222_v48  ;;  %v248_v55 = vsel %vm22460_vm0, %v222_v48, %v224_v49  ;;  %v18388_v48 = vld [vmem:[%s22400_s0 + $0x40] ss:$84 sps:$4 sm:$0xff]  }
  0x93   :  { %1807 = vrot.lane.b32.xlu0 %v18011_v13, %s17836_s19  ;;  %534 = vmatprep.subr.bf16.mxu0 %v247_v50  ;;  %v18396_v50 = vld [vmem:[%s22400_s0 + $0x44] ss:$84 sps:$4 sm:$0xff]  }
  0x94   :  { %1809 = vrot.lane.b32.xlu1 %v18016_v14, %s17836_s19  ;;  %15924 = vmatmul.mubr.msk.bf16.vlgmr.msra.gmra.mrb[8].mxu1 %vm272_vm1, %v18155_v27  ;;  %v18282_v14 = vld [vmem:[%s22400_s0 + $0x14] ss:$84 sps:$4 sm:$0xff]  }
  0x95   :  { %535 = vmatpush1.bf16.msra.mxu0 %v246_v51  ;;  %v226_v52 = vpop.permute.xlu0 %225  ;;  %609 = vmatprep.mubr.bf16.mxu1 %v17832_v1  ;;  %v228_v53 = vpop.permute.xlu1 %227 }
  0x96   :  { %v249_v54 = vsel %vm22460_vm0, %v224_v49, %v226_v52  ;;  %v250_v61 = vsel %vm22460_vm0, %v226_v52, %v228_v53 }
  0x97   :  { %1811 = vrot.lane.b32.xlu0 %v18027_v15, %s17836_s19  ;;  %577 = vmatprep.subr.bf16.mxu1 %v249_v54  ;;  %v18408_v54 = vld [vmem:[%s22400_s0 + $0x48] ss:$84 sps:$4 sm:$0xff]  }
  0x98   :  { %1813 = vrot.lane.b32.xlu1 %v18034_v16, %s17836_s19  ;;  %15925 = vmatmul.mubr.msk.bf16.vlgmr.msra.gmra.mrb[12].mxu0 %vm272_vm1, %v18155_v27  ;;  %v18292_v16 = vld [vmem:[%s22400_s0 + $0x18] ss:$84 sps:$4 sm:$0xff]  }
  0x99   :  { %578 = vmatpush1.bf16.msra.mxu1 %v248_v55  ;;  %v230_v56 = vpop.permute.xlu0 %229  ;;  %652 = vmatprep.mubr.bf16.mxu0 %v17832_v1  ;;  %v232_v57 = vpop.permute.xlu1 %231 }
  0x9a   :  { %v251_v58 = vsel %vm22460_vm0, %v228_v53, %v230_v56  ;;  %16558 = vmatprep.subr.bf16.mxu1 %v22422_v59  ;;  %v252_v60 = vsel %vm22460_vm0, %v230_v56, %v232_v57  ;;  %v18417_v57 = vld [vmem:[%s22400_s0 + $0x4c] ss:$84 sps:$4 sm:$0xff]  }
  0x9b   :  { %1815 = vrot.lane.b32.xlu0 %v18041_v17, %s17836_s19  ;;  %620 = vmatprep.subr.bf16.mxu0 %v251_v58 }
  0x9c   :  { %1817 = vrot.lane.b32.xlu1 %v18048_v18, %s17836_s19  ;;  %15926 = vmatmul.mubr.msk.bf16.vlgmr.msra.gmra.mrb[12].mxu1 %vm272_vm1, %v18155_v27 }
  0x9d   :  { %621 = vmatpush1.bf16.msra.mxu0 %v250_v61  ;;  %16559 = vmatpush3.bf16.msra.mxu1 %v252_v60  ;;  %v712_v62 = vpop.permute.xlu0 %711  ;;  %v714_v63 = vpop.permute.xlu1 %713  ;;  %v18428_v61 = vld [vmem:[%s22400_s0 + $0x50] ss:$84 sps:$4 sm:$0xff]  }
  0x9e   :  { %16560 = vmatprep.mubr.msk.bf16.mxu1 %vm22464_vm3, %v22422_v59  ;;  %v751_v0 = vsel %vm22462_vm2, %v712_v62, %v714_v63 }
  0x9f   :  { %1819 = vrot.lane.b32.xlu0 %v18055_v19, %s17836_s19  ;;  %791 = vmatprep.subr.bf16.mxu0 %v751_v0 }
  0xa0   :  { %1821 = vrot.lane.b32.xlu1 %v18062_v20, %s17836_s19  ;;  %15927 = vmatmul.mubr.msk.bf16.vlgmr.msra.gmra.mrb[16].mxu0 %vm272_vm1, %v18155_v27  ;;  %v18301_v20 = vld [vmem:[%s22400_s0 + $0x1c] ss:$84 sps:$4 sm:$0xff]  }
  0xa1   :  { %v710_v4 = vpop.permute.xlu0 %709  ;;  %823 = vmatprep.mubr.bf16.mxu0 %v17832_v1  ;;  %v716_v6 = vpop.permute.xlu1 %715 }
  0xa2   :  { %v750_v5 = vsel %vm22462_vm2, %v710_v4, %v712_v62  ;;  %v752_v13 = vsel %vm22462_vm2, %v714_v63, %v716_v6 }
  0xa3   :  { %792 = vmatpush1.bf16.msra.mxu0 %v750_v5  ;;  %3034 = vrot.lane.b32.xlu0 %v18240_v2, %s17839_s26  ;;  %v18446_v5 = vld [vmem:[%s22401_s1 + $0x10] sm:$0xff]  }
  0xa4   :  { %16561 = vmatmul.mubr.msk.bf16.vlgmr.msra.gmra.mrb[16].mxu1 %vm272_vm1, %v18155_v27  ;;  %3036 = vrot.lane.b32.xlu1 %v18249_v3, %s17839_s26 }
  0xa5   :  { %v718_v9 = vpop.permute.xlu0 %717  ;;  %866 = vmatprep.mubr.bf16.mxu1 %v17832_v1  ;;  %v720_v11 = vpop.permute.xlu1 %719 }
  0xa6   :  { %v753_v12 = vsel %vm22462_vm2, %v716_v6, %v718_v9  ;;  %v754_v19 = vsel %vm22462_vm2, %v718_v9, %v720_v11 }
  0xa7   :  { %834 = vmatprep.subr.bf16.mxu1 %v753_v12  ;;  %3032 = vrot.lane.b32.xlu0 %v18258_v7, %s17839_s26 }
  0xa8   :  { %15930 = vmatmul.mubr.msk.bf16.vlgmr.msra.gmra.mrb[0].mxu0 %vm272_vm1, %v18265_v8  ;;  %835 = vmatpush1.bf16.msra.mxu1 %v752_v13 }
  0xa9   :  { %v722_v15 = vpop.permute.xlu0 %721  ;;  %909 = vmatprep.mubr.bf16.mxu0 %v17832_v1  ;;  %3038 = vrot.lane.b32.xlu1 %v18273_v10, %s17839_s26  ;;  %v724_v17 = vpop.permute.xlu1 %723 }
  0xaa   :  { %v755_v18 = vsel %vm22462_vm2, %v720_v11, %v722_v15  ;;  %v756_v25 = vsel %vm22462_vm2, %v722_v15, %v724_v17 }
  0xab   :  { %877 = vmatprep.subr.bf16.mxu0 %v755_v18  ;;  %3040 = vrot.lane.b32.xlu0 %v18282_v14, %s17839_s26 }
  0xac   :  { %15931 = vmatmul.mubr.msk.bf16.vlgmr.msra.gmra.mrb[0].mxu1 %vm272_vm1, %v18265_v8  ;;  %878 = vmatpush1.bf16.msra.mxu0 %v754_v19 }
  0xad   :  { %v726_v21 = vpop.permute.xlu0 %725  ;;  %952 = vmatprep.mubr.bf16.mxu1 %v17832_v1  ;;  %3042 = vrot.lane.b32.xlu1 %v18292_v16, %s17839_s26  ;;  %v728_v23 = vpop.permute.xlu1 %727 }
  0xae   :  { %v757_v24 = vsel %vm22462_vm2, %v724_v17, %v726_v21  ;;  %v758_v31 = vsel %vm22462_vm2, %v726_v21, %v728_v23 }
  0xaf   :  { %920 = vmatprep.subr.bf16.mxu1 %v757_v24  ;;  %3044 = vrot.lane.b32.xlu0 %v18301_v20, %s17839_s26 }
  0xb0   :  { %15932 = vmatmul.mubr.msk.bf16.vlgmr.msra.gmra.mrb[4].mxu0 %vm272_vm1, %v18265_v8  ;;  %921 = vmatpush1.bf16.msra.mxu1 %v756_v25 }
  0xb1   :  { %v730_v27 = vpop.permute.xlu0 %729  ;;  %995 = vmatprep.mubr.bf16.mxu0 %v17832_v1  ;;  %3046 = vrot.lane.b32.xlu1 %v18311_v22, %s17839_s26  ;;  %v732_v29 = vpop.permute.xlu1 %731 }
  0xb2   :  { %v759_v30 = vsel %vm22462_vm2, %v728_v23, %v730_v27  ;;  %v760_v37 = vsel %vm22462_vm2, %v730_v27, %v732_v29 }
  0xb3   :  { %963 = vmatprep.subr.bf16.mxu0 %v759_v30  ;;  %3048 = vrot.lane.b32.xlu0 %v18320_v26, %s17839_s26 }
  0xb4   :  { %15933 = vmatmul.mubr.msk.bf16.vlgmr.msra.gmra.mrb[4].mxu1 %vm272_vm1, %v18265_v8  ;;  %964 = vmatpush1.bf16.msra.mxu0 %v758_v31 }
  0xb5   :  { %v734_v33 = vpop.permute.xlu0 %733  ;;  %1038 = vmatprep.mubr.bf16.mxu1 %v17832_v1  ;;  %3050 = vrot.lane.b32.xlu1 %v18330_v28, %s17839_s26  ;;  %v736_v35 = vpop.permute.xlu1 %735 }
  0xb6   :  { %v761_v36 = vsel %vm22462_vm2, %v732_v29, %v734_v33  ;;  %v762_v43 = vsel %vm22462_vm2, %v734_v33, %v736_v35 }
  0xb7   :  { %1006 = vmatprep.subr.bf16.mxu1 %v761_v36  ;;  %3052 = vrot.lane.b32.xlu0 %v18339_v32, %s17839_s26 }
  0xb8   :  { %15934 = vmatmul.mubr.msk.bf16.vlgmr.msra.gmra.mrb[8].mxu0 %vm272_vm1, %v18265_v8  ;;  %1007 = vmatpush1.bf16.msra.mxu1 %v760_v37 }
  0xb9   :  { %v738_v39 = vpop.permute.xlu0 %737  ;;  %1081 = vmatprep.mubr.bf16.mxu0 %v17832_v1  ;;  %3054 = vrot.lane.b32.xlu1 %v18349_v34, %s17839_s26  ;;  %v740_v41 = vpop.permute.xlu1 %739 }
  0xba   :  { %v763_v42 = vsel %vm22462_vm2, %v736_v35, %v738_v39  ;;  %v764_v49 = vsel %vm22462_vm2, %v738_v39, %v740_v41 }
  0xbb   :  { %1049 = vmatprep.subr.bf16.mxu0 %v763_v42  ;;  %3056 = vrot.lane.b32.xlu0 %v18358_v38, %s17839_s26 }
  0xbc   :  { %15935 = vmatmul.mubr.msk.bf16.vlgmr.msra.gmra.mrb[8].mxu1 %vm272_vm1, %v18265_v8  ;;  %1050 = vmatpush1.bf16.msra.mxu0 %v762_v43 }
  0xbd   :  { %v742_v45 = vpop.permute.xlu0 %741  ;;  %1124 = vmatprep.mubr.bf16.mxu1 %v17832_v1  ;;  %3058 = vrot.lane.b32.xlu1 %v18368_v40, %s17839_s26  ;;  %v744_v46 = vpop.permute.xlu1 %743 }
  0xbe   :  { %v765_v47 = vsel %vm22462_vm2, %v740_v41, %v742_v45  ;;  %v766_v56 = vsel %vm22462_vm2, %v742_v45, %v744_v46 }
  0xbf   :  { %1092 = vmatprep.subr.bf16.mxu1 %v765_v47  ;;  %3060 = vrot.lane.b32.xlu0 %v18377_v44, %s17839_s26 }
  0xc0   :  { %15936 = vmatmul.mubr.msk.bf16.vlgmr.msra.gmra.mrb[12].mxu0 %vm272_vm1, %v18265_v8  ;;  %1093 = vmatpush1.bf16.msra.mxu1 %v764_v49 }
  0xc1   :  { %v746_v51 = vpop.permute.xlu0 %745  ;;  %16564 = vmatprep.subr.bf16.mxu1 %v22422_v59  ;;  %1167 = vmatprep.mubr.bf16.mxu0 %v17832_v1  ;;  %v748_v52 = vpop.permute.xlu1 %747 }
  0xc2   :  { %v767_v53 = vsel %vm22462_vm2, %v744_v46, %v746_v51  ;;  %3062 = vrot.lane.b32.xlu1 %v18388_v48, %s17839_s26  ;;  %v768_v55 = vsel %vm22462_vm2, %v746_v51, %v748_v52 }
  0xc3   :  { %1135 = vmatprep.subr.bf16.mxu0 %v767_v53  ;;  %3064 = vrot.lane.b32.xlu0 %v18396_v50, %s17839_s26 }
  0xc4   :  { %15937 = vmatmul.mubr.msk.bf16.vlgmr.msra.gmra.mrb[12].mxu1 %vm272_vm1, %v18265_v8  ;;  %1136 = vmatpush1.bf16.msra.mxu0 %v766_v56 }
  0xc5   :  { %16565 = vmatpush3.bf16.msra.mxu1 %v768_v55  ;;  %v1230_v58 = vpop.permute.xlu0 %1229  ;;  %16566 = vmatprep.mubr.msk.bf16.mxu1 %vm22464_vm3, %v22422_v59  ;;  %v1232_v60 = vpop.permute.xlu1 %1231 }
  0xc6   :  { %3066 = vrot.lane.b32.xlu1 %v18408_v54, %s17839_s26  ;;  %v1269_v62 = vsel %vm22439_vm4, %v1230_v58, %v1232_v60 }
  0xc7   :  { %3068 = vrot.lane.b32.xlu0 %v18417_v57, %s17839_s26  ;;  %1309 = vmatprep.subr.bf16.mxu0 %v1269_v62 }
  0xc8   :  { %15938 = vmatmul.mubr.msk.bf16.vlgmr.msra.gmra.mrb[16].mxu0 %vm272_vm1, %v18265_v8 }
  0xc9   :  { %v1228_v63 = vpop.permute.xlu0 %1227  ;;  %1341 = vmatprep.mubr.bf16.mxu0 %v17832_v1  ;;  %v1234_v4 = vpop.permute.xlu1 %1233 }
  0xca   :  { %v1268_v0 = vsel %vm22439_vm4, %v1228_v63, %v1230_v58  ;;  %3070 = vrot.lane.b32.xlu1 %v18428_v61, %s17839_s26  ;;  %v1270_v12 = vsel %vm22439_vm4, %v1232_v60, %v1234_v4 }
  0xcb   :  { %1310 = vmatpush1.bf16.msra.mxu0 %v1268_v0  ;;  %3590 = vrot.lane.b32.xlu0 %v18240_v2, %s17840_s30  ;;  %v18542_v0 = vld [vmem:[%s22401_s1 + $0x18] sm:$0xff]  }
  0xcc   :  { %16567 = vmatmul.mubr.msk.bf16.vlgmr.msra.gmra.mrb[16].mxu1 %vm272_vm1, %v18265_v8 }
  0xcd   :  { %v1236_v6 = vpop.permute.xlu0 %1235  ;;  %1384 = vmatprep.mubr.bf16.mxu1 %v17832_v1  ;;  %v1238_v9 = vpop.permute.xlu1 %1237 }
  0xce   :  { %v1271_v11 = vsel %vm22439_vm4, %v1234_v4, %v1236_v6  ;;  %3592 = vrot.lane.b32.xlu1 %v18249_v3, %s17840_s30  ;;  %v1272_v17 = vsel %vm22439_vm4, %v1236_v6, %v1238_v9 }
  0xcf   :  { %1352 = vmatprep.subr.bf16.mxu1 %v1271_v11  ;;  %3588 = vrot.lane.b32.xlu0 %v18258_v7, %s17840_s30 }
  0xd0   :  { %15943 = vmatmul.mubr.msk.bf16.vlgmr.msra.gmra.mrb[0].mxu0 %vm272_vm1, %v18446_v5  ;;  %1353 = vmatpush1.bf16.msra.mxu1 %v1270_v12 }
  0xd1   :  { %v1240_v8 = vpop.permute.xlu0 %1239  ;;  %1427 = vmatprep.mubr.bf16.mxu0 %v17832_v1  ;;  %v1242_v13 = vpop.permute.xlu1 %1241 }
  0xd2   :  { %v1273_v15 = vsel %vm22439_vm4, %v1238_v9, %v1240_v8  ;;  %3594 = vrot.lane.b32.xlu1 %v18273_v10, %s17840_s30  ;;  %v1274_v23 = vsel %vm22439_vm4, %v1240_v8, %v1242_v13 }
  0xd3   :  { %1395 = vmatprep.subr.bf16.mxu0 %v1273_v15  ;;  %3596 = vrot.lane.b32.xlu0 %v18282_v14, %s17840_s30 }
  0xd4   :  { %15944 = vmatmul.mubr.msk.bf16.vlgmr.msra.gmra.mrb[0].mxu1 %vm272_vm1, %v18446_v5  ;;  %1396 = vmatpush1.bf16.msra.mxu0 %v1272_v17  ;;  %v18562_v17 = vld [vmem:[#allocation3] sm:$0xff] }
  0xd5   :  { %v1244_v18 = vpop.permute.xlu0 %1243  ;;  %1470 = vmatprep.mubr.bf16.mxu1 %v17832_v1  ;;  %v1246_v19 = vpop.permute.xlu1 %1245 }
  0xd6   :  { %v1275_v21 = vsel %vm22439_vm4, %v1242_v13, %v1244_v18  ;;  %3598 = vrot.lane.b32.xlu1 %v18292_v16, %s17840_s30  ;;  %v1276_v29 = vsel %vm22439_vm4, %v1244_v18, %v1246_v19 }
  0xd7   :  { %1438 = vmatprep.subr.bf16.mxu1 %v1275_v21  ;;  %3600 = vrot.lane.b32.xlu0 %v18301_v20, %s17840_s30 }
  0xd8   :  { %15945 = vmatmul.mubr.msk.bf16.vlgmr.msra.gmra.mrb[4].mxu0 %vm272_vm1, %v18446_v5  ;;  %1439 = vmatpush1.bf16.msra.mxu1 %v1274_v23 }
  0xd9   :  { %v1248_v24 = vpop.permute.xlu0 %1247  ;;  %1513 = vmatprep.mubr.bf16.mxu0 %v17832_v1  ;;  %v1250_v25 = vpop.permute.xlu1 %1249 }
  0xda   :  { %v1277_v27 = vsel %vm22439_vm4, %v1246_v19, %v1248_v24  ;;  %3602 = vrot.lane.b32.xlu1 %v18311_v22, %s17840_s30  ;;  %v1278_v35 = vsel %vm22439_vm4, %v1248_v24, %v1250_v25 }
  0xdb   :  { %1481 = vmatprep.subr.bf16.mxu0 %v1277_v27  ;;  %3604 = vrot.lane.b32.xlu0 %v18320_v26, %s17840_s30 }
  0xdc   :  { %15946 = vmatmul.mubr.msk.bf16.vlgmr.msra.gmra.mrb[4].mxu1 %vm272_vm1, %v18446_v5  ;;  %1482 = vmatpush1.bf16.msra.mxu0 %v1276_v29 }
  0xdd   :  { %v1252_v30 = vpop.permute.xlu0 %1251  ;;  %1556 = vmatprep.mubr.bf16.mxu1 %v17832_v1  ;;  %v1254_v31 = vpop.permute.xlu1 %1253 }
  0xde   :  { %v1279_v33 = vsel %vm22439_vm4, %v1250_v25, %v1252_v30  ;;  %3606 = vrot.lane.b32.xlu1 %v18330_v28, %s17840_s30  ;;  %v1280_v41 = vsel %vm22439_vm4, %v1252_v30, %v1254_v31 }
  0xdf   :  { %1524 = vmatprep.subr.bf16.mxu1 %v1279_v33  ;;  %3608 = vrot.lane.b32.xlu0 %v18339_v32, %s17840_s30 }
  0xe0   :  { %15947 = vmatmul.mubr.msk.bf16.vlgmr.msra.gmra.mrb[8].mxu0 %vm272_vm1, %v18446_v5  ;;  %1525 = vmatpush1.bf16.msra.mxu1 %v1278_v35 }
  0xe1   :  { %v1256_v36 = vpop.permute.xlu0 %1255  ;;  %1599 = vmatprep.mubr.bf16.mxu0 %v17832_v1  ;;  %v1258_v37 = vpop.permute.xlu1 %1257 }
  0xe2   :  { %v1281_v39 = vsel %vm22439_vm4, %v1254_v31, %v1256_v36  ;;  %3610 = vrot.lane.b32.xlu1 %v18349_v34, %s17840_s30  ;;  %v1282_v46 = vsel %vm22439_vm4, %v1256_v36, %v1258_v37 }
  0xe3   :  { %1567 = vmatprep.subr.bf16.mxu0 %v1281_v39  ;;  %3612 = vrot.lane.b32.xlu0 %v18358_v38, %s17840_s30 }
  0xe4   :  { %15948 = vmatmul.mubr.msk.bf16.vlgmr.msra.gmra.mrb[8].mxu1 %vm272_vm1, %v18446_v5  ;;  %1568 = vmatpush1.bf16.msra.mxu0 %v1280_v41 }
  0xe5   :  { %v1260_v42 = vpop.permute.xlu0 %1259  ;;  %1642 = vmatprep.mubr.bf16.mxu1 %v17832_v1  ;;  %v1262_v43 = vpop.permute.xlu1 %1261 }
  0xe6   :  { %v1283_v45 = vsel %vm22439_vm4, %v1258_v37, %v1260_v42  ;;  %3614 = vrot.lane.b32.xlu1 %v18368_v40, %s17840_s30  ;;  %v1284_v53 = vsel %vm22439_vm4, %v1260_v42, %v1262_v43 }
  0xe7   :  { %1610 = vmatprep.subr.bf16.mxu1 %v1283_v45  ;;  %3616 = vrot.lane.b32.xlu0 %v18377_v44, %s17840_s30 }
  0xe8   :  { %15949 = vmatmul.mubr.msk.bf16.vlgmr.msra.gmra.mrb[12].mxu0 %vm272_vm1, %v18446_v5  ;;  %1611 = vmatpush1.bf16.msra.mxu1 %v1282_v46 }
  0xe9   :  { %v1264_v47 = vpop.permute.xlu0 %1263  ;;  %16570 = vmatprep.subr.bf16.mxu1 %v22422_v59  ;;  %1685 = vmatprep.mubr.bf16.mxu0 %v17832_v1  ;;  %v1266_v49 = vpop.permute.xlu1 %1265 }
  0xea   :  { %v1285_v51 = vsel %vm22439_vm4, %v1262_v43, %v1264_v47  ;;  %3618 = vrot.lane.b32.xlu1 %v18388_v48, %s17840_s30  ;;  %v1286_v52 = vsel %vm22439_vm4, %v1264_v47, %v1266_v49 }
  0xeb   :  { %1653 = vmatprep.subr.bf16.mxu0 %v1285_v51  ;;  %3620 = vrot.lane.b32.xlu0 %v18396_v50, %s17840_s30 }
  0xec   :  { %15950 = vmatmul.mubr.msk.bf16.vlgmr.msra.gmra.mrb[12].mxu1 %vm272_vm1, %v18446_v5  ;;  %1654 = vmatpush1.bf16.msra.mxu0 %v1284_v53 }
  0xed   :  { %16571 = vmatpush3.bf16.msra.mxu1 %v1286_v52  ;;  %v1786_v55 = vpop.permute.xlu0 %1785  ;;  %16572 = vmatprep.mubr.msk.bf16.mxu1 %vm22464_vm3, %v22422_v59 }
  0xee   :  { %v1788_v56 = vpop.permute.xlu1 %1787  ;;  %3622 = vrot.lane.b32.xlu1 %v18408_v54, %s17840_s30 }
  0xef   :  { %v1825_v58 = vsel %vm22433_vm5, %v1786_v55, %v1788_v56  ;;  %3624 = vrot.lane.b32.xlu0 %v18417_v57, %s17840_s30 }
  0xf0   :  { %15951 = vmatmul.mubr.msk.bf16.vlgmr.msra.gmra.mrb[16].mxu0 %vm272_vm1, %v18446_v5  ;;  %1865 = vmatprep.subr.bf16.mxu0 %v1825_v58  ;;  %v18650_v58 = vld [vmem:[%s22401_s1 + $0x20] sm:$0xff]  }
  0xf1   :  { %v1784_v60 = vpop.permute.xlu0 %1783  ;;  %1897 = vmatprep.mubr.bf16.mxu0 %v17832_v1 }
  0xf2   :  { %v1824_v62 = vsel %vm22433_vm5, %v1784_v60, %v1786_v55  ;;  %v1790_v63 = vpop.permute.xlu1 %1789  ;;  %3626 = vrot.lane.b32.xlu1 %v18428_v61, %s17840_s30 }
  0xf3   :  { %1866 = vmatpush1.bf16.msra.mxu0 %v1824_v62  ;;  %4146 = vrot.lane.b32.xlu0 %v18240_v2, %s17841_s16  ;;  %v1826_v11 = vsel %vm22433_vm5, %v1788_v56, %v1790_v63 }
  0xf4   :  { %16573 = vmatmul.mubr.msk.bf16.vlgmr.msra.gmra.mrb[16].mxu1 %vm272_vm1, %v18446_v5 }
  0xf5   :  { %v1792_v4 = vpop.permute.xlu0 %1791  ;;  %1940 = vmatprep.mubr.bf16.mxu1 %v17832_v1 }
  0xf6   :  { %v1794_v6 = vpop.permute.xlu1 %1793  ;;  %v1827_v9 = vsel %vm22433_vm5, %v1790_v63, %v1792_v4  ;;  %4148 = vrot.lane.b32.xlu1 %v18249_v3, %s17841_s16  ;;  %v17764_v63 = vld [vmem:[%s22400_s0 + $0x4c] ss:$84 sps:$4 sm:$0xff]  }
  0xf7   :  { %1908 = vmatprep.subr.bf16.mxu1 %v1827_v9  ;;  %4144 = vrot.lane.b32.xlu0 %v18258_v7, %s17841_s16  ;;  %v1828_v13 = vsel %vm22433_vm5, %v1792_v4, %v1794_v6 }
  0xf8   :  { %15956 = vmatmul.mubr.msk.bf16.vlgmr.msra.gmra.mrb[0].mxu0 %vm272_vm1, %v18542_v0  ;;  %1909 = vmatpush1.bf16.msra.mxu1 %v1826_v11 }
  0xf9   :  { %v1796_v5 = vpop.permute.xlu0 %1795  ;;  %1983 = vmatprep.mubr.bf16.mxu0 %v17832_v1 }
  0xfa   :  { %v1798_v12 = vpop.permute.xlu1 %1797  ;;  %v1829_v8 = vsel %vm22433_vm5, %v1794_v6, %v1796_v5  ;;  %4150 = vrot.lane.b32.xlu1 %v18273_v10, %s17841_s16 }
  0xfb   :  { %1951 = vmatprep.subr.bf16.mxu0 %v1829_v8  ;;  %4152 = vrot.lane.b32.xlu0 %v18282_v14, %s17841_s16  ;;  %v1830_v19 = vsel %vm22433_vm5, %v1796_v5, %v1798_v12 }
  0xfc   :  { %15957 = vmatmul.mubr.msk.bf16.vlgmr.msra.gmra.mrb[0].mxu1 %vm272_vm1, %v18542_v0  ;;  %1952 = vmatpush1.bf16.msra.mxu0 %v1828_v13 }
  0xfd   :  { %v1800_v15 = vpop.permute.xlu0 %1799  ;;  %2026 = vmatprep.mubr.bf16.mxu1 %v18562_v17 }
  0xfe   :  { %v1802_v1 = vpop.permute.xlu1 %1801  ;;  %v1831_v18 = vsel %vm22433_vm5, %v1798_v12, %v1800_v15  ;;  %4154 = vrot.lane.b32.xlu1 %v18292_v16, %s17841_s16 }
  0xff   :  { %1994 = vmatprep.subr.bf16.mxu1 %v1831_v18  ;;  %4156 = vrot.lane.b32.xlu0 %v18301_v20, %s17841_s16  ;;  %v1832_v25 = vsel %vm22433_vm5, %v1800_v15, %v1802_v1 }
 0x100   :  { %15958 = vmatmul.mubr.msk.bf16.vlgmr.msra.gmra.mrb[4].mxu0 %vm272_vm1, %v18542_v0  ;;  %1995 = vmatpush1.bf16.msra.mxu1 %v1830_v19 }
 0x101   :  { %v1804_v21 = vpop.permute.xlu0 %1803  ;;  %2069 = vmatprep.mubr.bf16.mxu0 %v18562_v17 }
 0x102   :  { %v1806_v23 = vpop.permute.xlu1 %1805  ;;  %v1833_v24 = vsel %vm22433_vm5, %v1802_v1, %v1804_v21  ;;  %4158 = vrot.lane.b32.xlu1 %v18311_v22, %s17841_s16 }
 0x103   :  { %2037 = vmatprep.subr.bf16.mxu0 %v1833_v24  ;;  %4160 = vrot.lane.b32.xlu0 %v18320_v26, %s17841_s16  ;;  %v1834_v31 = vsel %vm22433_vm5, %v1804_v21, %v1806_v23 }
 0x104   :  { %15959 = vmatmul.mubr.msk.bf16.vlgmr.msra.gmra.mrb[4].mxu1 %vm272_vm1, %v18542_v0  ;;  %2038 = vmatpush1.bf16.msra.mxu0 %v1832_v25 }
 0x105   :  { %v1808_v27 = vpop.permute.xlu0 %1807  ;;  %2112 = vmatprep.mubr.bf16.mxu1 %v18562_v17 }
 0x106   :  { %v1810_v29 = vpop.permute.xlu1 %1809  ;;  %v1835_v30 = vsel %vm22433_vm5, %v1806_v23, %v1808_v27  ;;  %4162 = vrot.lane.b32.xlu1 %v18330_v28, %s17841_s16 }
 0x107   :  { %2080 = vmatprep.subr.bf16.mxu1 %v1835_v30  ;;  %4164 = vrot.lane.b32.xlu0 %v18339_v32, %s17841_s16  ;;  %v1836_v37 = vsel %vm22433_vm5, %v1808_v27, %v1810_v29 }
 0x108   :  { %15960 = vmatmul.mubr.msk.bf16.vlgmr.msra.gmra.mrb[8].mxu0 %vm272_vm1, %v18542_v0  ;;  %2081 = vmatpush1.bf16.msra.mxu1 %v1834_v31 }
 0x109   :  { %v1812_v33 = vpop.permute.xlu0 %1811  ;;  %2155 = vmatprep.mubr.bf16.mxu0 %v18562_v17 }
 0x10a   :  { %v1814_v35 = vpop.permute.xlu1 %1813  ;;  %v1837_v36 = vsel %vm22433_vm5, %v1810_v29, %v1812_v33  ;;  %4166 = vrot.lane.b32.xlu1 %v18349_v34, %s17841_s16 }
 0x10b   :  { %2123 = vmatprep.subr.bf16.mxu0 %v1837_v36  ;;  %4168 = vrot.lane.b32.xlu0 %v18358_v38, %s17841_s16  ;;  %v1838_v43 = vsel %vm22433_vm5, %v1812_v33, %v1814_v35 }
 0x10c   :  { %15961 = vmatmul.mubr.msk.bf16.vlgmr.msra.gmra.mrb[8].mxu1 %vm272_vm1, %v18542_v0  ;;  %2124 = vmatpush1.bf16.msra.mxu0 %v1836_v37 }
 0x10d   :  { %v1816_v39 = vpop.permute.xlu0 %1815  ;;  %2198 = vmatprep.mubr.bf16.mxu1 %v18562_v17 }
 0x10e   :  { %v1818_v41 = vpop.permute.xlu1 %1817  ;;  %v1839_v42 = vsel %vm22433_vm5, %v1814_v35, %v1816_v39  ;;  %4170 = vrot.lane.b32.xlu1 %v18368_v40, %s17841_s16 }
 0x10f   :  { %2166 = vmatprep.subr.bf16.mxu1 %v1839_v42  ;;  %4172 = vrot.lane.b32.xlu0 %v18377_v44, %s17841_s16  ;;  %v1840_v51 = vsel %vm22433_vm5, %v1816_v39, %v1818_v41 }
 0x110   :  { %15962 = vmatmul.mubr.msk.bf16.vlgmr.msra.gmra.mrb[12].mxu0 %vm272_vm1, %v18542_v0  ;;  %2167 = vmatpush1.bf16.msra.mxu1 %v1838_v43 }
 0x111   :  { %v1820_v45 = vpop.permute.xlu0 %1819  ;;  %16576 = vmatprep.subr.bf16.mxu1 %v22422_v59  ;;  %2241 = vmatprep.mubr.bf16.mxu0 %v18562_v17 }
 0x112   :  { %v1822_v46 = vpop.permute.xlu1 %1821  ;;  %v1841_v47 = vsel %vm22433_vm5, %v1818_v41, %v1820_v45  ;;  %4174 = vrot.lane.b32.xlu1 %v18388_v48, %s17841_s16 }
 0x113   :  { %v1842_v49 = vsel %vm22433_vm5, %v1820_v45, %v1822_v46  ;;  %2209 = vmatprep.subr.bf16.mxu0 %v1841_v47  ;;  %4176 = vrot.lane.b32.xlu0 %v18396_v50, %s17841_s16 }
 0x114   :  { %15963 = vmatmul.mubr.msk.bf16.vlgmr.msra.gmra.mrb[12].mxu1 %vm272_vm1, %v18542_v0  ;;  %2210 = vmatpush1.bf16.msra.mxu0 %v1840_v51 }
 0x115   :  { %16577 = vmatpush3.bf16.msra.mxu1 %v1842_v49  ;;  %16578 = vmatprep.mubr.msk.bf16.mxu1 %vm22464_vm3, %v22422_v59  ;;  %v18622_v52 = vpop.permute.xlu0 %3034 }
 0x116   :  { %2458 = vmatprep.subr.bf16.mxu0 %v18240_v2  ;;  %2501 = vmatprep.subr.bf16.mxu1 %v18273_v10  ;;  %v18626_v53 = vpop.permute.xlu1 %3036 }
 0x117   :  { %4180 = vrot.lane.b32.xlu0 %v18417_v57, %s17841_s16  ;;  %4178 = vrot.lane.b32.xlu1 %v18408_v54, %s17841_s16 }
 0x118   :  { %15964 = vmatmul.mubr.msk.bf16.vlgmr.msra.gmra.mrb[16].mxu0 %vm272_vm1, %v18542_v0 }
 0x119   :  { %2459 = vmatpush1.bf16.msra.mxu0 %v18258_v7  ;;  %2490 = vmatprep.mubr.bf16.mxu0 %v18562_v17  ;;  %v18636_v55 = vpop.permute.xlu0 %3032 }
 0x11a   :  { %2544 = vmatprep.subr.bf16.mxu0 %v18292_v16  ;;  %v3073_v6 = vsel %vm22417_vm6, %v18636_v55, %v18622_v52 }
 0x11b   :  { %4702 = vrot.lane.b32.xlu0 %v18240_v2, %s17842_s22  ;;  %4182 = vrot.lane.b32.xlu1 %v18428_v61, %s17841_s16  ;;  %v18643_v56 = vpop.permute.xlu1 %3038 }
 0x11c   :  { %16579 = vmatmul.mubr.msk.bf16.vlgmr.msra.gmra.mrb[16].mxu1 %vm272_vm1, %v18542_v0  ;;  %v3075_v11 = vsel %vm22417_vm6, %v18626_v53, %v18643_v56 }
 0x11d   :  { %2502 = vmatpush1.bf16.msra.mxu1 %v18249_v3  ;;  %2533 = vmatprep.mubr.bf16.mxu1 %v18562_v17  ;;  %v18654_v60 = vpop.permute.xlu0 %3040 }
 0x11e   :  { %2587 = vmatprep.subr.bf16.mxu1 %v18311_v22 }
 0x11f   :  { %4700 = vrot.lane.b32.xlu0 %v18258_v7, %s17842_s22  ;;  %4704 = vrot.lane.b32.xlu1 %v18249_v3, %s17842_s22  ;;  %v18661_v2 = vpop.permute.xlu1 %3042 }
 0x120   :  { %15988 = vmatmul.mubr.msk.bf16.vlgmr.msra.gmra.mrb[0].mxu0 %vm272_vm1, %v18650_v58  ;;  %v3077_v8 = vsel %vm22417_vm6, %v18654_v60, %v18661_v2 }
 0x121   :  { %2545 = vmatpush1.bf16.msra.mxu0 %v18282_v14  ;;  %2576 = vmatprep.mubr.bf16.mxu0 %v18562_v17  ;;  %v18667_v62 = vpop.permute.xlu0 %3044 }
 0x122   :  { %2630 = vmatprep.subr.bf16.mxu0 %v18330_v28 }
 0x123   :  { %4708 = vrot.lane.b32.xlu0 %v18282_v14, %s17842_s22  ;;  %4706 = vrot.lane.b32.xlu1 %v18273_v10, %s17842_s22  ;;  %v18674_v3 = vpop.permute.xlu1 %3046 }
 0x124   :  { %15989 = vmatmul.mubr.msk.bf16.vlgmr.msra.gmra.mrb[0].mxu1 %vm272_vm1, %v18650_v58  ;;  %v3079_v1 = vsel %vm22417_vm6, %v18667_v62, %v18674_v3 }
 0x125   :  { %2588 = vmatpush1.bf16.msra.mxu1 %v18301_v20  ;;  %2619 = vmatprep.mubr.bf16.mxu1 %v18562_v17  ;;  %v18680_v7 = vpop.permute.xlu0 %3048 }
 0x126   :  { %2673 = vmatprep.subr.bf16.mxu1 %v18349_v34 }
 0x127   :  { %4712 = vrot.lane.b32.xlu0 %v18301_v20, %s17842_s22  ;;  %4710 = vrot.lane.b32.xlu1 %v18292_v16, %s17842_s22  ;;  %v18687_v10 = vpop.permute.xlu1 %3050 }
 0x128   :  { %15990 = vmatmul.mubr.msk.bf16.vlgmr.msra.gmra.mrb[4].mxu0 %vm272_vm1, %v18650_v58  ;;  %v3081_v23 = vsel %vm22417_vm6, %v18680_v7, %v18687_v10 }
 0x129   :  { %2631 = vmatpush1.bf16.msra.mxu0 %v18320_v26  ;;  %2662 = vmatprep.mubr.bf16.mxu0 %v18562_v17  ;;  %v18693_v14 = vpop.permute.xlu0 %3052 }
 0x12a   :  { %2716 = vmatprep.subr.bf16.mxu0 %v18368_v40 }
 0x12b   :  { %4716 = vrot.lane.b32.xlu0 %v18320_v26, %s17842_s22  ;;  %4714 = vrot.lane.b32.xlu1 %v18311_v22, %s17842_s22  ;;  %v18700_v16 = vpop.permute.xlu1 %3054 }
 0x12c   :  { %15991 = vmatmul.mubr.msk.bf16.vlgmr.msra.gmra.mrb[4].mxu1 %vm272_vm1, %v18650_v58  ;;  %v3083_v29 = vsel %vm22417_vm6, %v18693_v14, %v18700_v16 }
 0x12d   :  { %2674 = vmatpush1.bf16.msra.mxu1 %v18339_v32  ;;  %2705 = vmatprep.mubr.bf16.mxu1 %v18562_v17  ;;  %v18706_v20 = vpop.permute.xlu0 %3056 }
 0x12e   :  { %2759 = vmatprep.subr.bf16.mxu1 %v18388_v48  ;;  %v3084_v18 = vsel %vm22417_vm6, %v18700_v16, %v18706_v20 }
 0x12f   :  { %4720 = vrot.lane.b32.xlu0 %v18339_v32, %s17842_s22  ;;  %4718 = vrot.lane.b32.xlu1 %v18330_v28, %s17842_s22  ;;  %v18713_v22 = vpop.permute.xlu1 %3058 }
 0x130   :  { %15992 = vmatmul.mubr.msk.bf16.vlgmr.msra.gmra.mrb[8].mxu0 %vm272_vm1, %v18650_v58  ;;  %v3085_v35 = vsel %vm22417_vm6, %v18706_v20, %v18713_v22  ;;  %v18944_v20 = vld [vmem:[%s22401_s1 + $0x30] sm:$0xff]  }
 0x131   :  { %2717 = vmatpush1.bf16.msra.mxu0 %v18358_v38  ;;  %2748 = vmatprep.mubr.bf16.mxu0 %v18562_v17  ;;  %v18719_v26 = vpop.permute.xlu0 %3060 }
 0x132   :  { %2802 = vmatprep.subr.bf16.mxu0 %v18408_v54  ;;  %v3086_v24 = vsel %vm22417_vm6, %v18713_v22, %v18719_v26 }
 0x133   :  { %4724 = vrot.lane.b32.xlu0 %v18358_v38, %s17842_s22  ;;  %4722 = vrot.lane.b32.xlu1 %v18349_v34, %s17842_s22  ;;  %v3074_v38 = vsel %vm22417_vm6, %v18622_v52, %v18626_v53 }
 0x134   :  { %15993 = vmatmul.mubr.msk.bf16.vlgmr.msra.gmra.mrb[8].mxu1 %vm272_vm1, %v18650_v58  ;;  %v18728_v28 = vpop.permute.xlu1 %3062 }
 0x135   :  { %2760 = vmatpush1.bf16.msra.mxu1 %v18377_v44  ;;  %2791 = vmatprep.mubr.bf16.mxu1 %v18562_v17  ;;  %v18732_v32 = vpop.permute.xlu0 %3064  ;;  %v3087_v41 = vsel %vm22417_vm6, %v18719_v26, %v18728_v28 }
 0x136   :  { %16582 = vmatprep.subr.bf16.mxu1 %v22422_v59  ;;  %v3088_v30 = vsel %vm22417_vm6, %v18728_v28, %v18732_v32 }
 0x137   :  { %4728 = vrot.lane.b32.xlu0 %v18377_v44, %s17842_s22  ;;  %4726 = vrot.lane.b32.xlu1 %v18368_v40, %s17842_s22  ;;  %v3076_v40 = vsel %vm22417_vm6, %v18643_v56, %v18654_v60  ;;  %v5248_v56 = vld [vmem:[%s22402_s2] sm:$0xff] }
 0x138   :  { %15994 = vmatmul.mubr.msk.bf16.vlgmr.msra.gmra.mrb[12].mxu0 %vm272_vm1, %v18650_v58  ;;  %v18744_v34 = vpop.permute.xlu1 %3066 }
 0x139   :  { %2803 = vmatpush1.bf16.msra.mxu0 %v18396_v50  ;;  %2834 = vmatprep.mubr.bf16.mxu0 %v18562_v17  ;;  %v18751_v0 = vpop.permute.xlu0 %3068  ;;  %v3089_v45 = vsel %vm22417_vm6, %v18732_v32, %v18744_v34 }
 0x13a   :  { %3114 = vmatprep.subr.bf16.mxu0 %v3074_v38  ;;  %v3090_v36 = vsel %vm22417_vm6, %v18744_v34, %v18751_v0 }
 0x13b   :  { %4732 = vrot.lane.b32.xlu0 %v18396_v50, %s17842_s22  ;;  %4730 = vrot.lane.b32.xlu1 %v18388_v48, %s17842_s22  ;;  %v3078_v48 = vsel %vm22417_vm6, %v18661_v2, %v18667_v62  ;;  %v5299_v62 = vld [vmem:[%s22403_s3 + $0x8] sm:$0xff] }
 0x13c   :  { %15995 = vmatmul.mubr.msk.bf16.vlgmr.msra.gmra.mrb[12].mxu1 %vm272_vm1, %v18650_v58  ;;  %v18762_v44 = vpop.permute.xlu1 %3070 }
 0x13d   :  { %16583 = vmatpush3.bf16.msra.mxu1 %v17764_v63  ;;  %16584 = vmatprep.mubr.msk.bf16.mxu1 %vm22464_vm3, %v22422_v59  ;;  %v18766_v4 = vpop.permute.xlu0 %3590  ;;  %v3091_v51 = vsel %vm22417_vm6, %v18751_v0, %v18762_v44 }
 0x13e   :  { %3157 = vmatprep.subr.bf16.mxu1 %v3076_v40 }
 0x13f   :  { %4736 = vrot.lane.b32.xlu0 %v18417_v57, %s17842_s22  ;;  %4734 = vrot.lane.b32.xlu1 %v18408_v54, %s17842_s22  ;;  %v3080_v57 = vsel %vm22417_vm6, %v18674_v3, %v18680_v7  ;;  %v18798_v54 = vld [vmem:[%s22401_s1 + $0x28] sm:$0xff]   ;;  %v5298_v7 = vld [vmem:[%s22403_s3] sm:$0xff] }
 0x140   :  { %15996 = vmatmul.mubr.msk.bf16.vlgmr.msra.gmra.mrb[16].mxu0 %vm272_vm1, %v18650_v58  ;;  %v18780_v50 = vpop.permute.xlu1 %3592 }
 0x141   :  { %3115 = vmatpush1.bf16.msra.mxu0 %v3073_v6  ;;  %3146 = vmatprep.mubr.bf16.mxu0 %v18562_v17  ;;  %v18783_v9 = vpop.permute.xlu0 %3588  ;;  %v3630_v46 = vsel %vm22416_vm7, %v18766_v4, %v18780_v50 }
 0x142   :  { %3200 = vmatprep.subr.bf16.mxu0 %v3078_v48  ;;  %v3629_v60 = vsel %vm22416_vm7, %v18783_v9, %v18766_v4 }
 0x143   :  { %4738 = vrot.lane.b32.xlu1 %v18428_v61, %s17842_s22  ;;  %v3082_v61 = vsel %vm22417_vm6, %v18687_v10, %v18693_v14  ;;  %5252 = vperm.xlu0 %17697, %v5248_v56  }
 0x144   :  { %16585 = vmatmul.mubr.msk.bf16.vlgmr.msra.gmra.mrb[16].mxu1 %vm272_vm1, %v18650_v58  ;;  %v18800_v5 = vpop.permute.xlu1 %3594  ;;  %v5249_v58 = vld [vmem:[%s22402_s2 + $0x8] sm:$0xff] }
 0x145   :  { %3158 = vmatpush1.bf16.msra.mxu1 %v3075_v11  ;;  %3189 = vmatprep.mubr.bf16.mxu1 %v18562_v17  ;;  %v18803_v12 = vpop.permute.xlu0 %3596  ;;  %v3631_v14 = vsel %vm22416_vm7, %v18780_v50, %v18800_v5 }
 0x146   :  { %3243 = vmatprep.subr.bf16.mxu1 %v3080_v57  ;;  %v3632_v52 = vsel %vm22416_vm7, %v18800_v5, %v18803_v12 }
 0x147   :  { %5257 = vperm.xlu1 %17698, %v5249_v58   ;;  %5307 = vperm.xlu0 %17697, %v5299_v62  }
 0x148   :  { %16021 = vmatmul.mubr.msk.bf16.vlgmr.msra.gmra.mrb[0].mxu0 %vm272_vm1, %v18798_v54  ;;  %v18813_v13 = vpop.permute.xlu1 %3598 }
 0x149   :  { %3201 = vmatpush1.bf16.msra.mxu0 %v3077_v8  ;;  %3232 = vmatprep.mubr.bf16.mxu0 %v18562_v17  ;;  %v18816_v15 = vpop.permute.xlu0 %3600  ;;  %v3633_v28 = vsel %vm22416_vm7, %v18803_v12, %v18813_v13 }
 0x14a   :  { %3286 = vmatprep.subr.bf16.mxu0 %v3082_v61  ;;  %v3634_v2 = vsel %vm22416_vm7, %v18813_v13, %v18816_v15 }
 0x14b   :  { %5302 = vperm.xlu1 %17698, %v5298_v7  }
 0x14c   :  { %16022 = vmatmul.mubr.msk.bf16.vlgmr.msra.gmra.mrb[0].mxu1 %vm272_vm1, %v18798_v54  ;;  %v18826_v19 = vpop.permute.xlu1 %3602 }
 0x14d   :  { %3244 = vmatpush1.bf16.msra.mxu1 %v3079_v1  ;;  %3275 = vmatprep.mubr.bf16.mxu1 %v18562_v17  ;;  %v18829_v21 = vpop.permute.xlu0 %3604  ;;  %v3635_v63 = vsel %vm22416_vm7, %v18816_v15, %v18826_v19 }
 0x14e   :  { %3329 = vmatprep.subr.bf16.mxu1 %v3084_v18  ;;  %v3636_v16 = vsel %vm22416_vm7, %v18826_v19, %v18829_v21 }
 0x14f   :  { %5565 = vrot.lane.b32.xlu1 %v18562_v17, %s17833_s29 }
 0x150   :  { %16023 = vmatmul.mubr.msk.bf16.vlgmr.msra.gmra.mrb[4].mxu0 %vm272_vm1, %v18798_v54  ;;  %v18839_v25 = vpop.permute.xlu1 %3606 }
 0x151   :  { %3287 = vmatpush1.bf16.msra.mxu0 %v3081_v23  ;;  %3318 = vmatprep.mubr.bf16.mxu0 %v18562_v17  ;;  %v18842_v27 = vpop.permute.xlu0 %3608  ;;  %v3637_v4 = vsel %vm22416_vm7, %v18829_v21, %v18839_v25 }
 0x152   :  { %3372 = vmatprep.subr.bf16.mxu0 %v3086_v24  ;;  %v3638_v32 = vsel %vm22416_vm7, %v18839_v25, %v18842_v27 }
 0x154   :  { %16024 = vmatmul.mubr.msk.bf16.vlgmr.msra.gmra.mrb[4].mxu1 %vm272_vm1, %v18798_v54  ;;  %v18852_v31 = vpop.permute.xlu1 %3610 }
 0x155   :  { %3330 = vmatpush1.bf16.msra.mxu1 %v3083_v29  ;;  %3361 = vmatprep.mubr.bf16.mxu1 %v18562_v17  ;;  %v18855_v33 = vpop.permute.xlu0 %3612  ;;  %v3639_v9 = vsel %vm22416_vm7, %v18842_v27, %v18852_v31 }
 0x156   :  { %3415 = vmatprep.subr.bf16.mxu1 %v3088_v30  ;;  %v3640_v0 = vsel %vm22416_vm7, %v18852_v31, %v18855_v33 }
 0x158   :  { %16025 = vmatmul.mubr.msk.bf16.vlgmr.msra.gmra.mrb[8].mxu0 %vm272_vm1, %v18798_v54  ;;  %v18865_v37 = vpop.permute.xlu1 %3614 }
 0x159   :  { %3373 = vmatpush1.bf16.msra.mxu0 %v3085_v35  ;;  %3404 = vmatprep.mubr.bf16.mxu0 %v18562_v17  ;;  %v18868_v39 = vpop.permute.xlu0 %3616  ;;  %v3641_v57 = vsel %vm22416_vm7, %v18855_v33, %v18865_v37  ;;  %v19068_v33 = vld [vmem:[%s22401_s1 + $0x38] sm:$0xff]  }
 0x15a   :  { %3458 = vmatprep.subr.bf16.mxu0 %v3090_v36  ;;  %v3642_v6 = vsel %vm22416_vm7, %v18865_v37, %v18868_v39 }
 0x15c   :  { %16026 = vmatmul.mubr.msk.bf16.vlgmr.msra.gmra.mrb[8].mxu1 %vm272_vm1, %v18798_v54  ;;  %v18875_v42 = vpop.permute.xlu1 %3618 }
 0x15d   :  { %3416 = vmatpush1.bf16.msra.mxu1 %v3087_v41  ;;  %3447 = vmatprep.mubr.bf16.mxu1 %v18562_v17  ;;  %v18878_v43 = vpop.permute.xlu0 %3620  ;;  %v3643_v8 = vsel %vm22416_vm7, %v18868_v39, %v18875_v42 }
 0x15e   :  { %16588 = vmatprep.subr.bf16.mxu1 %v22422_v59  ;;  %v3644_v11 = vsel %vm22416_vm7, %v18875_v42, %v18878_v43 }
 0x160   :  { %16027 = vmatmul.mubr.msk.bf16.vlgmr.msra.gmra.mrb[12].mxu0 %vm272_vm1, %v18798_v54  ;;  %v18889_v47 = vpop.permute.xlu1 %3622 }
 0x161   :  { %3459 = vmatpush1.bf16.msra.mxu0 %v3089_v45  ;;  %3490 = vmatprep.mubr.bf16.mxu0 %v18562_v17  ;;  %v18892_v49 = vpop.permute.xlu0 %3624  ;;  %v3645_v15 = vsel %vm22416_vm7, %v18878_v43, %v18889_v47 }
 0x162   :  { %3670 = vmatprep.subr.bf16.mxu0 %v3630_v46  ;;  %v3646_v12 = vsel %vm22416_vm7, %v18889_v47, %v18892_v49 }
 0x164   :  { %16028 = vmatmul.mubr.msk.bf16.vlgmr.msra.gmra.mrb[12].mxu1 %vm272_vm1, %v18798_v54  ;;  %v18902_v53 = vpop.permute.xlu1 %3626 }
 0x165   :  { %16589 = vmatpush3.bf16.msra.mxu1 %v3091_v51  ;;  %16590 = vmatprep.mubr.msk.bf16.mxu1 %vm22464_vm3, %v22422_v59  ;;  %v18906_v55 = vpop.permute.xlu0 %4146  ;;  %v3647_v18 = vsel %vm22416_vm7, %v18892_v49, %v18902_v53 }
 0x166   :  { %3713 = vmatprep.subr.bf16.mxu1 %v3632_v52 }
 0x168   :  { %16029 = vmatmul.mubr.msk.bf16.vlgmr.msra.gmra.mrb[16].mxu0 %vm272_vm1, %v18798_v54  ;;  %v18925_v3 = vpop.permute.xlu1 %4148 }
 0x169   :  { %3671 = vmatpush1.bf16.msra.mxu0 %v3629_v60  ;;  %3702 = vmatprep.mubr.bf16.mxu0 %v18562_v17  ;;  %v18931_v10 = vpop.permute.xlu0 %4144  ;;  %v4186_v1 = vsel %vm22415_vm8, %v18906_v55, %v18925_v3 }
 0x16a   :  { %3756 = vmatprep.subr.bf16.mxu0 %v3634_v2  ;;  %v4185_v24 = vsel %vm22415_vm8, %v18931_v10, %v18906_v55 }
 0x16c   :  { %16591 = vmatmul.mubr.msk.bf16.vlgmr.msra.gmra.mrb[16].mxu1 %vm272_vm1, %v18798_v54  ;;  %v18946_v22 = vpop.permute.xlu1 %4150 }
 0x16d   :  { %3714 = vmatpush1.bf16.msra.mxu1 %v3631_v14  ;;  %3745 = vmatprep.mubr.bf16.mxu1 %v18562_v17  ;;  %v18949_v26 = vpop.permute.xlu0 %4152  ;;  %v4187_v30 = vsel %vm22415_vm8, %v18925_v3, %v18946_v22 }
 0x16e   :  { %3799 = vmatprep.subr.bf16.mxu1 %v3636_v16  ;;  %v4188_v23 = vsel %vm22415_vm8, %v18946_v22, %v18949_v26 }
 0x170   :  { %16034 = vmatmul.mubr.msk.bf16.vlgmr.msra.gmra.mrb[0].mxu0 %vm272_vm1, %v18944_v20  ;;  %v18961_v38 = vpop.permute.xlu1 %4154 }
 0x171   :  { %3757 = vmatpush1.bf16.msra.mxu0 %v3633_v28  ;;  %3788 = vmatprep.mubr.bf16.mxu0 %v18562_v17  ;;  %v18964_v34 = vpop.permute.xlu0 %4156  ;;  %v4189_v35 = vsel %vm22415_vm8, %v18949_v26, %v18961_v38 }
 0x172   :  { %3842 = vmatprep.subr.bf16.mxu0 %v3638_v32  ;;  %v4190_v25 = vsel %vm22415_vm8, %v18961_v38, %v18964_v34 }
 0x174   :  { %16035 = vmatmul.mubr.msk.bf16.vlgmr.msra.gmra.mrb[0].mxu1 %vm272_vm1, %v18944_v20  ;;  %v18974_v40 = vpop.permute.xlu1 %4158 }
 0x175   :  { %3800 = vmatpush1.bf16.msra.mxu1 %v3635_v63  ;;  %3831 = vmatprep.mubr.bf16.mxu1 %v18562_v17  ;;  %v18977_v44 = vpop.permute.xlu0 %4160  ;;  %v4191_v41 = vsel %vm22415_vm8, %v18964_v34, %v18974_v40 }
 0x176   :  { %3885 = vmatprep.subr.bf16.mxu1 %v3640_v0  ;;  %v4192_v31 = vsel %vm22415_vm8, %v18974_v40, %v18977_v44  ;;  %v17768_v0 = vld [vmem:[%s22401_s1 + $0x40] sm:$0xff]  }
 0x178   :  { %16036 = vmatmul.mubr.msk.bf16.vlgmr.msra.gmra.mrb[4].mxu0 %vm272_vm1, %v18944_v20  ;;  %v18987_v48 = vpop.permute.xlu1 %4162 }
 0x179   :  { %3843 = vmatpush1.bf16.msra.mxu0 %v3637_v4  ;;  %3874 = vmatprep.mubr.bf16.mxu0 %v18562_v17  ;;  %v18990_v50 = vpop.permute.xlu0 %4164  ;;  %v4193_v46 = vsel %vm22415_vm8, %v18977_v44, %v18987_v48 }
 0x17a   :  { %3928 = vmatprep.subr.bf16.mxu0 %v3642_v6  ;;  %v4194_v39 = vsel %vm22415_vm8, %v18987_v48, %v18990_v50 }
 0x17c   :  { %16037 = vmatmul.mubr.msk.bf16.vlgmr.msra.gmra.mrb[4].mxu1 %vm272_vm1, %v18944_v20  ;;  %v19006_v5 = vpop.permute.xlu1 %4166 }
 0x17d   :  { %3886 = vmatpush1.bf16.msra.mxu1 %v3639_v9  ;;  %3917 = vmatprep.mubr.bf16.mxu1 %v18562_v17  ;;  %v19004_v54 = vpop.permute.xlu0 %4168  ;;  %v4195_v49 = vsel %vm22415_vm8, %v18990_v50, %v19006_v5 }
 0x17e   :  { %3971 = vmatprep.subr.bf16.mxu1 %v3644_v11  ;;  %v4196_v42 = vsel %vm22415_vm8, %v19006_v5, %v19004_v54 }
 0x180   :  { %16038 = vmatmul.mubr.msk.bf16.vlgmr.msra.gmra.mrb[8].mxu0 %vm272_vm1, %v18944_v20  ;;  %v19021_v13 = vpop.permute.xlu1 %4170 }
 0x181   :  { %3929 = vmatpush1.bf16.msra.mxu0 %v3641_v57  ;;  %3960 = vmatprep.mubr.bf16.mxu0 %v18562_v17  ;;  %v19019_v61 = vpop.permute.xlu0 %4172  ;;  %v4197_v55 = vsel %vm22415_vm8, %v19004_v54, %v19021_v13 }
 0x182   :  { %4014 = vmatprep.subr.bf16.mxu0 %v3646_v12  ;;  %v4198_v47 = vsel %vm22415_vm8, %v19021_v13, %v19019_v61 }
 0x184   :  { %16039 = vmatmul.mubr.msk.bf16.vlgmr.msra.gmra.mrb[8].mxu1 %vm272_vm1, %v18944_v20  ;;  %v4175_v21 = vpop.permute.xlu1 %4174 }
 0x185   :  { %3972 = vmatpush1.bf16.msra.mxu1 %v3643_v8  ;;  %4003 = vmatprep.mubr.bf16.mxu1 %v18562_v17  ;;  %v19037_v19 = vpop.permute.xlu0 %4176  ;;  %v4199_v2 = vsel %vm22415_vm8, %v19019_v61, %v4175_v21 }
 0x186   :  { %16594 = vmatprep.subr.bf16.mxu1 %v22422_v59  ;;  %v4200_v53 = vsel %vm22415_vm8, %v4175_v21, %v19037_v19 }
 0x188   :  { %16040 = vmatmul.mubr.msk.bf16.vlgmr.msra.gmra.mrb[12].mxu0 %vm272_vm1, %v18944_v20 }
 0x189   :  { %4015 = vmatpush1.bf16.msra.mxu0 %v3645_v15  ;;  %4046 = vmatprep.mubr.bf16.mxu0 %v18562_v17  ;;  %v19054_v27 = vpop.permute.xlu0 %4180  ;;  %v4179_v29 = vpop.permute.xlu1 %4178 }
 0x18a   :  { %4226 = vmatprep.subr.bf16.mxu0 %v4186_v1  ;;  %v4202_v56 = vsel %vm22415_vm8, %v4179_v29, %v19054_v27  ;;  %v4201_v62 = vsel %vm22415_vm8, %v19037_v19, %v4179_v29 }
 0x18c   :  { %16041 = vmatmul.mubr.msk.bf16.vlgmr.msra.gmra.mrb[12].mxu1 %vm272_vm1, %v18944_v20 }
 0x18d   :  { %16595 = vmatpush3.bf16.msra.mxu1 %v3647_v18  ;;  %16596 = vmatprep.mubr.msk.bf16.mxu1 %vm22464_vm3, %v22422_v59  ;;  %v4703_v36 = vpop.permute.xlu0 %4702  ;;  %v4183_v37 = vpop.permute.xlu1 %4182 }
 0x18e   :  { %4269 = vmatprep.subr.bf16.mxu1 %v4188_v23  ;;  %v4203_v14 = vsel %vm22415_vm8, %v19054_v27, %v4183_v37  ;;  %v5351_v23 = vlaneseq }
 0x190   :  { %16042 = vmatmul.mubr.msk.bf16.vlgmr.msra.gmra.mrb[16].mxu0 %vm272_vm1, %v18944_v20 }
 0x191   :  { %4227 = vmatpush1.bf16.msra.mxu0 %v4185_v24  ;;  %4258 = vmatprep.mubr.bf16.mxu0 %v18562_v17  ;;  %v4701_v43 = vpop.permute.xlu0 %4700  ;;  %v4705_v45 = vpop.permute.xlu1 %4704  ;;  %v77_v24 = vld [vmem:[%s22404_s12] sm:$0xff] }
 0x192   :  { %4312 = vmatprep.subr.bf16.mxu0 %v4190_v25  ;;  %v4742_v10 = vsel %vm22414_vm9, %v4703_v36, %v4705_v45  ;;  %v4741_v26 = vsel %vm22414_vm9, %v4701_v43, %v4703_v36  ;;  %v19184_v25 = vshrl.u32 %v5351_v23, 7  ;;  %vm80_vm10 = vcmp.gt.f32.partialorder %v77_v24, 0.5 }
 0x194   :  { %16597 = vmatmul.mubr.msk.bf16.vlgmr.msra.gmra.mrb[16].mxu1 %vm272_vm1, %v18944_v20  ;;  %v19187_v27 = vsub.s32 0, %v19184_v25  ;;  %v19190_v29 = vsub.s32 1, %v19184_v25  ;;  %v5369_v37 = vsub.s32 4, %v19184_v25 }
 0x195   :  { %4270 = vmatpush1.bf16.msra.mxu1 %v4187_v30  ;;  %4301 = vmatprep.mubr.bf16.mxu1 %v18562_v17  ;;  %v4709_v51 = vpop.permute.xlu0 %4708  ;;  %v4707_v52 = vpop.permute.xlu1 %4706  ;;  %v5348_v30 = vsel %vm80_vm10, 1, %v18562_v17 }
 0x196   :  { %4355 = vmatprep.subr.bf16.mxu1 %v4192_v31  ;;  %v4744_v16 = vsel %vm22414_vm9, %v4707_v52, %v4709_v51  ;;  %v4743_v32 = vsel %vm22414_vm9, %v4705_v45, %v4707_v52  ;;  %v19194_v31 = vsub.s32 2, %v19184_v25 }
 0x198   :  { %16047 = vmatmul.mubr.msk.bf16.vlgmr.msra.gmra.mrb[0].mxu0 %vm272_vm1, %v19068_v33  ;;  %v5362_v43 = vrot.slane %v5348_v30, %v19194_v31 }
 0x199   :  { %4313 = vmatpush1.bf16.msra.mxu0 %v4189_v35  ;;  %4344 = vmatprep.mubr.bf16.mxu0 %v18562_v17  ;;  %v4713_v58 = vpop.permute.xlu0 %4712  ;;  %v4711_v60 = vpop.permute.xlu1 %4710  ;;  %v78_v35 = vld [vmem:[%s22404_s12 + $0x8] sm:$0xff] }
 0x19a   :  { %4398 = vmatprep.subr.bf16.mxu0 %v4194_v39  ;;  %v4746_v28 = vsel %vm22414_vm9, %v4711_v60, %v4713_v58  ;;  %v4745_v40 = vsel %vm22414_vm9, %v4709_v51, %v4711_v60  ;;  %v5373_v39 = vsub.s32 5, %v19184_v25  ;;  %vm81_vm11 = vcmp.gt.f32.partialorder %v78_v35, 0.5 }
 0x19b   :  { %v19213_v51 = vrot.slane %v5348_v30, %v5369_v37  ;;  %vm19231_vm14 = vcmp.eq.s32.totalorder %v5362_v43, 1 }
 0x19c   :  { %16048 = vmatmul.mubr.msk.bf16.vlgmr.msra.gmra.mrb[0].mxu1 %vm272_vm1, %v19068_v33  ;;  %v19215_v52 = vrot.slane %v5348_v30, %v5373_v39 }
 0x19d   :  { %4356 = vmatpush1.bf16.msra.mxu1 %v4191_v41  ;;  %4387 = vmatprep.mubr.bf16.mxu1 %v18562_v17  ;;  %v4717_v3 = vpop.permute.xlu0 %4716  ;;  %v4715_v7 = vpop.permute.xlu1 %4714  ;;  %v5354_v41 = vrot.slane %v5348_v30, %v19187_v27  ;;  %vm22418_vm10 = vcmp.eq.s32.totalorder %v19213_v51, 1 }
 0x19e   :  { %4441 = vmatprep.subr.bf16.mxu1 %v4196_v42  ;;  %v4748_v63 = vsel %vm22414_vm9, %v4715_v7, %v4717_v3  ;;  %v4747_v48 = vsel %vm22414_vm9, %v4713_v58, %v4715_v7  ;;  %v5358_v42 = vrot.slane %v5348_v30, %v19190_v29 }
 0x19f   :  { %vm19222_vm12 = vcmp.eq.s32.totalorder %v5354_v41, 1  ;;  %v19317_v41 = vld [vmem:[#allocation3] sm:$0xff] }
 0x1a0   :  { %16049 = vmatmul.mubr.msk.bf16.vlgmr.msra.gmra.mrb[4].mxu0 %vm272_vm1, %v19068_v33  ;;  %vm19226_vm13 = vcmp.eq.s32.totalorder %v5358_v42, 1 }
 0x1a1   :  { %4399 = vmatpush1.bf16.msra.mxu0 %v4193_v46  ;;  %4430 = vmatprep.mubr.bf16.mxu0 %v18562_v17  ;;  %v4721_v20 = vpop.permute.xlu0 %4720  ;;  %v4719_v22 = vpop.permute.xlu1 %4718  ;;  %v5377_v46 = vsub.s32 6, %v19184_v25 }
 0x1a2   :  { %4484 = vmatprep.subr.bf16.mxu0 %v4198_v47  ;;  %v4750_v44 = vsel %vm22414_vm9, %v4719_v22, %v4721_v20  ;;  %v4749_v9 = vsel %vm22414_vm9, %v4717_v3, %v4719_v22  ;;  %v79_v22 = vld [vmem:[%s22404_s12 + $0x10] sm:$0x7] }
 0x1a4   :  { %16050 = vmatmul.mubr.msk.bf16.vlgmr.msra.gmra.mrb[4].mxu1 %vm272_vm1, %v19068_v33 }
 0x1a5   :  { %4442 = vmatpush1.bf16.msra.mxu1 %v4195_v49  ;;  %4473 = vmatprep.mubr.bf16.mxu1 %v18562_v17  ;;  %v4725_v38 = vpop.permute.xlu0 %4724  ;;  %v4723_v34 = vpop.permute.xlu1 %4722  ;;  %v5381_v49 = vsub.s32 7, %v19184_v25 }
 0x1a6   :  { %4527 = vmatprep.subr.bf16.mxu1 %v4200_v53  ;;  %v4752_v50 = vsel %vm22414_vm9, %v4723_v34, %v4725_v38  ;;  %v4751_v5 = vsel %vm22414_vm9, %v4721_v20, %v4723_v34  ;;  %v19218_v53 = vsel %vm81_vm11, 1, %v18562_v17  ;;  %vm22420_vm11 = vcmp.eq.s32.totalorder %v19215_v52, 1 }
 0x1a7   :  { %v5390_v20 = vrot.slane %v19218_v53, %v19190_v29 }
 0x1a8   :  { %16051 = vmatmul.mubr.msk.bf16.vlgmr.msra.gmra.mrb[8].mxu0 %vm272_vm1, %v19068_v33 }
 0x1a9   :  { %4485 = vmatpush1.bf16.msra.mxu0 %v4197_v55  ;;  %4516 = vmatprep.mubr.bf16.mxu0 %v18562_v17  ;;  %v4729_v4 = vpop.permute.xlu0 %4728  ;;  %v4727_v6 = vpop.permute.xlu1 %4726  ;;  %vm19380_vm6 = vcmp.eq.s32.totalorder %v5390_v20, 1 }
 0x1aa   :  { %4570 = vmatprep.subr.bf16.mxu0 %v4202_v56  ;;  %v4754_v54 = vsel %vm22414_vm9, %v4727_v6, %v4729_v4  ;;  %v4753_v13 = vsel %vm22414_vm9, %v4725_v38, %v4727_v6  ;;  %v5394_v38 = vrot.slane %v19218_v53, %v19194_v31  ;;  %v19271_v6 = vrot.slane %v19218_v53, %v5373_v39 }
 0x1ac   :  { %16052 = vmatmul.mubr.msk.bf16.vlgmr.msra.gmra.mrb[8].mxu1 %vm272_vm1, %v19068_v33 }
 0x1ad   :  { %4528 = vmatpush1.bf16.msra.mxu1 %v4199_v2  ;;  %4559 = vmatprep.mubr.bf16.mxu1 %v18562_v17  ;;  %v4733_v11 = vpop.permute.xlu0 %4732  ;;  %v4731_v57 = vpop.permute.xlu1 %4730 }
 0x1ae   :  { %16600 = vmatprep.subr.bf16.mxu1 %v22422_v59  ;;  %v4756_v12 = vsel %vm22414_vm9, %v4731_v57, %v4733_v11  ;;  %v4755_v1 = vsel %vm22414_vm9, %v4729_v4, %v4731_v57  ;;  %v19268_v4 = vrot.slane %v19218_v53, %v5369_v37 }
 0x1b0   :  { %16053 = vmatmul.mubr.msk.bf16.vlgmr.msra.gmra.mrb[12].mxu0 %vm272_vm1, %v19068_v33  ;;  %22475 = vst [vmem:[#allocation6_spill] sm:$0xff] %v19268_v4 }
 0x1b1   :  { %4571 = vmatpush1.bf16.msra.mxu0 %v4201_v62  ;;  %4602 = vmatprep.mubr.bf16.mxu0 %v18562_v17  ;;  %v4737_v8 = vpop.permute.xlu0 %4736  ;;  %v4735_v61 = vpop.permute.xlu1 %4734 }
 0x1b2   :  { %4782 = vmatprep.subr.bf16.mxu0 %v4742_v10  ;;  %v4758_v15 = vsel %vm22414_vm9, %v4735_v61, %v4737_v8  ;;  %v4757_v18 = vsel %vm22414_vm9, %v4733_v11, %v4735_v61  ;;  %v19278_v11 = vrot.slane %v19218_v53, %v5377_v46 }
 0x1b4   :  { %16054 = vmatmul.mubr.msk.bf16.vlgmr.msra.gmra.mrb[12].mxu1 %vm272_vm1, %v19068_v33  ;;  %22476 = vst [vmem:[#allocation7_spill] sm:$0xff] %v19278_v11 }
 0x1b5   :  { %16601 = vmatpush3.bf16.msra.mxu1 %v4203_v14  ;;  %16602 = vmatprep.mubr.msk.bf16.mxu1 %vm22464_vm3, %v22422_v59  ;;  %v4739_v19 = vpop.permute.xlu1 %4738  ;;  %v19241_v14 = vrot.slane %v5348_v30, %v5381_v49 }
 0x1b6   :  { %4825 = vmatprep.subr.bf16.mxu1 %v4744_v16  ;;  %v4759_v21 = vsel %vm22414_vm9, %v4737_v8, %v4739_v19  ;;  %v5386_v16 = vrot.slane %v19218_v53, %v19187_v27  ;;  %vm82_vm9 = vcmp.gt.f32.partialorder %v79_v22, 0.5 }
 0x1b7   :  { %vm22427_vm7 = vcmp.eq.s32.totalorder %v19241_v14, 1  ;;  %v19321_v42 = vsel %vm82_vm9, 1, %v19317_v41 }
 0x1b8   :  { %16055 = vmatmul.mubr.msk.bf16.vlgmr.msra.gmra.mrb[16].mxu0 %vm272_vm1, %v19068_v33  ;;  %vm19344_vm9 = vcmp.eq.s32.totalorder %v5386_v16, 1 }
 0x1b9   :  { %4783 = vmatpush1.bf16.msra.mxu0 %v4741_v26  ;;  %4814 = vmatprep.mubr.bf16.mxu0 %v18562_v17 }
 0x1ba   :  { %4868 = vmatprep.subr.bf16.mxu0 %v4746_v28 }
 0x1bc   :  { %16603 = vmatmul.mubr.msk.bf16.vlgmr.msra.gmra.mrb[16].mxu1 %vm272_vm1, %v19068_v33  ;;  %v5365_v33 = vsub.s32 3, %v19184_v25 }
 0x1bd   :  { %4826 = vmatpush1.bf16.msra.mxu1 %v4743_v32  ;;  %4857 = vmatprep.mubr.bf16.mxu1 %v18562_v17 }
 0x1be   :  { %4911 = vmatprep.subr.bf16.mxu1 %v4748_v63  ;;  %v19207_v45 = vrot.slane %v5348_v30, %v5365_v33  ;;  %v19259_v34 = vrot.slane %v19218_v53, %v5365_v33 }
 0x1c0   :  { %16060 = vmatmul.mubr.msk.bf16.vlgmr.msra.gmra.mrb[0].mxu0 %vm272_vm1, %v17768_v0  ;;  %vm22419_vm15 = vcmp.eq.s32.totalorder %v19207_v45, 1  ;;  %22474 = vst [vmem:[#allocation5_spill] sm:$0xff] %v19259_v34 }
 0x1c1   :  { %4869 = vmatpush1.bf16.msra.mxu0 %v4745_v40  ;;  %4900 = vmatprep.mubr.bf16.mxu0 %v18562_v17 }
 0x1c2   :  { %4954 = vmatprep.subr.bf16.mxu0 %v4750_v44  ;;  %v19210_v47 = vpop.permute.xlu0 %5252 }
 0x1c4   :  { %16061 = vmatmul.mubr.msk.bf16.vlgmr.msra.gmra.mrb[0].mxu1 %vm272_vm1, %v17768_v0 }
 0x1c5   :  { %4912 = vmatpush1.bf16.msra.mxu1 %v4747_v48  ;;  %4943 = vmatprep.mubr.bf16.mxu1 %v18562_v17 }
 0x1c6   :  { %4997 = vmatprep.subr.bf16.mxu1 %v4752_v50  ;;  %v19200_v36 = vpop.permute.xlu1 %5257  ;;  %v19261_v63 = vpop.permute.xlu0 %5307 }
 0x1c8   :  { %16062 = vmatmul.mubr.msk.bf16.vlgmr.msra.gmra.mrb[4].mxu0 %vm272_vm1, %v17768_v0 }
 0x1c9   :  { %4955 = vmatpush1.bf16.msra.mxu0 %v4749_v9  ;;  %4986 = vmatprep.mubr.bf16.mxu0 %v18562_v17 }
 0x1ca   :  { %5040 = vmatprep.subr.bf16.mxu0 %v4754_v54  ;;  %v19220_v56 = vpop.permute.xlu1 %5302 }
 0x1cc   :  { %16063 = vmatmul.mubr.msk.bf16.vlgmr.msra.gmra.mrb[4].mxu1 %vm272_vm1, %v17768_v0 }
 0x1cd   :  { %4998 = vmatpush1.bf16.msra.mxu1 %v4751_v5  ;;  %5029 = vmatprep.mubr.bf16.mxu1 %v18562_v17 }
 0x1ce   :  { %5083 = vmatprep.subr.bf16.mxu1 %v4756_v12 }
 0x1d0   :  { %16064 = vmatmul.mubr.msk.bf16.vlgmr.msra.gmra.mrb[8].mxu0 %vm272_vm1, %v17768_v0 }
 0x1d1   :  { %5041 = vmatpush1.bf16.msra.mxu0 %v4753_v13  ;;  %5072 = vmatprep.mubr.bf16.mxu0 %v18562_v17 }
 0x1d2   :  { %5126 = vmatprep.subr.bf16.mxu0 %v4758_v15 }
 0x1d4   :  { %16065 = vmatmul.mubr.msk.bf16.vlgmr.msra.gmra.mrb[8].mxu1 %vm272_vm1, %v17768_v0 }
 0x1d5   :  { %5084 = vmatpush1.bf16.msra.mxu1 %v4755_v1  ;;  %5115 = vmatprep.mubr.bf16.mxu1 %v18562_v17 }
 0x1d6   :  { %16606 = vmatprep.subr.bf16.mxu1 %v22422_v59 }
 0x1d8   :  { %16066 = vmatmul.mubr.msk.bf16.vlgmr.msra.gmra.mrb[12].mxu0 %vm272_vm1, %v17768_v0 }
 0x1d9   :  { %5127 = vmatpush1.bf16.msra.mxu0 %v4757_v18  ;;  %5158 = vmatprep.mubr.bf16.mxu0 %v18562_v17 }
 0x1dc   :  { %16067 = vmatmul.mubr.msk.bf16.vlgmr.msra.gmra.mrb[12].mxu1 %vm272_vm1, %v17768_v0 }
 0x1dd   :  { %16607 = vmatpush3.bf16.msra.mxu1 %v4759_v21  ;;  %16608 = vmatprep.mubr.msk.bf16.mxu1 %vm22464_vm3, %v22422_v59  ;;  %v5422_v59 = vrot.slane %v19321_v42, %v19190_v29 }
 0x1e0   :  { %16068 = vmatmul.mubr.msk.bf16.vlgmr.msra.gmra.mrb[16].mxu0 %vm272_vm1, %v17768_v0 }
 0x1e1   :  { %5678 = vmatprep.mubr.bf16.mxu0 %v18562_v17 }
 0x1e4   :  { %16609 = vmatmul.mubr.msk.bf16.vlgmr.msra.gmra.mrb[16].mxu1 %vm272_vm1, %v17768_v0 }
 0x1e5   :  { %5719 = vmatprep.mubr.bf16.mxu1 %v18562_v17  ;;  %v19236_v17 = vrot.slane %v5348_v30, %v5377_v46 }
 0x1e7   :  { %22473 = vst [vmem:[#allocation4_spill] sm:$0xff] %v19236_v17  ;;  %vm22421_vm8 = vcmp.eq.s32.totalorder %v19236_v17, 1 }
 0x293   :  { %v4816_v55 = vpop.f32.mrb[0].mxu0 }
 0x294   :  { %v5260_v2 = vmul.f32 %v19210_v47, %v4816_v55  ;;  %v4818_v62 = vpop.f32.mrb[1].mxu0 }
 0x295   :  { %v5261_v7 = vmul.f32 %v19210_v47, %v4818_v62  ;;  %v4820_v10 = vpop.f32.mrb[2].mxu0 }
 0x296   :  { %v5279_v26 = vmul.f32 %v19200_v36, %v4820_v10  ;;  %v19252_v28 = vadd.f32 %v19220_v56, %v5260_v2  ;;  %v4822_v32 = vpop.f32.mrb[3].mxu0 }
 0x297   :  { %v5280_v0 = vmul.f32 %v19200_v36, %v4822_v32  ;;  %v19265_v40 = vadd.f32 %v19220_v56, %v5261_v7  ;;  %v4859_v44 = vpop.f32.mrb[0].mxu1 }
 0x298   :  { %v19274_v48 = vadd.f32 %v19261_v63, %v5279_v26  ;;  %v5262_v50 = vmul.f32 %v19210_v47, %v4859_v44  ;;  %v4861_v9 = vpop.f32.mrb[1].mxu1  ;;  %v5446_v57 = vsel %vm19222_vm12, %v19252_v28, 0.0 }
 0x299   :  { %v19284_v54 = vadd.f32 %v19261_v63, %v5280_v0  ;;  %v5447_v5 = vsel %vm19226_vm13, %v19265_v40, 0.0  ;;  %v5263_v12 = vmul.f32 %v19210_v47, %v4861_v9  ;;  %v4863_v8 = vpop.f32.mrb[2].mxu1  ;;  %v22477_v0 = vmov 0 }
 0x29a   :  { %v5465_v61 = vsel %vm19222_vm12, %v19274_v48, 0.0  ;;  %v19296_v15 = vadd.f32 %v19220_v56, %v5262_v50  ;;  %v5281_v1 = vmul.f32 %v19200_v36, %v4863_v8  ;;  %v4865_v18 = vpop.f32.mrb[3].mxu1  ;;  %v22478_v0 = vsel %vm19344_vm9, 4294967295, %v22477_v0 }
 0x29b   :  { %v19299_v19 = vpack.c.bf16 %v5465_v61, %v5446_v57  ;;  %v5466_v21 = vsel %vm19226_vm13, %v19284_v54, 0.0  ;;  %v19307_v24 = vadd.f32 %v19220_v56, %v5263_v12  ;;  %v4902_v30 = vpop.f32.mrb[4].mxu0  ;;  %v5282_v37 = vmul.f32 %v19200_v36, %v4865_v18  ;;  %22479 = vst [vmem:[#allocation8_spill] sm:$0xff] %v22478_v0 }
 0x29c   :  { %v19311_v33 = vpack.c.bf16 %v5466_v21, %v5447_v5  ;;  %v19314_v35 = vadd.f32 %v19261_v63, %v5281_v1  ;;  %v4904_v39 = vpop.f32.mrb[5].mxu0  ;;  %v5448_v43 = vsel %vm19231_vm14, %v19296_v15, 0.0  ;;  %v5264_v55 = vmul.f32 %v19210_v47, %v4902_v30 }
 0x29d   :  { %v5449_v46 = vsel %vm22419_vm15, %v19307_v24, 0.0  ;;  %v5265_v2 = vmul.f32 %v19210_v47, %v4904_v39  ;;  %v4906_v62 = vpop.f32.mrb[6].mxu0  ;;  %5567 = vrot.lane.b32.xlu1 %v19299_v19, %s17833_s29  ;;  %v19339_v22 = vadd.f32 %v19261_v63, %v5282_v37 }
 0x29e   :  { %v5467_v7 = vsel %vm19231_vm14, %v19314_v35, 0.0  ;;  %v5283_v26 = vmul.f32 %v19200_v36, %v4906_v62  ;;  %v4908_v32 = vpop.f32.mrb[7].mxu0  ;;  %5569 = vrot.lane.b32.xlu0 %v19311_v33, %s17833_s29  ;;  %v19351_v50 = vadd.f32 %v19220_v56, %v5264_v55 }
 0x29f   :  { %v19348_v44 = vpack.c.bf16 %v5467_v7, %v5448_v43  ;;  %v19354_v9 = vadd.f32 %v19220_v56, %v5265_v2  ;;  %v5284_v57 = vmul.f32 %v19200_v36, %v4908_v32  ;;  %v4945_v5 = vpop.f32.mrb[4].mxu1  ;;  %v5468_v12 = vsel %vm22419_vm15, %v19339_v22, 0.0 }
 0x2a0   :  { %22480 = vst [vmem:[#allocation9_spill] sm:$0xff] %v19351_v50  ;;  %v19363_v8 = vadd.f32 %v19261_v63, %v5283_v26  ;;  %v5266_v61 = vmul.f32 %v19210_v47, %v4945_v5  ;;  %v4947_v1 = vpop.f32.mrb[5].mxu1  ;;  %v19366_v18 = vpack.c.bf16 %v5468_v12, %v5449_v46  ;;  %v5450_v21 = vsel %vm22418_vm10, %v19351_v50, 0.0 }
 0x2a1   :  { %v5451_v30 = vsel %vm22420_vm11, %v19354_v9, 0.0  ;;  %v19375_v37 = vadd.f32 %v19261_v63, %v5284_v57  ;;  %v4949_v39 = vpop.f32.mrb[6].mxu1  ;;  %v22482_v43 = vmov 0  ;;  %v5267_v62 = vmul.f32 %v19210_v47, %v4947_v1 }
 0x2a2   :  { %22481 = vst [vmem:[#allocation10_spill] sm:$0xff] %v19363_v8  ;;  %v22483_v43 = vsel %vm19380_vm6, 4294967295, %v22482_v43  ;;  %v5469_v46 = vsel %vm22418_vm10, %v19363_v8, 0.0  ;;  %v19390_v2 = vadd.f32 %v19220_v56, %v5266_v61  ;;  %v4951_v7 = vpop.f32.mrb[7].mxu1  ;;  %5571 = vrot.lane.b32.xlu0 %v19348_v44, %s17833_s29  ;;  %v5285_v57 = vmul.f32 %v19200_v36, %v4949_v39  ;;  %5573 = vrot.lane.b32.xlu1 %v19366_v18, %s17833_s29 }
 0x2a3   :  { %22484 = vst [vmem:[#allocation11_spill] sm:$0xff] %v22483_v43  ;;  %v19395_v20 = vpack.c.bf16 %v5469_v46, %v5450_v21  ;;  %v5470_v26 = vsel %vm22420_vm11, %v19375_v37, 0.0  ;;  %v4988_v5 = vpop.f32.mrb[8].mxu0  ;;  %vm19408_vm10 = vcmp.eq.s32.totalorder %v5394_v38, 1  ;;  %v22486_v12 = vmov 0 }
 0x2a4   :  { %22485 = vst [vmem:[#allocation12_spill] sm:$0xff] %v19390_v2  ;;  %v22487_v12 = vsel %vm19408_vm10, 4294967295, %v22486_v12  ;;  %vm22442_vm15 = vcmp.eq.s32.totalorder %v19259_v34, 1  ;;  %v19413_v61 = vpack.c.bf16 %v5470_v26, %v5451_v30  ;;  %v19416_v1 = vadd.f32 %v19220_v56, %v5267_v62  ;;  %v4990_v39 = vpop.f32.mrb[9].mxu0 }
 0x2a5   :  { %22488 = vst [vmem:[#allocation13_spill] sm:$0xff] %v22487_v12  ;;  %v5286_v21 = vmul.f32 %v19200_v36, %v4951_v7  ;;  %v19422_v46 = vrot.slane %v19218_v53, %v5381_v49  ;;  %v19425_v38 = vadd.f32 %v19261_v63, %v5285_v57  ;;  %v5268_v55 = vmul.f32 %v19210_v47, %v4988_v5  ;;  %v4992_v30 = vpop.f32.mrb[10].mxu0 }
 0x2a6   :  { %v5269_v10 = vmul.f32 %v19210_v47, %v4990_v39  ;;  %v5452_v7 = vsel %vm22421_vm8, %v19390_v2, 0.0  ;;  %v5453_v25 = vsel %vm22427_vm7, %v19416_v1, 0.0  ;;  %v5287_v53 = vmul.f32 %v19200_v36, %v4992_v30  ;;  %v4994_v26 = vpop.f32.mrb[11].mxu0  ;;  %5575 = vrot.lane.b32.xlu0 %v19395_v20, %s17833_s29  ;;  %5577 = vrot.lane.b32.xlu1 %v19413_v61, %s17833_s29 }
 0x2a7   :  { %22489 = vst [vmem:[#allocation14_spill] sm:$0xff] %v19425_v38  ;;  %v19438_v49 = vadd.f32 %v19261_v63, %v5286_v21  ;;  %v5471_v57 = vsel %vm22421_vm8, %v19425_v38, 0.0  ;;  %v19449_v39 = vadd.f32 %v19220_v56, %v5268_v55  ;;  %v5031_v21 = vpop.f32.mrb[8].mxu1  ;;  %vm22461_vm11 = vcmp.eq.s32.totalorder %v19268_v4, 1 }
 0x2a8   :  { %v19452_v32 = vadd.f32 %v19220_v56, %v5269_v10  ;;  %v19457_v30 = vpack.c.bf16 %v5471_v57, %v5452_v7  ;;  %v19465_v55 = vadd.f32 %v19261_v63, %v5287_v53  ;;  %v5033_v10 = vpop.f32.mrb[9].mxu1  ;;  %v5288_v7 = vmul.f32 %v19200_v36, %v4994_v26 }
 0x2a9   :  { %22490 = vst [vmem:[#allocation15_spill] sm:$0xff] %v19449_v39  ;;  %v5472_v13 = vsel %vm22427_vm7, %v19438_v49, 0.0  ;;  %v5454_v23 = vsel %vm19344_vm9, %v19449_v39, 0.0  ;;  %v5035_v57 = vpop.f32.mrb[10].mxu1  ;;  %vm22466_vm8 = vcmp.eq.s32.totalorder %v19271_v6, 1  ;;  %v5271_v5 = vmul.f32 %v19210_v47, %v5033_v10 }
 0x2aa   :  { %22491 = vst [vmem:[#allocation16_spill] sm:$0xff] %v19452_v32  ;;  %22492 = vst [vmem:[#allocation17_spill] sm:$0xff] %v19465_v55  ;;  %v19467_v16 = vpack.c.bf16 %v5472_v13, %v5453_v25  ;;  %v5473_v53 = vsel %vm19344_vm9, %v19465_v55, 0.0  ;;  %v5270_v25 = vmul.f32 %v19210_v47, %v5031_v21  ;;  %v5037_v62 = vpop.f32.mrb[11].mxu1  ;;  %5579 = vrot.lane.b32.xlu0 %v19457_v30, %s17833_s29  ;;  %vm22458_vm7 = vcmp.eq.s32.totalorder %v19278_v11, 1 }
 0x2ab   :  { %v19485_v26 = vpack.c.bf16 %v5473_v53, %v5454_v23  ;;  %v19488_v2 = vadd.f32 %v19261_v63, %v5288_v7  ;;  %v5289_v29 = vmul.f32 %v19200_v36, %v5035_v57  ;;  %v5290_v0 = vmul.f32 %v19200_v36, %v5037_v62  ;;  %v5074_v13 = vpop.f32.mrb[12].mxu0 }
 0x2ac   :  { %5581 = vrot.lane.b32.xlu1 %v19467_v16, %s17833_s29  ;;  %v5455_v21 = vsel %vm19380_vm6, %v19452_v32, 0.0  ;;  %v19499_v23 = vadd.f32 %v19220_v56, %v5270_v25  ;;  %v19502_v10 = vadd.f32 %v19220_v56, %v5271_v5  ;;  %v5272_v7 = vmul.f32 %v19210_v47, %v5074_v13  ;;  %v5076_v57 = vpop.f32.mrb[13].mxu0 }
 0x2ad   :  { %22493 = vst [vmem:[#allocation18_spill] sm:$0xff] %v19488_v2  ;;  %v5474_v62 = vsel %vm19380_vm6, %v19488_v2, 0.0  ;;  %v19511_v39 = vadd.f32 %v19261_v63, %v5289_v29  ;;  %v19514_v55 = vadd.f32 %v19261_v63, %v5290_v0  ;;  %v5078_v25 = vpop.f32.mrb[14].mxu0  ;;  %vm22463_vm5 = vcmp.eq.s32.totalorder %v19422_v46, 1 }
 0x2ae   :  { %22494 = vst [vmem:[#allocation19_spill] sm:$0xff] %v19499_v23  ;;  %22495 = vst [vmem:[#allocation20_spill] sm:$0xff] %v19502_v10  ;;  %v19516_v38 = vpack.c.bf16 %v5474_v62, %v5455_v21  ;;  %v5456_v5 = vsel %vm19408_vm10, %v19499_v23, 0.0  ;;  %v5457_v13 = vsel %vm22442_vm15, %v19502_v10, 0.0  ;;  %v19525_v17 = vadd.f32 %v19220_v56, %v5272_v7  ;;  %v5080_v53 = vpop.f32.mrb[15].mxu0  ;;  %5583 = vrot.lane.b32.xlu0 %v19485_v26, %s17833_s29 }
 0x2af   :  { %22496 = vst [vmem:[#allocation21_spill] sm:$0xff] %v19511_v39  ;;  %22497 = vst [vmem:[#allocation22_spill] sm:$0xff] %v19514_v55  ;;  %v5475_v0 = vsel %vm19408_vm10, %v19511_v39, 0.0  ;;  %v5476_v21 = vsel %vm22442_vm15, %v19514_v55, 0.0  ;;  %v5117_v62 = vpop.f32.mrb[12].mxu1  ;;  %v5273_v50 = vmul.f32 %v19210_v47, %v5076_v57  ;;  %v22499_v29 = vrot.slane %v19321_v42, %v19187_v27 }
 0x2b0   :  { %22498 = vst [vmem:[#allocation23_spill] sm:$0xff] %v19525_v17  ;;  %v19540_v32 = vpack.c.bf16 %v5475_v0, %v5456_v5  ;;  %v19542_v2 = vpack.c.bf16 %v5476_v21, %v5457_v13  ;;  %5585 = vrot.lane.b32.xlu1 %v19516_v38, %s17833_s29  ;;  %v5119_v12 = vpop.f32.mrb[13].mxu1  ;;  %v5291_v7 = vmul.f32 %v19200_v36, %v5078_v25  ;;  %v5458_v21 = vsel %vm22461_vm11, %v19525_v17, 0.0 }
 0x2b1   :  { %vm19550_vm4 = vcmp.eq.s32.totalorder %v22499_v29, 1  ;;  %v5292_v5 = vmul.f32 %v19200_v36, %v5080_v53  ;;  %v5274_v13 = vmul.f32 %v19210_v47, %v5117_v62  ;;  %v5275_v0 = vmul.f32 %v19210_v47, %v5119_v12  ;;  %v5121_v57 = vpop.f32.mrb[14].mxu1 }
 0x2b2   :  { %v19562_v39 = vadd.f32 %v19220_v56, %v5273_v50  ;;  %v5293_v27 = vmul.f32 %v19200_v36, %v5121_v57  ;;  %v5123_v29 = vpop.f32.mrb[15].mxu1  ;;  %5587 = vrot.lane.b32.xlu0 %v19540_v32, %s17833_s29  ;;  %vm19567_vm15 = vcmp.eq.s32.totalorder %v5422_v59, 1  ;;  %v19572_v12 = vadd.f32 %v19261_v63, %v5291_v7 }
 0x2b3   :  { %v19575_v25 = vadd.f32 %v19261_v63, %v5292_v5  ;;  %v19578_v62 = vadd.f32 %v19220_v56, %v5274_v13  ;;  %v19581_v50 = vadd.f32 %v19220_v56, %v5275_v0  ;;  %v5160_v57 = vpop.f32.mrb[16].mxu0  ;;  %v5294_v7 = vmul.f32 %v19200_v36, %v5123_v29 }
 0x2b4   :  { %22504 = vst [vmem:[#allocation24_spill] sm:$0xff] %v19572_v12  ;;  %v5459_v59 = vsel %vm22466_vm8, %v19562_v39, 0.0  ;;  %v19587_v10 = vadd.f32 %v19261_v63, %v5293_v27  ;;  %5589 = vrot.lane.b32.xlu1 %v19542_v2, %s17833_s29  ;;  %v5276_v5 = vmul.f32 %v19210_v47, %v5160_v57  ;;  %v5162_v13 = vpop.f32.mrb[17].mxu0  ;;  %v5477_v0 = vsel %vm22461_vm11, %v19572_v12, 0.0 }
 0x2b5   :  { %22505 = vst [vmem:[#allocation25_spill] sm:$0xff] %v19578_v62  ;;  %v5478_v27 = vsel %vm22466_vm8, %v19575_v25, 0.0  ;;  %v5164_v34 = vpop.f32.mrb[18].mxu0  ;;  %v19603_v8 = vpack.c.bf16 %v5477_v0, %v5458_v21  ;;  %v5460_v57 = vsel %vm22458_vm7, %v19578_v62, 0.0  ;;  %v5426_v55 = vrot.slane %v19321_v42, %v19194_v31 }
 0x2b6   :  { %22506 = vst [vmem:[#allocation26_spill] sm:$0xff] %v19587_v10  ;;  %v19605_v43 = vpack.c.bf16 %v5478_v27, %v5459_v59  ;;  %v5166_v4 = vpop.f32.mrb[19].mxu0  ;;  %v5479_v17 = vsel %vm22458_vm7, %v19587_v10, 0.0  ;;  %v19618_v21 = vadd.f32 %v19261_v63, %v5294_v7  ;;  %v19621_v59 = vadd.f32 %v19220_v56, %v5276_v5 }
 0x2b7   :  { %v5203_v0 = vpop.f32.mrb[16].mxu1  ;;  %v19623_v27 = vpack.c.bf16 %v5479_v17, %v5460_v57  ;;  %v5277_v12 = vmul.f32 %v19210_v47, %v5162_v13  ;;  %v5295_v31 = vmul.f32 %v19200_v36, %v5164_v34  ;;  %v5296_v42 = vmul.f32 %v19200_v36, %v5166_v4  ;;  %5591 = vrot.lane.b32.xlu0 %v19603_v8, %s17833_s29 }
 0x2b8   :  { %v16610_v11 = vpop.f32.mrb[17].mxu1  ;;  %v5461_v7 = vsel %vm22463_vm5, %v19581_v50, 0.0  ;;  %v5480_v5 = vsel %vm22463_vm5, %v19618_v21, 0.0  ;;  %5593 = vrot.lane.b32.xlu1 %v19605_v43, %s17833_s29  ;;  %v5278_v34 = vmul.f32 %v19210_v47, %v5203_v0  ;;  %v5462_v17 = vsel %vm19550_vm4, %v19621_v59, 0.0 }
 0x2b9   :  { %v5206_v4 = vpop.f32.mrb[18].mxu1  ;;  %v19641_v13 = vpack.c.bf16 %v5480_v5, %v5461_v7  ;;  %v19644_v11 = vadd.f32 %v19220_v56, %v5277_v12  ;;  %v19647_v57 = vadd.f32 %v19261_v63, %v5295_v31  ;;  %v19650_v29 = vadd.f32 %v19261_v63, %v5296_v42 }
 0x2ba   :  { %v16611_v62 = vpop.f32.mrb[19].mxu1  ;;  %v19656_v10 = vadd.f32 %v19220_v56, %v5278_v34  ;;  %v5297_v47 = vmul.f32 %v19200_v36, %v5206_v4  ;;  %vm19678_vm7 = vcmp.eq.s32.totalorder %v5426_v55, 1 }
 0x2bb   :  { %v5463_v12 = vsel %vm19567_vm15, %v19644_v11, 0.0  ;;  %v5481_v0 = vsel %vm19550_vm4, %v19647_v57, 0.0  ;;  %v5482_v31 = vsel %vm19567_vm15, %v19650_v29, 0.0  ;;  %5595 = vrot.lane.b32.xlu0 %v19623_v27, %s17833_s29 }
 0x2bc   :  { %22507 = vst [vmem:[#allocation27_spill] sm:$0xff] %v19656_v10  ;;  %v19672_v56 = vpack.c.bf16 %v5481_v0, %v5462_v17  ;;  %v19674_v36 = vpack.c.bf16 %v5482_v31, %v5463_v12  ;;  %5597 = vrot.lane.b32.xlu1 %v19641_v13, %s17833_s29  ;;  %v19685_v5 = vadd.f32 %v19261_v63, %v5297_v47  ;;  %v5464_v17 = vsel %vm19678_vm7, %v19656_v10, 0.0  ;;  %v5566_v63 = vpop.permute.xlu1 %5565 }
 0x2be   :  { %v5483_v34 = vsel %vm19678_vm7, %v19685_v5, 0.0 }
 0x2bf   :  { %5599 = vrot.lane.b32.xlu0 %v19672_v56, %s17833_s29  ;;  %v19697_v4 = vpack.c.bf16 %v5483_v34, %v5464_v17  ;;  %v19786_v17 = vld [vmem:[%s22405_s4 + $0x4] sm:$0xf] }
 0x2c0   :  { %5601 = vrot.lane.b32.xlu1 %v19674_v36, %s17833_s29 }
 0x2c3   :  { %5603 = vrot.lane.b32.xlu0 %v19697_v4, %s17833_s29 }
 0x2c4   :  { %6057 = vrot.lane.b32.xlu1 %v19299_v19, %s17834_s17 }
 0x2c7   :  { %6059 = vrot.lane.b32.xlu0 %v19311_v33, %s17834_s17 }
 0x2c8   :  { %6055 = vrot.lane.b32.xlu1 %v19317_v41, %s17834_s17 }
 0x2cb   :  { %6061 = vrot.lane.b32.xlu0 %v19348_v44, %s17834_s17 }
 0x2cc   :  { %6063 = vrot.lane.b32.xlu1 %v19366_v18, %s17834_s17 }
 0x2cf   :  { %6065 = vrot.lane.b32.xlu0 %v19395_v20, %s17834_s17 }
 0x2d0   :  { %6067 = vrot.lane.b32.xlu1 %v19413_v61, %s17834_s17 }
 0x2d3   :  { %6069 = vrot.lane.b32.xlu0 %v19457_v30, %s17834_s17 }
 0x2d4   :  { %6071 = vrot.lane.b32.xlu1 %v19467_v16, %s17834_s17 }
 0x2d7   :  { %6073 = vrot.lane.b32.xlu0 %v19485_v26, %s17834_s17 }
 0x2d8   :  { %6075 = vrot.lane.b32.xlu1 %v19516_v38, %s17834_s17 }
 0x2db   :  { %6077 = vrot.lane.b32.xlu0 %v19540_v32, %s17834_s17 }
 0x2dc   :  { %6079 = vrot.lane.b32.xlu1 %v19542_v2, %s17834_s17 }
 0x2df   :  { %6081 = vrot.lane.b32.xlu0 %v19603_v8, %s17834_s17 }
 0x2e0   :  { %6083 = vrot.lane.b32.xlu1 %v19605_v43, %s17834_s17 }
 0x2e3   :  { %6085 = vrot.lane.b32.xlu0 %v19623_v27, %s17834_s17 }
 0x2e4   :  { %6087 = vrot.lane.b32.xlu1 %v19641_v13, %s17834_s17 }
 0x2e7   :  { %6089 = vrot.lane.b32.xlu0 %v19672_v56, %s17834_s17 }
 0x2e8   :  { %6091 = vrot.lane.b32.xlu1 %v19674_v36, %s17834_s17 }
 0x2eb   :  { %6093 = vrot.lane.b32.xlu0 %v19697_v4, %s17834_s17 }
 0x2ec   :  { %6549 = vrot.lane.b32.xlu1 %v19299_v19, %s17835_s18 }
 0x2ef   :  { %6551 = vrot.lane.b32.xlu0 %v19311_v33, %s17835_s18 }
 0x2f0   :  { %6547 = vrot.lane.b32.xlu1 %v19317_v41, %s17835_s18 }
 0x2f3   :  { %6553 = vrot.lane.b32.xlu0 %v19348_v44, %s17835_s18 }
 0x2f4   :  { %6555 = vrot.lane.b32.xlu1 %v19366_v18, %s17835_s18 }
 0x2f7   :  { %6557 = vrot.lane.b32.xlu0 %v19395_v20, %s17835_s18 }
 0x2f8   :  { %6559 = vrot.lane.b32.xlu1 %v19413_v61, %s17835_s18 }
 0x2fb   :  { %6561 = vrot.lane.b32.xlu0 %v19457_v30, %s17835_s18 }
 0x2fc   :  { %6563 = vrot.lane.b32.xlu1 %v19467_v16, %s17835_s18 }
 0x2ff   :  { %6565 = vrot.lane.b32.xlu0 %v19485_v26, %s17835_s18 }
 0x300   :  { %6567 = vrot.lane.b32.xlu1 %v19516_v38, %s17835_s18 }
 0x303   :  { %6569 = vrot.lane.b32.xlu0 %v19540_v32, %s17835_s18 }
 0x304   :  { %6571 = vrot.lane.b32.xlu1 %v19542_v2, %s17835_s18 }
 0x307   :  { %6573 = vrot.lane.b32.xlu0 %v19603_v8, %s17835_s18 }
 0x308   :  { %6575 = vrot.lane.b32.xlu1 %v19605_v43, %s17835_s18 }
 0x30b   :  { %6577 = vrot.lane.b32.xlu0 %v19623_v27, %s17835_s18 }
 0x30c   :  { %6579 = vrot.lane.b32.xlu1 %v19641_v13, %s17835_s18 }
 0x30f   :  { %v5568_v47 = vpop.permute.xlu1 %5567  ;;  %6581 = vrot.lane.b32.xlu0 %v19672_v56, %s17835_s18 }
 0x310   :  { %v5570_v12 = vpop.permute.xlu0 %5569  ;;  %6583 = vrot.lane.b32.xlu1 %v19674_v36, %s17835_s18  ;;  %v5605_v31 = vsel %vm22460_vm0, %v5566_v63, %v5568_v47 }
 0x311   :  { %v5606_v0 = vsel %vm22460_vm0, %v5568_v47, %v5570_v12 }
 0x312   :  { %5646 = vmatprep.subr.bf16.mxu0 %v5606_v0 }
 0x313   :  { %5647 = vmatpush1.bf16.msra.mxu0 %v5605_v31  ;;  %6585 = vrot.lane.b32.xlu0 %v19697_v4, %s17835_s18 }
 0x314   :  { %v5572_v34 = vpop.permute.xlu0 %5571  ;;  %7060 = vrot.lane.b32.xlu1 %v19299_v19, %s17836_s19  ;;  %v5574_v55 = vpop.permute.xlu1 %5573 }
 0x315   :  { %v5607_v62 = vsel %vm22460_vm0, %v5570_v12, %v5572_v34  ;;  %v5608_v63 = vsel %vm22460_vm0, %v5572_v34, %v5574_v55 }
 0x316   :  { %16071 = vmatmul.mubr.msk.bf16.vlgmr.msra.gmra.mrb[20].mxu0 %vm272_vm1, %v19786_v17  ;;  %5687 = vmatprep.subr.bf16.mxu1 %v5608_v63 }
 0x317   :  { %5760 = vmatprep.mubr.bf16.mxu0 %v19317_v41  ;;  %7062 = vrot.lane.b32.xlu0 %v19311_v33, %s17836_s19 }
 0x318   :  { %5688 = vmatpush1.bf16.msra.mxu1 %v5607_v62  ;;  %v5576_v47 = vpop.permute.xlu0 %5575  ;;  %7058 = vrot.lane.b32.xlu1 %v19317_v41, %s17836_s19  ;;  %v5578_v0 = vpop.permute.xlu1 %5577 }
 0x319   :  { %v5609_v31 = vsel %vm22460_vm0, %v5574_v55, %v5576_v47  ;;  %v5610_v12 = vsel %vm22460_vm0, %v5576_v47, %v5578_v0 }
 0x31a   :  { %5728 = vmatprep.subr.bf16.mxu0 %v5610_v12 }
 0x31b   :  { %16072 = vmatmul.mubr.msk.bf16.vlgmr.msra.gmra.mrb[20].mxu1 %vm272_vm1, %v19786_v17  ;;  %7064 = vrot.lane.b32.xlu0 %v19348_v44, %s17836_s19 }
 0x31c   :  { %5729 = vmatpush1.bf16.msra.mxu0 %v5609_v31  ;;  %v5580_v34 = vpop.permute.xlu0 %5579  ;;  %7066 = vrot.lane.b32.xlu1 %v19366_v18, %s17836_s19 }
 0x31d   :  { %v5611_v63 = vsel %vm22460_vm0, %v5578_v0, %v5580_v34  ;;  %5801 = vmatprep.mubr.bf16.mxu1 %v19317_v41 }
 0x31e   :  { %v5582_v62 = vpop.permute.xlu1 %5581 }
 0x31f   :  { %v5612_v55 = vsel %vm22460_vm0, %v5580_v34, %v5582_v62  ;;  %16073 = vmatmul.mubr.msk.bf16.vlgmr.msra.gmra.mrb[24].mxu0 %vm272_vm1, %v19786_v17  ;;  %7068 = vrot.lane.b32.xlu0 %v19395_v20, %s17836_s19 }
 0x320   :  { %5769 = vmatprep.subr.bf16.mxu1 %v5612_v55  ;;  %v5584_v47 = vpop.permute.xlu0 %5583  ;;  %7070 = vrot.lane.b32.xlu1 %v19413_v61, %s17836_s19 }
 0x321   :  { %5770 = vmatpush1.bf16.msra.mxu1 %v5611_v63  ;;  %5842 = vmatprep.mubr.bf16.mxu0 %v19317_v41  ;;  %v5613_v0 = vsel %vm22460_vm0, %v5582_v62, %v5584_v47 }
 0x322   :  { %v5586_v31 = vpop.permute.xlu1 %5585 }
 0x323   :  { %v5614_v12 = vsel %vm22460_vm0, %v5584_v47, %v5586_v31  ;;  %7072 = vrot.lane.b32.xlu0 %v19457_v30, %s17836_s19 }
 0x324   :  { %16074 = vmatmul.mubr.msk.bf16.vlgmr.msra.gmra.mrb[24].mxu1 %vm272_vm1, %v19786_v17  ;;  %5810 = vmatprep.subr.bf16.mxu0 %v5614_v12  ;;  %v5588_v34 = vpop.permute.xlu0 %5587 }
 0x325   :  { %7074 = vrot.lane.b32.xlu1 %v19467_v16, %s17836_s19  ;;  %5811 = vmatpush1.bf16.msra.mxu0 %v5613_v0  ;;  %v5615_v62 = vsel %vm22460_vm0, %v5586_v31, %v5588_v34 }
 0x326   :  { %v5590_v63 = vpop.permute.xlu1 %5589  ;;  %5883 = vmatprep.mubr.bf16.mxu1 %v19317_v41 }
 0x327   :  { %v5616_v55 = vsel %vm22460_vm0, %v5588_v34, %v5590_v63  ;;  %7076 = vrot.lane.b32.xlu0 %v19485_v26, %s17836_s19 }
 0x328   :  { %16075 = vmatmul.mubr.msk.bf16.vlgmr.msra.gmra.mrb[28].mxu0 %vm272_vm1, %v19786_v17  ;;  %5851 = vmatprep.subr.bf16.mxu1 %v5616_v55 }
 0x329   :  { %7078 = vrot.lane.b32.xlu1 %v19516_v38, %s17836_s19  ;;  %5852 = vmatpush1.bf16.msra.mxu1 %v5615_v62  ;;  %v5592_v47 = vpop.permute.xlu0 %5591 }
 0x32a   :  { %5924 = vmatprep.mubr.bf16.mxu0 %v19317_v41  ;;  %v5594_v0 = vpop.permute.xlu1 %5593  ;;  %v5617_v12 = vsel %vm22460_vm0, %v5590_v63, %v5592_v47 }
 0x32b   :  { %7080 = vrot.lane.b32.xlu0 %v19540_v32, %s17836_s19  ;;  %v5618_v31 = vsel %vm22460_vm0, %v5592_v47, %v5594_v0 }
 0x32c   :  { %16076 = vmatmul.mubr.msk.bf16.vlgmr.msra.gmra.mrb[28].mxu1 %vm272_vm1, %v19786_v17  ;;  %5892 = vmatprep.subr.bf16.mxu0 %v5618_v31  ;;  %v22510_v31 = vmov 0.0  }
 0x32d   :  { %7082 = vrot.lane.b32.xlu1 %v19542_v2, %s17836_s19  ;;  %v5596_v34 = vpop.permute.xlu0 %5595  ;;  %5965 = vmatprep.mubr.bf16.mxu1 %v19317_v41 }
 0x32e   :  { %5893 = vmatpush1.bf16.msra.mxu0 %v5617_v12  ;;  %v5598_v55 = vpop.permute.xlu1 %5597  ;;  %v5619_v62 = vsel %vm22460_vm0, %v5594_v0, %v5596_v34 }
 0x32f   :  { %7084 = vrot.lane.b32.xlu0 %v19603_v8, %s17836_s19  ;;  %v5620_v42 = vsel %vm22460_vm0, %v5596_v34, %v5598_v55 }
 0x330   :  { %5933 = vmatprep.subr.bf16.mxu1 %v5620_v42 }
 0x331   :  { %7086 = vrot.lane.b32.xlu1 %v19605_v43, %s17836_s19  ;;  %16077 = vmatmul.mubr.msk.bf16.vlgmr.msra.gmra.mrb[32].mxu0 %vm272_vm1, %v19786_v17  ;;  %v5600_v63 = vpop.permute.xlu0 %5599 }
 0x332   :  { %5934 = vmatpush1.bf16.msra.mxu1 %v5619_v62  ;;  %v5602_v47 = vpop.permute.xlu1 %5601  ;;  %6006 = vmatprep.mubr.bf16.mxu0 %v19317_v41  ;;  %v5621_v12 = vsel %vm22460_vm0, %v5598_v55, %v5600_v63 }
 0x333   :  { %16612 = vmatprep.subr.bf16.mxu1 %v22510_v31  ;;  %7088 = vrot.lane.b32.xlu0 %v19623_v27, %s17836_s19  ;;  %v5622_v0 = vsel %vm22460_vm0, %v5600_v63, %v5602_v47 }
 0x334   :  { %5974 = vmatprep.subr.bf16.mxu0 %v5622_v0 }
 0x335   :  { %7090 = vrot.lane.b32.xlu1 %v19641_v13, %s17836_s19  ;;  %16078 = vmatmul.mubr.msk.bf16.vlgmr.msra.gmra.mrb[32].mxu1 %vm272_vm1, %v19786_v17  ;;  %v5604_v42 = vpop.permute.xlu0 %5603 }
 0x336   :  { %16614 = vmatprep.mubr.msk.bf16.mxu1 %vm22464_vm3, %v22510_v31  ;;  %5975 = vmatpush1.bf16.msra.mxu0 %v5621_v12  ;;  %v5623_v34 = vsel %vm22460_vm0, %v5602_v47, %v5604_v42  ;;  %v6058_v62 = vpop.permute.xlu1 %6057  ;;  %vm22511_vm0 = vcmask 269312  }
 0x337   :  { %7092 = vrot.lane.b32.xlu0 %v19672_v56, %s17836_s19  ;;  %16613 = vmatpush3.bf16.msra.mxu1 %v5623_v34  ;;  %v19886_v34 = vld [vmem:[%s22405_s4] sm:$0xf]  ;;  %vm22512_vm11 = vmmov %vm22511_vm0 }
 0x339   :  { %7094 = vrot.lane.b32.xlu1 %v19674_v36, %s17836_s19  ;;  %16079 = vmatmul.mubr.msk.bf16.vlgmr.msra.gmra.mrb[36].mxu0 %vm272_vm1, %v19786_v17  ;;  %v6060_v55 = vpop.permute.xlu0 %6059 }
 0x33a   :  { %v6056_v63 = vpop.permute.xlu1 %6055  ;;  %v6096_v0 = vsel %vm22462_vm2, %v6058_v62, %v6060_v55  ;;  %6168 = vmatprep.mubr.bf16.mxu0 %v19317_v41 }
 0x33b   :  { %v6095_v12 = vsel %vm22462_vm2, %v6056_v63, %v6058_v62  ;;  %7096 = vrot.lane.b32.xlu0 %v19697_v4, %s17836_s19  ;;  %6136 = vmatprep.subr.bf16.mxu0 %v6096_v0 }
 0x33c   :  { %6137 = vmatpush1.bf16.msra.mxu0 %v6095_v12 }
 0x33d   :  { %8044 = vrot.lane.b32.xlu1 %v19311_v33, %s17839_s26  ;;  %16615 = vmatmul.mubr.msk.bf16.vlgmr.msra.gmra.mrb[36].mxu1 %vm272_vm1, %v19786_v17  ;;  %v6062_v47 = vpop.permute.xlu0 %6061 }
 0x33e   :  { %6209 = vmatprep.mubr.bf16.mxu1 %v19317_v41  ;;  %v6064_v42 = vpop.permute.xlu1 %6063  ;;  %v6097_v62 = vsel %vm22462_vm2, %v6060_v55, %v6062_v47 }
 0x33f   :  { %8046 = vrot.lane.b32.xlu0 %v19348_v44, %s17839_s26  ;;  %v6098_v63 = vsel %vm22462_vm2, %v6062_v47, %v6064_v42 }
 0x340   :  { %6177 = vmatprep.subr.bf16.mxu1 %v6098_v63 }
 0x341   :  { %8042 = vrot.lane.b32.xlu1 %v19299_v19, %s17839_s26  ;;  %16081 = vmatmul.mubr.msk.bf16.vlgmr.msra.gmra.mrb[20].mxu0 %vm272_vm1, %v19886_v34  ;;  %v6066_v17 = vpop.permute.xlu0 %6065 }
 0x342   :  { %6178 = vmatpush1.bf16.msra.mxu1 %v6097_v62  ;;  %v6068_v0 = vpop.permute.xlu1 %6067  ;;  %6250 = vmatprep.mubr.bf16.mxu0 %v19317_v41  ;;  %v6099_v12 = vsel %vm22462_vm2, %v6064_v42, %v6066_v17 }
 0x343   :  { %8048 = vrot.lane.b32.xlu0 %v19366_v18, %s17839_s26  ;;  %v6100_v55 = vsel %vm22462_vm2, %v6066_v17, %v6068_v0 }
 0x344   :  { %6218 = vmatprep.subr.bf16.mxu0 %v6100_v55 }
 0x345   :  { %8050 = vrot.lane.b32.xlu1 %v19395_v20, %s17839_s26  ;;  %16082 = vmatmul.mubr.msk.bf16.vlgmr.msra.gmra.mrb[20].mxu1 %vm272_vm1, %v19886_v34  ;;  %v6070_v47 = vpop.permute.xlu0 %6069 }
 0x346   :  { %6291 = vmatprep.mubr.bf16.mxu1 %v19317_v41  ;;  %6219 = vmatpush1.bf16.msra.mxu0 %v6099_v12  ;;  %v6072_v62 = vpop.permute.xlu1 %6071  ;;  %v6101_v63 = vsel %vm22462_vm2, %v6068_v0, %v6070_v47 }
 0x347   :  { %8052 = vrot.lane.b32.xlu0 %v19413_v61, %s17839_s26  ;;  %v6102_v10 = vsel %vm22462_vm2, %v6070_v47, %v6072_v62 }
 0x348   :  { %6259 = vmatprep.subr.bf16.mxu1 %v6102_v10 }
 0x349   :  { %8054 = vrot.lane.b32.xlu1 %v19457_v30, %s17839_s26  ;;  %16083 = vmatmul.mubr.msk.bf16.vlgmr.msra.gmra.mrb[24].mxu0 %vm272_vm1, %v19886_v34  ;;  %v6074_v42 = vpop.permute.xlu0 %6073 }
 0x34a   :  { %6260 = vmatpush1.bf16.msra.mxu1 %v6101_v63  ;;  %v6076_v17 = vpop.permute.xlu1 %6075  ;;  %6332 = vmatprep.mubr.bf16.mxu0 %v19317_v41  ;;  %v6103_v55 = vsel %vm22462_vm2, %v6072_v62, %v6074_v42 }
 0x34b   :  { %8056 = vrot.lane.b32.xlu0 %v19467_v16, %s17839_s26  ;;  %v6104_v0 = vsel %vm22462_vm2, %v6074_v42, %v6076_v17 }
 0x34c   :  { %6300 = vmatprep.subr.bf16.mxu0 %v6104_v0 }
 0x34d   :  { %8058 = vrot.lane.b32.xlu1 %v19485_v26, %s17839_s26  ;;  %16084 = vmatmul.mubr.msk.bf16.vlgmr.msra.gmra.mrb[24].mxu1 %vm272_vm1, %v19886_v34  ;;  %v6078_v10 = vpop.permute.xlu0 %6077 }
 0x34e   :  { %6373 = vmatprep.mubr.bf16.mxu1 %v19317_v41  ;;  %6301 = vmatpush1.bf16.msra.mxu0 %v6103_v55  ;;  %v6080_v12 = vpop.permute.xlu1 %6079  ;;  %v6105_v47 = vsel %vm22462_vm2, %v6076_v17, %v6078_v10 }
 0x34f   :  { %8060 = vrot.lane.b32.xlu0 %v19516_v38, %s17839_s26  ;;  %v6106_v63 = vsel %vm22462_vm2, %v6078_v10, %v6080_v12 }
 0x350   :  { %6341 = vmatprep.subr.bf16.mxu1 %v6106_v63 }
 0x351   :  { %8062 = vrot.lane.b32.xlu1 %v19540_v32, %s17839_s26  ;;  %16085 = vmatmul.mubr.msk.bf16.vlgmr.msra.gmra.mrb[28].mxu0 %vm272_vm1, %v19886_v34  ;;  %v6082_v62 = vpop.permute.xlu0 %6081 }
 0x352   :  { %6342 = vmatpush1.bf16.msra.mxu1 %v6105_v47  ;;  %v6084_v42 = vpop.permute.xlu1 %6083  ;;  %6414 = vmatprep.mubr.bf16.mxu0 %v19317_v41  ;;  %v6107_v0 = vsel %vm22462_vm2, %v6080_v12, %v6082_v62 }
 0x353   :  { %8064 = vrot.lane.b32.xlu0 %v19542_v2, %s17839_s26  ;;  %v6108_v17 = vsel %vm22462_vm2, %v6082_v62, %v6084_v42 }
 0x354   :  { %6382 = vmatprep.subr.bf16.mxu0 %v6108_v17 }
 0x355   :  { %8066 = vrot.lane.b32.xlu1 %v19603_v8, %s17839_s26  ;;  %16086 = vmatmul.mubr.msk.bf16.vlgmr.msra.gmra.mrb[28].mxu1 %vm272_vm1, %v19886_v34  ;;  %v6086_v55 = vpop.permute.xlu0 %6085 }
 0x356   :  { %6455 = vmatprep.mubr.bf16.mxu1 %v19317_v41  ;;  %6383 = vmatpush1.bf16.msra.mxu0 %v6107_v0  ;;  %v6088_v10 = vpop.permute.xlu1 %6087  ;;  %v6109_v47 = vsel %vm22462_vm2, %v6084_v42, %v6086_v55 }
 0x357   :  { %8068 = vrot.lane.b32.xlu0 %v19605_v43, %s17839_s26  ;;  %v6110_v63 = vsel %vm22462_vm2, %v6086_v55, %v6088_v10 }
 0x358   :  { %6423 = vmatprep.subr.bf16.mxu1 %v6110_v63 }
 0x359   :  { %8070 = vrot.lane.b32.xlu1 %v19623_v27, %s17839_s26  ;;  %16087 = vmatmul.mubr.msk.bf16.vlgmr.msra.gmra.mrb[32].mxu0 %vm272_vm1, %v19886_v34  ;;  %v6090_v12 = vpop.permute.xlu0 %6089 }
 0x35a   :  { %6424 = vmatpush1.bf16.msra.mxu1 %v6109_v47  ;;  %v6092_v62 = vpop.permute.xlu1 %6091  ;;  %6496 = vmatprep.mubr.bf16.mxu0 %v19317_v41  ;;  %v6111_v17 = vsel %vm22462_vm2, %v6088_v10, %v6090_v12 }
 0x35b   :  { %16618 = vmatprep.subr.bf16.mxu1 %v22510_v31  ;;  %8072 = vrot.lane.b32.xlu0 %v19641_v13, %s17839_s26  ;;  %v6112_v42 = vsel %vm22462_vm2, %v6090_v12, %v6092_v62 }
 0x35c   :  { %6464 = vmatprep.subr.bf16.mxu0 %v6112_v42 }
 0x35d   :  { %8074 = vrot.lane.b32.xlu1 %v19672_v56, %s17839_s26  ;;  %16088 = vmatmul.mubr.msk.bf16.vlgmr.msra.gmra.mrb[32].mxu1 %vm272_vm1, %v19886_v34  ;;  %v6094_v0 = vpop.permute.xlu0 %6093 }
 0x35e   :  { %16620 = vmatprep.mubr.msk.bf16.mxu1 %vm22464_vm3, %v22510_v31  ;;  %6465 = vmatpush1.bf16.msra.mxu0 %v6111_v17  ;;  %v6113_v55 = vsel %vm22462_vm2, %v6092_v62, %v6094_v0  ;;  %v6550_v47 = vpop.permute.xlu1 %6549  ;;  %v19982_v0 = vld [vmem:[%s22405_s4 + $0x8] sm:$0xf]  ;;  %vm22514_vm2 = vmmov %vm22511_vm0 }
 0x35f   :  { %8076 = vrot.lane.b32.xlu0 %v19674_v36, %s17839_s26  ;;  %16619 = vmatpush3.bf16.msra.mxu1 %v6113_v55 }
 0x361   :  { %8078 = vrot.lane.b32.xlu1 %v19697_v4, %s17839_s26  ;;  %16089 = vmatmul.mubr.msk.bf16.vlgmr.msra.gmra.mrb[36].mxu0 %vm272_vm1, %v19886_v34  ;;  %v6552_v10 = vpop.permute.xlu0 %6551 }
 0x362   :  { %v6548_v63 = vpop.permute.xlu1 %6547  ;;  %v6588_v12 = vsel %vm22511_vm0, %v6550_v47, %v6552_v10  ;;  %6660 = vmatprep.mubr.bf16.mxu0 %v19317_v41 }
 0x363   :  { %v6587_v42 = vsel %vm22512_vm11, %v6548_v63, %v6550_v47  ;;  %8080 = vrot.lane.b32.xlu0 %v19317_v41, %s17839_s26  ;;  %6628 = vmatprep.subr.bf16.mxu0 %v6588_v12  ;;  %vm22513_vm11 = vmmov %vm22511_vm0 }
 0x364   :  { %6629 = vmatpush1.bf16.msra.mxu0 %v6587_v42 }
 0x365   :  { %8555 = vrot.lane.b32.xlu1 %v19311_v33, %s17840_s30  ;;  %16621 = vmatmul.mubr.msk.bf16.vlgmr.msra.gmra.mrb[36].mxu1 %vm272_vm1, %v19886_v34  ;;  %v6554_v62 = vpop.permute.xlu0 %6553 }
 0x366   :  { %6701 = vmatprep.mubr.bf16.mxu1 %v19317_v41  ;;  %v6556_v17 = vpop.permute.xlu1 %6555  ;;  %v6589_v55 = vsel %vm22511_vm0, %v6552_v10, %v6554_v62 }
 0x367   :  { %8557 = vrot.lane.b32.xlu0 %v19348_v44, %s17840_s30  ;;  %v6590_v47 = vsel %vm22513_vm11, %v6554_v62, %v6556_v17  ;;  %vm22515_vm11 = vmmov %vm22511_vm0 }
 0x368   :  { %6669 = vmatprep.subr.bf16.mxu1 %v6590_v47 }
 0x369   :  { %8553 = vrot.lane.b32.xlu1 %v19299_v19, %s17840_s30  ;;  %16092 = vmatmul.mubr.msk.bf16.vlgmr.msra.gmra.mrb[20].mxu0 %vm272_vm1, %v19982_v0  ;;  %v6558_v34 = vpop.permute.xlu0 %6557 }
 0x36a   :  { %6670 = vmatpush1.bf16.msra.mxu1 %v6589_v55  ;;  %v6560_v63 = vpop.permute.xlu1 %6559  ;;  %6742 = vmatprep.mubr.bf16.mxu0 %v19317_v41  ;;  %v6591_v12 = vsel %vm22514_vm2, %v6556_v17, %v6558_v34  ;;  %vm22516_vm2 = vmmov %vm22511_vm0 }
 0x36b   :  { %8559 = vrot.lane.b32.xlu0 %v19366_v18, %s17840_s30  ;;  %v6592_v10 = vsel %vm22511_vm0, %v6558_v34, %v6560_v63 }
 0x36c   :  { %6710 = vmatprep.subr.bf16.mxu0 %v6592_v10 }
 0x36d   :  { %8561 = vrot.lane.b32.xlu1 %v19395_v20, %s17840_s30  ;;  %16093 = vmatmul.mubr.msk.bf16.vlgmr.msra.gmra.mrb[20].mxu1 %vm272_vm1, %v19982_v0  ;;  %v6562_v42 = vpop.permute.xlu0 %6561 }
 0x36e   :  { %6783 = vmatprep.mubr.bf16.mxu1 %v19317_v41  ;;  %6711 = vmatpush1.bf16.msra.mxu0 %v6591_v12  ;;  %v6564_v62 = vpop.permute.xlu1 %6563  ;;  %v6593_v55 = vsel %vm22515_vm11, %v6560_v63, %v6562_v42  ;;  %vm22517_vm11 = vmmov %vm22511_vm0 }
 0x36f   :  { %8563 = vrot.lane.b32.xlu0 %v19413_v61, %s17840_s30  ;;  %v6594_v47 = vsel %vm22511_vm0, %v6562_v42, %v6564_v62 }
 0x370   :  { %6751 = vmatprep.subr.bf16.mxu1 %v6594_v47 }
 0x371   :  { %8565 = vrot.lane.b32.xlu1 %v19457_v30, %s17840_s30  ;;  %16094 = vmatmul.mubr.msk.bf16.vlgmr.msra.gmra.mrb[24].mxu0 %vm272_vm1, %v19982_v0  ;;  %v6566_v17 = vpop.permute.xlu0 %6565 }
 0x372   :  { %6752 = vmatpush1.bf16.msra.mxu1 %v6593_v55  ;;  %v6568_v34 = vpop.permute.xlu1 %6567  ;;  %6824 = vmatprep.mubr.bf16.mxu0 %v19317_v41  ;;  %v6595_v10 = vsel %vm22517_vm11, %v6564_v62, %v6566_v17  ;;  %vm22519_vm11 = vmmov %vm22511_vm0 }
 0x373   :  { %8567 = vrot.lane.b32.xlu0 %v19467_v16, %s17840_s30  ;;  %v6596_v63 = vsel %vm22516_vm2, %v6566_v17, %v6568_v34  ;;  %vm22518_vm2 = vmmov %vm22511_vm0 }
 0x374   :  { %6792 = vmatprep.subr.bf16.mxu0 %v6596_v63 }
 0x375   :  { %8569 = vrot.lane.b32.xlu1 %v19485_v26, %s17840_s30  ;;  %16095 = vmatmul.mubr.msk.bf16.vlgmr.msra.gmra.mrb[24].mxu1 %vm272_vm1, %v19982_v0  ;;  %v6570_v12 = vpop.permute.xlu0 %6569 }
 0x376   :  { %6865 = vmatprep.mubr.bf16.mxu1 %v19317_v41  ;;  %6793 = vmatpush1.bf16.msra.mxu0 %v6595_v10  ;;  %v6572_v42 = vpop.permute.xlu1 %6571  ;;  %v6597_v55 = vsel %vm22511_vm0, %v6568_v34, %v6570_v12 }
 0x377   :  { %8571 = vrot.lane.b32.xlu0 %v19516_v38, %s17840_s30  ;;  %v6598_v47 = vsel %vm22518_vm2, %v6570_v12, %v6572_v42  ;;  %vm22520_vm2 = vmmov %vm22511_vm0 }
 0x378   :  { %6833 = vmatprep.subr.bf16.mxu1 %v6598_v47 }
 0x379   :  { %8573 = vrot.lane.b32.xlu1 %v19540_v32, %s17840_s30  ;;  %16096 = vmatmul.mubr.msk.bf16.vlgmr.msra.gmra.mrb[28].mxu0 %vm272_vm1, %v19982_v0  ;;  %v6574_v62 = vpop.permute.xlu0 %6573 }
 0x37a   :  { %6834 = vmatpush1.bf16.msra.mxu1 %v6597_v55  ;;  %v6576_v17 = vpop.permute.xlu1 %6575  ;;  %6906 = vmatprep.mubr.bf16.mxu0 %v19317_v41  ;;  %v6599_v63 = vsel %vm22511_vm0, %v6572_v42, %v6574_v62 }
 0x37b   :  { %8575 = vrot.lane.b32.xlu0 %v19542_v2, %s17840_s30  ;;  %v6600_v34 = vsel %vm22519_vm11, %v6574_v62, %v6576_v17  ;;  %vm22521_vm11 = vmmov %vm22511_vm0 }
 0x37c   :  { %6874 = vmatprep.subr.bf16.mxu0 %v6600_v34 }
 0x37d   :  { %8577 = vrot.lane.b32.xlu1 %v19603_v8, %s17840_s30  ;;  %16097 = vmatmul.mubr.msk.bf16.vlgmr.msra.gmra.mrb[28].mxu1 %vm272_vm1, %v19982_v0  ;;  %v6578_v10 = vpop.permute.xlu0 %6577 }
 0x37e   :  { %6947 = vmatprep.mubr.bf16.mxu1 %v19317_v41  ;;  %6875 = vmatpush1.bf16.msra.mxu0 %v6599_v63  ;;  %v6580_v12 = vpop.permute.xlu1 %6579  ;;  %v6601_v55 = vsel %vm22520_vm2, %v6576_v17, %v6578_v10  ;;  %v20046_v41 = vld [vmem:[#allocation3] sm:$0xff]  ;;  %vm22522_vm2 = vmmov %vm22511_vm0 }
 0x37f   :  { %8579 = vrot.lane.b32.xlu0 %v19605_v43, %s17840_s30  ;;  %v6602_v47 = vsel %vm22521_vm11, %v6578_v10, %v6580_v12  ;;  %vm22523_vm11 = vmmov %vm22511_vm0 }
 0x380   :  { %6915 = vmatprep.subr.bf16.mxu1 %v6602_v47 }
 0x381   :  { %8581 = vrot.lane.b32.xlu1 %v19623_v27, %s17840_s30  ;;  %16098 = vmatmul.mubr.msk.bf16.vlgmr.msra.gmra.mrb[32].mxu0 %vm272_vm1, %v19982_v0  ;;  %v6582_v42 = vpop.permute.xlu0 %6581 }
 0x382   :  { %6916 = vmatpush1.bf16.msra.mxu1 %v6601_v55  ;;  %v6584_v62 = vpop.permute.xlu1 %6583  ;;  %6988 = vmatprep.mubr.bf16.mxu0 %v20046_v41  ;;  %v6603_v34 = vsel %vm22522_vm2, %v6580_v12, %v6582_v42 }
 0x383   :  { %16624 = vmatprep.subr.bf16.mxu1 %v22510_v31  ;;  %8583 = vrot.lane.b32.xlu0 %v19641_v13, %s17840_s30  ;;  %v6604_v17 = vsel %vm22511_vm0, %v6582_v42, %v6584_v62  ;;  %vm22524_vm0 = vcmask 7168  }
 0x384   :  { %6956 = vmatprep.subr.bf16.mxu0 %v6604_v17  ;;  %vm22525_vm2 = vmmov %vm22524_vm0 }
 0x385   :  { %8585 = vrot.lane.b32.xlu1 %v19672_v56, %s17840_s30  ;;  %16099 = vmatmul.mubr.msk.bf16.vlgmr.msra.gmra.mrb[32].mxu1 %vm272_vm1, %v19982_v0  ;;  %v6586_v63 = vpop.permute.xlu0 %6585 }
 0x386   :  { %16626 = vmatprep.mubr.msk.bf16.mxu1 %vm22464_vm3, %v22510_v31  ;;  %6957 = vmatpush1.bf16.msra.mxu0 %v6603_v34  ;;  %v6605_v10 = vsel %vm22523_vm11, %v6584_v62, %v6586_v63  ;;  %v7061_v55 = vpop.permute.xlu1 %7060  ;;  %v20080_v63 = vld [vmem:[%s22405_s4 + $0xc] sm:$0xf]  ;;  %vm22526_vm11 = vmmov %vm22524_vm0 }
 0x387   :  { %8587 = vrot.lane.b32.xlu0 %v19674_v36, %s17840_s30  ;;  %16625 = vmatpush3.bf16.msra.mxu1 %v6605_v10 }
 0x389   :  { %8589 = vrot.lane.b32.xlu1 %v19697_v4, %s17840_s30  ;;  %16100 = vmatmul.mubr.msk.bf16.vlgmr.msra.gmra.mrb[36].mxu0 %vm272_vm1, %v19982_v0  ;;  %v7063_v12 = vpop.permute.xlu0 %7062 }
 0x38a   :  { %v7059_v47 = vpop.permute.xlu1 %7058  ;;  %v7099_v42 = vsel %vm22524_vm0, %v7061_v55, %v7063_v12  ;;  %7171 = vmatprep.mubr.bf16.mxu0 %v20046_v41 }
 0x38b   :  { %v7098_v17 = vsel %vm22525_vm2, %v7059_v47, %v7061_v55  ;;  %8591 = vrot.lane.b32.xlu0 %v20046_v41, %s17840_s30  ;;  %7139 = vmatprep.subr.bf16.mxu0 %v7099_v42  ;;  %vm22527_vm2 = vmmov %vm22524_vm0 }
 0x38c   :  { %7140 = vmatpush1.bf16.msra.mxu0 %v7098_v17 }
 0x38d   :  { %9066 = vrot.lane.b32.xlu1 %v19311_v33, %s17841_s16  ;;  %16627 = vmatmul.mubr.msk.bf16.vlgmr.msra.gmra.mrb[36].mxu1 %vm272_vm1, %v19982_v0  ;;  %v7065_v62 = vpop.permute.xlu0 %7064 }
 0x38e   :  { %7212 = vmatprep.mubr.bf16.mxu1 %v20046_v41  ;;  %v7067_v34 = vpop.permute.xlu1 %7066  ;;  %v7100_v10 = vsel %vm22526_vm11, %v7063_v12, %v7065_v62  ;;  %vm22528_vm11 = vmmov %vm22524_vm0 }
 0x38f   :  { %9068 = vrot.lane.b32.xlu0 %v19348_v44, %s17841_s16  ;;  %v7101_v55 = vsel %vm22524_vm0, %v7065_v62, %v7067_v34 }
 0x390   :  { %7180 = vmatprep.subr.bf16.mxu1 %v7101_v55 }
 0x391   :  { %9064 = vrot.lane.b32.xlu1 %v19299_v19, %s17841_s16  ;;  %16103 = vmatmul.mubr.msk.bf16.vlgmr.msra.gmra.mrb[20].mxu0 %vm272_vm1, %v20080_v63  ;;  %v7069_v0 = vpop.permute.xlu0 %7068 }
 0x392   :  { %7181 = vmatpush1.bf16.msra.mxu1 %v7100_v10  ;;  %v7071_v47 = vpop.permute.xlu1 %7070  ;;  %7253 = vmatprep.mubr.bf16.mxu0 %v20046_v41  ;;  %v7102_v42 = vsel %vm22528_vm11, %v7067_v34, %v7069_v0  ;;  %vm22530_vm11 = vmmov %vm22524_vm0 }
 0x393   :  { %9070 = vrot.lane.b32.xlu0 %v19366_v18, %s17841_s16  ;;  %v7103_v12 = vsel %vm22527_vm2, %v7069_v0, %v7071_v47  ;;  %vm22529_vm2 = vmmov %vm22524_vm0 }
 0x394   :  { %7221 = vmatprep.subr.bf16.mxu0 %v7103_v12 }
 0x395   :  { %9072 = vrot.lane.b32.xlu1 %v19395_v20, %s17841_s16  ;;  %16104 = vmatmul.mubr.msk.bf16.vlgmr.msra.gmra.mrb[20].mxu1 %vm272_vm1, %v20080_v63  ;;  %v7073_v17 = vpop.permute.xlu0 %7072 }
 0x396   :  { %7294 = vmatprep.mubr.bf16.mxu1 %v20046_v41  ;;  %7222 = vmatpush1.bf16.msra.mxu0 %v7102_v42  ;;  %v7104_v10 = vsel %vm22524_vm0, %v7071_v47, %v7073_v17 }
 0x397   :  { %v7075_v62 = vpop.permute.xlu1 %7074  ;;  %9074 = vrot.lane.b32.xlu0 %v19413_v61, %s17841_s16 }
 0x398   :  { %v7105_v55 = vsel %vm22529_vm2, %v7073_v17, %v7075_v62  ;;  %vm22531_vm2 = vmmov %vm22524_vm0 }
 0x399   :  { %9076 = vrot.lane.b32.xlu1 %v19457_v30, %s17841_s16  ;;  %7262 = vmatprep.subr.bf16.mxu1 %v7105_v55  ;;  %v7077_v34 = vpop.permute.xlu0 %7076 }
 0x39a   :  { %16105 = vmatmul.mubr.msk.bf16.vlgmr.msra.gmra.mrb[24].mxu0 %vm272_vm1, %v20080_v63  ;;  %7263 = vmatpush1.bf16.msra.mxu1 %v7104_v10  ;;  %v7106_v12 = vsel %vm22524_vm0, %v7075_v62, %v7077_v34 }
 0x39b   :  { %v7079_v0 = vpop.permute.xlu1 %7078  ;;  %7335 = vmatprep.mubr.bf16.mxu0 %v20046_v41  ;;  %9078 = vrot.lane.b32.xlu0 %v19467_v16, %s17841_s16 }
 0x39c   :  { %v7107_v47 = vsel %vm22530_vm11, %v7077_v34, %v7079_v0  ;;  %vm22532_vm11 = vmmov %vm22524_vm0 }
 0x39d   :  { %9080 = vrot.lane.b32.xlu1 %v19485_v26, %s17841_s16  ;;  %16106 = vmatmul.mubr.msk.bf16.vlgmr.msra.gmra.mrb[24].mxu1 %vm272_vm1, %v20080_v63  ;;  %v7081_v42 = vpop.permute.xlu0 %7080 }
 0x39e   :  { %7303 = vmatprep.subr.bf16.mxu0 %v7107_v47  ;;  %7376 = vmatprep.mubr.bf16.mxu1 %v20046_v41  ;;  %v7108_v10 = vsel %vm22531_vm2, %v7079_v0, %v7081_v42  ;;  %vm22533_vm2 = vmmov %vm22524_vm0 }
 0x39f   :  { %7304 = vmatpush1.bf16.msra.mxu0 %v7106_v12  ;;  %v7083_v17 = vpop.permute.xlu1 %7082  ;;  %9082 = vrot.lane.b32.xlu0 %v19516_v38, %s17841_s16 }
 0x3a0   :  { %v7109_v55 = vsel %vm22532_vm11, %v7081_v42, %v7083_v17  ;;  %vm22534_vm11 = vmmov %vm22524_vm0 }
 0x3a1   :  { %9084 = vrot.lane.b32.xlu1 %v19540_v32, %s17841_s16  ;;  %7344 = vmatprep.subr.bf16.mxu1 %v7109_v55  ;;  %v7085_v62 = vpop.permute.xlu0 %7084 }
 0x3a2   :  { %16107 = vmatmul.mubr.msk.bf16.vlgmr.msra.gmra.mrb[28].mxu0 %vm272_vm1, %v20080_v63  ;;  %7345 = vmatpush1.bf16.msra.mxu1 %v7108_v10  ;;  %v7110_v47 = vsel %vm22533_vm2, %v7083_v17, %v7085_v62  ;;  %vm22535_vm2 = vmmov %vm22524_vm0 }
 0x3a3   :  { %v7087_v34 = vpop.permute.xlu1 %7086  ;;  %7417 = vmatprep.mubr.bf16.mxu0 %v20046_v41  ;;  %9086 = vrot.lane.b32.xlu0 %v19542_v2, %s17841_s16  ;;  %vm22537_vm5 = vmmov %vm22535_vm2 }
 0x3a4   :  { %v7111_v0 = vsel %vm22524_vm0, %v7085_v62, %v7087_v34 }
 0x3a5   :  { %9088 = vrot.lane.b32.xlu1 %v19603_v8, %s17841_s16  ;;  %16108 = vmatmul.mubr.msk.bf16.vlgmr.msra.gmra.mrb[28].mxu1 %vm272_vm1, %v20080_v63  ;;  %v7089_v12 = vpop.permute.xlu0 %7088 }
 0x3a6   :  { %7385 = vmatprep.subr.bf16.mxu0 %v7111_v0  ;;  %7458 = vmatprep.mubr.bf16.mxu1 %v20046_v41  ;;  %v7112_v10 = vsel %vm22534_vm11, %v7087_v34, %v7089_v12  ;;  %vm22536_vm11 = vmmov %vm22524_vm0 }
 0x3a7   :  { %7386 = vmatpush1.bf16.msra.mxu0 %v7110_v47  ;;  %v7091_v42 = vpop.permute.xlu1 %7090  ;;  %9090 = vrot.lane.b32.xlu0 %v19605_v43, %s17841_s16 }
 0x3a8   :  { %v7113_v55 = vsel %vm22524_vm0, %v7089_v12, %v7091_v42  ;;  %vm16445_vm0 = vmpackc.low %vm19226_vm13, %vm19226_vm13 }
 0x3a9   :  { %9092 = vrot.lane.b32.xlu1 %v19623_v27, %s17841_s16  ;;  %7426 = vmatprep.subr.bf16.mxu1 %v7113_v55  ;;  %v7093_v17 = vpop.permute.xlu0 %7092  ;;  %v22542_v55 = vpack.c.bf16 %v19274_v48, %v19252_v28  ;;  %v22545_v28 = vpack.c.bf16 %v19314_v35, %v19296_v15 }
 0x3aa   :  { %16109 = vmatmul.mubr.msk.bf16.vlgmr.msra.gmra.mrb[32].mxu0 %vm272_vm1, %v20080_v63  ;;  %7427 = vmatpush1.bf16.msra.mxu1 %v7112_v10  ;;  %v7114_v0 = vsel %vm22536_vm11, %v7091_v42, %v7093_v17  ;;  %v22539_v42 = vpack.c.bf16 %v19284_v54, %v19265_v40  ;;  %v22541_v40 = vpack.c.bf16 %v19339_v22, %v19307_v24 }
 0x3ab   :  { %v7095_v62 = vpop.permute.xlu1 %7094  ;;  %7499 = vmatprep.mubr.bf16.mxu0 %v20046_v41  ;;  %16630 = vmatprep.subr.bf16.mxu1 %v22510_v31  ;;  %v22546_v24 = vpack.c.bf16 %v19438_v49, %v19416_v1  ;;  %v22552_v49 = vld [vmem:[#allocation4_spill] sm:$0xff] }
 0x3ac   :  { %9094 = vrot.lane.b32.xlu0 %v19641_v13, %s17841_s16  ;;  %v7115_v34 = vsel %vm22535_vm2, %v7093_v17, %v7095_v62  ;;  %vm22538_vm2 = vcmp.eq.s32.totalorder %v19207_v45, 1 }
 0x3ad   :  { %9096 = vrot.lane.b32.xlu1 %v19672_v56, %s17841_s16  ;;  %16110 = vmatmul.mubr.msk.bf16.vlgmr.msra.gmra.mrb[32].mxu1 %vm272_vm1, %v20080_v63  ;;  %v7097_v47 = vpop.permute.xlu0 %7096  ;;  %vm16451_vm11 = vmpackc.low %vm22538_vm2, %vm22538_vm2  ;;  %vm22544_vm2 = vcmp.eq.s32.totalorder %v19241_v14, 1 }
 0x3ae   :  { %7467 = vmatprep.subr.bf16.mxu0 %v7115_v34  ;;  %16632 = vmatprep.mubr.msk.bf16.mxu1 %vm22464_vm3, %v22510_v31  ;;  %v7116_v12 = vsel %vm22537_vm5, %v7095_v62, %v7097_v47  ;;  %vm16448_vm3 = vmpackc.low %vm19222_vm12, %vm19222_vm12  ;;  %vm22540_vm5 = vcmp.eq.s32.totalorder %v19215_v52, 1  ;;  %v22543_v62 = vpack.c.bf16 %v19375_v37, %v19354_v9  ;;  %v22549_v9 = vld [vmem:[#allocation10_spill] sm:$0xff]  ;;  %v22550_v37 = vld [vmem:[#allocation9_spill] sm:$0xff] }
 0x3af   :  { %7468 = vmatpush1.bf16.msra.mxu0 %v7114_v0  ;;  %v20160_v10 = vpop.permute.xlu1 %8044  ;;  %16631 = vmatpush3.bf16.msra.mxu1 %v7116_v12  ;;  %vm16457_vm8 = vmpackc.low %vm22540_vm5, %vm22540_vm5  ;;  %v22551_v1 = vpack.c.bf16 %v22549_v9, %v22550_v37  ;;  %v22557_v0 = vld [vmem:[#allocation5_spill] sm:$0xff]  ;;  %v22559_v47 = vld [vmem:[#allocation14_spill] sm:$0xff] }
 0x3b0   :  { %16447 = vmatprep.subr.msk.bf16.mxu0 %vm16445_vm0, %v22539_v42  ;;  %9098 = vrot.lane.b32.xlu0 %v19674_v36, %s17841_s16  ;;  %vm16454_vm0 = vmpackc.low %vm19231_vm14, %vm19231_vm14  ;;  %v22560_v12 = vld [vmem:[#allocation12_spill] sm:$0xff]  ;;  %v22567_v9 = vld [vmem:[#allocation17_spill] sm:$0xff] }
 0x3b1   :  { %9100 = vrot.lane.b32.xlu1 %v19697_v4, %s17841_s16  ;;  %16453 = vmatprep.subr.msk.bf16.mxu1 %vm16451_vm11, %v22541_v40  ;;  %v20183_v54 = vpop.permute.xlu0 %8046  ;;  %vm16463_vm11 = vmpackc.low %vm22544_vm2, %vm22544_vm2  ;;  %v22561_v42 = vpack.c.bf16 %v22559_v47, %v22560_v12  ;;  %v22568_v37 = vld [vmem:[#allocation15_spill] sm:$0xff] }
 0x3b2   :  { %16111 = vmatmul.mubr.msk.bf16.vlgmr.msra.gmra.mrb[36].mxu0 %vm272_vm1, %v20080_v63  ;;  %vm16469_vm5 = vmpackc.low %vm19380_vm6, %vm19380_vm6 }
 0x3b3   :  { %16450 = vmatpush1.bf16.msk.msra.mxu0 %vm16448_vm3, %v22542_v55  ;;  %v20188_v17 = vpop.permute.xlu1 %8042  ;;  %7604 = vmatprep.mubr.bf16.mxu0 %v20046_v41  ;;  %vm22547_vm3 = vcmp.eq.s32.totalorder %v19213_v51, 1  ;;  %v22562_v55 = vld [vmem:[#allocation22_spill] sm:$0xff] }
 0x3b4   :  { %16459 = vmatprep.subr.msk.bf16.mxu0 %vm16457_vm8, %v22543_v62  ;;  %9102 = vrot.lane.b32.xlu0 %v20046_v41, %s17841_s16  ;;  %vm16460_vm8 = vmpackc.low %vm22547_vm3, %vm22547_vm3 }
 0x3b5   :  { %9577 = vrot.lane.b32.xlu1 %v19311_v33, %s17842_s22  ;;  %16633 = vmatmul.mubr.msk.bf16.vlgmr.msra.gmra.mrb[36].mxu1 %vm272_vm1, %v20080_v63  ;;  %v20209_v48 = vpop.permute.xlu0 %8048  ;;  %v20220_v33 = vld [vmem:[%s22405_s4 + $0x10] sm:$0xf]  ;;  %v22555_v63 = vld [vmem:[#allocation16_spill] sm:$0xff] }
 0x3b6   :  { %16456 = vmatpush1.bf16.msk.msra.mxu1 %vm16454_vm0, %v22545_v28  ;;  %7645 = vmatprep.mubr.bf16.mxu1 %v20046_v41  ;;  %vm22553_vm0 = vcmp.eq.s32.totalorder %v22552_v49, 1 }
 0x3b7   :  { %16465 = vmatprep.subr.msk.bf16.mxu1 %vm16463_vm11, %v22546_v24  ;;  %v20215_v22 = vpop.permute.xlu1 %8050  ;;  %vm16466_vm2 = vmpackc.low %vm22553_vm0, %vm22553_vm0  ;;  %vm22558_vm11 = vcmp.eq.s32.totalorder %v22557_v0, 1 }
 0x3b8   :  { %9579 = vrot.lane.b32.xlu0 %v19348_v44, %s17842_s22  ;;  %vm16475_vm3 = vmpackc.low %vm22558_vm11, %vm22558_vm11  ;;  %vm22572_vm11 = vcmp.eq.s32.totalorder %v19422_v46, 1 }
 0x3b9   :  { %9575 = vrot.lane.b32.xlu1 %v19299_v19, %s17842_s22  ;;  %v20234_v35 = vpop.permute.xlu0 %8052  ;;  %v22554_v19 = vld [vmem:[#allocation18_spill] sm:$0xff] }
 0x3ba   :  { %16114 = vmatmul.mubr.msk.bf16.vlgmr.msra.gmra.mrb[20].mxu0 %vm272_vm1, %v20220_v33  ;;  %v22556_v34 = vpack.c.bf16 %v22554_v19, %v22555_v63  ;;  %v22573_v63 = vld [vmem:[#allocation21_spill] sm:$0xff] }
 0x3bb   :  { %16462 = vmatpush1.bf16.msk.msra.mxu0 %vm16460_vm8, %v22551_v1  ;;  %v20239_v44 = vpop.permute.xlu1 %8054  ;;  %7686 = vmatprep.mubr.bf16.mxu0 %v20046_v41  ;;  %vm16472_vm8 = vmpackc.low %vm19344_vm9, %vm19344_vm9  ;;  %v22569_v1 = vpack.c.bf16 %v22567_v9, %v22568_v37 }
 0x3bc   :  { %16471 = vmatprep.subr.msk.bf16.mxu0 %vm16469_vm5, %v22556_v34  ;;  %9581 = vrot.lane.b32.xlu0 %v19366_v18, %s17842_s22  ;;  %v22563_v18 = vld [vmem:[#allocation20_spill] sm:$0xff]  ;;  %vm22566_vm5 = vcmp.eq.s32.totalorder %v19271_v6, 1  ;;  %v22574_v34 = vld [vmem:[#allocation19_spill] sm:$0xff] }
 0x3bd   :  { %9583 = vrot.lane.b32.xlu1 %v19395_v20, %s17842_s22  ;;  %16115 = vmatmul.mubr.msk.bf16.vlgmr.msra.gmra.mrb[20].mxu1 %vm272_vm1, %v20220_v33  ;;  %v20260_v40 = vpop.permute.xlu0 %8056  ;;  %v22564_v62 = vpack.c.bf16 %v22562_v55, %v22563_v18  ;;  %vm16481_vm0 = vmpackc.low %vm22566_vm5, %vm22566_vm5  ;;  %v22575_v47 = vpack.c.bf16 %v22573_v63, %v22574_v34  ;;  %v22582_v55 = vld [vmem:[#allocation7_spill] sm:$0xff]  ;;  %v22585_v18 = vld [vmem:[#allocation26_spill] sm:$0xff] }
 0x3be   :  { %16468 = vmatpush1.bf16.msk.msra.mxu1 %vm16466_vm2, %v22561_v42  ;;  %7727 = vmatprep.mubr.bf16.mxu1 %v20046_v41  ;;  %vm16478_vm2 = vmpackc.low %vm19408_vm10, %vm19408_vm10 }
 0x3bf   :  { %16477 = vmatprep.subr.msk.bf16.mxu1 %vm16475_vm3, %v22564_v62  ;;  %v20266_v28 = vpop.permute.xlu1 %8058  ;;  %vm16487_vm3 = vmpackc.low %vm22572_vm11, %vm22572_vm11  ;;  %v22586_v62 = vld [vmem:[#allocation25_spill] sm:$0xff] }
 0x3c0   :  { %9585 = vrot.lane.b32.xlu0 %v19413_v61, %s17842_s22  ;;  %v22587_v9 = vpack.c.bf16 %v22585_v18, %v22586_v62 }
 0x3c1   :  { %9587 = vrot.lane.b32.xlu1 %v19457_v30, %s17842_s22  ;;  %v20280_v24 = vpop.permute.xlu0 %8060  ;;  %v22571_v30 = vpack.c.bf16 %v19575_v25, %v19562_v39 }
 0x3c2   :  { %16116 = vmatmul.mubr.msk.bf16.vlgmr.msra.gmra.mrb[24].mxu0 %vm272_vm1, %v20220_v33 }
 0x3c3   :  { %16474 = vmatpush1.bf16.msk.msra.mxu0 %vm16472_vm8, %v22569_v1  ;;  %v20285_v61 = vpop.permute.xlu1 %8062  ;;  %7768 = vmatprep.mubr.bf16.mxu0 %v20046_v41 }
 0x3c4   :  { %16483 = vmatprep.subr.msk.bf16.mxu0 %vm16481_vm0, %v22571_v30  ;;  %9589 = vrot.lane.b32.xlu0 %v19467_v16, %s17842_s22  ;;  %v22576_v16 = vpack.c.bf16 %v19618_v21, %v19581_v50  ;;  %vm16493_vm0 = vmpackc.low %vm19567_vm15, %vm19567_vm15  ;;  %v22579_v50 = vld [vmem:[#allocation24_spill] sm:$0xff]  ;;  %v22580_v21 = vld [vmem:[#allocation23_spill] sm:$0xff] }
 0x3c5   :  { %9591 = vrot.lane.b32.xlu1 %v19485_v26, %s17842_s22  ;;  %16117 = vmatmul.mubr.msk.bf16.vlgmr.msra.gmra.mrb[24].mxu1 %vm272_vm1, %v20220_v33  ;;  %v20306_v12 = vpop.permute.xlu0 %8064  ;;  %v22577_v26 = vld [vmem:[#allocation6_spill] sm:$0xff]  ;;  %v22581_v42 = vpack.c.bf16 %v22579_v50, %v22580_v21 }
 0x3c6   :  { %16480 = vmatpush1.bf16.msk.msra.mxu1 %vm16478_vm2, %v22575_v47  ;;  %7809 = vmatprep.mubr.bf16.mxu1 %v20046_v41  ;;  %vm22578_vm8 = vcmp.eq.s32.totalorder %v22577_v26, 1  ;;  %vm22583_vm2 = vcmp.eq.s32.totalorder %v22582_v55, 1  ;;  %v10084_v30 = vld [vmem:[%s22406_s5] sm:$0xff] }
 0x3c7   :  { %16489 = vmatprep.subr.msk.bf16.mxu1 %vm16487_vm3, %v22576_v16  ;;  %v20312_v39 = vpop.permute.xlu1 %8066  ;;  %vm16484_vm5 = vmpackc.low %vm22578_vm8, %vm22578_vm8  ;;  %vm22589_vm8 = vcmask 1039360  }
 0x3c8   :  { %9593 = vrot.lane.b32.xlu0 %v19516_v38, %s17842_s22  ;;  %vm16490_vm11 = vmpackc.low %vm22583_vm2, %vm22583_vm2  ;;  %vm22593_vm2 = vmmov 0  }
 0x3c9   :  { %9595 = vrot.lane.b32.xlu1 %v19540_v32, %s17842_s22  ;;  %v20326_v25 = vpop.permute.xlu0 %8068  ;;  %v22584_v32 = vpack.c.bf16 %v19650_v29, %v19644_v11  ;;  %vm16496_vm3 = vmpackc.low %vm19550_vm4, %vm19550_vm4 }
 0x3ca   :  { %16118 = vmatmul.mubr.msk.bf16.vlgmr.msra.gmra.mrb[28].mxu0 %vm272_vm1, %v20220_v33 }
 0x3cb   :  { %16486 = vmatpush1.bf16.msk.msra.mxu0 %vm16484_vm5, %v22581_v42  ;;  %v20331_v38 = vpop.permute.xlu1 %8070  ;;  %7850 = vmatprep.mubr.bf16.mxu0 %v20046_v41  ;;  %vm16499_vm5 = vmpackc.low %vm19678_vm7, %vm19678_vm7 }
 0x3cc   :  { %16495 = vmatprep.subr.msk.bf16.mxu0 %vm16493_vm0, %v22584_v32  ;;  %9597 = vrot.lane.b32.xlu0 %v19542_v2, %s17842_s22  ;;  %v22588_v2 = vpack.c.bf16 %v19647_v57, %v19621_v59  ;;  %v22590_v59 = vld [vmem:[#allocation27_spill] sm:$0xff]  ;;  %vm22592_vm0 = vmmov %vm22589_vm8 }
 0x3cd   :  { %9599 = vrot.lane.b32.xlu1 %v19603_v8, %s17842_s22  ;;  %16119 = vmatmul.mubr.msk.bf16.vlgmr.msra.gmra.mrb[28].mxu1 %vm272_vm1, %v20220_v33  ;;  %v20349_v37 = vpop.permute.xlu0 %8072  ;;  %v8085_v11 = vsel %vm22592_vm0, %v20209_v48, %v20215_v22 }
 0x3ce   :  { %16492 = vmatpush1.bf16.msk.msra.mxu1 %vm16490_vm11, %v22587_v9  ;;  %7891 = vmatprep.mubr.bf16.mxu1 %v20046_v41  ;;  %vm22594_vm11 = vmmov %vm22592_vm0 }
 0x3cf   :  { %v20352_v1 = vpop.permute.xlu1 %8074  ;;  %16636 = vmatprep.subr.bf16.mxu1 %v22510_v31 }
 0x3d0   :  { %9601 = vrot.lane.b32.xlu0 %v19605_v43, %s17842_s22  ;;  %v8083_v43 = vsel %vm22589_vm8, %v20160_v10, %v20183_v54  ;;  %vm22596_vm8 = vmmov %vm22592_vm0 }
 0x3d1   :  { %9603 = vrot.lane.b32.xlu1 %v19623_v27, %s17842_s22  ;;  %v20364_v8 = vpop.permute.xlu0 %8076  ;;  %v22591_v27 = vpack.c.bf16 %v19685_v5, %v22590_v59  ;;  %v8096_v59 = vsel %vm22592_vm0, %v20331_v38, %v20349_v37 }
 0x3d2   :  { %16120 = vmatmul.mubr.msk.bf16.vlgmr.msra.gmra.mrb[32].mxu0 %vm272_vm1, %v20220_v33 }
 0x3d3   :  { %16498 = vmatpush1.bf16.msk.msra.mxu0 %vm16496_vm3, %v22588_v2  ;;  %v20372_v29 = vpop.permute.xlu1 %8078  ;;  %7932 = vmatprep.mubr.bf16.mxu0 %v20046_v41  ;;  %vm22595_vm3 = vmmov %vm22592_vm0 }
 0x3d4   :  { %8123 = vmatprep.subr.bf16.mxu0 %v8083_v43  ;;  %9605 = vrot.lane.b32.xlu0 %v19641_v13, %s17842_s22 }
 0x3d5   :  { %9607 = vrot.lane.b32.xlu1 %v19672_v56, %s17842_s22  ;;  %16121 = vmatmul.mubr.msk.bf16.vlgmr.msra.gmra.mrb[32].mxu1 %vm272_vm1, %v20220_v33  ;;  %v20390_v57 = vpop.permute.xlu0 %8080  ;;  %v8082_v56 = vsel %vm22594_vm11, %v20188_v17, %v20160_v10  ;;  %v10109_v10 = vld [vmem:[%s22407_s6] sm:$0xff]  ;;  %vm22598_vm11 = vmmov %vm22592_vm0 }
 0x3d6   :  { %16637 = vmatpush3.bf16.msk.msra.mxu1 %vm16499_vm5, %v22591_v27  ;;  %16638 = vmatprep.mubr.msk.bf16.mxu1 %vm22593_vm2, %v22510_v31  ;;  %vm22597_vm5 = vmmov %vm22592_vm0  ;;  %v8091_v16 = vsel %vm22598_vm11, %v20280_v24, %v20285_v61 }
 0x3d7   :  { %8164 = vmatprep.subr.bf16.mxu1 %v8085_v11  ;;  %v20394_v13 = vpop.permute.xlu1 %8555  ;;  %v8089_v17 = vsel %vm22597_vm5, %v20260_v40, %v20266_v28  ;;  %vm22601_vm5 = vmmov %vm22592_vm0 }
 0x3d8   :  { %9609 = vrot.lane.b32.xlu0 %v19674_v36, %s17842_s22  ;;  %v8087_v36 = vsel %vm22595_vm3, %v20234_v35, %v20239_v44  ;;  %vm22599_vm3 = vmmov %vm22592_vm0  ;;  %v8090_v32 = vsel %vm22601_vm5, %v20266_v28, %v20280_v24 }
 0x3d9   :  { %9611 = vrot.lane.b32.xlu1 %v19697_v4, %s17842_s22  ;;  %v20405_v5 = vpop.permute.xlu0 %8557  ;;  %v8084_v4 = vsel %vm22596_vm8, %v20183_v54, %v20209_v48  ;;  %v20437_v54 = vld [vmem:[%s22405_s4 + $0x14] sm:$0xf]  ;;  %v8086_v48 = vsel %vm22592_vm0, %v20215_v22, %v20234_v35  ;;  %v8088_v21 = vsel %vm22599_vm3, %v20239_v44, %v20260_v40  ;;  %vm22600_vm8 = vmmov %vm22592_vm0  ;;  %v8095_v40 = vsel %vm22592_vm0, %v20326_v25, %v20331_v38 }
 0x3da   :  { %16122 = vmatmul.mubr.msk.bf16.vlgmr.msra.gmra.mrb[36].mxu0 %vm272_vm1, %v20220_v33  ;;  %v8093_v22 = vsel %vm22600_vm8, %v20306_v12, %v20312_v39  ;;  %vm22602_vm11 = vmmov %vm22592_vm0 }
 0x3db   :  { %8124 = vmatpush1.bf16.msra.mxu0 %v8082_v56  ;;  %v20413_v63 = vpop.permute.xlu1 %8553  ;;  %8155 = vmatprep.mubr.bf16.mxu0 %v20046_v41  ;;  %v8092_v62 = vsel %vm22602_vm11, %v20285_v61, %v20306_v12  ;;  %vm22603_vm3 = vmmov %vm22592_vm0 }
 0x3dc   :  { %8205 = vmatprep.subr.bf16.mxu0 %v8087_v36  ;;  %9613 = vrot.lane.b32.xlu0 %v20046_v41, %s17842_s22  ;;  %v8097_v28 = vsel %vm22603_vm3, %v20349_v37, %v20352_v1  ;;  %vm22604_vm8 = vmmov %vm22592_vm0  ;;  %vm22607_vm3 = vcmask 777216  }
 0x3dd   :  { %10087 = vperm.xlu1 %17698, %v10084_v30   ;;  %16639 = vmatmul.mubr.msk.bf16.vlgmr.msra.gmra.mrb[36].mxu1 %vm272_vm1, %v20220_v33  ;;  %v20429_v34 = vpop.permute.xlu0 %8559  ;;  %v8094_v2 = vsel %vm22604_vm8, %v20312_v39, %v20326_v25  ;;  %vm22605_vm5 = vmmov %vm22592_vm0  ;;  %v8594_v38 = vsel %vm22607_vm3, %v20394_v13, %v20405_v5 }
 0x3de   :  { %8165 = vmatpush1.bf16.msra.mxu1 %v8084_v4  ;;  %8196 = vmatprep.mubr.bf16.mxu1 %v20046_v41  ;;  %v8099_v12 = vsel %vm22605_vm5, %v20364_v8, %v20372_v29  ;;  %vm22606_vm11 = vmmov %vm22592_vm0 }
 0x3df   :  { %8246 = vmatprep.subr.bf16.mxu1 %v8089_v17  ;;  %v20432_v47 = vpop.permute.xlu1 %8561  ;;  %v8098_v27 = vsel %vm22606_vm11, %v20352_v1, %v20364_v8  ;;  %vm22608_vm8 = vmmov %vm22592_vm0 }
 0x3e0   :  { %10112 = vperm.xlu0 %17697, %v10109_v10   ;;  %v8100_v56 = vsel %vm22608_vm8, %v20372_v29, %v20390_v57  ;;  %vm22609_vm5 = vmmov %vm22607_vm3 }
 0x3e1   :  { %v20444_v33 = vpop.permute.xlu0 %8563  ;;  %v8596_v1 = vsel %vm22609_vm5, %v20429_v34, %v20432_v47  ;;  %vm22610_vm0 = vmmov %vm22607_vm3 }
 0x3e2   :  { %16125 = vmatmul.mubr.msk.bf16.vlgmr.msra.gmra.mrb[20].mxu0 %vm272_vm1, %v20437_v54  ;;  %v8593_v29 = vsel %vm22610_vm0, %v20413_v63, %v20394_v13  ;;  %vm22611_vm11 = vmmov %vm22610_vm0 }
 0x3e3   :  { %8206 = vmatpush1.bf16.msra.mxu0 %v8086_v48  ;;  %v20449_v50 = vpop.permute.xlu1 %8565  ;;  %8237 = vmatprep.mubr.bf16.mxu0 %v20046_v41  ;;  %vm22612_vm3 = vmmov %vm22610_vm0 }
 0x3e4   :  { %8287 = vmatprep.subr.bf16.mxu0 %v8091_v16  ;;  %v8598_v36 = vsel %vm22611_vm11, %v20444_v33, %v20449_v50  ;;  %v8595_v13 = vsel %vm22612_vm3, %v20405_v5, %v20429_v34  ;;  %vm22613_vm8 = vmmov %vm22610_vm0 }
 0x3e5   :  { %16126 = vmatmul.mubr.msk.bf16.vlgmr.msra.gmra.mrb[20].mxu1 %vm272_vm1, %v20437_v54  ;;  %v20460_v35 = vpop.permute.xlu0 %8567  ;;  %vm22614_vm5 = vmmov %vm22610_vm0 }
 0x3e6   :  { %8247 = vmatpush1.bf16.msra.mxu1 %v8088_v21  ;;  %8278 = vmatprep.mubr.bf16.mxu1 %v20046_v41  ;;  %v8597_v5 = vsel %vm22614_vm5, %v20432_v47, %v20444_v33  ;;  %vm22615_vm11 = vmmov %vm22610_vm0 }
 0x3e7   :  { %8328 = vmatprep.subr.bf16.mxu1 %v8093_v22  ;;  %v20463_v42 = vpop.permute.xlu1 %8569  ;;  %v8599_v21 = vsel %vm22615_vm11, %v20449_v50, %v20460_v35  ;;  %vm22616_vm3 = vmmov %vm22610_vm0 }
 0x3e8   :  { %v8600_v63 = vsel %vm22613_vm8, %v20460_v35, %v20463_v42  ;;  %vm22617_vm8 = vmmov %vm22610_vm0 }
 0x3e9   :  { %v20470_v44 = vpop.permute.xlu0 %8571  ;;  %vm22618_vm5 = vmmov %vm22610_vm0 }
 0x3ea   :  { %16127 = vmatmul.mubr.msk.bf16.vlgmr.msra.gmra.mrb[24].mxu0 %vm272_vm1, %v20437_v54  ;;  %vm22619_vm11 = vmmov %vm22610_vm0 }
 0x3eb   :  { %8288 = vmatpush1.bf16.msra.mxu0 %v8090_v32  ;;  %v20475_v18 = vpop.permute.xlu1 %8573  ;;  %8319 = vmatprep.mubr.bf16.mxu0 %v20046_v41  ;;  %v8601_v32 = vsel %vm22617_vm8, %v20463_v42, %v20470_v44  ;;  %vm22621_vm8 = vmmov %vm22610_vm0 }
 0x3ec   :  { %8369 = vmatprep.subr.bf16.mxu0 %v8095_v40  ;;  %v8602_v48 = vsel %vm22610_vm0, %v20470_v44, %v20475_v18 }
 0x3ed   :  { %16128 = vmatmul.mubr.msk.bf16.vlgmr.msra.gmra.mrb[24].mxu1 %vm272_vm1, %v20437_v54  ;;  %v20486_v24 = vpop.permute.xlu0 %8575 }
 0x3ee   :  { %8329 = vmatpush1.bf16.msra.mxu1 %v8092_v62  ;;  %8360 = vmatprep.mubr.bf16.mxu1 %v20046_v41  ;;  %v8603_v62 = vsel %vm22610_vm0, %v20475_v18, %v20486_v24 }
 0x3ef   :  { %8410 = vmatprep.subr.bf16.mxu1 %v8097_v28  ;;  %v20489_v9 = vpop.permute.xlu1 %8577 }
 0x3f0   :  { %v8604_v47 = vsel %vm22616_vm3, %v20486_v24, %v20489_v9  ;;  %vm22620_vm3 = vmmov %vm22610_vm0 }
 0x3f1   :  { %v20496_v61 = vpop.permute.xlu0 %8579 }
 0x3f2   :  { %16129 = vmatmul.mubr.msk.bf16.vlgmr.msra.gmra.mrb[28].mxu0 %vm272_vm1, %v20437_v54 }
 0x3f3   :  { %8370 = vmatpush1.bf16.msra.mxu0 %v8094_v2  ;;  %v20501_v43 = vpop.permute.xlu1 %8581  ;;  %8401 = vmatprep.mubr.bf16.mxu0 %v20046_v41  ;;  %v8605_v2 = vsel %vm22620_vm3, %v20489_v9, %v20496_v61  ;;  %vm22624_vm3 = vmmov %vm22610_vm0 }
 0x3f4   :  { %8451 = vmatprep.subr.bf16.mxu0 %v8099_v12  ;;  %v8606_v50 = vsel %vm22618_vm5, %v20496_v61, %v20501_v43  ;;  %vm22622_vm5 = vmmov %vm22610_vm0 }
 0x3f5   :  { %16130 = vmatmul.mubr.msk.bf16.vlgmr.msra.gmra.mrb[28].mxu1 %vm272_vm1, %v20437_v54  ;;  %v20509_v39 = vpop.permute.xlu0 %8583 }
 0x3f6   :  { %8411 = vmatpush1.bf16.msra.mxu1 %v8096_v59  ;;  %8442 = vmatprep.mubr.bf16.mxu1 %v20046_v41  ;;  %v8607_v24 = vsel %vm22622_vm5, %v20501_v43, %v20509_v39 }
 0x3f7   :  { %v20512_v25 = vpop.permute.xlu1 %8585  ;;  %16642 = vmatprep.subr.bf16.mxu1 %v22510_v31 }
 0x3f8   :  { %v8608_v42 = vsel %vm22619_vm11, %v20509_v39, %v20512_v25  ;;  %vm22623_vm11 = vcmask 769024  }
 0x3f9   :  { %v20520_v11 = vpop.permute.xlu0 %8587 }
 0x3fa   :  { %16131 = vmatmul.mubr.msk.bf16.vlgmr.msra.gmra.mrb[32].mxu0 %vm272_vm1, %v20437_v54  ;;  %v8609_v12 = vsel %vm22610_vm0, %v20512_v25, %v20520_v11 }
 0x3fb   :  { %8452 = vmatpush1.bf16.msra.mxu0 %v8098_v27  ;;  %v20525_v37 = vpop.permute.xlu1 %8589  ;;  %8483 = vmatprep.mubr.bf16.mxu0 %v20046_v41 }
 0x3fc   :  { %8634 = vmatprep.subr.bf16.mxu0 %v8594_v38  ;;  %v8610_v18 = vsel %vm22621_vm8, %v20520_v11, %v20525_v37  ;;  %vm22625_vm8 = vmmov %vm22623_vm11 }
 0x3fd   :  { %16132 = vmatmul.mubr.msk.bf16.vlgmr.msra.gmra.mrb[32].mxu1 %vm272_vm1, %v20437_v54  ;;  %v20536_v8 = vpop.permute.xlu0 %8591  ;;  %vm22626_vm5 = vmmov %vm22625_vm8 }
 0x3fe   :  { %16643 = vmatpush3.bf16.msra.mxu1 %v8100_v56  ;;  %16644 = vmatprep.mubr.msk.bf16.mxu1 %vm22593_vm2, %v22510_v31  ;;  %v8611_v59 = vsel %vm22624_vm3, %v20525_v37, %v20536_v8  ;;  %vm22627_vm0 = vmmov %vm22626_vm5 }
 0x3ff   :  { %8675 = vmatprep.subr.bf16.mxu1 %v8596_v1  ;;  %v20540_v30 = vpop.permute.xlu1 %9066  ;;  %vm22629_vm3 = vmmov %vm22627_vm0 }
 0x401   :  { %v20547_v57 = vpop.permute.xlu0 %9068 }
 0x402   :  { %16133 = vmatmul.mubr.msk.bf16.vlgmr.msra.gmra.mrb[36].mxu0 %vm272_vm1, %v20437_v54  ;;  %v9105_v43 = vsel %vm22623_vm11, %v20540_v30, %v20547_v57  ;;  %vm22628_vm11 = vmmov %vm22627_vm0 }
 0x403   :  { %8635 = vmatpush1.bf16.msra.mxu0 %v8593_v29  ;;  %v20552_v4 = vpop.permute.xlu1 %9064  ;;  %8666 = vmatprep.mubr.bf16.mxu0 %v20046_v41 }
 0x404   :  { %8716 = vmatprep.subr.bf16.mxu0 %v8598_v36  ;;  %v9104_v11 = vsel %vm22626_vm5, %v20552_v4, %v20540_v30  ;;  %v20687_v30 = vld [vmem:[%s22405_s4 + $0x1c] sm:$0xf]  ;;  %vm22631_vm5 = vmmov %vm22627_vm0 }
 0x405   :  { %16645 = vmatmul.mubr.msk.bf16.vlgmr.msra.gmra.mrb[36].mxu1 %vm272_vm1, %v20437_v54  ;;  %v20563_v10 = vpop.permute.xlu0 %9070  ;;  %v20571_v54 = vld [vmem:[%s22405_s4 + $0x18] sm:$0xf] }
 0x406   :  { %8676 = vmatpush1.bf16.msra.mxu1 %v8595_v13  ;;  %8707 = vmatprep.mubr.bf16.mxu1 %v20046_v41  ;;  %v9106_v1 = vsel %vm22628_vm11, %v20547_v57, %v20563_v10  ;;  %vm22632_vm11 = vmmov %vm22627_vm0 }
 0x407   :  { %8757 = vmatprep.subr.bf16.mxu1 %v8600_v63  ;;  %v20566_v17 = vpop.permute.xlu1 %9072 }
 0x408   :  { %v9107_v25 = vsel %vm22625_vm8, %v20563_v10, %v20566_v17  ;;  %vm22630_vm8 = vmmov %vm22627_vm0 }
 0x409   :  { %v20578_v34 = vpop.permute.xlu0 %9074 }
 0x40a   :  { %16136 = vmatmul.mubr.msk.bf16.vlgmr.msra.gmra.mrb[20].mxu0 %vm272_vm1, %v20571_v54  ;;  %v9108_v57 = vsel %vm22630_vm8, %v20566_v17, %v20578_v34  ;;  %vm22634_vm8 = vmmov %vm22627_vm0 }
 0x40b   :  { %8717 = vmatpush1.bf16.msra.mxu0 %v8597_v5  ;;  %v20583_v16 = vpop.permute.xlu1 %9076  ;;  %8748 = vmatprep.mubr.bf16.mxu0 %v20046_v41 }
 0x40c   :  { %8798 = vmatprep.subr.bf16.mxu0 %v8602_v48  ;;  %v9109_v38 = vsel %vm22627_vm0, %v20578_v34, %v20583_v16 }
 0x40d   :  { %16137 = vmatmul.mubr.msk.bf16.vlgmr.msra.gmra.mrb[20].mxu1 %vm272_vm1, %v20571_v54  ;;  %v20594_v33 = vpop.permute.xlu0 %9078 }
 0x40e   :  { %8758 = vmatpush1.bf16.msra.mxu1 %v8599_v21  ;;  %8789 = vmatprep.mubr.bf16.mxu1 %v20046_v41  ;;  %v9110_v13 = vsel %vm22627_vm0, %v20583_v16, %v20594_v33 }
 0x40f   :  { %8839 = vmatprep.subr.bf16.mxu1 %v8604_v47  ;;  %v20597_v22 = vpop.permute.xlu1 %9080 }
 0x410   :  { %v9111_v8 = vsel %vm22629_vm3, %v20594_v33, %v20597_v22  ;;  %vm22633_vm3 = vmmov %vm22627_vm0 }
 0x411   :  { %v20608_v35 = vpop.permute.xlu0 %9082 }
 0x412   :  { %16138 = vmatmul.mubr.msk.bf16.vlgmr.msra.gmra.mrb[24].mxu0 %vm272_vm1, %v20571_v54 }
 0x413   :  { %8799 = vmatpush1.bf16.msra.mxu0 %v8601_v32  ;;  %8830 = vmatprep.mubr.bf16.mxu0 %v20046_v41  ;;  %v20610_v40 = vpop.permute.xlu1 %9084 }
 0x414   :  { %8880 = vmatprep.subr.bf16.mxu0 %v8606_v50  ;;  %v9113_v4 = vsel %vm22631_vm5, %v20608_v35, %v20610_v40  ;;  %vm22635_vm5 = vmmov %vm22627_vm0 }
 0x415   :  { %16139 = vmatmul.mubr.msk.bf16.vlgmr.msra.gmra.mrb[24].mxu1 %vm272_vm1, %v20571_v54  ;;  %v20621_v44 = vpop.permute.xlu0 %9086 }
 0x416   :  { %8840 = vmatpush1.bf16.msra.mxu1 %v8603_v62  ;;  %8871 = vmatprep.mubr.bf16.mxu1 %v20046_v41  ;;  %v9114_v34 = vsel %vm22635_vm5, %v20610_v40, %v20621_v44  ;;  %vm22639_vm5 = vmmov %vm22627_vm0 }
 0x417   :  { %8921 = vmatprep.subr.bf16.mxu1 %v8608_v42  ;;  %v20623_v28 = vpop.permute.xlu1 %9088 }
 0x418   :  { %v9115_v63 = vsel %vm22632_vm11, %v20621_v44, %v20623_v28  ;;  %vm22636_vm11 = vmmov %vm22627_vm0 }
 0x419   :  { %v20641_v9 = vpop.permute.xlu0 %9090 }
 0x41a   :  { %16140 = vmatmul.mubr.msk.bf16.vlgmr.msra.gmra.mrb[28].mxu0 %vm272_vm1, %v20571_v54  ;;  %v9116_v47 = vsel %vm22636_vm11, %v20623_v28, %v20641_v9 }
 0x41b   :  { %8881 = vmatpush1.bf16.msra.mxu0 %v8605_v2  ;;  %8912 = vmatprep.mubr.bf16.mxu0 %v20046_v41  ;;  %v20643_v61 = vpop.permute.xlu1 %9092 }
 0x41c   :  { %8962 = vmatprep.subr.bf16.mxu0 %v8610_v18  ;;  %v9117_v5 = vsel %vm22634_vm8, %v20641_v9, %v20643_v61  ;;  %vm22638_vm8 = vmmov %vm22627_vm0 }
 0x41d   :  { %16141 = vmatmul.mubr.msk.bf16.vlgmr.msra.gmra.mrb[28].mxu1 %vm272_vm1, %v20571_v54 }
 0x41e   :  { %8922 = vmatpush1.bf16.msra.mxu1 %v8607_v24  ;;  %8953 = vmatprep.mubr.bf16.mxu1 %v20046_v41  ;;  %v9095_v39 = vpop.permute.xlu0 %9094 }
 0x41f   :  { %16648 = vmatprep.subr.bf16.mxu1 %v22510_v31  ;;  %v20659_v27 = vpop.permute.xlu1 %9096  ;;  %v9118_v50 = vsel %vm22638_vm8, %v20643_v61, %v9095_v39 }
 0x420   :  { %v9119_v21 = vsel %vm22627_vm0, %v9095_v39, %v20659_v27  ;;  %v16157_v39 = vld [vmem:[%s22405_s4 + $0x20] sm:$0xf] }
 0x422   :  { %16142 = vmatmul.mubr.msk.bf16.vlgmr.msra.gmra.mrb[32].mxu0 %vm272_vm1, %v20571_v54  ;;  %v9099_v37 = vpop.permute.xlu0 %9098 }
 0x423   :  { %8963 = vmatpush1.bf16.msra.mxu0 %v8609_v12  ;;  %8994 = vmatprep.mubr.bf16.mxu0 %v20046_v41  ;;  %v9101_v56 = vpop.permute.xlu1 %9100  ;;  %v9120_v62 = vsel %vm22639_vm5, %v20659_v27, %v9099_v37 }
 0x424   :  { %9145 = vmatprep.subr.bf16.mxu0 %v9105_v43 }
 0x425   :  { %16143 = vmatmul.mubr.msk.bf16.vlgmr.msra.gmra.mrb[32].mxu1 %vm272_vm1, %v20571_v54 }
 0x426   :  { %16649 = vmatpush3.bf16.msra.mxu1 %v8611_v59  ;;  %16650 = vmatprep.mubr.msk.bf16.mxu1 %vm22593_vm2, %v22510_v31  ;;  %v9103_v29 = vpop.permute.xlu0 %9102 }
 0x427   :  { %9186 = vmatprep.subr.bf16.mxu1 %v9107_v25  ;;  %v9578_v36 = vpop.permute.xlu1 %9577 }
 0x42a   :  { %16144 = vmatmul.mubr.msk.bf16.vlgmr.msra.gmra.mrb[36].mxu0 %vm272_vm1, %v20571_v54  ;;  %v9580_v10 = vpop.permute.xlu0 %9579 }
 0x42b   :  { %9146 = vmatpush1.bf16.msra.mxu0 %v9104_v11  ;;  %9177 = vmatprep.mubr.bf16.mxu0 %v20046_v41  ;;  %v9576_v17 = vpop.permute.xlu1 %9575 }
 0x42c   :  { %9227 = vmatprep.subr.bf16.mxu0 %v9109_v38 }
 0x42d   :  { %16651 = vmatmul.mubr.msk.bf16.vlgmr.msra.gmra.mrb[36].mxu1 %vm272_vm1, %v20571_v54  ;;  %v9112_v54 = vsel %vm22633_vm3, %v20597_v22, %v20608_v35  ;;  %vm22637_vm3 = vmmov %vm22627_vm0  ;;  %vm22640_vm0 = vcmask 760832  }
 0x42e   :  { %9187 = vmatpush1.bf16.msra.mxu1 %v9106_v1  ;;  %9218 = vmatprep.mubr.bf16.mxu1 %v20046_v41  ;;  %v9582_v48 = vpop.permute.xlu0 %9581  ;;  %v9121_v33 = vsel %vm22637_vm3, %v9099_v37, %v9101_v56  ;;  %v9616_v42 = vsel %vm22640_vm0, %v9578_v36, %v9580_v10  ;;  %vm22641_vm11 = vmmov %vm22637_vm3 }
 0x42f   :  { %9268 = vmatprep.subr.bf16.mxu1 %v9111_v8  ;;  %v9584_v16 = vpop.permute.xlu1 %9583  ;;  %v9122_v44 = vsel %vm22641_vm11, %v9101_v56, %v9103_v29  ;;  %vm22642_vm3 = vmmov %vm22640_vm0  ;;  %v9617_v61 = vsel %vm22640_vm0, %v9580_v10, %v9582_v48 }
 0x430   :  { %v9618_v28 = vsel %vm22642_vm3, %v9582_v48, %v9584_v16  ;;  %vm22643_vm8 = vmmov %vm22640_vm0 }
 0x431   :  { %v9615_v24 = vsel %vm22643_vm8, %v9576_v17, %v9578_v36  ;;  %vm22644_vm5 = vmmov %vm22640_vm0 }
 0x432   :  { %16147 = vmatmul.mubr.msk.bf16.vlgmr.msra.gmra.mrb[20].mxu0 %vm272_vm1, %v20687_v30  ;;  %v9586_v22 = vpop.permute.xlu0 %9585  ;;  %vm22645_vm11 = vmmov %vm22640_vm0 }
 0x433   :  { %9228 = vmatpush1.bf16.msra.mxu0 %v9108_v57  ;;  %9259 = vmatprep.mubr.bf16.mxu0 %v20046_v41  ;;  %v9588_v32 = vpop.permute.xlu1 %9587  ;;  %vm22646_vm3 = vmmov %vm22640_vm0 }
 0x434   :  { %9309 = vmatprep.subr.bf16.mxu0 %v9113_v4  ;;  %v9620_v9 = vsel %vm22644_vm5, %v9586_v22, %v9588_v32  ;;  %v9619_v27 = vsel %vm22646_vm3, %v9584_v16, %v9586_v22  ;;  %vm22647_vm8 = vmmov %vm22640_vm0 }
 0x435   :  { %16148 = vmatmul.mubr.msk.bf16.vlgmr.msra.gmra.mrb[20].mxu1 %vm272_vm1, %v20687_v30  ;;  %vm22648_vm5 = vmmov %vm22640_vm0 }
 0x436   :  { %9269 = vmatpush1.bf16.msra.mxu1 %v9110_v13  ;;  %9300 = vmatprep.mubr.bf16.mxu1 %v20046_v41  ;;  %v9590_v35 = vpop.permute.xlu0 %9589  ;;  %vm22650_vm3 = vmmov %vm22640_vm0 }
 0x437   :  { %9350 = vmatprep.subr.bf16.mxu1 %v9115_v63  ;;  %v9592_v40 = vpop.permute.xlu1 %9591  ;;  %v9621_v37 = vsel %vm22648_vm5, %v9588_v32, %v9590_v35  ;;  %vm22652_vm5 = vmmov %vm22640_vm0 }
 0x438   :  { %v9622_v59 = vsel %vm22645_vm11, %v9590_v35, %v9592_v40  ;;  %vm22649_vm11 = vmmov %vm22640_vm0 }
 0x43a   :  { %16149 = vmatmul.mubr.msk.bf16.vlgmr.msra.gmra.mrb[24].mxu0 %vm272_vm1, %v20687_v30  ;;  %v9594_v2 = vpop.permute.xlu0 %9593 }
 0x43b   :  { %9310 = vmatpush1.bf16.msra.mxu0 %v9112_v54  ;;  %9341 = vmatprep.mubr.bf16.mxu0 %v20046_v41  ;;  %v9596_v18 = vpop.permute.xlu1 %9595 }
 0x43c   :  { %9391 = vmatprep.subr.bf16.mxu0 %v9117_v5  ;;  %v9624_v25 = vsel %vm22647_vm8, %v9594_v2, %v9596_v18  ;;  %vm22651_vm8 = vmmov %vm22640_vm0 }
 0x43d   :  { %16150 = vmatmul.mubr.msk.bf16.vlgmr.msra.gmra.mrb[24].mxu1 %vm272_vm1, %v20687_v30 }
 0x43e   :  { %9351 = vmatpush1.bf16.msra.mxu1 %v9114_v34  ;;  %9382 = vmatprep.mubr.bf16.mxu1 %v20046_v41  ;;  %v9598_v12 = vpop.permute.xlu0 %9597  ;;  %v20788_v34 = vld [vmem:[#allocation3] sm:$0xff] }
 0x43f   :  { %9432 = vmatprep.subr.bf16.mxu1 %v9119_v21  ;;  %v9600_v43 = vpop.permute.xlu1 %9599  ;;  %v9625_v36 = vsel %vm22651_vm8, %v9596_v18, %v9598_v12  ;;  %vm22655_vm8 = vmmov %vm22640_vm0 }
 0x440   :  { %v9626_v56 = vsel %vm22640_vm0, %v9598_v12, %v9600_v43 }
 0x442   :  { %16151 = vmatmul.mubr.msk.bf16.vlgmr.msra.gmra.mrb[28].mxu0 %vm272_vm1, %v20687_v30  ;;  %v9602_v11 = vpop.permute.xlu0 %9601 }
 0x443   :  { %9392 = vmatpush1.bf16.msra.mxu0 %v9116_v47  ;;  %9423 = vmatprep.mubr.bf16.mxu0 %v20046_v41  ;;  %v9604_v38 = vpop.permute.xlu1 %9603  ;;  %v9627_v63 = vsel %vm22640_vm0, %v9600_v43, %v9602_v11 }
 0x444   :  { %9473 = vmatprep.subr.bf16.mxu0 %v9121_v33  ;;  %v9628_v29 = vsel %vm22650_vm3, %v9602_v11, %v9604_v38  ;;  %vm22654_vm3 = vmmov %vm22640_vm0 }
 0x445   :  { %16152 = vmatmul.mubr.msk.bf16.vlgmr.msra.gmra.mrb[28].mxu1 %vm272_vm1, %v20687_v30 }
 0x446   :  { %9433 = vmatpush1.bf16.msra.mxu1 %v9118_v50  ;;  %9464 = vmatprep.mubr.bf16.mxu1 %v20046_v41  ;;  %v9606_v1 = vpop.permute.xlu0 %9605 }
 0x447   :  { %16654 = vmatprep.subr.bf16.mxu1 %v22510_v31  ;;  %v9608_v8 = vpop.permute.xlu1 %9607  ;;  %v9629_v17 = vsel %vm22654_vm3, %v9604_v38, %v9606_v1  ;;  %vm22666_vm3 = vcmp.eq.s32.totalorder %v19422_v46, 1 }
 0x448   :  { %v9630_v57 = vsel %vm22652_vm5, %v9606_v1, %v9608_v8  ;;  %vm22656_vm5 = vmmov %vm22640_vm0 }
 0x44a   :  { %16153 = vmatmul.mubr.msk.bf16.vlgmr.msra.gmra.mrb[32].mxu0 %vm272_vm1, %v20687_v30  ;;  %v9610_v4 = vpop.permute.xlu0 %9609 }
 0x44b   :  { %9474 = vmatpush1.bf16.msra.mxu0 %v9120_v62  ;;  %9505 = vmatprep.mubr.bf16.mxu0 %v20046_v41  ;;  %v9612_v13 = vpop.permute.xlu1 %9611  ;;  %v9631_v5 = vsel %vm22655_vm8, %v9608_v8, %v9610_v4 }
 0x44c   :  { %9656 = vmatprep.subr.bf16.mxu0 %v9616_v42 }
 0x44d   :  { %16154 = vmatmul.mubr.msk.bf16.vlgmr.msra.gmra.mrb[32].mxu1 %vm272_vm1, %v20687_v30 }
 0x44e   :  { %16655 = vmatpush3.bf16.msra.mxu1 %v9122_v44  ;;  %16656 = vmatprep.mubr.msk.bf16.mxu1 %vm22593_vm2, %v22510_v31  ;;  %v9614_v54 = vpop.permute.xlu0 %9613 }
 0x44f   :  { %9697 = vmatprep.subr.bf16.mxu1 %v9618_v28  ;;  %v9633_v48 = vsel %vm22656_vm5, %v9612_v13, %v9614_v54  ;;  %vm10381_vm5 = vcmask 64512  }
 0x452   :  { %16155 = vmatmul.mubr.msk.bf16.vlgmr.msra.gmra.mrb[36].mxu0 %vm272_vm1, %v20687_v30 }
 0x453   :  { %9657 = vmatpush1.bf16.msra.mxu0 %v9615_v24  ;;  %9688 = vmatprep.mubr.bf16.mxu0 %v20046_v41 }
 0x454   :  { %9738 = vmatprep.subr.bf16.mxu0 %v9620_v9 }
 0x455   :  { %16657 = vmatmul.mubr.msk.bf16.vlgmr.msra.gmra.mrb[36].mxu1 %vm272_vm1, %v20687_v30  ;;  %v9623_v30 = vsel %vm22649_vm11, %v9592_v40, %v9594_v2  ;;  %vm22653_vm11 = vmmov %vm22640_vm0  ;;  %vm22661_vm0 = vcmp.eq.s32.totalorder %v19241_v14, 1 }
 0x456   :  { %9698 = vmatpush1.bf16.msra.mxu1 %v9617_v61  ;;  %9729 = vmatprep.mubr.bf16.mxu1 %v20046_v41  ;;  %v9632_v10 = vsel %vm22653_vm11, %v9610_v4, %v9612_v13  ;;  %vm22665_vm11 = vcmp.eq.s32.totalorder %v22582_v55, 1 }
 0x457   :  { %9779 = vmatprep.subr.bf16.mxu1 %v9622_v59 }
 0x45a   :  { %16158 = vmatmul.mubr.msk.bf16.vlgmr.msra.gmra.mrb[20].mxu0 %vm272_vm1, %v16157_v39 }
 0x45b   :  { %9739 = vmatpush1.bf16.msra.mxu0 %v9619_v27  ;;  %9770 = vmatprep.mubr.bf16.mxu0 %v20046_v41 }
 0x45c   :  { %9820 = vmatprep.subr.bf16.mxu0 %v9624_v25 }
 0x45d   :  { %16159 = vmatmul.mubr.msk.bf16.vlgmr.msra.gmra.mrb[20].mxu1 %vm272_vm1, %v16157_v39 }
 0x45e   :  { %9780 = vmatpush1.bf16.msra.mxu1 %v9621_v37  ;;  %9811 = vmatprep.mubr.bf16.mxu1 %v20046_v41 }
 0x45f   :  { %9861 = vmatprep.subr.bf16.mxu1 %v9626_v56  ;;  %v20802_v33 = vpop.permute.xlu0 %10112 }
 0x462   :  { %16160 = vmatmul.mubr.msk.bf16.vlgmr.msra.gmra.mrb[24].mxu0 %vm272_vm1, %v16157_v39 }
 0x463   :  { %9821 = vmatpush1.bf16.msra.mxu0 %v9623_v30  ;;  %9852 = vmatprep.mubr.bf16.mxu0 %v20046_v41 }
 0x464   :  { %9902 = vmatprep.subr.bf16.mxu0 %v9628_v29 }
 0x465   :  { %16161 = vmatmul.mubr.msk.bf16.vlgmr.msra.gmra.mrb[24].mxu1 %vm272_vm1, %v16157_v39 }
 0x466   :  { %9862 = vmatpush1.bf16.msra.mxu1 %v9625_v36  ;;  %9893 = vmatprep.mubr.bf16.mxu1 %v20046_v41 }
 0x467   :  { %9943 = vmatprep.subr.bf16.mxu1 %v9630_v57 }
 0x46a   :  { %16162 = vmatmul.mubr.msk.bf16.vlgmr.msra.gmra.mrb[28].mxu0 %vm272_vm1, %v16157_v39 }
 0x46b   :  { %9903 = vmatpush1.bf16.msra.mxu0 %v9627_v63  ;;  %9934 = vmatprep.mubr.bf16.mxu0 %v20046_v41 }
 0x46c   :  { %9984 = vmatprep.subr.bf16.mxu0 %v9632_v10 }
 0x46d   :  { %16163 = vmatmul.mubr.msk.bf16.vlgmr.msra.gmra.mrb[28].mxu1 %vm272_vm1, %v16157_v39 }
 0x46e   :  { %9944 = vmatpush1.bf16.msra.mxu1 %v9629_v17  ;;  %9975 = vmatprep.mubr.bf16.mxu1 %v20046_v41  ;;  %v20799_v41 = vpop.permute.xlu1 %10087 }
 0x46f   :  { %16660 = vmatprep.subr.bf16.mxu1 %v22510_v31 }
 0x472   :  { %16164 = vmatmul.mubr.msk.bf16.vlgmr.msra.gmra.mrb[32].mxu0 %vm272_vm1, %v16157_v39 }
 0x473   :  { %9985 = vmatpush1.bf16.msra.mxu0 %v9631_v5  ;;  %10016 = vmatprep.mubr.bf16.mxu0 %v20788_v34 }
 0x475   :  { %16165 = vmatmul.mubr.msk.bf16.vlgmr.msra.gmra.mrb[32].mxu1 %vm272_vm1, %v16157_v39 }
 0x476   :  { %16661 = vmatpush3.bf16.msra.mxu1 %v9633_v48  ;;  %16662 = vmatprep.mubr.msk.bf16.mxu1 %vm22593_vm2, %v22510_v31 }
 0x47a   :  { %16166 = vmatmul.mubr.msk.bf16.vlgmr.msra.gmra.mrb[36].mxu0 %vm272_vm1, %v16157_v39 }
 0x47b   :  { %10475 = vmatprep.mubr.bf16.mxu0 %v20788_v34 }
 0x47d   :  { %16663 = vmatmul.mubr.msk.bf16.vlgmr.msra.gmra.mrb[36].mxu1 %vm272_vm1, %v16157_v39  ;;  %vm22657_vm1 = vcmp.eq.s32.totalorder %v19207_v45, 1 }
 0x47e   :  { %10516 = vmatprep.mubr.bf16.mxu1 %v20788_v34 }
 0x52d   :  { %v9690_v16 = vpop.f32.mrb[20].mxu0 }
 0x52e   :  { %v10090_v21 = vmul.f32 %v20799_v41, %v9690_v16  ;;  %v9692_v47 = vpop.f32.mrb[21].mxu0 }
 0x52f   :  { %v10091_v22 = vmul.f32 %v20799_v41, %v9692_v47  ;;  %v9694_v32 = vpop.f32.mrb[22].mxu0 }
 0x530   :  { %v10115_v50 = vadd.f32 %v20802_v33, %v10090_v21  ;;  %v9695_v35 = vpop.f32.mrb[23].mxu0  ;;  %v9731_v40 = vpop.f32.mrb[20].mxu1 }
 0x531   :  { %v10116_v62 = vadd.f32 %v20802_v33, %v10091_v22  ;;  %v10092_v42 = vmul.f32 %v20799_v41, %v9731_v40  ;;  %v9733_v44 = vpop.f32.mrb[21].mxu1 }
 0x532   :  { %v10134_v28 = vmax.f32 %v10115_v50, 0.0  ;;  %v10093_v2 = vmul.f32 %v20799_v41, %v9733_v44  ;;  %v9735_v18 = vpop.f32.mrb[22].mxu1 }
 0x533   :  { %v10135_v24 = vmax.f32 %v10116_v62, 0.0  ;;  %v10117_v9 = vadd.f32 %v20802_v33, %v10092_v42  ;;  %v9736_v61 = vpop.f32.mrb[23].mxu1 }
 0x534   :  { %v20812_v12 = vsel %vm19222_vm12, %v10134_v28, 0.0  ;;  %v10118_v43 = vadd.f32 %v20802_v33, %v10093_v2  ;;  %vm22658_vm12 = vcmp.eq.s32.totalorder %v19213_v51, 1 }
 0x535   :  { %v20817_v59 = vsel %vm19226_vm13, %v10135_v24, 0.0  ;;  %v10136_v39 = vmax.f32 %v10117_v9, 0.0  ;;  %v9772_v27 = vpop.f32.mrb[24].mxu0  ;;  %vm22659_vm13 = vcmp.eq.s32.totalorder %v19215_v52, 1 }
 0x536   :  { %v16435_v25 = vpack.c.bf16 %v20817_v59, %v20812_v12  ;;  %v10137_v11 = vmax.f32 %v10118_v43, 0.0  ;;  %v10094_v38 = vmul.f32 %v20799_v41, %v9772_v27  ;;  %v9774_v37 = vpop.f32.mrb[25].mxu0 }
 0x537   :  { %v20824_v58 = vsel %vm19231_vm14, %v10136_v39, 0.0  ;;  %v10095_v56 = vmul.f32 %v20799_v41, %v9774_v37  ;;  %v9776_v1 = vpop.f32.mrb[26].mxu0  ;;  %vm22660_vm14 = vcmp.eq.s32.totalorder %v22552_v49, 1 }
 0x538   :  { %10249 = vst [vmem:[#allocation3 + $0x4] sm:$0xff] %v16435_v25  ;;  %v20829_v60 = vsel %vm22657_vm1, %v10137_v11, 0.0  ;;  %v10119_v8 = vadd.f32 %v20802_v33, %v10094_v38  ;;  %v9777_v30 = vpop.f32.mrb[27].mxu0  ;;  %v9813_v29 = vpop.f32.mrb[24].mxu1 }
 0x539   :  { %v16436_v36 = vpack.c.bf16 %v20829_v60, %v20824_v58  ;;  %v10120_v57 = vadd.f32 %v20802_v33, %v10095_v56  ;;  %v10096_v3 = vmul.f32 %v20799_v41, %v9813_v29  ;;  %v9815_v4 = vpop.f32.mrb[25].mxu1 }
 0x53a   :  { %v10138_v13 = vmax.f32 %v10119_v8, 0.0  ;;  %v10097_v63 = vmul.f32 %v20799_v41, %v9815_v4  ;;  %v9817_v10 = vpop.f32.mrb[26].mxu1 }
 0x53b   :  { %10250 = vst [vmem:[#allocation3 + $0xc] sm:$0xff] %v16436_v36  ;;  %v10139_v45 = vmax.f32 %v10120_v57, 0.0  ;;  %v10121_v17 = vadd.f32 %v20802_v33, %v10096_v3  ;;  %v9818_v54 = vpop.f32.mrb[27].mxu1 }
 0x53c   :  { %v20840_v5 = vsel %vm22658_vm12, %v10138_v13, 0.0  ;;  %v10122_v48 = vadd.f32 %v20802_v33, %v10097_v63 }
 0x53d   :  { %v20845_v16 = vsel %vm22659_vm13, %v10139_v45, 0.0  ;;  %v10140_v21 = vmax.f32 %v10121_v17, 0.0  ;;  %v9854_v47 = vpop.f32.mrb[28].mxu0 }
 0x53e   :  { %v16437_v22 = vpack.c.bf16 %v20845_v16, %v20840_v5  ;;  %v10141_v32 = vmax.f32 %v10122_v48, 0.0  ;;  %v10098_v50 = vmul.f32 %v20799_v41, %v9854_v47  ;;  %v9856_v35 = vpop.f32.mrb[29].mxu0 }
 0x53f   :  { %v20852_v51 = vsel %vm22660_vm14, %v10140_v21, 0.0  ;;  %v10099_v40 = vmul.f32 %v20799_v41, %v9856_v35  ;;  %v9858_v62 = vpop.f32.mrb[30].mxu0  ;;  %v10259_v42 = vld [vmem:[#allocation3] sm:$0xff] }
 0x540   :  { %10251 = vst [vmem:[#allocation3 + $0x14] sm:$0xff] %v16437_v22  ;;  %v20857_v52 = vsel %vm22661_vm0, %v10141_v32, 0.0  ;;  %v10123_v44 = vadd.f32 %v20802_v33, %v10098_v50  ;;  %v9859_v28 = vpop.f32.mrb[31].mxu0  ;;  %v9895_v2 = vpop.f32.mrb[28].mxu1  ;;  %v20860_v18 = vcombine.high %v10259_v42, %v10259_v42  ;;  %v20862_v24 = vcombine.low %v10259_v42, %v10259_v42 }
 0x541   :  { %v16438_v49 = vpack.c.bf16 %v20857_v52, %v20852_v51  ;;  %v10124_v9 = vadd.f32 %v20802_v33, %v10099_v40  ;;  %v10100_v61 = vmul.f32 %v20799_v41, %v9895_v2  ;;  %v9897_v43 = vpop.f32.mrb[29].mxu1 }
 0x542   :  { %v10142_v39 = vmax.f32 %v10123_v44, 0.0  ;;  %v10101_v14 = vmul.f32 %v20799_v41, %v9897_v43  ;;  %10324 = vrot.lane.b32.xlu0 %v20860_v18, %s17833_s29  ;;  %10322 = vrot.lane.b32.xlu1 %v20862_v24, %s17833_s29  ;;  %v9899_v27 = vpop.f32.mrb[30].mxu1  ;;  %v10260_v25 = vld [vmem:[#allocation3 + $0x8] sm:$0xff] }
 0x543   :  { %10252 = vst [vmem:[#allocation3 + $0x1c] sm:$0xff] %v16438_v49  ;;  %v10143_v11 = vmax.f32 %v10124_v9, 0.0  ;;  %v10125_v38 = vadd.f32 %v20802_v33, %v10100_v61  ;;  %v9900_v37 = vpop.f32.mrb[31].mxu1  ;;  %v20874_v56 = vcombine.high %v10260_v25, %v10260_v25  ;;  %v20876_v1 = vcombine.low %v10260_v25, %v10260_v25 }
 0x544   :  { %v20880_v8 = vsel %vm19344_vm9, %v10142_v39, 0.0  ;;  %v10126_v30 = vadd.f32 %v20802_v33, %v10101_v14  ;;  %vm22664_vm9 = vcmp.eq.s32.totalorder %v19271_v6, 1 }
 0x545   :  { %v20885_v29 = vsel %vm19380_vm6, %v10143_v11, 0.0  ;;  %v10144_v36 = vmax.f32 %v10125_v38, 0.0  ;;  %v9936_v57 = vpop.f32.mrb[32].mxu0  ;;  %vm22662_vm6 = vcmp.eq.s32.totalorder %v22557_v0, 1 }
 0x546   :  { %v16439_v3 = vpack.c.bf16 %v20885_v29, %v20880_v8  ;;  %v10145_v4 = vmax.f32 %v10126_v30, 0.0  ;;  %v10102_v13 = vmul.f32 %v20799_v41, %v9936_v57  ;;  %v9938_v63 = vpop.f32.mrb[33].mxu0  ;;  %10328 = vrot.lane.b32.xlu0 %v20874_v56, %s17833_s29  ;;  %10326 = vrot.lane.b32.xlu1 %v20876_v1, %s17833_s29 }
 0x547   :  { %v20896_v15 = vsel %vm19408_vm10, %v10144_v36, 0.0  ;;  %v10103_v20 = vmul.f32 %v20799_v41, %v9938_v63  ;;  %v9940_v10 = vpop.f32.mrb[34].mxu0  ;;  %v10261_v45 = vld [vmem:[#allocation3 + $0x10] sm:$0xff]  ;;  %vm22663_vm10 = vcmp.eq.s32.totalorder %v22577_v26, 1 }
 0x548   :  { %10253 = vst [vmem:[#allocation3 + $0x24] sm:$0xff] %v16439_v3  ;;  %v20901_v17 = vsel %vm22662_vm6, %v10145_v4, 0.0  ;;  %v10127_v54 = vadd.f32 %v20802_v33, %v10102_v13  ;;  %v9941_v48 = vpop.f32.mrb[35].mxu0  ;;  %v9977_v21 = vpop.f32.mrb[32].mxu1  ;;  %v20904_v47 = vcombine.high %v10261_v45, %v10261_v45  ;;  %v20906_v22 = vcombine.low %v10261_v45, %v10261_v45 }
 0x549   :  { %v16440_v19 = vpack.c.bf16 %v20901_v17, %v20896_v15  ;;  %v10128_v32 = vadd.f32 %v20802_v33, %v10103_v20  ;;  %v10104_v50 = vmul.f32 %v20799_v41, %v9977_v21  ;;  %v9979_v35 = vpop.f32.mrb[33].mxu1 }
 0x54a   :  { %v10146_v40 = vmax.f32 %v10127_v54, 0.0  ;;  %v10105_v0 = vmul.f32 %v20799_v41, %v9979_v35  ;;  %10332 = vrot.lane.b32.xlu0 %v20904_v47, %s17833_s29  ;;  %10330 = vrot.lane.b32.xlu1 %v20906_v22, %s17833_s29  ;;  %v9981_v62 = vpop.f32.mrb[34].mxu1  ;;  %v10262_v42 = vld [vmem:[#allocation3 + $0x18] sm:$0xff] }
 0x54b   :  { %10254 = vst [vmem:[#allocation3 + $0x2c] sm:$0xff] %v16440_v19  ;;  %v10147_v44 = vmax.f32 %v10128_v32, 0.0  ;;  %v10129_v28 = vadd.f32 %v20802_v33, %v10104_v50  ;;  %v9982_v2 = vpop.f32.mrb[35].mxu1  ;;  %v20918_v49 = vcombine.high %v10262_v42, %v10262_v42  ;;  %v20920_v9 = vcombine.low %v10262_v42, %v10262_v42 }
 0x54c   :  { %v20924_v61 = vsel %vm22663_vm10, %v10146_v40, 0.0  ;;  %v10130_v43 = vadd.f32 %v20802_v33, %v10105_v0 }
 0x54d   :  { %v20929_v39 = vsel %vm22664_vm9, %v10147_v44, 0.0  ;;  %v10148_v14 = vmax.f32 %v10129_v28, 0.0  ;;  %v10018_v27 = vpop.f32.mrb[36].mxu0 }
 0x54e   :  { %v16441_v25 = vpack.c.bf16 %v20929_v39, %v20924_v61  ;;  %v10149_v11 = vmax.f32 %v10130_v43, 0.0  ;;  %v10106_v38 = vmul.f32 %v20799_v41, %v10018_v27  ;;  %v10020_v37 = vpop.f32.mrb[37].mxu0  ;;  %10336 = vrot.lane.b32.xlu0 %v20918_v49, %s17833_s29  ;;  %10334 = vrot.lane.b32.xlu1 %v20920_v9, %s17833_s29 }
 0x54f   :  { %v20940_v6 = vsel %vm22665_vm11, %v10148_v14, 0.0  ;;  %v10107_v26 = vmul.f32 %v20799_v41, %v10020_v37  ;;  %v10022_v30 = vpop.f32.mrb[38].mxu0  ;;  %v10263_v36 = vld [vmem:[#allocation3 + $0x20] sm:$0xff] }
 0x550   :  { %10255 = vst [vmem:[#allocation3 + $0x34] sm:$0xff] %v16441_v25  ;;  %v20945_v57 = vsel %vm22666_vm3, %v10149_v11, 0.0  ;;  %v10131_v3 = vadd.f32 %v20802_v33, %v10106_v38  ;;  %v10023_v4 = vpop.f32.mrb[39].mxu0  ;;  %v10059_v13 = vpop.f32.mrb[36].mxu1  ;;  %v20948_v63 = vcombine.high %v10263_v36, %v10263_v36  ;;  %v20950_v20 = vcombine.low %v10263_v36, %v10263_v36 }
 0x551   :  { %v16442_v55 = vpack.c.bf16 %v20945_v57, %v20940_v6  ;;  %v10132_v10 = vadd.f32 %v20802_v33, %v10107_v26  ;;  %v10108_v45 = vmul.f32 %v20799_v41, %v10059_v13  ;;  %v16664_v54 = vpop.f32.mrb[37].mxu1 }
 0x552   :  { %v10150_v48 = vmax.f32 %v10131_v3, 0.0  ;;  %10340 = vrot.lane.b32.xlu0 %v20948_v63, %s17833_s29  ;;  %10338 = vrot.lane.b32.xlu1 %v20950_v20, %s17833_s29  ;;  %v10062_v46 = vpop.f32.mrb[38].mxu1  ;;  %v10264_v21 = vld [vmem:[#allocation3 + $0x28] sm:$0xff] }
 0x553   :  { %10256 = vst [vmem:[#allocation3 + $0x3c] sm:$0xff] %v16442_v55  ;;  %v10151_v19 = vmax.f32 %v10132_v10, 0.0  ;;  %v10133_v32 = vadd.f32 %v20802_v33, %v10108_v45  ;;  %v16665_v50 = vpop.f32.mrb[39].mxu1  ;;  %v20961_v35 = vcombine.high %v10264_v21, %v10264_v21  ;;  %v20963_v40 = vcombine.low %v10264_v21, %v10264_v21 }
 0x554   :  { %v20967_v41 = vsel %vm19550_vm4, %v10150_v48, 0.0  ;;  %vm22667_vm4 = vcmask 277504   ;;  %v21105_v48 = vld [vmem:[%s22408_s7 + $0x4] sm:$0xf] }
 0x555   :  { %v20971_v0 = vsel %vm19567_vm15, %v10151_v19, 0.0  ;;  %v10152_v62 = vmax.f32 %v10133_v32, 0.0  ;;  %vm10385_vm15 = vcmask 1043456   ;;  %vm22669_vm8 = vmmov %vm22667_vm4 }
 0x556   :  { %v16443_v42 = vpack.c.bf16 %v20971_v0, %v20967_v41  ;;  %10344 = vrot.lane.b32.xlu0 %v20961_v35, %s17833_s29  ;;  %10342 = vrot.lane.b32.xlu1 %v20963_v40, %s17833_s29  ;;  %vm22670_vm1 = vmmov %vm22667_vm4 }
 0x557   :  { %v10171_v33 = vsel %vm19678_vm7, %v10152_v62, 0.0  ;;  %v10265_v23 = vld [vmem:[#allocation3 + $0x30] sm:$0xff]  ;;  %vm22668_vm7 = vmmov %vm22667_vm4 }
 0x558   :  { %10257 = vst [vmem:[#allocation3 + $0x44] sm:$0xff] %v16443_v42  ;;  %v16444_v44 = vpack.c.bf16 %v10171_v33, %v10171_v33  ;;  %v20981_v28 = vcombine.high %v10265_v23, %v10265_v23  ;;  %v20983_v53 = vcombine.low %v10265_v23, %v10265_v23  ;;  %vm22671_vm12 = vmmov %vm22670_vm1 }
 0x559   :  { %vm22672_vm13 = vmmov %vm22670_vm1 }
 0x55a   :  { %10258 = vst [vmem:[#allocation3 + $0x4c] sm:$0xf] %v16444_v44  ;;  %10348 = vrot.lane.b32.xlu0 %v20981_v28, %s17833_s29  ;;  %10346 = vrot.lane.b32.xlu1 %v20983_v53, %s17833_s29  ;;  %v10266_v2 = vld [vmem:[#allocation3 + $0x38] sm:$0xff]  ;;  %vm22673_vm14 = vmmov %vm22670_vm1 }
 0x55b   :  { %v20989_v43 = vcombine.high %v10266_v2, %v10266_v2  ;;  %v20991_v14 = vcombine.low %v10266_v2, %v10266_v2  ;;  %vm22674_vm0 = vmmov %vm22670_vm1 }
 0x55c   :  { %vm22675_vm6 = vmmov %vm22674_vm0 }
 0x55d   :  { %vm22676_vm10 = vmmov %vm22674_vm0 }
 0x55e   :  { %10352 = vrot.lane.b32.xlu0 %v20989_v43, %s17833_s29  ;;  %10350 = vrot.lane.b32.xlu1 %v20991_v14, %s17833_s29  ;;  %vm22677_vm9 = vmmov %vm22674_vm0 }
 0x55f   :  { %v10267_v7 = vld [vmem:[#allocation3 + $0x40] sm:$0xff]  ;;  %vm22678_vm11 = vmmov %vm22674_vm0 }
 0x560   :  { %v20997_v27 = vcombine.high %v10267_v7, %v10267_v7  ;;  %v20999_v25 = vcombine.low %v10267_v7, %v10267_v7  ;;  %vm22679_vm3 = vmmov %vm22674_vm0 }
 0x561   :  { %v10268_v11 = vld [vmem:[#allocation3 + $0x48] sm:$0xff] }
 0x562   :  { %10356 = vrot.lane.b32.xlu0 %v20997_v27, %s17833_s29  ;;  %10354 = vrot.lane.b32.xlu1 %v20999_v25, %s17833_s29  ;;  %v21005_v38 = vcombine.high %v10268_v11, %v10268_v11  ;;  %v21007_v37 = vcombine.low %v10268_v11, %v10268_v11 }
 0x566   :  { %10360 = vrot.lane.b32.xlu0 %v21005_v38, %s17833_s29  ;;  %10358 = vrot.lane.b32.xlu1 %v21007_v37, %s17833_s29 }
 0x56a   :  { %10854 = vrot.lane.b32.xlu0 %v20860_v18, %s17834_s17  ;;  %10852 = vrot.lane.b32.xlu1 %v20862_v24, %s17834_s17 }
 0x56e   :  { %10858 = vrot.lane.b32.xlu0 %v20874_v56, %s17834_s17  ;;  %10856 = vrot.lane.b32.xlu1 %v20876_v1, %s17834_s17 }
 0x572   :  { %10862 = vrot.lane.b32.xlu0 %v20904_v47, %s17834_s17  ;;  %10860 = vrot.lane.b32.xlu1 %v20906_v22, %s17834_s17 }
 0x576   :  { %10866 = vrot.lane.b32.xlu0 %v20918_v49, %s17834_s17  ;;  %10864 = vrot.lane.b32.xlu1 %v20920_v9, %s17834_s17 }
 0x57a   :  { %10870 = vrot.lane.b32.xlu0 %v20948_v63, %s17834_s17  ;;  %10868 = vrot.lane.b32.xlu1 %v20950_v20, %s17834_s17 }
 0x57e   :  { %10874 = vrot.lane.b32.xlu0 %v20961_v35, %s17834_s17  ;;  %10872 = vrot.lane.b32.xlu1 %v20963_v40, %s17834_s17 }
 0x582   :  { %10878 = vrot.lane.b32.xlu0 %v20981_v28, %s17834_s17  ;;  %10876 = vrot.lane.b32.xlu1 %v20983_v53, %s17834_s17 }
 0x586   :  { %10882 = vrot.lane.b32.xlu0 %v20989_v43, %s17834_s17  ;;  %10880 = vrot.lane.b32.xlu1 %v20991_v14, %s17834_s17 }
 0x58a   :  { %10886 = vrot.lane.b32.xlu0 %v20997_v27, %s17834_s17  ;;  %10884 = vrot.lane.b32.xlu1 %v20999_v25, %s17834_s17 }
 0x58e   :  { %10890 = vrot.lane.b32.xlu0 %v21005_v38, %s17834_s17  ;;  %10888 = vrot.lane.b32.xlu1 %v21007_v37, %s17834_s17 }
 0x592   :  { %11384 = vrot.lane.b32.xlu0 %v20860_v18, %s17835_s18  ;;  %11382 = vrot.lane.b32.xlu1 %v20862_v24, %s17835_s18 }
 0x596   :  { %11388 = vrot.lane.b32.xlu0 %v20874_v56, %s17835_s18  ;;  %11386 = vrot.lane.b32.xlu1 %v20876_v1, %s17835_s18 }
 0x59a   :  { %11392 = vrot.lane.b32.xlu0 %v20904_v47, %s17835_s18  ;;  %11390 = vrot.lane.b32.xlu1 %v20906_v22, %s17835_s18 }
 0x59e   :  { %11396 = vrot.lane.b32.xlu0 %v20918_v49, %s17835_s18  ;;  %11394 = vrot.lane.b32.xlu1 %v20920_v9, %s17835_s18 }
 0x5a2   :  { %11400 = vrot.lane.b32.xlu0 %v20948_v63, %s17835_s18  ;;  %11398 = vrot.lane.b32.xlu1 %v20950_v20, %s17835_s18 }
 0x5a6   :  { %11404 = vrot.lane.b32.xlu0 %v20961_v35, %s17835_s18  ;;  %11402 = vrot.lane.b32.xlu1 %v20963_v40, %s17835_s18 }
 0x5aa   :  { %11408 = vrot.lane.b32.xlu0 %v20981_v28, %s17835_s18  ;;  %11406 = vrot.lane.b32.xlu1 %v20983_v53, %s17835_s18 }
 0x5ae   :  { %11412 = vrot.lane.b32.xlu0 %v20989_v43, %s17835_s18  ;;  %11410 = vrot.lane.b32.xlu1 %v20991_v14, %s17835_s18 }
 0x5b2   :  { %11416 = vrot.lane.b32.xlu0 %v20997_v27, %s17835_s18  ;;  %11414 = vrot.lane.b32.xlu1 %v20999_v25, %s17835_s18 }
 0x5b4   :  { %v10325_v26 = vpop.permute.xlu0 %10324  ;;  %v10323_v30 = vpop.permute.xlu1 %10322 }
 0x5b5   :  { %v10362_v36 = vsel %vm22667_vm4, %v10323_v30, %v10325_v26  ;;  %vm22680_vm4 = vmmov %vm22674_vm0 }
 0x5b6   :  { %11420 = vrot.lane.b32.xlu0 %v21005_v38, %s17835_s18  ;;  %11418 = vrot.lane.b32.xlu1 %v21007_v37, %s17835_s18  ;;  %v10387_v55 = vsel %vm10385_vm15, %v10362_v36, 0 }
 0x5b8   :  { %v10329_v3 = vpop.permute.xlu0 %10328  ;;  %v10327_v4 = vpop.permute.xlu1 %10326 }
 0x5b9   :  { %v10363_v13 = vsel %vm22668_vm7, %v10325_v26, %v10327_v4  ;;  %v10364_v10 = vsel %vm22669_vm8, %v10327_v4, %v10329_v3  ;;  %vm22681_vm7 = vmmov %vm22674_vm0 }
 0x5ba   :  { %11933 = vrot.lane.b32.xlu0 %v20860_v18, %s17836_s19  ;;  %11931 = vrot.lane.b32.xlu1 %v20862_v24, %s17836_s19  ;;  %v10393_v24 = vsel %vm10385_vm15, %v10364_v10, 0  ;;  %vm22682_vm8 = vmmov %vm22674_vm0 }
 0x5bb   :  { %16199 = vmatprep.subr.msk.bf16.mxu0 %vm10385_vm15, %v10363_v13 }
 0x5bc   :  { %10444 = vmatpush1.bf16.msra.mxu0 %v10387_v55  ;;  %v10333_v45 = vpop.permute.xlu0 %10332  ;;  %v10331_v54 = vpop.permute.xlu1 %10330 }
 0x5bd   :  { %v10365_v18 = vsel %vm22670_vm1, %v10329_v3, %v10331_v54  ;;  %v10366_v46 = vsel %vm22671_vm12, %v10331_v54, %v10333_v45  ;;  %vm22683_vm1 = vmmov %vm22674_vm0 }
 0x5be   :  { %11937 = vrot.lane.b32.xlu0 %v20874_v56, %s17836_s19  ;;  %11935 = vrot.lane.b32.xlu1 %v20876_v1, %s17836_s19  ;;  %v10399_v56 = vsel %vm10385_vm15, %v10366_v46, 0  ;;  %vm22684_vm12 = vmmov %vm22674_vm0 }
 0x5bf   :  { %16200 = vmatmul.mubr.msk.bf16.vlgmr.msra.gmra.mrb[40].mxu0 %vm10381_vm5, %v21105_v48  ;;  %16201 = vmatprep.subr.msk.bf16.mxu1 %vm10385_vm15, %v10365_v18 }
 0x5c0   :  { %10485 = vmatpush1.bf16.msra.mxu1 %v10393_v24  ;;  %v10337_v21 = vpop.permute.xlu0 %10336  ;;  %v10335_v19 = vpop.permute.xlu1 %10334  ;;  %10557 = vmatprep.mubr.bf16.mxu0 %v20788_v34 }
 0x5c1   :  { %v10367_v32 = vsel %vm22672_vm13, %v10333_v45, %v10335_v19  ;;  %v10368_v1 = vsel %vm22673_vm14, %v10335_v19, %v10337_v21  ;;  %vm22685_vm13 = vmmov %vm22674_vm0  ;;  %vm22686_vm14 = vcmask 285696   ;;  %v21211_v19 = vpack.c.bf16 %v20812_v12, %v20812_v12 }
 0x5c2   :  { %11941 = vrot.lane.b32.xlu0 %v20904_v47, %s17836_s19  ;;  %11939 = vrot.lane.b32.xlu1 %v20906_v22, %s17836_s19  ;;  %v10405_v47 = vsel %vm10385_vm15, %v10368_v1, 0  ;;  %v21230_v1 = vpack.c.bf16 %v20824_v58, %v20824_v58 }
 0x5c3   :  { %16202 = vmatmul.mubr.msk.bf16.vlgmr.msra.gmra.mrb[40].mxu1 %vm10381_vm5, %v21105_v48  ;;  %16203 = vmatprep.subr.msk.bf16.mxu0 %vm10385_vm15, %v10367_v32 }
 0x5c4   :  { %10526 = vmatpush1.bf16.msra.mxu0 %v10399_v56  ;;  %v10341_v50 = vpop.permute.xlu0 %10340  ;;  %v10339_v62 = vpop.permute.xlu1 %10338  ;;  %10598 = vmatprep.mubr.bf16.mxu1 %v20788_v34  ;;  %v21226_v56 = vpack.c.bf16 %v20829_v60, %v20829_v60 }
 0x5c5   :  { %v10369_v42 = vsel %vm22674_vm0, %v10337_v21, %v10339_v62  ;;  %v10370_v22 = vsel %vm22675_vm6, %v10339_v62, %v10341_v50  ;;  %v21207_v21 = vpack.c.bf16 %v20817_v59, %v20817_v59  ;;  %vm22687_vm0 = vmmov %vm22686_vm14 }
 0x5c6   :  { %11945 = vrot.lane.b32.xlu0 %v20918_v49, %s17836_s19  ;;  %11943 = vrot.lane.b32.xlu1 %v20920_v9, %s17836_s19  ;;  %v10411_v49 = vsel %vm10385_vm15, %v10370_v22, 0  ;;  %vm22688_vm6 = vmmov %vm22687_vm0  ;;  %v21254_v22 = vpack.c.bf16 %v20840_v5, %v20840_v5 }
 0x5c7   :  { %16204 = vmatmul.mubr.msk.bf16.vlgmr.msra.gmra.mrb[44].mxu0 %vm10381_vm5, %v21105_v48  ;;  %16205 = vmatprep.subr.msk.bf16.mxu1 %vm10385_vm15, %v10369_v42 }
 0x5c8   :  { %10567 = vmatpush1.bf16.msra.mxu1 %v10405_v47  ;;  %v10345_v33 = vpop.permute.xlu0 %10344  ;;  %v10343_v23 = vpop.permute.xlu1 %10342  ;;  %10639 = vmatprep.mubr.bf16.mxu0 %v20788_v34  ;;  %v21250_v47 = vpack.c.bf16 %v20845_v16, %v20845_v16 }
 0x5c9   :  { %v10371_v44 = vsel %vm22676_vm10, %v10341_v50, %v10343_v23  ;;  %v10372_v9 = vsel %vm22677_vm9, %v10343_v23, %v10345_v33  ;;  %v21235_v50 = vld [vmem:[%s22408_s7] sm:$0xf]  ;;  %vm22689_vm10 = vmmov %vm22687_vm0 }
 0x5ca   :  { %11949 = vrot.lane.b32.xlu0 %v20948_v63, %s17836_s19  ;;  %11947 = vrot.lane.b32.xlu1 %v20950_v20, %s17836_s19  ;;  %v10417_v63 = vsel %vm10385_vm15, %v10372_v9, 0  ;;  %vm22690_vm9 = vmmov %vm22687_vm0  ;;  %v21273_v9 = vpack.c.bf16 %v20852_v51, %v20852_v51 }
 0x5cb   :  { %16206 = vmatmul.mubr.msk.bf16.vlgmr.msra.gmra.mrb[44].mxu1 %vm10381_vm5, %v21105_v48  ;;  %16207 = vmatprep.subr.msk.bf16.mxu0 %vm10385_vm15, %v10371_v44 }
 0x5cc   :  { %10608 = vmatpush1.bf16.msra.mxu0 %v10411_v49  ;;  %v10349_v2 = vpop.permute.xlu0 %10348  ;;  %v10347_v7 = vpop.permute.xlu1 %10346  ;;  %10680 = vmatprep.mubr.bf16.mxu1 %v20788_v34  ;;  %v21269_v49 = vpack.c.bf16 %v20857_v52, %v20857_v52 }
 0x5cd   :  { %v10373_v11 = vsel %vm22678_vm11, %v10345_v33, %v10347_v7  ;;  %v10374_v20 = vsel %vm22679_vm3, %v10347_v7, %v10349_v2  ;;  %vm22691_vm11 = vmmov %vm22687_vm0 }
 0x5ce   :  { %11953 = vrot.lane.b32.xlu0 %v20961_v35, %s17836_s19  ;;  %11951 = vrot.lane.b32.xlu1 %v20963_v40, %s17836_s19  ;;  %v10423_v35 = vsel %vm10385_vm15, %v10374_v20, 0  ;;  %vm22692_vm3 = vmmov %vm22687_vm0  ;;  %v21292_v20 = vpack.c.bf16 %v20880_v8, %v20880_v8 }
 0x5cf   :  { %16208 = vmatmul.mubr.msk.bf16.vlgmr.msra.gmra.mrb[48].mxu0 %vm10381_vm5, %v21105_v48  ;;  %16209 = vmatprep.subr.msk.bf16.mxu1 %vm10385_vm15, %v10373_v11 }
 0x5d0   :  { %10649 = vmatpush1.bf16.msra.mxu1 %v10417_v63  ;;  %v10353_v26 = vpop.permute.xlu0 %10352  ;;  %v10351_v30 = vpop.permute.xlu1 %10350  ;;  %10721 = vmatprep.mubr.bf16.mxu0 %v20788_v34  ;;  %v21288_v63 = vpack.c.bf16 %v20885_v29, %v20885_v29 }
 0x5d1   :  { %v10375_v36 = vsel %vm22680_vm4, %v10349_v2, %v10351_v30  ;;  %v10376_v40 = vsel %vm22681_vm7, %v10351_v30, %v10353_v26  ;;  %vm22693_vm4 = vmmov %vm22687_vm0 }
 0x5d2   :  { %11957 = vrot.lane.b32.xlu0 %v20981_v28, %s17836_s19  ;;  %11955 = vrot.lane.b32.xlu1 %v20983_v53, %s17836_s19  ;;  %v10429_v28 = vsel %vm10385_vm15, %v10376_v40, 0  ;;  %vm22694_vm7 = vmmov %vm22687_vm0  ;;  %v21311_v40 = vpack.c.bf16 %v20896_v15, %v20896_v15 }
 0x5d3   :  { %16210 = vmatmul.mubr.msk.bf16.vlgmr.msra.gmra.mrb[48].mxu1 %vm10381_vm5, %v21105_v48  ;;  %16211 = vmatprep.subr.msk.bf16.mxu0 %vm10385_vm15, %v10375_v36 }
 0x5d4   :  { %10690 = vmatpush1.bf16.msra.mxu0 %v10423_v35  ;;  %v10357_v3 = vpop.permute.xlu0 %10356  ;;  %v10355_v4 = vpop.permute.xlu1 %10354  ;;  %10762 = vmatprep.mubr.bf16.mxu1 %v20788_v34  ;;  %v21307_v35 = vpack.c.bf16 %v20901_v17, %v20901_v17 }
 0x5d5   :  { %v10377_v13 = vsel %vm22682_vm8, %v10353_v26, %v10355_v4  ;;  %v10378_v53 = vsel %vm22683_vm1, %v10355_v4, %v10357_v3  ;;  %vm22695_vm8 = vmmov %vm22687_vm0 }
 0x5d6   :  { %11961 = vrot.lane.b32.xlu0 %v20989_v43, %s17836_s19  ;;  %11959 = vrot.lane.b32.xlu1 %v20991_v14, %s17836_s19  ;;  %v10435_v54 = vsel %vm10385_vm15, %v10378_v53, 0  ;;  %vm22696_vm1 = vmmov %vm22687_vm0  ;;  %v21330_v53 = vpack.c.bf16 %v20924_v61, %v20924_v61 }
 0x5d7   :  { %16212 = vmatmul.mubr.msk.bf16.vlgmr.msra.gmra.mrb[52].mxu0 %vm10381_vm5, %v21105_v48  ;;  %16213 = vmatprep.subr.msk.bf16.mxu1 %vm10385_vm15, %v10377_v13 }
 0x5d8   :  { %10731 = vmatpush1.bf16.msra.mxu1 %v10429_v28  ;;  %v10361_v55 = vpop.permute.xlu0 %10360  ;;  %v10359_v10 = vpop.permute.xlu1 %10358  ;;  %10803 = vmatprep.mubr.bf16.mxu0 %v20788_v34  ;;  %v21326_v28 = vpack.c.bf16 %v20929_v39, %v20929_v39 }
 0x5d9   :  { %v10380_v45 = vsel %vm22684_vm12, %v10359_v10, %v10361_v55  ;;  %v10379_v43 = vsel %vm22685_vm13, %v10357_v3, %v10359_v10  ;;  %16666 = vmatprep.subr.bf16.mxu1 %v22510_v31  ;;  %vm22697_vm12 = vmmov %vm22687_vm0 }
 0x5da   :  { %11965 = vrot.lane.b32.xlu0 %v20997_v27, %s17836_s19  ;;  %11963 = vrot.lane.b32.xlu1 %v20999_v25, %s17836_s19  ;;  %v10441_v14 = vsel %vm10385_vm15, %v10380_v45, 0  ;;  %vm22698_vm13 = vmmov %vm22687_vm0 }
 0x5db   :  { %16214 = vmatmul.mubr.msk.bf16.vlgmr.msra.gmra.mrb[52].mxu1 %vm10381_vm5, %v21105_v48  ;;  %16215 = vmatprep.subr.msk.bf16.mxu0 %vm10385_vm15, %v10379_v43  ;;  %v21345_v43 = vpack.c.bf16 %v20945_v57, %v20945_v57 }
 0x5dc   :  { %10772 = vmatpush1.bf16.msra.mxu0 %v10435_v54  ;;  %16667 = vmatpush3.bf16.msra.mxu1 %v10441_v14  ;;  %v10855_v18 = vpop.permute.xlu0 %10854  ;;  %v10853_v24 = vpop.permute.xlu1 %10852  ;;  %v21349_v14 = vpack.c.bf16 %v20940_v6, %v20940_v6 }
 0x5dd   :  { %16668 = vmatprep.mubr.msk.bf16.mxu1 %vm22593_vm2, %v22510_v31  ;;  %v10892_v27 = vsel %vm22686_vm14, %v10853_v24, %v10855_v18  ;;  %vm22699_vm14 = vmmov %vm22687_vm0 }
 0x5de   :  { %11969 = vrot.lane.b32.xlu0 %v21005_v38, %s17836_s19  ;;  %11967 = vrot.lane.b32.xlu1 %v21007_v37, %s17836_s19  ;;  %v10915_v37 = vsel %vm10385_vm15, %v10892_v27, 0  ;;  %v21364_v27 = vpack.c.bf16 %v20971_v0, %v20971_v0 }
 0x5df   :  { %16216 = vmatmul.mubr.msk.bf16.vlgmr.msra.gmra.mrb[56].mxu0 %vm10381_vm5, %v21105_v48 }
 0x5e0   :  { %v10859_v25 = vpop.permute.xlu0 %10858  ;;  %v10857_v46 = vpop.permute.xlu1 %10856  ;;  %11003 = vmatprep.mubr.bf16.mxu0 %v20788_v34 }
 0x5e1   :  { %v10893_v38 = vsel %vm22687_vm0, %v10855_v18, %v10857_v46  ;;  %v10894_v12 = vsel %vm22688_vm6, %v10857_v46, %v10859_v25  ;;  %vm22700_vm6 = vmmov %vm22687_vm0 }
 0x5e2   :  { %13090 = vrot.lane.b32.xlu0 %v21207_v21, %s17839_s26  ;;  %13088 = vrot.lane.b32.xlu1 %v21211_v19, %s17839_s26  ;;  %v10921_v58 = vsel %vm10385_vm15, %v10894_v12, 0 }
 0x5e3   :  { %16669 = vmatmul.mubr.msk.bf16.vlgmr.msra.gmra.mrb[56].mxu1 %vm10381_vm5, %v21105_v48  ;;  %16218 = vmatprep.subr.msk.bf16.mxu0 %vm10385_vm15, %v10893_v38 }
 0x5e4   :  { %10972 = vmatpush1.bf16.msra.mxu0 %v10915_v37  ;;  %v10863_v59 = vpop.permute.xlu0 %10862  ;;  %v10861_v32 = vpop.permute.xlu1 %10860  ;;  %11044 = vmatprep.mubr.bf16.mxu1 %v20788_v34  ;;  %v13035_v37 = vld [vmem:[#allocation3 + $0x4c] sm:$0xff] }
 0x5e5   :  { %v10895_v48 = vsel %vm22689_vm10, %v10859_v25, %v10861_v32  ;;  %v10896_v60 = vsel %vm22690_vm9, %v10861_v32, %v10863_v59  ;;  %vm22701_vm10 = vmmov %vm22687_vm0  ;;  %v21368_v25 = vpack.c.bf16 %v20967_v41, %v20967_v41  ;;  %v21383_v32 = vcombine.high %v13035_v37, %v13035_v37 }
 0x5e6   :  { %13094 = vrot.lane.b32.xlu0 %v21226_v56, %s17839_s26  ;;  %13092 = vrot.lane.b32.xlu1 %v21230_v1, %s17839_s26  ;;  %v10927_v16 = vsel %vm10385_vm15, %v10896_v60, 0  ;;  %vm22702_vm9 = vmmov %vm22687_vm0 }
 0x5e7   :  { %16219 = vmatmul.mubr.msk.bf16.vlgmr.msra.gmra.mrb[40].mxu0 %vm10381_vm5, %v21235_v50  ;;  %16220 = vmatprep.subr.msk.bf16.mxu1 %vm10385_vm15, %v10895_v48  ;;  %v21385_v48 = vcombine.low %v13035_v37, %v13035_v37 }
 0x5e8   :  { %11013 = vmatpush1.bf16.msra.mxu1 %v10921_v58  ;;  %v10867_v62 = vpop.permute.xlu0 %10866  ;;  %v10865_v42 = vpop.permute.xlu1 %10864  ;;  %11085 = vmatprep.mubr.bf16.mxu0 %v20788_v34 }
 0x5e9   :  { %v10897_v33 = vsel %vm22691_vm11, %v10863_v59, %v10865_v42  ;;  %v10898_v5 = vsel %vm22692_vm3, %v10865_v42, %v10867_v62  ;;  %vm22703_vm11 = vmmov %vm22687_vm0  ;;  %vm22704_vm3 = vcmask 269312  }
 0x5ea   :  { %13098 = vrot.lane.b32.xlu0 %v21250_v47, %s17839_s26  ;;  %13096 = vrot.lane.b32.xlu1 %v21254_v22, %s17839_s26  ;;  %v10933_v52 = vsel %vm10385_vm15, %v10898_v5, 0 }
 0x5eb   :  { %16221 = vmatmul.mubr.msk.bf16.vlgmr.msra.gmra.mrb[40].mxu1 %vm10381_vm5, %v21235_v50  ;;  %16222 = vmatprep.subr.msk.bf16.mxu0 %vm10385_vm15, %v10897_v33 }
 0x5ec   :  { %11054 = vmatpush1.bf16.msra.mxu0 %v10927_v16  ;;  %v10871_v23 = vpop.permute.xlu0 %10870  ;;  %v10869_v44 = vpop.permute.xlu1 %10868  ;;  %11126 = vmatprep.mubr.bf16.mxu1 %v20788_v34 }
 0x5ed   :  { %v10899_v2 = vsel %vm22693_vm4, %v10867_v62, %v10869_v44  ;;  %v10900_v51 = vsel %vm22694_vm7, %v10869_v44, %v10871_v23  ;;  %vm22705_vm4 = vmmov %vm22704_vm3  ;;  %v21410_v44 = vld [vmem:[%s22408_s7 + $0x8] sm:$0xf] }
 0x5ee   :  { %13102 = vrot.lane.b32.xlu0 %v21269_v49, %s17839_s26  ;;  %13100 = vrot.lane.b32.xlu1 %v21273_v9, %s17839_s26  ;;  %v10939_v29 = vsel %vm10385_vm15, %v10900_v51, 0  ;;  %vm22706_vm7 = vmmov %vm22704_vm3 }
 0x5ef   :  { %16223 = vmatmul.mubr.msk.bf16.vlgmr.msra.gmra.mrb[44].mxu0 %vm10381_vm5, %v21235_v50  ;;  %16224 = vmatprep.subr.msk.bf16.mxu1 %vm10385_vm15, %v10899_v2 }
 0x5f0   :  { %11095 = vmatpush1.bf16.msra.mxu1 %v10933_v52  ;;  %v10875_v7 = vpop.permute.xlu0 %10874  ;;  %v10873_v11 = vpop.permute.xlu1 %10872  ;;  %11167 = vmatprep.mubr.bf16.mxu0 %v20788_v34 }
 0x5f1   :  { %v10901_v26 = vsel %vm22695_vm8, %v10871_v23, %v10873_v11  ;;  %v10902_v8 = vsel %vm22696_vm1, %v10873_v11, %v10875_v7  ;;  %vm22707_vm8 = vmmov %vm22704_vm3 }
 0x5f2   :  { %13106 = vrot.lane.b32.xlu0 %v21288_v63, %s17839_s26  ;;  %13104 = vrot.lane.b32.xlu1 %v21292_v20, %s17839_s26  ;;  %v10945_v17 = vsel %vm10385_vm15, %v10902_v8, 0  ;;  %vm22708_vm1 = vmmov %vm22704_vm3 }
 0x5f3   :  { %16225 = vmatmul.mubr.msk.bf16.vlgmr.msra.gmra.mrb[44].mxu1 %vm10381_vm5, %v21235_v50  ;;  %16226 = vmatprep.subr.msk.bf16.mxu0 %vm10385_vm15, %v10901_v26 }
 0x5f4   :  { %11136 = vmatpush1.bf16.msra.mxu0 %v10939_v29  ;;  %v10879_v30 = vpop.permute.xlu0 %10878  ;;  %v10877_v36 = vpop.permute.xlu1 %10876  ;;  %11208 = vmatprep.mubr.bf16.mxu1 %v20788_v34 }
 0x5f5   :  { %v10903_v3 = vsel %vm22697_vm12, %v10875_v7, %v10877_v36  ;;  %v10904_v15 = vsel %vm22698_vm13, %v10877_v36, %v10879_v30  ;;  %vm22709_vm12 = vmmov %vm22708_vm1 }
 0x5f6   :  { %13110 = vrot.lane.b32.xlu0 %v21307_v35, %s17839_s26  ;;  %13108 = vrot.lane.b32.xlu1 %v21311_v40, %s17839_s26  ;;  %v10951_v39 = vsel %vm10385_vm15, %v10904_v15, 0  ;;  %vm22710_vm13 = vmmov %vm22708_vm1 }
 0x5f7   :  { %16227 = vmatmul.mubr.msk.bf16.vlgmr.msra.gmra.mrb[48].mxu0 %vm10381_vm5, %v21235_v50  ;;  %16228 = vmatprep.subr.msk.bf16.mxu1 %vm10385_vm15, %v10903_v3 }
 0x5f8   :  { %11177 = vmatpush1.bf16.msra.mxu1 %v10945_v17  ;;  %v10883_v4 = vpop.permute.xlu0 %10882  ;;  %v10881_v13 = vpop.permute.xlu1 %10880  ;;  %11249 = vmatprep.mubr.bf16.mxu0 %v20788_v34 }
 0x5f9   :  { %v10905_v55 = vsel %vm22699_vm14, %v10879_v30, %v10881_v13  ;;  %v10906_v61 = vsel %vm22687_vm0, %v10881_v13, %v10883_v4  ;;  %vm22711_vm14 = vmmov %vm22708_vm1 }
 0x5fa   :  { %13114 = vrot.lane.b32.xlu0 %v21326_v28, %s17839_s26  ;;  %13112 = vrot.lane.b32.xlu1 %v21330_v53, %s17839_s26  ;;  %v10957_v57 = vsel %vm10385_vm15, %v10906_v61, 0  ;;  %vm22712_vm0 = vmmov %vm22708_vm1 }
 0x5fb   :  { %16229 = vmatmul.mubr.msk.bf16.vlgmr.msra.gmra.mrb[48].mxu1 %vm10381_vm5, %v21235_v50  ;;  %16230 = vmatprep.subr.msk.bf16.mxu0 %vm10385_vm15, %v10905_v55 }
 0x5fc   :  { %11218 = vmatpush1.bf16.msra.mxu0 %v10951_v39  ;;  %v10887_v10 = vpop.permute.xlu0 %10886  ;;  %v10885_v45 = vpop.permute.xlu1 %10884  ;;  %11290 = vmatprep.mubr.bf16.mxu1 %v20788_v34 }
 0x5fd   :  { %v10907_v54 = vsel %vm22700_vm6, %v10883_v4, %v10885_v45  ;;  %v10908_v6 = vsel %vm22701_vm10, %v10885_v45, %v10887_v10  ;;  %vm22713_vm6 = vmmov %vm22712_vm0 }
 0x5fe   :  { %13118 = vrot.lane.b32.xlu0 %v21345_v43, %s17839_s26  ;;  %13116 = vrot.lane.b32.xlu1 %v21349_v14, %s17839_s26  ;;  %v10963_v41 = vsel %vm10385_vm15, %v10908_v6, 0  ;;  %vm22714_vm10 = vmmov %vm22712_vm0 }
 0x5ff   :  { %16231 = vmatmul.mubr.msk.bf16.vlgmr.msra.gmra.mrb[52].mxu0 %vm10381_vm5, %v21235_v50  ;;  %16232 = vmatprep.subr.msk.bf16.mxu1 %vm10385_vm15, %v10907_v54 }
 0x600   :  { %11259 = vmatpush1.bf16.msra.mxu1 %v10957_v57  ;;  %v10891_v18 = vpop.permute.xlu0 %10890  ;;  %v10889_v24 = vpop.permute.xlu1 %10888  ;;  %11331 = vmatprep.mubr.bf16.mxu0 %v20788_v34 }
 0x601   :  { %v10910_v46 = vsel %vm22702_vm9, %v10889_v24, %v10891_v18  ;;  %v10909_v38 = vsel %vm22703_vm11, %v10887_v10, %v10889_v24  ;;  %16672 = vmatprep.subr.bf16.mxu1 %v22510_v31  ;;  %vm22715_vm9 = vmmov %vm22712_vm0 }
 0x602   :  { %13122 = vrot.lane.b32.xlu0 %v21364_v27, %s17839_s26  ;;  %13120 = vrot.lane.b32.xlu1 %v21368_v25, %s17839_s26  ;;  %v10969_v0 = vsel %vm10385_vm15, %v10910_v46, 0  ;;  %vm22716_vm11 = vmmov %vm22712_vm0 }
 0x603   :  { %16233 = vmatmul.mubr.msk.bf16.vlgmr.msra.gmra.mrb[52].mxu1 %vm10381_vm5, %v21235_v50  ;;  %16234 = vmatprep.subr.msk.bf16.mxu0 %vm10385_vm15, %v10909_v38 }
 0x604   :  { %11300 = vmatpush1.bf16.msra.mxu0 %v10963_v41  ;;  %16673 = vmatpush3.bf16.msra.mxu1 %v10969_v0  ;;  %v11385_v12 = vpop.permute.xlu0 %11384  ;;  %v11383_v59 = vpop.permute.xlu1 %11382 }
 0x605   :  { %16674 = vmatprep.mubr.msk.bf16.mxu1 %vm22593_vm2, %v22510_v31  ;;  %v11422_v58 = vsel %vm22704_vm3, %v11383_v59, %v11385_v12  ;;  %vm22717_vm3 = vmmov %vm22712_vm0 }
 0x606   :  { %13126 = vrot.lane.b32.xlu0 %v21383_v32, %s17839_s26  ;;  %13124 = vrot.lane.b32.xlu1 %v21385_v48, %s17839_s26  ;;  %v11445_v33 = vsel %vm10385_vm15, %v11422_v58, 0 }
 0x607   :  { %16235 = vmatmul.mubr.msk.bf16.vlgmr.msra.gmra.mrb[56].mxu0 %vm10381_vm5, %v21235_v50 }
 0x608   :  { %v11389_v60 = vpop.permute.xlu0 %11388  ;;  %v11387_v62 = vpop.permute.xlu1 %11386  ;;  %11533 = vmatprep.mubr.bf16.mxu0 %v20788_v34 }
 0x609   :  { %v11423_v42 = vsel %vm22705_vm4, %v11385_v12, %v11387_v62  ;;  %v11424_v16 = vsel %vm22706_vm7, %v11387_v62, %v11389_v60  ;;  %vm22718_vm4 = vmmov %vm22712_vm0 }
 0x60a   :  { %13639 = vrot.lane.b32.xlu0 %v21207_v21, %s17840_s30  ;;  %13637 = vrot.lane.b32.xlu1 %v21211_v19, %s17840_s30  ;;  %vm22719_vm7 = vmmov %vm22712_vm0 }
 0x60b   :  { %16675 = vmatmul.mubr.msk.bf16.vlgmr.msra.gmra.mrb[56].mxu1 %vm10381_vm5, %v21235_v50  ;;  %16238 = vmatprep.subr.msk.bf16.mxu0 %vm10385_vm15, %v11423_v42  ;;  %v11451_v50 = vsel %vm10385_vm15, %v11424_v16, 0 }
 0x60c   :  { %11502 = vmatpush1.bf16.msra.mxu0 %v11445_v33  ;;  %v11393_v5 = vpop.permute.xlu0 %11392  ;;  %v11391_v23 = vpop.permute.xlu1 %11390  ;;  %11574 = vmatprep.mubr.bf16.mxu1 %v20788_v34 }
 0x60d   :  { %v11425_v2 = vsel %vm22707_vm8, %v11389_v60, %v11391_v23  ;;  %v11426_v52 = vsel %vm22708_vm1, %v11391_v23, %v11393_v5  ;;  %vm22720_vm8 = vmmov %vm22712_vm0 }
 0x60e   :  { %13643 = vrot.lane.b32.xlu0 %v21226_v56, %s17840_s30  ;;  %13641 = vrot.lane.b32.xlu1 %v21230_v1, %s17840_s30  ;;  %v11457_v26 = vsel %vm10385_vm15, %v11426_v52, 0  ;;  %vm22721_vm1 = vmmov %vm22712_vm0 }
 0x60f   :  { %16239 = vmatmul.mubr.msk.bf16.vlgmr.msra.gmra.mrb[40].mxu0 %vm10381_vm5, %v21410_v44  ;;  %16240 = vmatprep.subr.msk.bf16.mxu1 %vm10385_vm15, %v11425_v2 }
 0x610   :  { %11543 = vmatpush1.bf16.msra.mxu1 %v11451_v50  ;;  %v11397_v51 = vpop.permute.xlu0 %11396  ;;  %v11395_v7 = vpop.permute.xlu1 %11394  ;;  %11615 = vmatprep.mubr.bf16.mxu0 %v20788_v34 }
 0x611   :  { %v11427_v11 = vsel %vm22709_vm12, %v11393_v5, %v11395_v7  ;;  %v11428_v29 = vsel %vm22710_vm13, %v11395_v7, %v11397_v51  ;;  %vm22722_vm12 = vmmov %vm22712_vm0  ;;  %vm22723_vm13 = vcmask 7168  }
 0x612   :  { %13647 = vrot.lane.b32.xlu0 %v21250_v47, %s17840_s30  ;;  %13645 = vrot.lane.b32.xlu1 %v21254_v22, %s17840_s30  ;;  %v11463_v3 = vsel %vm10385_vm15, %v11428_v29, 0 }
 0x613   :  { %16241 = vmatmul.mubr.msk.bf16.vlgmr.msra.gmra.mrb[40].mxu1 %vm10381_vm5, %v21410_v44  ;;  %16242 = vmatprep.subr.msk.bf16.mxu0 %vm10385_vm15, %v11427_v11 }
 0x614   :  { %11584 = vmatpush1.bf16.msra.mxu0 %v11457_v26  ;;  %v11401_v8 = vpop.permute.xlu0 %11400  ;;  %v11399_v30 = vpop.permute.xlu1 %11398  ;;  %11656 = vmatprep.mubr.bf16.mxu1 %v20788_v34 }
 0x615   :  { %v11429_v36 = vsel %vm22711_vm14, %v11397_v51, %v11399_v30  ;;  %v11430_v17 = vsel %vm22712_vm0, %v11399_v30, %v11401_v8  ;;  %vm22724_vm14 = vmmov %vm22723_vm13 }
 0x616   :  { %13651 = vrot.lane.b32.xlu0 %v21269_v49, %s17840_s30  ;;  %13649 = vrot.lane.b32.xlu1 %v21273_v9, %s17840_s30  ;;  %v11469_v55 = vsel %vm10385_vm15, %v11430_v17, 0  ;;  %vm22725_vm0 = vmmov %vm22723_vm13 }
 0x617   :  { %16243 = vmatmul.mubr.msk.bf16.vlgmr.msra.gmra.mrb[44].mxu0 %vm10381_vm5, %v21410_v44  ;;  %16244 = vmatprep.subr.msk.bf16.mxu1 %vm10385_vm15, %v11429_v36 }
 0x618   :  { %11625 = vmatpush1.bf16.msra.mxu1 %v11463_v3  ;;  %v11405_v15 = vpop.permute.xlu0 %11404  ;;  %v11403_v4 = vpop.permute.xlu1 %11402  ;;  %11697 = vmatprep.mubr.bf16.mxu0 %v20788_v34 }
 0x619   :  { %v11431_v13 = vsel %vm22713_vm6, %v11401_v8, %v11403_v4  ;;  %v11432_v39 = vsel %vm22714_vm10, %v11403_v4, %v11405_v15  ;;  %v21525_v8 = vld [vmem:[%s22408_s7 + $0xc] sm:$0xf]  ;;  %vm22726_vm6 = vmmov %vm22725_vm0 }
 0x61a   :  { %13655 = vrot.lane.b32.xlu0 %v21288_v63, %s17840_s30  ;;  %13653 = vrot.lane.b32.xlu1 %v21292_v20, %s17840_s30  ;;  %v11475_v54 = vsel %vm10385_vm15, %v11432_v39, 0  ;;  %vm22727_vm10 = vmmov %vm22725_vm0 }
 0x61b   :  { %16245 = vmatmul.mubr.msk.bf16.vlgmr.msra.gmra.mrb[44].mxu1 %vm10381_vm5, %v21410_v44  ;;  %16246 = vmatprep.subr.msk.bf16.mxu0 %vm10385_vm15, %v11431_v13 }
 0x61c   :  { %11666 = vmatpush1.bf16.msra.mxu0 %v11469_v55  ;;  %v11409_v61 = vpop.permute.xlu0 %11408  ;;  %v11407_v10 = vpop.permute.xlu1 %11406  ;;  %11738 = vmatprep.mubr.bf16.mxu1 %v20788_v34 }
 0x61d   :  { %v11433_v45 = vsel %vm22715_vm9, %v11405_v15, %v11407_v10  ;;  %v11434_v57 = vsel %vm22716_vm11, %v11407_v10, %v11409_v61  ;;  %vm22728_vm9 = vmmov %vm22725_vm0 }
 0x61e   :  { %13659 = vrot.lane.b32.xlu0 %v21307_v35, %s17840_s30  ;;  %13657 = vrot.lane.b32.xlu1 %v21311_v40, %s17840_s30  ;;  %v11481_v46 = vsel %vm10385_vm15, %v11434_v57, 0  ;;  %vm22729_vm11 = vmmov %vm22725_vm0 }
 0x61f   :  { %16247 = vmatmul.mubr.msk.bf16.vlgmr.msra.gmra.mrb[48].mxu0 %vm10381_vm5, %v21410_v44  ;;  %16248 = vmatprep.subr.msk.bf16.mxu1 %vm10385_vm15, %v11433_v45 }
 0x620   :  { %11707 = vmatpush1.bf16.msra.mxu1 %v11475_v54  ;;  %v11413_v6 = vpop.permute.xlu0 %11412  ;;  %v11411_v18 = vpop.permute.xlu1 %11410  ;;  %11779 = vmatprep.mubr.bf16.mxu0 %v20788_v34 }
 0x621   :  { %v11435_v24 = vsel %vm22717_vm3, %v11409_v61, %v11411_v18  ;;  %v11436_v38 = vsel %vm22718_vm4, %v11411_v18, %v11413_v6  ;;  %vm22730_vm3 = vmmov %vm22725_vm0 }
 0x622   :  { %13663 = vrot.lane.b32.xlu0 %v21326_v28, %s17840_s30  ;;  %13661 = vrot.lane.b32.xlu1 %v21330_v53, %s17840_s30  ;;  %v11487_v12 = vsel %vm10385_vm15, %v11436_v38, 0  ;;  %vm22731_vm4 = vmmov %vm22725_vm0 }
 0x623   :  { %16249 = vmatmul.mubr.msk.bf16.vlgmr.msra.gmra.mrb[48].mxu1 %vm10381_vm5, %v21410_v44  ;;  %16250 = vmatprep.subr.msk.bf16.mxu0 %vm10385_vm15, %v11435_v24 }
 0x624   :  { %11748 = vmatpush1.bf16.msra.mxu0 %v11481_v46  ;;  %v11417_v37 = vpop.permute.xlu0 %11416  ;;  %v11415_v0 = vpop.permute.xlu1 %11414  ;;  %11820 = vmatprep.mubr.bf16.mxu1 %v20788_v34 }
 0x625   :  { %v11437_v41 = vsel %vm22719_vm7, %v11413_v6, %v11415_v0  ;;  %v11438_v59 = vsel %vm22720_vm8, %v11415_v0, %v11417_v37  ;;  %vm22732_vm7 = vmmov %vm22725_vm0 }
 0x626   :  { %13667 = vrot.lane.b32.xlu0 %v21345_v43, %s17840_s30  ;;  %13665 = vrot.lane.b32.xlu1 %v21349_v14, %s17840_s30  ;;  %v11493_v16 = vsel %vm10385_vm15, %v11438_v59, 0  ;;  %vm22733_vm8 = vmmov %vm22725_vm0 }
 0x627   :  { %16251 = vmatmul.mubr.msk.bf16.vlgmr.msra.gmra.mrb[52].mxu0 %vm10381_vm5, %v21410_v44  ;;  %16252 = vmatprep.subr.msk.bf16.mxu1 %vm10385_vm15, %v11437_v41 }
 0x628   :  { %11789 = vmatpush1.bf16.msra.mxu1 %v11487_v12  ;;  %v11421_v58 = vpop.permute.xlu0 %11420  ;;  %v11419_v60 = vpop.permute.xlu1 %11418  ;;  %11861 = vmatprep.mubr.bf16.mxu0 %v20788_v34 }
 0x629   :  { %v11440_v62 = vsel %vm22721_vm1, %v11419_v60, %v11421_v58  ;;  %v11439_v42 = vsel %vm22722_vm12, %v11417_v37, %v11419_v60  ;;  %16678 = vmatprep.subr.bf16.mxu1 %v22510_v31  ;;  %vm22734_vm1 = vmmov %vm22725_vm0 }
 0x62a   :  { %13671 = vrot.lane.b32.xlu0 %v21364_v27, %s17840_s30  ;;  %13669 = vrot.lane.b32.xlu1 %v21368_v25, %s17840_s30  ;;  %v11499_v33 = vsel %vm10385_vm15, %v11440_v62, 0  ;;  %vm22735_vm12 = vmmov %vm22725_vm0 }
 0x62b   :  { %16253 = vmatmul.mubr.msk.bf16.vlgmr.msra.gmra.mrb[52].mxu1 %vm10381_vm5, %v21410_v44  ;;  %16254 = vmatprep.subr.msk.bf16.mxu0 %vm10385_vm15, %v11439_v42 }
 0x62c   :  { %11830 = vmatpush1.bf16.msra.mxu0 %v11493_v16  ;;  %16679 = vmatpush3.bf16.msra.mxu1 %v11499_v33  ;;  %v11934_v5 = vpop.permute.xlu0 %11933  ;;  %v11932_v23 = vpop.permute.xlu1 %11931 }
 0x62d   :  { %16680 = vmatprep.mubr.msk.bf16.mxu1 %vm22593_vm2, %v22510_v31  ;;  %v11971_v2 = vsel %vm22723_vm13, %v11932_v23, %v11934_v5  ;;  %vm22736_vm13 = vmmov %vm22725_vm0 }
 0x62e   :  { %13675 = vrot.lane.b32.xlu0 %v21383_v32, %s17840_s30  ;;  %13673 = vrot.lane.b32.xlu1 %v21385_v48, %s17840_s30  ;;  %v11994_v7 = vsel %vm10385_vm15, %v11971_v2, 0 }
 0x62f   :  { %16255 = vmatmul.mubr.msk.bf16.vlgmr.msra.gmra.mrb[56].mxu0 %vm10381_vm5, %v21410_v44 }
 0x630   :  { %v11938_v50 = vpop.permute.xlu0 %11937  ;;  %v11936_v52 = vpop.permute.xlu1 %11935  ;;  %12082 = vmatprep.mubr.bf16.mxu0 %v20788_v34 }
 0x631   :  { %v11972_v51 = vsel %vm22724_vm14, %v11934_v5, %v11936_v52  ;;  %v11973_v11 = vsel %vm22725_vm0, %v11936_v52, %v11938_v50  ;;  %vm22737_vm14 = vmmov %vm22725_vm0  ;;  %v12478_v52 = vld [vmem:[#allocation3 + $0x4] sm:$0xff] }
 0x632   :  { %14188 = vrot.lane.b32.xlu0 %v21207_v21, %s17841_s16  ;;  %14186 = vrot.lane.b32.xlu1 %v21211_v19, %s17841_s16 }
 0x633   :  { %16681 = vmatmul.mubr.msk.bf16.vlgmr.msra.gmra.mrb[56].mxu1 %vm10381_vm5, %v21410_v44  ;;  %16258 = vmatprep.subr.msk.bf16.mxu0 %vm10385_vm15, %v11972_v51  ;;  %v12000_v44 = vsel %vm10385_vm15, %v11973_v11, 0  ;;  %v12479_v51 = vld [vmem:[#allocation3 + $0xc] sm:$0xff] }
 0x634   :  { %12051 = vmatpush1.bf16.msra.mxu0 %v11994_v7  ;;  %v11942_v26 = vpop.permute.xlu0 %11941  ;;  %v11940_v29 = vpop.permute.xlu1 %11939  ;;  %12123 = vmatprep.mubr.bf16.mxu1 %v20788_v34 }
 0x635   :  { %v11974_v30 = vsel %vm22726_vm6, %v11938_v50, %v11940_v29  ;;  %v11975_v36 = vsel %vm22727_vm10, %v11940_v29, %v11942_v26  ;;  %vm22738_vm6 = vmmov %vm22725_vm0 }
 0x636   :  { %14192 = vrot.lane.b32.xlu0 %v21226_v56, %s17841_s16  ;;  %14190 = vrot.lane.b32.xlu1 %v21230_v1, %s17841_s16  ;;  %v12006_v4 = vsel %vm10385_vm15, %v11975_v36, 0  ;;  %vm22739_vm10 = vmmov %vm22725_vm0  ;;  %v16278_v36 = vcombine.low %v12478_v52, %v12478_v52 }
 0x637   :  { %16259 = vmatmul.mubr.msk.bf16.vlgmr.msra.gmra.mrb[40].mxu0 %vm10381_vm5, %v21525_v8  ;;  %16260 = vmatprep.subr.msk.bf16.mxu1 %vm10385_vm15, %v11974_v30  ;;  %v16279_v30 = vcombine.high %v12478_v52, %v12478_v52 }
 0x638   :  { %12092 = vmatpush1.bf16.msra.mxu1 %v12000_v44  ;;  %v11946_v3 = vpop.permute.xlu0 %11945  ;;  %v11944_v17 = vpop.permute.xlu1 %11943  ;;  %12164 = vmatprep.mubr.bf16.mxu0 %v20788_v34  ;;  %v16281_v44 = vcombine.high %v12479_v51, %v12479_v51 }
 0x639   :  { %v11976_v15 = vsel %vm22728_vm9, %v11942_v26, %v11944_v17  ;;  %v11977_v13 = vsel %vm22729_vm11, %v11944_v17, %v11946_v3  ;;  %vm22740_vm9 = vmmov %vm22725_vm0  ;;  %vm22741_vm11 = vcmask 1039360  }
 0x63a   :  { %14196 = vrot.lane.b32.xlu0 %v21250_v47, %s17841_s16  ;;  %14194 = vrot.lane.b32.xlu1 %v21254_v22, %s17841_s16  ;;  %v12012_v10 = vsel %vm10385_vm15, %v11977_v13, 0 }
 0x63b   :  { %16261 = vmatmul.mubr.msk.bf16.vlgmr.msra.gmra.mrb[40].mxu1 %vm10381_vm5, %v21525_v8  ;;  %16262 = vmatprep.subr.msk.bf16.mxu0 %vm10385_vm15, %v11976_v15  ;;  %v12480_v15 = vld [vmem:[#allocation3 + $0x14] sm:$0xff] }
 0x63c   :  { %12133 = vmatpush1.bf16.msra.mxu0 %v12006_v4  ;;  %v11950_v55 = vpop.permute.xlu0 %11949  ;;  %v11948_v39 = vpop.permute.xlu1 %11947  ;;  %12205 = vmatprep.mubr.bf16.mxu1 %v20788_v34  ;;  %v12542_v4 = vsel %vm10385_vm15, %v16278_v36, 0  ;;  %v16283_v13 = vcombine.high %v12480_v15, %v12480_v15 }
 0x63d   :  { %v11978_v61 = vsel %vm22730_vm3, %v11946_v3, %v11948_v39  ;;  %v11979_v45 = vsel %vm22731_vm4, %v11948_v39, %v11950_v55  ;;  %vm22742_vm3 = vmmov %vm22741_vm11 }
 0x63e   :  { %14200 = vrot.lane.b32.xlu0 %v21269_v49, %s17841_s16  ;;  %14198 = vrot.lane.b32.xlu1 %v21273_v9, %s17841_s16  ;;  %v12018_v18 = vsel %vm10385_vm15, %v11979_v45, 0  ;;  %vm22743_vm4 = vmmov %vm22742_vm3 }
 0x63f   :  { %16263 = vmatmul.mubr.msk.bf16.vlgmr.msra.gmra.mrb[44].mxu0 %vm10381_vm5, %v21525_v8  ;;  %16264 = vmatprep.subr.msk.bf16.mxu1 %vm10385_vm15, %v11978_v61 }
 0x640   :  { %12174 = vmatpush1.bf16.msra.mxu1 %v12012_v10  ;;  %v11954_v54 = vpop.permute.xlu0 %11953  ;;  %v11952_v57 = vpop.permute.xlu1 %11951  ;;  %12246 = vmatprep.mubr.bf16.mxu0 %v20788_v34  ;;  %v12481_v10 = vld [vmem:[#allocation3 + $0x1c] sm:$0xff] }
 0x641   :  { %v11980_v6 = vsel %vm22732_vm7, %v11950_v55, %v11952_v57  ;;  %v11981_v24 = vsel %vm22733_vm8, %v11952_v57, %v11954_v54  ;;  %v16280_v55 = vcombine.low %v12479_v51, %v12479_v51  ;;  %v16282_v57 = vcombine.low %v12480_v15, %v12480_v15  ;;  %vm22744_vm7 = vmmov %vm22742_vm3 }
 0x642   :  { %14204 = vrot.lane.b32.xlu0 %v21288_v63, %s17841_s16  ;;  %14202 = vrot.lane.b32.xlu1 %v21292_v20, %s17841_s16  ;;  %v12024_v0 = vsel %vm10385_vm15, %v11981_v24, 0  ;;  %v21652_v24 = vld [vmem:[%s22408_s7 + $0x10] sm:$0xf]  ;;  %vm22745_vm8 = vmmov %vm22742_vm3 }
 0x643   :  { %16265 = vmatmul.mubr.msk.bf16.vlgmr.msra.gmra.mrb[44].mxu1 %vm10381_vm5, %v21525_v8  ;;  %16266 = vmatprep.subr.msk.bf16.mxu0 %vm10385_vm15, %v11980_v6  ;;  %v12548_v45 = vsel %vm10385_vm15, %v16280_v55, 0  ;;  %v15371_v55 = vld [vmem:[%s22411_s11] sm:$0xf] }
 0x644   :  { %12215 = vmatpush1.bf16.msra.mxu0 %v12018_v18  ;;  %v11958_v46 = vpop.permute.xlu0 %11957  ;;  %v11956_v38 = vpop.permute.xlu1 %11955  ;;  %12287 = vmatprep.mubr.bf16.mxu1 %v20788_v34 }
 0x645   :  { %v11982_v37 = vsel %vm22734_vm1, %v11954_v54, %v11956_v38  ;;  %v11983_v41 = vsel %vm22735_vm12, %v11956_v38, %v11958_v46  ;;  %v16285_v54 = vcombine.high %v12481_v10, %v12481_v10  ;;  %vm22746_vm1 = vmmov %vm22742_vm3 }
 0x646   :  { %14208 = vrot.lane.b32.xlu0 %v21307_v35, %s17841_s16  ;;  %14206 = vrot.lane.b32.xlu1 %v21311_v40, %s17841_s16  ;;  %v12030_v60 = vsel %vm10385_vm15, %v11983_v41, 0  ;;  %vm22747_vm12 = vmmov %vm22746_vm1 }
 0x647   :  { %16267 = vmatmul.mubr.msk.bf16.vlgmr.msra.gmra.mrb[48].mxu0 %vm10381_vm5, %v21525_v8  ;;  %16268 = vmatprep.subr.msk.bf16.mxu1 %vm10385_vm15, %v11982_v37 }
 0x648   :  { %12256 = vmatpush1.bf16.msra.mxu1 %v12024_v0  ;;  %v11962_v12 = vpop.permute.xlu0 %11961  ;;  %v11960_v59 = vpop.permute.xlu1 %11959  ;;  %12328 = vmatprep.mubr.bf16.mxu0 %v20788_v34  ;;  %v12483_v0 = vld [vmem:[#allocation3 + $0x2c] sm:$0xff] }
 0x649   :  { %v11984_v58 = vsel %vm22736_vm13, %v11958_v46, %v11960_v59  ;;  %v11985_v62 = vsel %vm22737_vm14, %v11960_v59, %v11962_v12  ;;  %v16284_v46 = vcombine.low %v12481_v10, %v12481_v10  ;;  %vm22748_vm13 = vmmov %vm22746_vm1 }
 0x64a   :  { %14212 = vrot.lane.b32.xlu0 %v21326_v28, %s17841_s16  ;;  %14210 = vrot.lane.b32.xlu1 %v21330_v53, %s17841_s16  ;;  %v12036_v5 = vsel %vm10385_vm15, %v11985_v62, 0  ;;  %vm22749_vm14 = vmmov %vm22746_vm1 }
 0x64b   :  { %16269 = vmatmul.mubr.msk.bf16.vlgmr.msra.gmra.mrb[48].mxu1 %vm10381_vm5, %v21525_v8  ;;  %16270 = vmatprep.subr.msk.bf16.mxu0 %vm10385_vm15, %v11984_v58  ;;  %v12484_v58 = vld [vmem:[#allocation3 + $0x34] sm:$0xff] }
 0x64c   :  { %12297 = vmatpush1.bf16.msra.mxu0 %v12030_v60  ;;  %v11966_v42 = vpop.permute.xlu0 %11965  ;;  %v11964_v33 = vpop.permute.xlu1 %11963  ;;  %12369 = vmatprep.mubr.bf16.mxu1 %v20788_v34  ;;  %v16288_v60 = vcombine.low %v12483_v0, %v12483_v0 }
 0x64d   :  { %v11986_v16 = vsel %vm22725_vm0, %v11962_v12, %v11964_v33  ;;  %v11987_v23 = vsel %vm22738_vm6, %v11964_v33, %v11966_v42  ;;  %v12485_v33 = vld [vmem:[#allocation3 + $0x3c] sm:$0xff]  ;;  %vm22750_vm0 = vmmov %vm22746_vm1 }
 0x64e   :  { %14216 = vrot.lane.b32.xlu0 %v21345_v43, %s17841_s16  ;;  %14214 = vrot.lane.b32.xlu1 %v21349_v14, %s17841_s16  ;;  %v12042_v29 = vsel %vm10385_vm15, %v11987_v23, 0  ;;  %vm22751_vm6 = vmmov %vm22750_vm0 }
 0x64f   :  { %16271 = vmatmul.mubr.msk.bf16.vlgmr.msra.gmra.mrb[52].mxu0 %vm10381_vm5, %v21525_v8  ;;  %16272 = vmatprep.subr.msk.bf16.mxu1 %vm10385_vm15, %v11986_v16  ;;  %v16290_v16 = vcombine.low %v12484_v58, %v12484_v58 }
 0x650   :  { %12338 = vmatpush1.bf16.msra.mxu1 %v12036_v5  ;;  %v11970_v2 = vpop.permute.xlu0 %11969  ;;  %v11968_v50 = vpop.permute.xlu1 %11967  ;;  %12410 = vmatprep.mubr.bf16.mxu0 %v20788_v34 }
 0x651   :  { %v11988_v7 = vsel %vm22739_vm10, %v11966_v42, %v11968_v50  ;;  %v11989_v11 = vsel %vm22740_vm9, %v11968_v50, %v11970_v2  ;;  %16684 = vmatprep.subr.bf16.mxu1 %v22510_v31  ;;  %v12486_v2 = vld [vmem:[#allocation3 + $0x44] sm:$0xff]  ;;  %v16292_v50 = vcombine.low %v12485_v33, %v12485_v33  ;;  %vm22752_vm10 = vmmov %vm22750_vm0 }
 0x652   :  { %v12048_v26 = vsel %vm10385_vm15, %v11989_v11, 0  ;;  %14220 = vrot.lane.b32.xlu0 %v21364_v27, %s17841_s16  ;;  %14218 = vrot.lane.b32.xlu1 %v21368_v25, %s17841_s16  ;;  %vm22753_vm9 = vmmov %vm22750_vm0 }
 0x653   :  { %16273 = vmatmul.mubr.msk.bf16.vlgmr.msra.gmra.mrb[52].mxu1 %vm10381_vm5, %v21525_v8  ;;  %16274 = vmatprep.subr.msk.bf16.mxu0 %vm10385_vm15, %v11988_v7 }
 0x654   :  { %12379 = vmatpush1.bf16.msra.mxu0 %v12042_v29  ;;  %16685 = vmatpush3.bf16.msra.mxu1 %v12048_v26  ;;  %v21617_v3 = vpop.permute.xlu0 %13090  ;;  %v21619_v17 = vpop.permute.xlu1 %13088 }
 0x655   :  { %16297 = vmatprep.subr.msk.bf16.mxu0 %vm10385_vm15, %v16279_v30  ;;  %16299 = vmatprep.subr.msk.bf16.mxu1 %vm10385_vm15, %v16281_v44 }
 0x656   :  { %14224 = vrot.lane.b32.xlu0 %v21383_v32, %s17841_s16  ;;  %14222 = vrot.lane.b32.xlu1 %v21385_v48, %s17841_s16 }
 0x657   :  { %16275 = vmatmul.mubr.msk.bf16.vlgmr.msra.gmra.mrb[56].mxu0 %vm10381_vm5, %v21525_v8  ;;  %16686 = vmatprep.mubr.msk.bf16.mxu1 %vm22593_vm2, %v22510_v31 }
 0x658   :  { %12599 = vmatpush1.bf16.msra.mxu0 %v12542_v4  ;;  %v21632_v39 = vpop.permute.xlu0 %13094  ;;  %v21634_v61 = vpop.permute.xlu1 %13092  ;;  %12630 = vmatprep.mubr.bf16.mxu0 %v20788_v34 }
 0x659   :  { %16301 = vmatprep.subr.msk.bf16.mxu0 %vm10385_vm15, %v16283_v13  ;;  %v13129_v26 = vsel %vm22741_vm11, %v21617_v3, %v21634_v61  ;;  %vm22754_vm11 = vmmov %vm22750_vm0 }
 0x65a   :  { %14737 = vrot.lane.b32.xlu0 %v21207_v21, %s17842_s22  ;;  %14735 = vrot.lane.b32.xlu1 %v21211_v19, %s17842_s22  ;;  %v12482_v21 = vld [vmem:[#allocation3 + $0x24] sm:$0xff]  ;;  %v12554_v19 = vsel %vm10385_vm15, %v16282_v57, 0 }
 0x65b   :  { %16687 = vmatmul.mubr.msk.bf16.vlgmr.msra.gmra.mrb[56].mxu1 %vm10381_vm5, %v21525_v8  ;;  %v16287_v8 = vcombine.high %v12482_v21, %v12482_v21  ;;  %v16286_v41 = vcombine.low %v12482_v21, %v12482_v21 }
 0x65c   :  { %12640 = vmatpush1.bf16.msra.mxu1 %v12548_v45  ;;  %v21645_v6 = vpop.permute.xlu0 %13098  ;;  %v21647_v18 = vpop.permute.xlu1 %13096  ;;  %12671 = vmatprep.mubr.bf16.mxu1 %v20788_v34 }
 0x65d   :  { %16303 = vmatprep.subr.msk.bf16.mxu1 %vm10385_vm15, %v16285_v54  ;;  %v13131_v44 = vsel %vm22743_vm4, %v21632_v39, %v21647_v18  ;;  %v21814_v54 = vld [vmem:[%s22408_s7 + $0x14] sm:$0xf]  ;;  %vm22756_vm4 = vmmov %vm22750_vm0 }
 0x65e   :  { %14741 = vrot.lane.b32.xlu0 %v21226_v56, %s17842_s22  ;;  %14739 = vrot.lane.b32.xlu1 %v21230_v1, %s17842_s22  ;;  %v12560_v56 = vsel %vm10385_vm15, %v16284_v46, 0  ;;  %v16289_v1 = vcombine.high %v12483_v0, %v12483_v0 }
 0x65f   :  { %16298 = vmatmul.mubr.msk.bf16.vlgmr.msra.gmra.mrb[40].mxu0 %vm10381_vm5, %v21652_v24 }
 0x660   :  { %12681 = vmatpush1.bf16.msra.mxu0 %v12554_v19  ;;  %v21663_v38 = vpop.permute.xlu0 %13102  ;;  %v21665_v37 = vpop.permute.xlu1 %13100  ;;  %12712 = vmatprep.mubr.bf16.mxu0 %v20788_v34 }
 0x661   :  { %16305 = vmatprep.subr.msk.bf16.mxu0 %vm10385_vm15, %v16287_v8 }
 0x662   :  { %14745 = vrot.lane.b32.xlu0 %v21250_v47, %s17842_s22  ;;  %14743 = vrot.lane.b32.xlu1 %v21254_v22, %s17842_s22  ;;  %v12566_v47 = vsel %vm10385_vm15, %v16286_v41, 0  ;;  %v16291_v22 = vcombine.high %v12484_v58, %v12484_v58 }
 0x663   :  { %16300 = vmatmul.mubr.msk.bf16.vlgmr.msra.gmra.mrb[40].mxu1 %vm10381_vm5, %v21652_v24 }
 0x664   :  { %12722 = vmatpush1.bf16.msra.mxu1 %v12560_v56  ;;  %v21676_v12 = vpop.permute.xlu0 %13106  ;;  %v21678_v59 = vpop.permute.xlu1 %13104  ;;  %12753 = vmatprep.mubr.bf16.mxu1 %v20788_v34 }
 0x665   :  { %16307 = vmatprep.subr.msk.bf16.mxu1 %vm10385_vm15, %v16289_v1  ;;  %v13136_v8 = vsel %vm22750_vm0, %v21678_v59, %v21676_v12 }
 0x666   :  { %14749 = vrot.lane.b32.xlu0 %v21269_v49, %s17842_s22  ;;  %14747 = vrot.lane.b32.xlu1 %v21273_v9, %s17842_s22  ;;  %v12572_v49 = vsel %vm10385_vm15, %v16288_v60, 0  ;;  %v16293_v9 = vcombine.high %v12485_v33, %v12485_v33  ;;  %v13175_v0 = vsel %vm10385_vm15, %v13136_v8, 0 }
 0x667   :  { %16302 = vmatmul.mubr.msk.bf16.vlgmr.msra.gmra.mrb[44].mxu0 %vm10381_vm5, %v21652_v24 }
 0x668   :  { %12763 = vmatpush1.bf16.msra.mxu0 %v12566_v47  ;;  %v21689_v62 = vpop.permute.xlu0 %13110  ;;  %v21691_v42 = vpop.permute.xlu1 %13108  ;;  %12794 = vmatprep.mubr.bf16.mxu0 %v20788_v34 }
 0x669   :  { %16309 = vmatprep.subr.msk.bf16.mxu0 %vm10385_vm15, %v16291_v22  ;;  %v13138_v56 = vsel %vm22752_vm10, %v21691_v42, %v21689_v62 }
 0x66a   :  { %14753 = vrot.lane.b32.xlu0 %v21288_v63, %s17842_s22  ;;  %14751 = vrot.lane.b32.xlu1 %v21292_v20, %s17842_s22  ;;  %v12578_v63 = vsel %vm10385_vm15, %v16290_v16, 0  ;;  %v16295_v20 = vcombine.high %v12486_v2, %v12486_v2 }
 0x66b   :  { %16304 = vmatmul.mubr.msk.bf16.vlgmr.msra.gmra.mrb[44].mxu1 %vm10381_vm5, %v21652_v24 }
 0x66c   :  { %12804 = vmatpush1.bf16.msra.mxu1 %v12572_v49  ;;  %v21702_v5 = vpop.permute.xlu0 %13114  ;;  %v21704_v23 = vpop.permute.xlu1 %13112  ;;  %12835 = vmatprep.mubr.bf16.mxu1 %v20788_v34 }
 0x66d   :  { %16311 = vmatprep.subr.msk.bf16.mxu1 %vm10385_vm15, %v16293_v9  ;;  %v13139_v46 = vsel %vm22751_vm6, %v21689_v62, %v21704_v23  ;;  %v13140_v58 = vsel %vm22754_vm11, %v21704_v23, %v21702_v5 }
 0x66e   :  { %14757 = vrot.lane.b32.xlu0 %v21307_v35, %s17842_s22  ;;  %14755 = vrot.lane.b32.xlu1 %v21311_v40, %s17842_s22  ;;  %v12584_v35 = vsel %vm10385_vm15, %v16292_v50, 0  ;;  %v16294_v40 = vcombine.low %v12486_v2, %v12486_v2  ;;  %v13187_v62 = vsel %vm10385_vm15, %v13140_v58, 0 }
 0x66f   :  { %16306 = vmatmul.mubr.msk.bf16.vlgmr.msra.gmra.mrb[48].mxu0 %vm10381_vm5, %v21652_v24 }
 0x670   :  { %12845 = vmatpush1.bf16.msra.mxu0 %v12578_v63  ;;  %v21715_v52 = vpop.permute.xlu0 %13118  ;;  %v21717_v51 = vpop.permute.xlu1 %13116  ;;  %12876 = vmatprep.mubr.bf16.mxu0 %v20788_v34 }
 0x671   :  { %16313 = vmatprep.subr.msk.bf16.mxu0 %vm10385_vm15, %v16295_v20  ;;  %v13141_v1 = vsel %vm22753_vm9, %v21702_v5, %v21717_v51 }
 0x672   :  { %14761 = vrot.lane.b32.xlu0 %v21326_v28, %s17842_s22  ;;  %14759 = vrot.lane.b32.xlu1 %v21330_v53, %s17842_s22  ;;  %v12590_v28 = vsel %vm10385_vm15, %v16294_v40, 0  ;;  %v17809_v53 = vld [vmem:[#allocation3 + $0x4c] ss:$0 sps:$4 sm:$0xff]  }
 0x673   :  { %16308 = vmatmul.mubr.msk.bf16.vlgmr.msra.gmra.mrb[48].mxu1 %vm10381_vm5, %v21652_v24 }
 0x674   :  { %12886 = vmatpush1.bf16.msra.mxu1 %v12584_v35  ;;  %v21728_v7 = vpop.permute.xlu0 %13122  ;;  %v21730_v11 = vpop.permute.xlu1 %13120  ;;  %12917 = vmatprep.mubr.bf16.mxu1 %v20788_v34 }
 0x675   :  { %16690 = vmatprep.subr.bf16.mxu1 %v22510_v31 }
 0x676   :  { %14765 = vrot.lane.b32.xlu0 %v21345_v43, %s17842_s22  ;;  %14763 = vrot.lane.b32.xlu1 %v21349_v14, %s17842_s22  ;;  %v12596_v43 = vsel %vm10385_vm15, %v17809_v53, 0  ;;  %v13128_v14 = vsel %vm22742_vm3, %v21619_v17, %v21617_v3  ;;  %v15307_v3 = vld [vmem:[%s22409_s9] sm:$0xff]  ;;  %vm22755_vm3 = vmmov %vm22750_vm0 }
 0x677   :  { %16310 = vmatmul.mubr.msk.bf16.vlgmr.msra.gmra.mrb[52].mxu0 %vm10381_vm5, %v21652_v24  ;;  %v15282_v17 = vld [vmem:[%s22410_s8] sm:$0xff]  ;;  %v13143_v47 = vsel %vm22755_vm3, %v21715_v52, %v21730_v11 }
 0x678   :  { %12927 = vmatpush1.bf16.msra.mxu0 %v12590_v28  ;;  %v21744_v29 = vpop.permute.xlu0 %13126  ;;  %v21746_v30 = vpop.permute.xlu1 %13124  ;;  %12958 = vmatprep.mubr.bf16.mxu0 %v20788_v34 }
 0x679   :  { %16337 = vmatprep.subr.msk.bf16.mxu0 %vm10385_vm15, %v13129_v26 }
 0x67a   :  { %14769 = vrot.lane.b32.xlu0 %v21364_v27, %s17842_s22  ;;  %14767 = vrot.lane.b32.xlu1 %v21368_v25, %s17842_s22  ;;  %v13151_v25 = vsel %vm10385_vm15, %v13128_v14, 0 }
 0x67b   :  { %16312 = vmatmul.mubr.msk.bf16.vlgmr.msra.gmra.mrb[52].mxu1 %vm10381_vm5, %v21652_v24 }
 0x67c   :  { %16691 = vmatpush3.bf16.msra.mxu1 %v12596_v43  ;;  %v21763_v36 = vpop.permute.xlu0 %13639  ;;  %v21765_v27 = vpop.permute.xlu1 %13637  ;;  %16692 = vmatprep.mubr.msk.bf16.mxu1 %vm22593_vm2, %v22510_v31 }
 0x67d   :  { %16339 = vmatprep.subr.msk.bf16.mxu1 %vm10385_vm15, %v13131_v44 }
 0x67e   :  { %14773 = vrot.lane.b32.xlu0 %v21383_v32, %s17842_s22  ;;  %14771 = vrot.lane.b32.xlu1 %v21385_v48, %s17842_s22  ;;  %v13130_v32 = vsel %vm22744_vm7, %v21634_v61, %v21632_v39  ;;  %v13133_v48 = vsel %vm22745_vm8, %v21645_v6, %v21665_v37  ;;  %v13132_v39 = vsel %vm22746_vm1, %v21647_v18, %v21645_v6  ;;  %vm22757_vm7 = vmmov %vm22750_vm0 }
 0x67f   :  { %16314 = vmatmul.mubr.msk.bf16.vlgmr.msra.gmra.mrb[56].mxu0 %vm10381_vm5, %v21652_v24  ;;  %v13157_v13 = vsel %vm10385_vm15, %v13130_v32, 0  ;;  %v13135_v61 = vsel %vm22747_vm12, %v21663_v38, %v21678_v59  ;;  %v13163_v57 = vsel %vm10385_vm15, %v13132_v39, 0  ;;  %v13134_v6 = vsel %vm22748_vm13, %v21665_v37, %v21663_v38  ;;  %vm22758_vm8 = vmmov %vm22750_vm0 }
 0x680   :  { %13208 = vmatpush1.bf16.msra.mxu0 %v13151_v25  ;;  %v21789_v15 = vpop.permute.xlu0 %13643  ;;  %v21791_v4 = vpop.permute.xlu1 %13641  ;;  %13239 = vmatprep.mubr.bf16.mxu0 %v20788_v34  ;;  %v13137_v18 = vsel %vm22749_vm14, %v21676_v12, %v21691_v42  ;;  %v13169_v19 = vsel %vm10385_vm15, %v13134_v6, 0  ;;  %v13181_v59 = vsel %vm10385_vm15, %v13138_v56, 0  ;;  %v13142_v42 = vsel %vm22756_vm4, %v21717_v51, %v21715_v52  ;;  %vm22759_vm1 = vmmov %vm22750_vm0  ;;  %v21965_v25 = vld [vmem:[%s22408_s7 + $0x18] sm:$0xf] }
 0x681   :  { %16341 = vmatprep.subr.msk.bf16.mxu0 %vm10385_vm15, %v13133_v48  ;;  %v13145_v33 = vsel %vm22757_vm7, %v21728_v7, %v21746_v30  ;;  %v13193_v16 = vsel %vm10385_vm15, %v13142_v42, 0  ;;  %v13144_v5 = vsel %vm22758_vm8, %v21730_v11, %v21728_v7  ;;  %v13146_v20 = vsel %vm22759_vm1, %v21746_v30, %v21744_v29 }
 0x682   :  { %15310 = vperm.xlu0 %17697, %v15307_v3   ;;  %15285 = vperm.xlu1 %17698, %v15282_v17   ;;  %v13199_v63 = vsel %vm10385_vm15, %v13144_v5, 0  ;;  %vm22760_vm12 = vcmask 777216   ;;  %v13205_v35 = vsel %vm10385_vm15, %v13146_v20, 0  ;;  %v22100_v20 = vld [vmem:[%s22408_s7 + $0x1c] sm:$0xf] }
 0x683   :  { %16693 = vmatmul.mubr.msk.bf16.vlgmr.msra.gmra.mrb[56].mxu1 %vm10381_vm5, %v21652_v24  ;;  %v13678_v50 = vsel %vm22760_vm12, %v21763_v36, %v21791_v4  ;;  %vm22761_vm13 = vmmov %vm22760_vm12 }
 0x684   :  { %13249 = vmatpush1.bf16.msra.mxu1 %v13157_v13  ;;  %v21807_v10 = vpop.permute.xlu0 %13647  ;;  %v21809_v45 = vpop.permute.xlu1 %13645  ;;  %13280 = vmatprep.mubr.bf16.mxu1 %v20788_v34  ;;  %v13677_v40 = vsel %vm22761_vm13, %v21765_v27, %v21763_v36  ;;  %vm22762_vm14 = vmmov %vm22760_vm12 }
 0x685   :  { %16343 = vmatprep.subr.msk.bf16.mxu1 %vm10385_vm15, %v13135_v61  ;;  %v13680_v7 = vsel %vm22762_vm14, %v21789_v15, %v21809_v45  ;;  %v13700_v53 = vsel %vm10385_vm15, %v13677_v40, 0  ;;  %vm22763_vm0 = vmmov %vm22760_vm12 }
 0x686   :  { %15374 = vperm.xlu1 %17698, %v15371_v55   ;;  %v13679_v26 = vsel %vm22763_vm0, %v21791_v4, %v21789_v15  ;;  %vm22764_vm6 = vmmov %vm22763_vm0 }
 0x687   :  { %16338 = vmatmul.mubr.msk.bf16.vlgmr.msra.gmra.mrb[40].mxu0 %vm10381_vm5, %v21814_v54  ;;  %v13706_v14 = vsel %vm10385_vm15, %v13679_v26, 0  ;;  %vm22765_vm10 = vmmov %vm22763_vm0 }
 0x688   :  { %13290 = vmatpush1.bf16.msra.mxu0 %v13163_v57  ;;  %v21827_v24 = vpop.permute.xlu0 %13651  ;;  %v21829_v21 = vpop.permute.xlu1 %13649  ;;  %13321 = vmatprep.mubr.bf16.mxu0 %v20788_v34  ;;  %v13681_v44 = vsel %vm22765_vm10, %v21809_v45, %v21807_v10  ;;  %vm22766_vm9 = vmmov %vm22763_vm0 }
 0x689   :  { %16345 = vmatprep.subr.msk.bf16.mxu0 %vm10385_vm15, %v13137_v18  ;;  %v13682_v29 = vsel %vm22764_vm6, %v21807_v10, %v21829_v21  ;;  %v13712_v3 = vsel %vm10385_vm15, %v13681_v44, 0  ;;  %vm22767_vm11 = vmmov %vm22763_vm0 }
 0x68a   :  { %v13683_v32 = vsel %vm22767_vm11, %v21829_v21, %v21827_v24  ;;  %vm22768_vm3 = vmmov %vm22763_vm0 }
 0x68b   :  { %16340 = vmatmul.mubr.msk.bf16.vlgmr.msra.gmra.mrb[40].mxu1 %vm10381_vm5, %v21814_v54  ;;  %v13718_v4 = vsel %vm10385_vm15, %v13683_v32, 0  ;;  %vm22769_vm4 = vmmov %vm22763_vm0 }
 0x68c   :  { %13331 = vmatpush1.bf16.msra.mxu1 %v13169_v19  ;;  %v21842_v38 = vpop.permute.xlu0 %13655  ;;  %v21844_v37 = vpop.permute.xlu1 %13653  ;;  %13362 = vmatprep.mubr.bf16.mxu1 %v20788_v34  ;;  %vm22770_vm7 = vmmov %vm22763_vm0 }
 0x68d   :  { %16347 = vmatprep.subr.msk.bf16.mxu1 %vm10385_vm15, %v13139_v46  ;;  %v13684_v36 = vsel %vm22766_vm9, %v21827_v24, %v21844_v37  ;;  %v13685_v13 = vsel %vm22769_vm4, %v21844_v37, %v21842_v38  ;;  %vm22771_vm8 = vmmov %vm22763_vm0  ;;  %vm22778_vm9 = vcmask 769024  }
 0x68e   :  { %v13724_v10 = vsel %vm10385_vm15, %v13685_v13, 0  ;;  %vm22772_vm1 = vmmov %vm22763_vm0 }
 0x68f   :  { %16342 = vmatmul.mubr.msk.bf16.vlgmr.msra.gmra.mrb[44].mxu0 %vm10381_vm5, %v21814_v54  ;;  %vm22773_vm12 = vmmov %vm22763_vm0 }
 0x690   :  { %13372 = vmatpush1.bf16.msra.mxu0 %v13175_v0  ;;  %v21857_v41 = vpop.permute.xlu0 %13659  ;;  %v21859_v12 = vpop.permute.xlu1 %13657  ;;  %13403 = vmatprep.mubr.bf16.mxu0 %v20788_v34  ;;  %vm22774_vm13 = vmmov %vm22763_vm0 }
 0x691   :  { %16349 = vmatprep.subr.msk.bf16.mxu0 %vm10385_vm15, %v13141_v1  ;;  %v13686_v48 = vsel %vm22768_vm3, %v21842_v38, %v21859_v12  ;;  %v13687_v45 = vsel %vm22771_vm8, %v21859_v12, %v21857_v41  ;;  %vm22775_vm14 = vmmov %vm22763_vm0 }
 0x692   :  { %v13730_v6 = vsel %vm10385_vm15, %v13687_v45, 0  ;;  %vm22776_vm6 = vmmov %vm22763_vm0 }
 0x693   :  { %16344 = vmatmul.mubr.msk.bf16.vlgmr.msra.gmra.mrb[44].mxu1 %vm10381_vm5, %v21814_v54  ;;  %vm22777_vm10 = vmmov %vm22763_vm0 }
 0x694   :  { %13413 = vmatpush1.bf16.msra.mxu1 %v13181_v59  ;;  %v21872_v22 = vpop.permute.xlu0 %13663  ;;  %v21874_v60 = vpop.permute.xlu1 %13661  ;;  %13444 = vmatprep.mubr.bf16.mxu1 %v20788_v34  ;;  %vm22779_vm11 = vmmov %vm22778_vm9 }
 0x695   :  { %16351 = vmatprep.subr.msk.bf16.mxu1 %vm10385_vm15, %v13143_v47  ;;  %v13688_v55 = vsel %vm22770_vm7, %v21857_v41, %v21874_v60  ;;  %v13689_v24 = vsel %vm22773_vm12, %v21874_v60, %v21872_v22  ;;  %vm22780_vm3 = vmmov %vm22778_vm9 }
 0x696   :  { %v13736_v19 = vsel %vm10385_vm15, %v13689_v24, 0  ;;  %vm22781_vm4 = vmmov %vm22780_vm3 }
 0x697   :  { %16346 = vmatmul.mubr.msk.bf16.vlgmr.msra.gmra.mrb[48].mxu0 %vm10381_vm5, %v21814_v54  ;;  %vm22782_vm7 = vmmov %vm22780_vm3 }
 0x698   :  { %13454 = vmatpush1.bf16.msra.mxu0 %v13187_v62  ;;  %v21887_v49 = vpop.permute.xlu0 %13667  ;;  %v21889_v9 = vpop.permute.xlu1 %13665  ;;  %13485 = vmatprep.mubr.bf16.mxu0 %v20788_v34  ;;  %vm22783_vm8 = vmmov %vm22780_vm3 }
 0x699   :  { %16353 = vmatprep.subr.msk.bf16.mxu0 %vm10385_vm15, %v13145_v33  ;;  %v13691_v46 = vsel %vm22775_vm14, %v21889_v9, %v21887_v49 }
 0x69a   :  { %v13742_v0 = vsel %vm10385_vm15, %v13691_v46, 0 }
 0x69b   :  { %16348 = vmatmul.mubr.msk.bf16.vlgmr.msra.gmra.mrb[48].mxu1 %vm10381_vm5, %v21814_v54 }
 0x69c   :  { %13495 = vmatpush1.bf16.msra.mxu1 %v13193_v16  ;;  %v21899_v23 = vpop.permute.xlu0 %13671  ;;  %v21901_v2 = vpop.permute.xlu1 %13669  ;;  %13526 = vmatprep.mubr.bf16.mxu1 %v20788_v34 }
 0x69d   :  { %16696 = vmatprep.subr.bf16.mxu1 %v22510_v31  ;;  %v13692_v21 = vsel %vm22774_vm13, %v21887_v49, %v21901_v2  ;;  %v13693_v56 = vsel %vm22776_vm6, %v21901_v2, %v21899_v23 }
 0x69e   :  { %v13748_v41 = vsel %vm10385_vm15, %v13693_v56, 0  ;;  %v22192_v56 = vld [vmem:[%s22408_s7 + $0x20] sm:$0xf] }
 0x69f   :  { %16350 = vmatmul.mubr.msk.bf16.vlgmr.msra.gmra.mrb[52].mxu0 %vm10381_vm5, %v21814_v54 }
 0x6a0   :  { %13536 = vmatpush1.bf16.msra.mxu0 %v13199_v63  ;;  %v21914_v52 = vpop.permute.xlu0 %13675  ;;  %v21916_v51 = vpop.permute.xlu1 %13673  ;;  %13567 = vmatprep.mubr.bf16.mxu0 %v20788_v34 }
 0x6a1   :  { %16357 = vmatprep.subr.msk.bf16.mxu0 %vm10385_vm15, %v13678_v50  ;;  %v13694_v38 = vsel %vm22763_vm0, %v21899_v23, %v21916_v51  ;;  %v13695_v59 = vsel %vm22777_vm10, %v21916_v51, %v21914_v52 }
 0x6a2   :  { %v13754_v47 = vsel %vm10385_vm15, %v13695_v59, 0 }
 0x6a3   :  { %16352 = vmatmul.mubr.msk.bf16.vlgmr.msra.gmra.mrb[52].mxu1 %vm10381_vm5, %v21814_v54 }
 0x6a4   :  { %16697 = vmatpush3.bf16.msra.mxu1 %v13205_v35  ;;  %v21929_v11 = vpop.permute.xlu0 %14188  ;;  %v21931_v28 = vpop.permute.xlu1 %14186  ;;  %16698 = vmatprep.mubr.msk.bf16.mxu1 %vm22593_vm2, %v22510_v31 }
 0x6a5   :  { %16359 = vmatprep.subr.msk.bf16.mxu1 %vm10385_vm15, %v13680_v7  ;;  %v14226_v60 = vsel %vm22779_vm11, %v21931_v28, %v21929_v11 }
 0x6a6   :  { %v14249_v33 = vsel %vm10385_vm15, %v14226_v60, 0 }
 0x6a7   :  { %16354 = vmatmul.mubr.msk.bf16.vlgmr.msra.gmra.mrb[56].mxu0 %vm10381_vm5, %v21814_v54 }
 0x6a8   :  { %13757 = vmatpush1.bf16.msra.mxu0 %v13700_v53  ;;  %v21945_v30 = vpop.permute.xlu1 %14190  ;;  %13788 = vmatprep.mubr.bf16.mxu0 %v20788_v34  ;;  %v21949_v43 = vpop.permute.xlu0 %14192 }
 0x6a9   :  { %16361 = vmatprep.subr.msk.bf16.mxu0 %vm10385_vm15, %v13682_v29  ;;  %v14227_v58 = vsel %vm22778_vm9, %v21929_v11, %v21945_v30  ;;  %v14228_v49 = vsel %vm22781_vm4, %v21945_v30, %v21949_v43 }
 0x6aa   :  { %v14255_v5 = vsel %vm10385_vm15, %v14228_v49, 0 }
 0x6ab   :  { %16699 = vmatmul.mubr.msk.bf16.vlgmr.msra.gmra.mrb[56].mxu1 %vm10381_vm5, %v21814_v54  ;;  %v13690_v54 = vsel %vm22772_vm1, %v21872_v22, %v21889_v9  ;;  %vm22784_vm1 = vmmov %vm22780_vm3 }
 0x6ac   :  { %13798 = vmatpush1.bf16.msra.mxu1 %v13706_v14  ;;  %v21960_v27 = vpop.permute.xlu1 %14194  ;;  %13829 = vmatprep.mubr.bf16.mxu1 %v20788_v34  ;;  %v21970_v17 = vpop.permute.xlu0 %14196  ;;  %vm22785_vm12 = vmmov %vm22784_vm1 }
 0x6ad   :  { %16363 = vmatprep.subr.msk.bf16.mxu1 %vm10385_vm15, %v13684_v36  ;;  %v14229_v62 = vsel %vm22780_vm3, %v21949_v43, %v21960_v27  ;;  %v14230_v2 = vsel %vm22783_vm8, %v21960_v27, %v21970_v17  ;;  %vm22786_vm13 = vmmov %vm22784_vm1 }
 0x6ae   :  { %v14261_v50 = vsel %vm10385_vm15, %v14230_v2, 0  ;;  %vm22787_vm14 = vmmov %vm22784_vm1 }
 0x6af   :  { %16358 = vmatmul.mubr.msk.bf16.vlgmr.msra.gmra.mrb[40].mxu0 %vm10381_vm5, %v21965_v25  ;;  %vm22788_vm0 = vmmov %vm22784_vm1 }
 0x6b0   :  { %13839 = vmatpush1.bf16.msra.mxu0 %v13712_v3  ;;  %v21980_v15 = vpop.permute.xlu1 %14198  ;;  %13870 = vmatprep.mubr.bf16.mxu0 %v20788_v34  ;;  %v21996_v61 = vpop.permute.xlu0 %14200  ;;  %vm22789_vm6 = vmmov %vm22788_vm0 }
 0x6b1   :  { %16365 = vmatprep.subr.msk.bf16.mxu0 %vm10385_vm15, %v13686_v48  ;;  %v14231_v9 = vsel %vm22782_vm7, %v21970_v17, %v21980_v15  ;;  %v14232_v51 = vsel %vm22785_vm12, %v21980_v15, %v21996_v61  ;;  %vm22790_vm10 = vmmov %vm22788_vm0 }
 0x6b2   :  { %v14267_v7 = vsel %vm10385_vm15, %v14232_v51, 0  ;;  %vm22791_vm9 = vmmov %vm22788_vm0 }
 0x6b3   :  { %16360 = vmatmul.mubr.msk.bf16.vlgmr.msra.gmra.mrb[40].mxu1 %vm10381_vm5, %v21965_v25  ;;  %vm22792_vm11 = vmmov %vm22788_vm0 }
 0x6b4   :  { %13880 = vmatpush1.bf16.msra.mxu1 %v13718_v4  ;;  %v21993_v39 = vpop.permute.xlu1 %14202  ;;  %13911 = vmatprep.mubr.bf16.mxu1 %v20788_v34  ;;  %v22013_v18 = vpop.permute.xlu0 %14204  ;;  %vm22793_vm3 = vmmov %vm22788_vm0 }
 0x6b5   :  { %16367 = vmatprep.subr.msk.bf16.mxu1 %vm10385_vm15, %v13688_v55  ;;  %v14233_v63 = vsel %vm22784_vm1, %v21996_v61, %v21993_v39  ;;  %v14234_v11 = vsel %vm22787_vm14, %v21993_v39, %v22013_v18  ;;  %vm22794_vm4 = vmmov %vm22788_vm0  ;;  %vm22797_vm1 = vcmask 760832  }
 0x6b6   :  { %v14273_v26 = vsel %vm10385_vm15, %v14234_v11, 0  ;;  %vm22795_vm7 = vmmov %vm22788_vm0 }
 0x6b7   :  { %16362 = vmatmul.mubr.msk.bf16.vlgmr.msra.gmra.mrb[44].mxu0 %vm10381_vm5, %v21965_v25  ;;  %vm22796_vm8 = vmmov %vm22788_vm0 }
 0x6b8   :  { %13921 = vmatpush1.bf16.msra.mxu0 %v13724_v10  ;;  %13952 = vmatprep.mubr.bf16.mxu0 %v20788_v34  ;;  %v22010_v57 = vpop.permute.xlu1 %14206  ;;  %v22037_v37 = vpop.permute.xlu0 %14208  ;;  %vm22798_vm12 = vmmov %vm22797_vm1 }
 0x6b9   :  { %16369 = vmatprep.subr.msk.bf16.mxu0 %vm10385_vm15, %v13690_v54  ;;  %v14235_v35 = vsel %vm22786_vm13, %v22013_v18, %v22010_v57  ;;  %v14236_v30 = vsel %vm22789_vm6, %v22010_v57, %v22037_v37  ;;  %vm22799_vm13 = vmmov %vm22797_vm1 }
 0x6ba   :  { %v14279_v14 = vsel %vm10385_vm15, %v14236_v30, 0  ;;  %vm22800_vm14 = vmmov %vm22797_vm1 }
 0x6bb   :  { %16364 = vmatmul.mubr.msk.bf16.vlgmr.msra.gmra.mrb[44].mxu1 %vm10381_vm5, %v21965_v25 }
 0x6bc   :  { %13962 = vmatpush1.bf16.msra.mxu1 %v13730_v6  ;;  %13993 = vmatprep.mubr.bf16.mxu1 %v20788_v34  ;;  %v22026_v8 = vpop.permute.xlu1 %14210  ;;  %v14213_v12 = vpop.permute.xlu0 %14212 }
 0x6bd   :  { %16371 = vmatprep.subr.msk.bf16.mxu1 %vm10385_vm15, %v13692_v21  ;;  %v14237_v28 = vsel %vm22788_vm0, %v22037_v37, %v22026_v8  ;;  %v14238_v36 = vsel %vm22791_vm9, %v22026_v8, %v14213_v12  ;;  %vm22801_vm0 = vmmov %vm22797_vm1 }
 0x6be   :  { %v14285_v3 = vsel %vm10385_vm15, %v14238_v36, 0  ;;  %vm22802_vm6 = vmmov %vm22801_vm0 }
 0x6bf   :  { %16366 = vmatmul.mubr.msk.bf16.vlgmr.msra.gmra.mrb[48].mxu0 %vm10381_vm5, %v21965_v25  ;;  %vm22804_vm9 = vmmov %vm22801_vm0 }
 0x6c0   :  { %14003 = vmatpush1.bf16.msra.mxu0 %v13736_v19  ;;  %14034 = vmatprep.mubr.bf16.mxu0 %v20788_v34  ;;  %v22047_v1 = vpop.permute.xlu1 %14214  ;;  %v14217_v42 = vpop.permute.xlu0 %14216 }
 0x6c1   :  { %16373 = vmatprep.subr.msk.bf16.mxu0 %vm10385_vm15, %v13694_v38  ;;  %v14239_v43 = vsel %vm22790_vm10, %v14213_v12, %v22047_v1  ;;  %v14240_v17 = vsel %vm22793_vm3, %v22047_v1, %v14217_v42  ;;  %vm22803_vm10 = vmmov %vm22801_vm0 }
 0x6c2   :  { %v14291_v15 = vsel %vm10385_vm15, %v14240_v17, 0  ;;  %vm22806_vm3 = vmmov %vm22801_vm0 }
 0x6c3   :  { %16368 = vmatmul.mubr.msk.bf16.vlgmr.msra.gmra.mrb[48].mxu1 %vm10381_vm5, %v21965_v25 }
 0x6c4   :  { %14044 = vmatpush1.bf16.msra.mxu1 %v13742_v0  ;;  %14075 = vmatprep.mubr.bf16.mxu1 %v20788_v34  ;;  %v22062_v22 = vpop.permute.xlu1 %14218  ;;  %v14221_v23 = vpop.permute.xlu0 %14220 }
 0x6c5   :  { %16702 = vmatprep.subr.bf16.mxu1 %v22510_v31  ;;  %v14241_v27 = vsel %vm22792_vm11, %v14217_v42, %v22062_v22  ;;  %v14242_v13 = vsel %vm22795_vm7, %v22062_v22, %v14221_v23  ;;  %vm22805_vm11 = vmmov %vm22801_vm0 }
 0x6c6   :  { %v14297_v55 = vsel %vm10385_vm15, %v14242_v13, 0  ;;  %vm22808_vm7 = vmmov %vm22801_vm0 }
 0x6c7   :  { %16370 = vmatmul.mubr.msk.bf16.vlgmr.msra.gmra.mrb[52].mxu0 %vm10381_vm5, %v21965_v25 }
 0x6c8   :  { %14085 = vmatpush1.bf16.msra.mxu0 %v13748_v41  ;;  %14116 = vmatprep.mubr.bf16.mxu0 %v20788_v34  ;;  %v22085_v16 = vpop.permute.xlu1 %14222  ;;  %v14225_v40 = vpop.permute.xlu0 %14224 }
 0x6c9   :  { %16377 = vmatprep.subr.msk.bf16.mxu0 %vm10385_vm15, %v14227_v58  ;;  %v14243_v32 = vsel %vm22794_vm4, %v14221_v23, %v22085_v16  ;;  %v14244_v61 = vsel %vm22796_vm8, %v22085_v16, %v14225_v40  ;;  %vm22807_vm4 = vmmov %vm22801_vm0 }
 0x6ca   :  { %v14303_v54 = vsel %vm10385_vm15, %v14244_v61, 0  ;;  %vm22809_vm8 = vmmov %vm22801_vm0 }
 0x6cb   :  { %16372 = vmatmul.mubr.msk.bf16.vlgmr.msra.gmra.mrb[52].mxu1 %vm10381_vm5, %v21965_v25 }
 0x6cc   :  { %16703 = vmatpush3.bf16.msra.mxu1 %v13754_v47  ;;  %16704 = vmatprep.mubr.msk.bf16.mxu1 %vm22593_vm2, %v22510_v31  ;;  %v14736_v52 = vpop.permute.xlu1 %14735  ;;  %v14738_v29 = vpop.permute.xlu0 %14737 }
 0x6cd   :  { %16379 = vmatprep.subr.msk.bf16.mxu1 %vm10385_vm15, %v14229_v62  ;;  %v14775_v57 = vsel %vm22798_vm12, %v14736_v52, %v14738_v29  ;;  %vm22811_vm12 = vmmov %vm22801_vm0 }
 0x6ce   :  { %v14798_v24 = vsel %vm10385_vm15, %v14775_v57, 0 }
 0x6cf   :  { %16374 = vmatmul.mubr.msk.bf16.vlgmr.msra.gmra.mrb[56].mxu0 %vm10381_vm5, %v21965_v25 }
 0x6d0   :  { %14306 = vmatpush1.bf16.msra.mxu0 %v14249_v33  ;;  %14337 = vmatprep.mubr.bf16.mxu0 %v20788_v34  ;;  %v14740_v53 = vpop.permute.xlu1 %14739 }
 0x6d1   :  { %16381 = vmatprep.subr.msk.bf16.mxu0 %vm10385_vm15, %v14231_v9  ;;  %v14776_v10 = vsel %vm22797_vm1, %v14738_v29, %v14740_v53  ;;  %vm22810_vm1 = vmmov %vm22801_vm0 }
 0x6d3   :  { %16705 = vmatmul.mubr.msk.bf16.vlgmr.msra.gmra.mrb[56].mxu1 %vm10381_vm5, %v21965_v25  ;;  %v14742_v25 = vpop.permute.xlu0 %14741 }
 0x6d4   :  { %14347 = vmatpush1.bf16.msra.mxu1 %v14255_v5  ;;  %14378 = vmatprep.mubr.bf16.mxu1 %v20788_v34  ;;  %v14744_v44 = vpop.permute.xlu1 %14743  ;;  %v14777_v19 = vsel %vm22800_vm14, %v14740_v53, %v14742_v25  ;;  %vm22813_vm14 = vmmov %vm22801_vm0 }
 0x6d5   :  { %16383 = vmatprep.subr.msk.bf16.mxu1 %vm10385_vm15, %v14233_v63  ;;  %v14778_v6 = vsel %vm22799_vm13, %v14742_v25, %v14744_v44  ;;  %v14804_v46 = vsel %vm10385_vm15, %v14777_v19, 0  ;;  %vm22812_vm13 = vmmov %vm22801_vm0 }
 0x6d7   :  { %16378 = vmatmul.mubr.msk.bf16.vlgmr.msra.gmra.mrb[40].mxu0 %vm10381_vm5, %v22100_v20  ;;  %v14746_v4 = vpop.permute.xlu0 %14745 }
 0x6d8   :  { %14388 = vmatpush1.bf16.msra.mxu0 %v14261_v50  ;;  %14419 = vmatprep.mubr.bf16.mxu0 %v20788_v34  ;;  %v14748_v48 = vpop.permute.xlu1 %14747  ;;  %v14779_v37 = vsel %vm22802_vm6, %v14744_v44, %v14746_v4  ;;  %vm22814_vm6 = vmmov %vm22801_vm0 }
 0x6d9   :  { %16385 = vmatprep.subr.msk.bf16.mxu0 %vm10385_vm15, %v14235_v35  ;;  %v14780_v8 = vsel %vm22801_vm0, %v14746_v4, %v14748_v48  ;;  %v14810_v41 = vsel %vm10385_vm15, %v14779_v37, 0 }
 0x6db   :  { %16380 = vmatmul.mubr.msk.bf16.vlgmr.msra.gmra.mrb[40].mxu1 %vm10381_vm5, %v22100_v20  ;;  %v14750_v45 = vpop.permute.xlu0 %14749 }
 0x6dc   :  { %14429 = vmatpush1.bf16.msra.mxu1 %v14267_v7  ;;  %14460 = vmatprep.mubr.bf16.mxu1 %v20788_v34  ;;  %v14752_v39 = vpop.permute.xlu1 %14751  ;;  %v14781_v12 = vsel %vm22804_vm9, %v14748_v48, %v14750_v45 }
 0x6dd   :  { %16387 = vmatprep.subr.msk.bf16.mxu1 %vm10385_vm15, %v14237_v28  ;;  %v14782_v0 = vsel %vm22803_vm10, %v14750_v45, %v14752_v39  ;;  %v14816_v47 = vsel %vm10385_vm15, %v14781_v12, 0 }
 0x6df   :  { %16382 = vmatmul.mubr.msk.bf16.vlgmr.msra.gmra.mrb[44].mxu0 %vm10381_vm5, %v22100_v20  ;;  %v14754_v21 = vpop.permute.xlu0 %14753 }
 0x6e0   :  { %14470 = vmatpush1.bf16.msra.mxu0 %v14273_v26  ;;  %14501 = vmatprep.mubr.bf16.mxu0 %v20788_v34  ;;  %v14756_v18 = vpop.permute.xlu1 %14755  ;;  %v14783_v60 = vsel %vm22806_vm3, %v14752_v39, %v14754_v21 }
 0x6e1   :  { %16389 = vmatprep.subr.msk.bf16.mxu0 %vm10385_vm15, %v14239_v43  ;;  %v14784_v59 = vsel %vm22805_vm11, %v14754_v21, %v14756_v18  ;;  %v14822_v42 = vsel %vm10385_vm15, %v14783_v60, 0 }
 0x6e3   :  { %16384 = vmatmul.mubr.msk.bf16.vlgmr.msra.gmra.mrb[44].mxu1 %vm10381_vm5, %v22100_v20  ;;  %v14758_v1 = vpop.permute.xlu0 %14757 }
 0x6e4   :  { %14511 = vmatpush1.bf16.msra.mxu1 %v14279_v14  ;;  %14542 = vmatprep.mubr.bf16.mxu1 %v20788_v34  ;;  %v14760_v38 = vpop.permute.xlu1 %14759  ;;  %v14785_v49 = vsel %vm22808_vm7, %v14756_v18, %v14758_v1 }
 0x6e5   :  { %16391 = vmatprep.subr.msk.bf16.mxu1 %vm10385_vm15, %v14241_v27  ;;  %v14786_v62 = vsel %vm22807_vm4, %v14758_v1, %v14760_v38  ;;  %v14828_v5 = vsel %vm10385_vm15, %v14785_v49, 0 }
 0x6e7   :  { %16386 = vmatmul.mubr.msk.bf16.vlgmr.msra.gmra.mrb[48].mxu0 %vm10381_vm5, %v22100_v20  ;;  %v14762_v22 = vpop.permute.xlu0 %14761 }
 0x6e8   :  { %14552 = vmatpush1.bf16.msra.mxu0 %v14285_v3  ;;  %14583 = vmatprep.mubr.bf16.mxu0 %v20788_v34  ;;  %v14764_v58 = vpop.permute.xlu1 %14763  ;;  %v14787_v23 = vsel %vm22810_vm1, %v14760_v38, %v14762_v22 }
 0x6e9   :  { %16393 = vmatprep.subr.msk.bf16.mxu0 %vm10385_vm15, %v14243_v32  ;;  %v14788_v9 = vsel %vm22809_vm8, %v14762_v22, %v14764_v58 }
 0x6eb   :  { %16388 = vmatmul.mubr.msk.bf16.vlgmr.msra.gmra.mrb[48].mxu1 %vm10381_vm5, %v22100_v20  ;;  %v14766_v16 = vpop.permute.xlu0 %14765 }
 0x6ec   :  { %14593 = vmatpush1.bf16.msra.mxu1 %v14291_v15  ;;  %14624 = vmatprep.mubr.bf16.mxu1 %v20788_v34  ;;  %v14768_v33 = vpop.permute.xlu1 %14767  ;;  %v14789_v52 = vsel %vm22812_vm13, %v14764_v58, %v14766_v16 }
 0x6ed   :  { %16708 = vmatprep.subr.bf16.mxu1 %v22510_v31  ;;  %v14790_v2 = vsel %vm22811_vm12, %v14766_v16, %v14768_v33  ;;  %v14840_v35 = vsel %vm10385_vm15, %v14789_v52, 0 }
 0x6ef   :  { %16390 = vmatmul.mubr.msk.bf16.vlgmr.msra.gmra.mrb[52].mxu0 %vm10381_vm5, %v22100_v20  ;;  %v14770_v50 = vpop.permute.xlu0 %14769 }
 0x6f0   :  { %14634 = vmatpush1.bf16.msra.mxu0 %v14297_v55  ;;  %14665 = vmatprep.mubr.bf16.mxu0 %v20788_v34  ;;  %v14772_v63 = vpop.permute.xlu1 %14771  ;;  %v14791_v40 = vsel %vm22801_vm0, %v14768_v33, %v14770_v50 }
 0x6f1   :  { %16397 = vmatprep.subr.msk.bf16.mxu0 %vm10385_vm15, %v14776_v10  ;;  %v14792_v51 = vsel %vm22813_vm14, %v14770_v50, %v14772_v63  ;;  %v14846_v11 = vsel %vm10385_vm15, %v14791_v40, 0 }
 0x6f3   :  { %16392 = vmatmul.mubr.msk.bf16.vlgmr.msra.gmra.mrb[52].mxu1 %vm10381_vm5, %v22100_v20  ;;  %v14774_v7 = vpop.permute.xlu0 %14773 }
 0x6f4   :  { %16709 = vmatpush3.bf16.msra.mxu1 %v14303_v54  ;;  %16710 = vmatprep.mubr.msk.bf16.mxu1 %vm22593_vm2, %v22510_v31  ;;  %v14793_v28 = vsel %vm22814_vm6, %v14772_v63, %v14774_v7 }
 0x6f5   :  { %16399 = vmatprep.subr.msk.bf16.mxu1 %vm10385_vm15, %v14778_v6  ;;  %v14852_v53 = vsel %vm10385_vm15, %v14793_v28, 0 }
 0x6f7   :  { %16394 = vmatmul.mubr.msk.bf16.vlgmr.msra.gmra.mrb[56].mxu0 %vm10381_vm5, %v22100_v20 }
 0x6f8   :  { %14855 = vmatpush1.bf16.msra.mxu0 %v14798_v24  ;;  %14886 = vmatprep.mubr.bf16.mxu0 %v20788_v34 }
 0x6f9   :  { %16401 = vmatprep.subr.msk.bf16.mxu0 %vm10385_vm15, %v14780_v8 }
 0x6fb   :  { %16711 = vmatmul.mubr.msk.bf16.vlgmr.msra.gmra.mrb[56].mxu1 %vm10381_vm5, %v22100_v20  ;;  %v14834_v20 = vsel %vm10385_vm15, %v14787_v23, 0 }
 0x6fc   :  { %14896 = vmatpush1.bf16.msra.mxu1 %v14804_v46  ;;  %14927 = vmatprep.mubr.bf16.mxu1 %v20788_v34 }
 0x6fd   :  { %16403 = vmatprep.subr.msk.bf16.mxu1 %vm10385_vm15, %v14782_v0 }
 0x6ff   :  { %16398 = vmatmul.mubr.msk.bf16.vlgmr.msra.gmra.mrb[40].mxu0 %vm10381_vm5, %v22192_v56 }
 0x700   :  { %14937 = vmatpush1.bf16.msra.mxu0 %v14810_v41  ;;  %14968 = vmatprep.mubr.bf16.mxu0 %v20788_v34 }
 0x701   :  { %16405 = vmatprep.subr.msk.bf16.mxu0 %vm10385_vm15, %v14784_v59  ;;  %v22253_v26 = vpop.permute.xlu1 %15285  ;;  %v22256_v14 = vpop.permute.xlu0 %15310 }
 0x703   :  { %16400 = vmatmul.mubr.msk.bf16.vlgmr.msra.gmra.mrb[40].mxu1 %vm10381_vm5, %v22192_v56 }
 0x704   :  { %14978 = vmatpush1.bf16.msra.mxu1 %v14816_v47  ;;  %15009 = vmatprep.mubr.bf16.mxu1 %v20788_v34 }
 0x705   :  { %16407 = vmatprep.subr.msk.bf16.mxu1 %vm10385_vm15, %v14786_v62 }
 0x707   :  { %16402 = vmatmul.mubr.msk.bf16.vlgmr.msra.gmra.mrb[44].mxu0 %vm10381_vm5, %v22192_v56 }
 0x708   :  { %15019 = vmatpush1.bf16.msra.mxu0 %v14822_v42  ;;  %15050 = vmatprep.mubr.bf16.mxu0 %v20788_v34 }
 0x709   :  { %16409 = vmatprep.subr.msk.bf16.mxu0 %vm10385_vm15, %v14788_v9 }
 0x70b   :  { %16404 = vmatmul.mubr.msk.bf16.vlgmr.msra.gmra.mrb[44].mxu1 %vm10381_vm5, %v22192_v56 }
 0x70c   :  { %15060 = vmatpush1.bf16.msra.mxu1 %v14828_v5  ;;  %15091 = vmatprep.mubr.bf16.mxu1 %v20788_v34 }
 0x70d   :  { %16411 = vmatprep.subr.msk.bf16.mxu1 %vm10385_vm15, %v14790_v2 }
 0x70f   :  { %16406 = vmatmul.mubr.msk.bf16.vlgmr.msra.gmra.mrb[48].mxu0 %vm10381_vm5, %v22192_v56 }
 0x710   :  { %15101 = vmatpush1.bf16.msra.mxu0 %v14834_v20  ;;  %15132 = vmatprep.mubr.bf16.mxu0 %v20788_v34 }
 0x711   :  { %16413 = vmatprep.subr.msk.bf16.mxu0 %vm10385_vm15, %v14792_v51 }
 0x713   :  { %16408 = vmatmul.mubr.msk.bf16.vlgmr.msra.gmra.mrb[48].mxu1 %vm10381_vm5, %v22192_v56 }
 0x714   :  { %15142 = vmatpush1.bf16.msra.mxu1 %v14840_v35  ;;  %15173 = vmatprep.mubr.bf16.mxu1 %v20788_v34 }
 0x715   :  { %16714 = vmatprep.subr.bf16.mxu1 %v22510_v31 }
 0x717   :  { %16410 = vmatmul.mubr.msk.bf16.vlgmr.msra.gmra.mrb[52].mxu0 %vm10381_vm5, %v22192_v56 }
 0x718   :  { %15183 = vmatpush1.bf16.msra.mxu0 %v14846_v11  ;;  %15214 = vmatprep.mubr.bf16.mxu0 %v20788_v34 }
 0x71b   :  { %16412 = vmatmul.mubr.msk.bf16.vlgmr.msra.gmra.mrb[52].mxu1 %vm10381_vm5, %v22192_v56 }
 0x71c   :  { %16715 = vmatpush3.bf16.msra.mxu1 %v14852_v53  ;;  %16716 = vmatprep.mubr.msk.bf16.mxu1 %vm22593_vm2, %v22510_v31 }
 0x71f   :  { %16414 = vmatmul.mubr.msk.bf16.vlgmr.msra.gmra.mrb[56].mxu0 %vm10381_vm5, %v22192_v56 }
 0x720   :  { %15469 = vmatprep.mubr.bf16.mxu0 %v20788_v34 }
 0x723   :  { %16717 = vmatmul.mubr.msk.bf16.vlgmr.msra.gmra.mrb[56].mxu1 %vm10381_vm5, %v22192_v56  ;;  %v22273_v56 = vld [vmem:[%s22412_s10] sm:$0x3] }
 0x724   :  { %15510 = vmatprep.mubr.bf16.mxu1 %v20788_v34 }
 0x7d2   :  { %v14888_v29 = vpop.f32.mrb[40].mxu0 }
 0x7d3   :  { %v15288_v30 = vmul.f32 %v22253_v26, %v14888_v29  ;;  %v14890_v43 = vpop.f32.mrb[41].mxu0 }
 0x7d4   :  { %v15289_v44 = vmul.f32 %v22253_v26, %v14890_v43  ;;  %v14892_v36 = vpop.f32.mrb[42].mxu0 }
 0x7d5   :  { %v15313_v27 = vadd.f32 %v22256_v14, %v15288_v30  ;;  %v14893_v25 = vpop.f32.mrb[43].mxu0 }
 0x7d6   :  { %v15314_v3 = vadd.f32 %v22256_v14, %v15289_v44  ;;  %v14929_v17 = vpop.f32.mrb[40].mxu1 }
 0x7d7   :  { %v15332_v32 = vmax.f32 %v15313_v27, 0.0  ;;  %v15290_v48 = vmul.f32 %v22253_v26, %v14929_v17  ;;  %v14931_v15 = vpop.f32.mrb[41].mxu1 }
 0x7d8   :  { %v15333_v4 = vmax.f32 %v15314_v3, 0.0  ;;  %v15291_v13 = vmul.f32 %v22253_v26, %v14931_v15  ;;  %v14933_v55 = vpop.f32.mrb[42].mxu1 }
 0x7d9   :  { %v15352_v39 = vpack.c.bf16 %v15332_v32, %v15332_v32  ;;  %v15315_v61 = vadd.f32 %v22256_v14, %v15290_v48  ;;  %v14934_v10 = vpop.f32.mrb[43].mxu1 }
 0x7da   :  { %v15353_v45 = vpack.c.bf16 %v15333_v4, %v15333_v4  ;;  %v15316_v54 = vadd.f32 %v22256_v14, %v15291_v13  ;;  %v14970_v57 = vpop.f32.mrb[44].mxu0 }
 0x7db   :  { %v15334_v6 = vmax.f32 %v15315_v61, 0.0  ;;  %v15292_v18 = vmul.f32 %v22253_v26, %v14970_v57  ;;  %v14972_v24 = vpop.f32.mrb[45].mxu0  ;;  %v15381_v21 = vsel %vm10385_vm15, %v15352_v39, 0 }
 0x7dc   :  { %v15335_v19 = vmax.f32 %v15316_v54, 0.0  ;;  %v15293_v8 = vmul.f32 %v22253_v26, %v14972_v24  ;;  %v14974_v46 = vpop.f32.mrb[46].mxu0  ;;  %16416 = vmatprep.subr.msk.bf16.mxu0 %vm10385_vm15, %v15353_v45 }
 0x7dd   :  { %v15354_v38 = vpack.c.bf16 %v15334_v6, %v15334_v6  ;;  %v15317_v37 = vadd.f32 %v22256_v14, %v15292_v18  ;;  %v14975_v0 = vpop.f32.mrb[47].mxu0  ;;  %15438 = vmatpush1.bf16.msra.mxu0 %v15381_v21 }
 0x7de   :  { %v15355_v1 = vpack.c.bf16 %v15335_v19, %v15335_v19  ;;  %v15318_v41 = vadd.f32 %v22256_v14, %v15293_v8  ;;  %v15011_v12 = vpop.f32.mrb[44].mxu1 }
 0x7df   :  { %v15336_v59 = vmax.f32 %v15317_v37, 0.0  ;;  %v15294_v58 = vmul.f32 %v22253_v26, %v15011_v12  ;;  %v15013_v47 = vpop.f32.mrb[45].mxu1  ;;  %v15387_v22 = vsel %vm10385_vm15, %v15354_v38, 0 }
 0x7e0   :  { %v15337_v60 = vmax.f32 %v15318_v41, 0.0  ;;  %v15295_v62 = vmul.f32 %v22253_v26, %v15013_v47  ;;  %v15015_v42 = vpop.f32.mrb[46].mxu1  ;;  %16417 = vmatmul.mubr.msk.bf16.vlgmr.msra.gmra.mrb[60].mxu0 %vm10381_vm5, %v22273_v56  ;;  %16418 = vmatprep.subr.msk.bf16.mxu1 %vm10385_vm15, %v15355_v1 }
 0x7e1   :  { %v15356_v33 = vpack.c.bf16 %v15336_v59, %v15336_v59  ;;  %v15319_v49 = vadd.f32 %v22256_v14, %v15294_v58  ;;  %v15016_v9 = vpop.f32.mrb[47].mxu1  ;;  %15479 = vmatpush1.bf16.msra.mxu1 %v15387_v22  ;;  %15551 = vmatprep.mubr.bf16.mxu0 %v20788_v34 }
 0x7e2   :  { %v15357_v16 = vpack.c.bf16 %v15337_v60, %v15337_v60  ;;  %v15320_v5 = vadd.f32 %v22256_v14, %v15295_v62  ;;  %v15052_v23 = vpop.f32.mrb[48].mxu0 }
 0x7e3   :  { %v15338_v2 = vmax.f32 %v15319_v49, 0.0  ;;  %v15296_v63 = vmul.f32 %v22253_v26, %v15052_v23  ;;  %v15054_v20 = vpop.f32.mrb[49].mxu0  ;;  %v15393_v50 = vsel %vm10385_vm15, %v15356_v33, 0 }
 0x7e4   :  { %v15339_v52 = vmax.f32 %v15320_v5, 0.0  ;;  %v15297_v51 = vmul.f32 %v22253_v26, %v15054_v20  ;;  %v15056_v35 = vpop.f32.mrb[50].mxu0  ;;  %16419 = vmatmul.mubr.msk.bf16.vlgmr.msra.gmra.mrb[60].mxu1 %vm10381_vm5, %v22273_v56  ;;  %16420 = vmatprep.subr.msk.bf16.mxu0 %vm10385_vm15, %v15357_v16 }
 0x7e5   :  { %v15358_v40 = vpack.c.bf16 %v15338_v2, %v15338_v2  ;;  %v15321_v7 = vadd.f32 %v22256_v14, %v15296_v63  ;;  %v15057_v11 = vpop.f32.mrb[51].mxu0  ;;  %15520 = vmatpush1.bf16.msra.mxu0 %v15393_v50  ;;  %15592 = vmatprep.mubr.bf16.mxu1 %v20788_v34 }
 0x7e6   :  { %v15359_v28 = vpack.c.bf16 %v15339_v52, %v15339_v52  ;;  %v15322_v53 = vadd.f32 %v22256_v14, %v15297_v51  ;;  %v15093_v29 = vpop.f32.mrb[48].mxu1 }
 0x7e7   :  { %v15340_v30 = vmax.f32 %v15321_v7, 0.0  ;;  %v15298_v43 = vmul.f32 %v22253_v26, %v15093_v29  ;;  %v15095_v44 = vpop.f32.mrb[49].mxu1  ;;  %v15399_v36 = vsel %vm10385_vm15, %v15358_v40, 0 }
 0x7e8   :  { %v15341_v27 = vmax.f32 %v15322_v53, 0.0  ;;  %v15299_v25 = vmul.f32 %v22253_v26, %v15095_v44  ;;  %v15097_v3 = vpop.f32.mrb[50].mxu1  ;;  %16421 = vmatmul.mubr.msk.bf16.vlgmr.msra.gmra.mrb[64].mxu0 %vm10381_vm5, %v22273_v56  ;;  %16422 = vmatprep.subr.msk.bf16.mxu1 %vm10385_vm15, %v15359_v28 }
 0x7e9   :  { %v15360_v17 = vpack.c.bf16 %v15340_v30, %v15340_v30  ;;  %v15323_v32 = vadd.f32 %v22256_v14, %v15298_v43  ;;  %v15098_v48 = vpop.f32.mrb[51].mxu1  ;;  %15561 = vmatpush1.bf16.msra.mxu1 %v15399_v36  ;;  %15633 = vmatprep.mubr.bf16.mxu0 %v20788_v34 }
 0x7ea   :  { %v15361_v15 = vpack.c.bf16 %v15341_v27, %v15341_v27  ;;  %v15324_v4 = vadd.f32 %v22256_v14, %v15299_v25  ;;  %v15134_v13 = vpop.f32.mrb[52].mxu0 }
 0x7eb   :  { %v15342_v55 = vmax.f32 %v15323_v32, 0.0  ;;  %v15300_v39 = vmul.f32 %v22253_v26, %v15134_v13  ;;  %v15136_v61 = vpop.f32.mrb[53].mxu0  ;;  %v15405_v10 = vsel %vm10385_vm15, %v15360_v17, 0 }
 0x7ec   :  { %v15343_v45 = vmax.f32 %v15324_v4, 0.0  ;;  %v15301_v54 = vmul.f32 %v22253_v26, %v15136_v61  ;;  %v15138_v57 = vpop.f32.mrb[54].mxu0  ;;  %16423 = vmatmul.mubr.msk.bf16.vlgmr.msra.gmra.mrb[64].mxu1 %vm10381_vm5, %v22273_v56  ;;  %16424 = vmatprep.subr.msk.bf16.mxu0 %vm10385_vm15, %v15361_v15 }
 0x7ed   :  { %v15362_v6 = vpack.c.bf16 %v15342_v55, %v15342_v55  ;;  %v15325_v18 = vadd.f32 %v22256_v14, %v15300_v39  ;;  %v15139_v24 = vpop.f32.mrb[55].mxu0  ;;  %15602 = vmatpush1.bf16.msra.mxu0 %v15405_v10  ;;  %15674 = vmatprep.mubr.bf16.mxu1 %v20788_v34 }
 0x7ee   :  { %v15363_v21 = vpack.c.bf16 %v15343_v45, %v15343_v45  ;;  %v15326_v19 = vadd.f32 %v22256_v14, %v15301_v54  ;;  %v15175_v8 = vpop.f32.mrb[52].mxu1 }
 0x7ef   :  { %v15344_v46 = vmax.f32 %v15325_v18, 0.0  ;;  %v15302_v38 = vmul.f32 %v22253_v26, %v15175_v8  ;;  %v15177_v37 = vpop.f32.mrb[53].mxu1  ;;  %v15411_v0 = vsel %vm10385_vm15, %v15362_v6, 0 }
 0x7f0   :  { %v15345_v1 = vmax.f32 %v15326_v19, 0.0  ;;  %v15303_v41 = vmul.f32 %v22253_v26, %v15177_v37  ;;  %v15179_v12 = vpop.f32.mrb[54].mxu1  ;;  %16425 = vmatmul.mubr.msk.bf16.vlgmr.msra.gmra.mrb[68].mxu0 %vm10381_vm5, %v22273_v56  ;;  %16426 = vmatprep.subr.msk.bf16.mxu1 %vm10385_vm15, %v15363_v21 }
 0x7f1   :  { %v15364_v59 = vpack.c.bf16 %v15344_v46, %v15344_v46  ;;  %v15327_v58 = vadd.f32 %v22256_v14, %v15302_v38  ;;  %v15180_v47 = vpop.f32.mrb[55].mxu1  ;;  %15643 = vmatpush1.bf16.msra.mxu1 %v15411_v0  ;;  %15715 = vmatprep.mubr.bf16.mxu0 %v20788_v34 }
 0x7f2   :  { %v15365_v22 = vpack.c.bf16 %v15345_v1, %v15345_v1  ;;  %v15328_v60 = vadd.f32 %v22256_v14, %v15303_v41  ;;  %v15216_v62 = vpop.f32.mrb[56].mxu0 }
 0x7f3   :  { %v15346_v42 = vmax.f32 %v15327_v58, 0.0  ;;  %v15304_v33 = vmul.f32 %v22253_v26, %v15216_v62  ;;  %v15218_v49 = vpop.f32.mrb[57].mxu0  ;;  %v15417_v9 = vsel %vm10385_vm15, %v15364_v59, 0 }
 0x7f4   :  { %v15347_v16 = vmax.f32 %v15328_v60, 0.0  ;;  %v15305_v5 = vmul.f32 %v22253_v26, %v15218_v49  ;;  %v15220_v23 = vpop.f32.mrb[58].mxu0  ;;  %16427 = vmatmul.mubr.msk.bf16.vlgmr.msra.gmra.mrb[68].mxu1 %vm10381_vm5, %v22273_v56  ;;  %16428 = vmatprep.subr.msk.bf16.mxu0 %vm10385_vm15, %v15365_v22 }
 0x7f5   :  { %v15366_v2 = vpack.c.bf16 %v15346_v42, %v15346_v42  ;;  %v15329_v63 = vadd.f32 %v22256_v14, %v15304_v33  ;;  %v15221_v20 = vpop.f32.mrb[59].mxu0  ;;  %15684 = vmatpush1.bf16.msra.mxu0 %v15417_v9  ;;  %15756 = vmatprep.mubr.bf16.mxu1 %v20788_v34 }
 0x7f6   :  { %v15367_v50 = vpack.c.bf16 %v15347_v16, %v15347_v16  ;;  %v15330_v52 = vadd.f32 %v22256_v14, %v15305_v5  ;;  %v15257_v51 = vpop.f32.mrb[56].mxu1 }
 0x7f7   :  { %v15348_v35 = vmax.f32 %v15329_v63, 0.0  ;;  %v15306_v40 = vmul.f32 %v22253_v26, %v15257_v51  ;;  %v16718_v7 = vpop.f32.mrb[57].mxu1  ;;  %v15423_v11 = vsel %vm10385_vm15, %v15366_v2, 0 }
 0x7f8   :  { %v15349_v28 = vmax.f32 %v15330_v52, 0.0  ;;  %v15260_v53 = vpop.f32.mrb[58].mxu1  ;;  %16429 = vmatmul.mubr.msk.bf16.vlgmr.msra.gmra.mrb[72].mxu0 %vm10381_vm5, %v22273_v56  ;;  %16430 = vmatprep.subr.msk.bf16.mxu1 %vm10385_vm15, %v15367_v50 }
 0x7f9   :  { %v15368_v29 = vpack.c.bf16 %v15348_v35, %v15348_v35  ;;  %v15331_v30 = vadd.f32 %v22256_v14, %v15306_v40  ;;  %v16719_v43 = vpop.f32.mrb[59].mxu1  ;;  %15725 = vmatpush1.bf16.msra.mxu1 %v15423_v11  ;;  %15797 = vmatprep.mubr.bf16.mxu0 %v20788_v34  ;;  %v22349_v34 = vpop.permute.xlu1 %15374 }
 0x7fa   :  { %v15369_v44 = vpack.c.bf16 %v15349_v28, %v15349_v28  ;;  %16720 = vmatprep.subr.bf16.mxu1 %v22510_v31 }
 0x7fb   :  { %v15350_v26 = vmax.f32 %v15331_v30, 0.0  ;;  %v15429_v36 = vsel %vm10385_vm15, %v15368_v29, 0 }
 0x7fc   :  { %16431 = vmatmul.mubr.msk.bf16.vlgmr.msra.gmra.mrb[72].mxu1 %vm10381_vm5, %v22273_v56  ;;  %16432 = vmatprep.subr.msk.bf16.mxu0 %vm10385_vm15, %v15369_v44 }
 0x7fd   :  { %v15370_v27 = vpack.c.bf16 %v15350_v26, %v15350_v26  ;;  %15766 = vmatpush1.bf16.msra.mxu0 %v15429_v36  ;;  %16722 = vmatprep.mubr.msk.bf16.mxu1 %vm22593_vm2, %v22510_v31 }
 0x7ff   :  { %v15435_v14 = vsel %vm10385_vm15, %v15370_v27, 0 }
 0x800   :  { %16433 = vmatmul.mubr.msk.bf16.vlgmr.msra.gmra.mrb[76].mxu0 %vm10381_vm5, %v22273_v56  ;;  %16721 = vmatpush3.bf16.msra.mxu1 %v15435_v14 }
 0x804   :  { %16723 = vmatmul.mubr.msk.bf16.vlgmr.msra.gmra.mrb[76].mxu1 %vm10381_vm5, %v22273_v56 }
 0x8b3   :  { %v15471_v25 = vpop.f32.mrb[60].mxu0 }
 0x8b4   :  { %v15472_v3 = vadd.f32 %v15471_v25, %v22349_v34  ;;  %v15473_v17 = vpop.f32.mrb[61].mxu0 }
 0x8b5   :  { %v15474_v32 = vadd.f32 %v15473_v17, %v22349_v34  ;;  %v15475_v48 = vpop.f32.mrb[62].mxu0 }
 0x8b6   :  { %v15476_v15 = vpop.f32.mrb[63].mxu0 }
 0x8b7   :  { %v15864_v31 = vcombine.low %v15472_v3, %v15474_v32  ;;  %v15512_v4 = vpop.f32.mrb[60].mxu1 }
 0x8b8   :  { %v15513_v13 = vadd.f32 %v15512_v4, %v22349_v34  ;;  %v15514_v55 = vpop.f32.mrb[61].mxu1 }
 0x8b9   :  { %15882 = vst [vmem:[%s22413_s13] sm:$0xff] %v15864_v31  ;;  %v15515_v56 = vadd.f32 %v15514_v55, %v22349_v34  ;;  %v15516_v39 = vpop.f32.mrb[62].mxu1 }
 0x8ba   :  { %v15517_v61 = vpop.f32.mrb[63].mxu1 }
 0x8bb   :  { %v15865_v10 = vcombine.low %v15513_v13, %v15515_v56  ;;  %v15553_v45 = vpop.f32.mrb[64].mxu0 }
 0x8bc   :  { %v15554_v54 = vadd.f32 %v15553_v45, %v22349_v34  ;;  %v15555_v57 = vpop.f32.mrb[65].mxu0 }
 0x8bd   :  { %15883 = vst [vmem:[%s22413_s13 + $0x8] sm:$0xff] %v15865_v10  ;;  %v15556_v6 = vadd.f32 %v15555_v57, %v22349_v34  ;;  %v15557_v18 = vpop.f32.mrb[66].mxu0 }
 0x8be   :  { %v15558_v24 = vpop.f32.mrb[67].mxu0 }
 0x8bf   :  { %v15866_v21 = vcombine.low %v15554_v54, %v15556_v6  ;;  %v15594_v19 = vpop.f32.mrb[64].mxu1 }
 0x8c0   :  { %v15595_v8 = vadd.f32 %v15594_v19, %v22349_v34  ;;  %v15596_v46 = vpop.f32.mrb[65].mxu1 }
 0x8c1   :  { %15884 = vst [vmem:[%s22413_s13 + $0x10] sm:$0xff] %v15866_v21  ;;  %v15597_v38 = vadd.f32 %v15596_v46, %v22349_v34  ;;  %v15598_v37 = vpop.f32.mrb[66].mxu1 }
 0x8c2   :  { %v15599_v0 = vpop.f32.mrb[67].mxu1 }
 0x8c3   :  { %v15867_v1 = vcombine.low %v15595_v8, %v15597_v38  ;;  %v15635_v41 = vpop.f32.mrb[68].mxu0 }
 0x8c4   :  { %v15636_v12 = vadd.f32 %v15635_v41, %v22349_v34  ;;  %v15637_v59 = vpop.f32.mrb[69].mxu0 }
 0x8c5   :  { %15885 = vst [vmem:[%s22413_s13 + $0x18] sm:$0xff] %v15867_v1  ;;  %v15638_v58 = vadd.f32 %v15637_v59, %v22349_v34  ;;  %v15639_v47 = vpop.f32.mrb[70].mxu0 }
 0x8c6   :  { %v15640_v22 = vpop.f32.mrb[71].mxu0 }
 0x8c7   :  { %v15868_v60 = vcombine.low %v15636_v12, %v15638_v58  ;;  %v15676_v62 = vpop.f32.mrb[68].mxu1 }
 0x8c8   :  { %v15677_v42 = vadd.f32 %v15676_v62, %v22349_v34  ;;  %v15678_v33 = vpop.f32.mrb[69].mxu1 }
 0x8c9   :  { %15886 = vst [vmem:[%s22413_s13 + $0x20] sm:$0xff] %v15868_v60  ;;  %v15679_v49 = vadd.f32 %v15678_v33, %v22349_v34  ;;  %v15680_v9 = vpop.f32.mrb[70].mxu1 }
 0x8ca   :  { %v15681_v16 = vpop.f32.mrb[71].mxu1 }
 0x8cb   :  { %v15869_v5 = vcombine.low %v15677_v42, %v15679_v49  ;;  %v15717_v23 = vpop.f32.mrb[72].mxu0 }
 0x8cc   :  { %v15718_v2 = vadd.f32 %v15717_v23, %v22349_v34  ;;  %v15719_v63 = vpop.f32.mrb[73].mxu0 }
 0x8cd   :  { %15887 = vst [vmem:[%s22413_s13 + $0x28] sm:$0xff] %v15869_v5  ;;  %v15720_v20 = vadd.f32 %v15719_v63, %v22349_v34  ;;  %v15721_v50 = vpop.f32.mrb[74].mxu0 }
 0x8ce   :  { %v15722_v52 = vpop.f32.mrb[75].mxu0 }
 0x8cf   :  { %v15870_v51 = vcombine.low %v15718_v2, %v15720_v20  ;;  %v15758_v35 = vpop.f32.mrb[72].mxu1 }
 0x8d0   :  { %v15759_v40 = vadd.f32 %v15758_v35, %v22349_v34  ;;  %v15760_v7 = vpop.f32.mrb[73].mxu1 }
 0x8d1   :  { %15888 = vst [vmem:[%s22413_s13 + $0x30] sm:$0xff] %v15870_v51  ;;  %v15761_v11 = vadd.f32 %v15760_v7, %v22349_v34  ;;  %v15762_v28 = vpop.f32.mrb[74].mxu1 }
 0x8d2   :  { %v15763_v53 = vpop.f32.mrb[75].mxu1 }
 0x8d3   :  { %v15871_v29 = vcombine.low %v15759_v40, %v15761_v11  ;;  %v15799_v30 = vpop.f32.mrb[76].mxu0 }
 0x8d4   :  { %v15800_v43 = vadd.f32 %v15799_v30, %v22349_v34  ;;  %v15801_v44 = vpop.f32.mrb[77].mxu0 }
 0x8d5   :  { %15889 = vst [vmem:[%s22413_s13 + $0x38] sm:$0xff] %v15871_v29  ;;  %v15802_v26 = vadd.f32 %v15801_v44, %v22349_v34  ;;  %v15803_v36 = vpop.f32.mrb[78].mxu0 }
 0x8d6   :  { %v15804_v27 = vpop.f32.mrb[79].mxu0 }
 0x8d7   :  { %v15872_v14 = vcombine.low %v15800_v43, %v15802_v26  ;;  %v15840_v25 = vpop.f32.mrb[76].mxu1 }
 0x8d8   :  { %v15841_v3 = vadd.f32 %v15840_v25, %v22349_v34  ;;  %v16724_v17 = vpop.f32.mrb[77].mxu1 }
 0x8d9   :  { %15890 = vst [vmem:[%s22413_s13 + $0x40] sm:$0xff] %v15872_v14  ;;  %v15843_v32 = vpop.f32.mrb[78].mxu1 }
 0x8da   :  { %15891 = vst [vmem:[%s22413_s13 + $0x48] sm:$0xf] %v15841_v3  ;;  %v16725_v48 = vpop.f32.mrb[79].mxu1 }

</bundles_post_ra>
